<compile_context>
chip_gen: v7x
topology: tpu7x:2x2x1
jax: 0.10.0
libtpu: 0.0.40
codegen_flags: <defaults>
</compile_context>

<pallas_src>
import functools

import jax
import jax.numpy as jnp
from jax.experimental import pallas as pl
from jax.experimental.pallas import tpu as pltpu


def _round_up(x, m):
    return (x + m - 1) // m * m


def _k_tiling(K):
    """Pick (padded K, K-tile). Prefer 256-deep K tiles (v6e/v7x MXU is 2x256^2);
    tiny K stays at one 128-deep step."""
    kp128 = _round_up(K, 128)
    if kp128 % 256 == 0:
        return kp128, 256
    if kp128 <= 256:
        return kp128, 128
    return _round_up(K, 256), 256


# ----------------------------- Pallas kernels ------------------------------

def _mm_bn_kernel(a_ref, w_ref, shift_ref, *rest, relu, add_residual):
    """Tiled GEMM, accumulating into the f32 output block (resident across the
    K grid axis).  Last K step applies the fused epilogue:
        out = act(acc + shift [+ residual]).
    BN scale is pre-folded into the bf16 weights, so no per-element multiply."""
    if add_residual:
        res_ref, o_ref = rest
    else:
        (o_ref,) = rest
    k = pl.program_id(2)

    @pl.when(k == 0)
    def _():
        o_ref[...] = jnp.zeros_like(o_ref)

    o_ref[...] += jnp.dot(a_ref[...], w_ref[...],
                          preferred_element_type=jnp.float32)

    @pl.when(k == pl.num_programs(2) - 1)
    def _():
        r = o_ref[...] + shift_ref[...]
        if add_residual:
            r = r + res_ref[...]
        if relu:
            r = jnp.maximum(r, 0.0)
        o_ref[...] = r


def matmul_bn(a, w_p, shift_p, cout, residual=None, relu=False):
    """out[:M,:cout] = act((a @ w_p) + shift [+ residual]).

    a:      (M, K)  activations (any float dtype; cast to bf16 here).
    w_p:    (Kp, Cp) bf16 weights, BN scale already folded in, pre-padded.
    shift_p:(1, Cp)  f32 BN shift / bias, pre-padded.
    """
    M, K = a.shape
    Kp, Cp = w_p.shape
    tk = 256 if Kp % 256 == 0 else 128
    tn = 256 if Cp % 256 == 0 else 128
    tm = min(256, _round_up(M, 8))
    Mp = _round_up(M, tm)

    a_p = a.astype(jnp.bfloat16)
    if (Mp, Kp) != (M, K):
        a_p = jnp.pad(a_p, ((0, Mp - M), (0, Kp - K)))

    add_residual = residual is not None
    args = [a_p, w_p, shift_p]
    in_specs = [
        pl.BlockSpec((tm, tk), lambda i, j, k: (i, k)),   # A
        pl.BlockSpec((tk, tn), lambda i, j, k: (k, j)),   # W (bf16, BN-folded)
        pl.BlockSpec((1, tn), lambda i, j, k: (0, j)),    # shift
    ]
    if add_residual:
        res_p = residual.astype(jnp.float32)
        if res_p.shape != (Mp, Cp):
            res_p = jnp.pad(res_p, ((0, Mp - M), (0, Cp - res_p.shape[1])))
        args.append(res_p)
        in_specs.append(pl.BlockSpec((tm, tn), lambda i, j, k: (i, j)))

    kern = functools.partial(_mm_bn_kernel, relu=relu, add_residual=add_residual)
    out = pl.pallas_call(
        kern,
        out_shape=jax.ShapeDtypeStruct((Mp, Cp), jnp.float32),
        grid_spec=pltpu.PrefetchScalarGridSpec(
            num_scalar_prefetch=0,
            grid=(Mp // tm, Cp // tn, Kp // tk),
            in_specs=in_specs,
            out_specs=pl.BlockSpec((tm, tn), lambda i, j, k: (i, j)),
        ),
        compiler_params=pltpu.CompilerParams(
            dimension_semantics=("parallel", "parallel", "arbitrary")),
    )(*args)
    return out[:M, :cout]


def _reduce_max_kernel(x_ref, o_ref):
    o_ref[...] = jnp.max(x_ref[...], axis=0)


def reduce_max_axis0(x):
    """(R, M, C) -> (M, C) max over the leading (window) axis, tiled over M."""
    R, M, C = x.shape
    tm = min(512, _round_up(M, 8))
    Mp = _round_up(M, tm)
    if Mp != M:
        x = jnp.pad(x, ((0, 0), (0, Mp - M), (0, 0)),
                    constant_values=-jnp.inf)
    out = pl.pallas_call(
        _reduce_max_kernel,
        out_shape=jax.ShapeDtypeStruct((Mp, C), jnp.float32),
        grid=(Mp // tm,),
        in_specs=[pl.BlockSpec((R, tm, C), lambda i: (0, i, 0))],
        out_specs=pl.BlockSpec((tm, C), lambda i: (i, 0)),
        compiler_params=pltpu.CompilerParams(
            dimension_semantics=("parallel",)),
    )(x)
    return out[:M, :]


# ------------------------------ JAX glue ops -------------------------------

def _im2col(x, kh, kw, stride, pad):
    """NHWC (bf16) -> (N*Ho*Wo, kh*kw*C) patches (rows in n,h,w order).
    TODO(synk): replace materialized im2col / stacked maxpool windows with
    implicit-GEMM (kernel-position grid axis) to cut the 9x HBM amplification."""
    N, H, W, C = x.shape
    xp = jnp.pad(x, ((0, 0), (pad, pad), (pad, pad), (0, 0)))
    Ho = (H + 2 * pad - kh) // stride + 1
    Wo = (W + 2 * pad - kw) // stride + 1
    cols = []
    for i in range(kh):
        for j in range(kw):
            cols.append(xp[:, i:i + stride * Ho:stride,
                           j:j + stride * Wo:stride, :])
    a = jnp.stack(cols, axis=3)                       # (N, Ho, Wo, kh*kw, C)
    return a.reshape(N * Ho * Wo, kh * kw * C), Ho, Wo


def conv_bn(x, pc, kh, kw, cout, stride, pad, relu, residual=None):
    """Conv2d(bias=False) + folded BatchNorm (+residual) (+ReLU) via Pallas GEMM."""
    N, H, W, _ = x.shape
    a, Ho, Wo = _im2col(x.astype(jnp.bfloat16), kh, kw, stride, pad)
    res2d = None if residual is None else residual.reshape(N * Ho * Wo, cout)
    out = matmul_bn(a, pc["w"], pc["shift"], cout, residual=res2d, relu=relu)
    return out.reshape(N, Ho, Wo, cout)


def maxpool_3x3_s2_p1(x):
    N, H, W, C = x.shape
    xp = jnp.pad(x, ((0, 0), (1, 1), (1, 1), (0, 0)),
                 constant_values=-jnp.inf)
    Ho = (H + 2 - 3) // 2 + 1
    Wo = (W + 2 - 3) // 2 + 1
    wins = []
    for i in range(3):
        for j in range(3):
            wins.append(xp[:, i:i + 2 * Ho:2, j:j + 2 * Wo:2, :])
    stacked = jnp.stack(wins, 0).reshape(9, N * Ho * Wo, C)
    out = reduce_max_axis0(stacked)
    return out.reshape(N, Ho, Wo, C)


# --------------------------- parameter creation ----------------------------

def init_conv(key, kh, kw, cin, cout):
    fan_in = kh * kw * cin
    return (jax.random.normal(key, (kh, kw, cin, cout), jnp.float32)
            / jnp.sqrt(float(fan_in)))


def init_bn(key, c):
    """Eval-mode BN with synthetic stats, folded to per-channel (scale, shift)."""
    k1, k2, k3, k4 = jax.random.split(key, 4)
    gamma = 1.0 + 0.1 * jax.random.normal(k1, (c,), jnp.float32)
    beta = 0.1 * jax.random.normal(k2, (c,), jnp.float32)
    mean = 0.1 * jax.random.normal(k3, (c,), jnp.float32)
    var = 1.0 + 0.1 * jnp.abs(jax.random.normal(k4, (c,), jnp.float32))
    scale = gamma / jnp.sqrt(var + 1e-5)
    shift = beta - mean * scale
    return scale, shift


def pack_conv(w, scale, shift):
    """Fold BN scale into weights, pad to (Kp, Cp), cast weights to bf16. Done
    once at init so the forward pass never re-pads / re-casts weights."""
    kh, kw, cin, cout = w.shape
    K = kh * kw * cin
    Kp, _ = _k_tiling(K)
    Cp = _round_up(cout, 128)
    w2d = w.reshape(K, cout) * scale[None, :]
    w_p = jnp.zeros((Kp, Cp), jnp.bfloat16).at[:K, :cout].set(
        w2d.astype(jnp.bfloat16))
    shift_p = jnp.zeros((1, Cp), jnp.float32).at[0, :cout].set(shift)
    return {"w": w_p, "shift": shift_p}


# Exactly mirrors the PyTorch module: note both blocks of layer2/3/4 use stride 2.
ARCH = {
    "layer1": [(64, 64, 1), (64, 64, 1)],
    "layer2": [(64, 128, 2), (128, 128, 2)],
    "layer3": [(128, 256, 2), (256, 256, 2)],
    "layer4": [(256, 512, 2), (512, 512, 2)],
}


def init_params(key):
    keys = jax.random.split(key, 32)
    ki = iter(keys)
    params = {
        "first": pack_conv(init_conv(next(ki), 7, 7, 3, 64),
                           *init_bn(next(ki), 64)),
    }
    fc_w = init_conv(next(ki), 1, 1, 512, 5)                # (1,1,512,5)
    fc_b = 0.1 * jax.random.normal(next(ki), (5,), jnp.float32)
    params["fc"] = pack_conv(fc_w, jnp.ones((5,), jnp.float32), fc_b)
    for name in ("layer1", "layer2", "layer3", "layer4"):
        blocks = []
        for (cin, cout, stride) in ARCH[name]:
            bkeys = jax.random.split(next(ki), 6)
            bp = {
                "conv1": pack_conv(init_conv(bkeys[0], 3, 3, cin, cout),
                                   *init_bn(bkeys[1], cout)),
                "conv2": pack_conv(init_conv(bkeys[2], 3, 3, cout, cout),
                                   *init_bn(bkeys[3], cout)),
            }
            if stride != 1 or cin != cout:
                bp["ds"] = pack_conv(init_conv(bkeys[4], 1, 1, cin, cout),
                                     *init_bn(bkeys[5], cout))
            blocks.append(bp)
        params[name] = blocks
    return params


# ------------------------------ forward pass -------------------------------

def basic_block(x, bp, cin, cout, stride):
    out = conv_bn(x, bp["conv1"], 3, 3, cout, stride, 1, relu=True)
    if stride != 1 or cin != cout:
        residual = conv_bn(x, bp["ds"], 1, 1, cout, stride, 0, relu=False)
    else:
        residual = x
    # second conv: bn2 + residual add + ReLU fused in one Pallas GEMM epilogue
    out = conv_bn(out, bp["conv2"], 3, 3, cout, 1, 1, relu=True,
                  residual=residual)
    return out


def resnet18_forward(params, x_nchw):
    x = jnp.transpose(x_nchw, (0, 2, 3, 1)).astype(jnp.float32)  # NCHW -> NHWC
    x = conv_bn(x, params["first"], 7, 7, 64, 2, 3, relu=True)
    x = maxpool_3x3_s2_p1(x)
    for name in ("layer1", "layer2", "layer3", "layer4"):
        for bp, (cin, cout, stride) in zip(params[name], ARCH[name]):
            x = basic_block(x, bp, cin, cout, stride)
    # Adaptive avg-pool to 1x1: trivially small -> plain JAX (per perf review).
    pooled = jnp.mean(x, axis=(1, 2))                            # (N, 512)
    logits = matmul_bn(pooled, params["fc"]["w"], params["fc"]["shift"], 5,
                       relu=False)                               # (N, 5)
    return logits


# ---------------------------------- main -----------------------------------

if __name__ == "__main__":
    key = jax.random.PRNGKey(0)
    pkey, xkey = jax.random.split(key)
    params = init_params(pkey)
    x = jax.random.normal(xkey, (2, 3, 32, 32), jnp.float32)  # NCHW like PyTorch

    fwd = jax.jit(resnet18_forward)
    out = jax.block_until_ready(fwd(params, x))

    assert out.shape == (2, 5), out.shape
    assert bool(jnp.all(jnp.isfinite(out)))
    print("KERNEL_OK")
</pallas_src>

<mosaic_0001>
module attributes {stable_mosaic.version = 11 : i64} {
  func.func @_mm_bn_kernel(%arg0: i32, %arg1: i32, %arg2: i32, %arg3: memref<256x256xbf16, #tpu.memory_space<vmem>>, %arg4: memref<256x128xbf16, #tpu.memory_space<vmem>>, %arg5: memref<1x128xf32, #tpu.memory_space<vmem>>, %arg6: memref<256x128xf32, #tpu.memory_space<vmem>>) attributes {dimension_semantics = [#tpu.dimension_semantics<parallel>, #tpu.dimension_semantics<parallel>, #tpu.dimension_semantics<arbitrary>], iteration_bounds = array<i64: 2, 1, 1>, scalar_prefetch = 0 : i64, scratch_operands = 0 : i64, tpu.core_type = #tpu.core_type<tc>, window_params = [{transform_indices = @transform_0, window_bounds = array<i64: 256, 256>}, {transform_indices = @transform_1, window_bounds = array<i64: 256, 128>}, {transform_indices = @transform_2, window_bounds = array<i64: 1, 128>}, {transform_indices = @transform_3, window_bounds = array<i64: 256, 128>}]} {
    %c0_i32 = arith.constant 0 : i32
    %0 = arith.cmpi eq, %arg2, %c0_i32 : i32
    %1 = arith.extui %0 : i1 to i32
    %c0_i32_0 = arith.constant 0 : i32
    %2 = arith.cmpi ne, %1, %c0_i32_0 : i32
    scf.if %2 {
      %cst_10 = arith.constant 0.000000e+00 : f32
      %12 = vector.broadcast %cst_10 : f32 to vector<256x128xf32>
      %c0_11 = arith.constant 0 : index
      %c0_12 = arith.constant 0 : index
      %13 = vector.load %arg6[%c0_11, %c0_12] : memref<256x128xf32, #tpu.memory_space<vmem>>, vector<256x128xf32>
      tpu.vector_store %arg6[%c0_11, %c0_12], %12 {strides = array<i32>} : memref<256x128xf32, #tpu.memory_space<vmem>>, vector<256x128xf32>,
    } else {
    }
    %c0 = arith.constant 0 : index
    %c0_1 = arith.constant 0 : index
    %3 = vector.load %arg6[%c0, %c0_1] : memref<256x128xf32, #tpu.memory_space<vmem>>, vector<256x128xf32>
    %c0_2 = arith.constant 0 : index
    %c0_3 = arith.constant 0 : index
    %4 = vector.load %arg3[%c0_2, %c0_3] : memref<256x256xbf16, #tpu.memory_space<vmem>>, vector<256x256xbf16>
    %c0_4 = arith.constant 0 : index
    %c0_5 = arith.constant 0 : index
    %5 = vector.load %arg4[%c0_4, %c0_5] : memref<256x128xbf16, #tpu.memory_space<vmem>>, vector<256x128xbf16>
    %cst = arith.constant dense<0.000000e+00> : vector<256x128xf32>
    %6 = tpu.matmul %4, %5, %cst {dimension_numbers = #tpu.dot_dimension_numbers<[1], [0], [0], [1], [0, 0, 1, 1], [], []>} : vector<256x256xbf16>, vector<256x128xbf16>, vector<256x128xf32> -> vector<256x128xf32>
    %7 = arith.addf %3, %6 : vector<256x128xf32>
    %c0_6 = arith.constant 0 : index
    %c0_7 = arith.constant 0 : index
    %8 = vector.load %arg6[%c0_6, %c0_7] : memref<256x128xf32, #tpu.memory_space<vmem>>, vector<256x128xf32>
    tpu.vector_store %arg6[%c0_6, %c0_7], %7 {strides = array<i32>} : memref<256x128xf32, #tpu.memory_space<vmem>>, vector<256x128xf32>,
    %c0_i32_8 = arith.constant 0 : i32
    %9 = arith.cmpi eq, %arg2, %c0_i32_8 : i32
    %10 = arith.extui %9 : i1 to i32
    %c0_i32_9 = arith.constant 0 : i32
    %11 = arith.cmpi ne, %10, %c0_i32_9 : i32
    scf.if %11 {
      %c0_10 = arith.constant 0 : index
      %c0_11 = arith.constant 0 : index
      %12 = vector.load %arg6[%c0_10, %c0_11] : memref<256x128xf32, #tpu.memory_space<vmem>>, vector<256x128xf32>
      %c0_12 = arith.constant 0 : index
      %c0_13 = arith.constant 0 : index
      %13 = vector.load %arg5[%c0_12, %c0_13] : memref<1x128xf32, #tpu.memory_space<vmem>>, vector<1x128xf32>
      %14 = vector.broadcast %13 : vector<1x128xf32> to vector<256x128xf32>
      %15 = arith.addf %12, %14 : vector<256x128xf32>
      %cst_14 = arith.constant 0.000000e+00 : f32
      %16 = vector.broadcast %cst_14 : f32 to vector<256x128xf32>
      %17 = arith.maximumf %15, %16 : vector<256x128xf32>
      %c0_15 = arith.constant 0 : index
      %c0_16 = arith.constant 0 : index
      %18 = vector.load %arg6[%c0_15, %c0_16] : memref<256x128xf32, #tpu.memory_space<vmem>>, vector<256x128xf32>
      tpu.vector_store %arg6[%c0_15, %c0_16], %17 {strides = array<i32>} : memref<256x128xf32, #tpu.memory_space<vmem>>, vector<256x128xf32>,
    } else {
    }
    return
  }
  func.func @transform_0(%arg0: i32, %arg1: i32, %arg2: i32) -> (i32, i32) {
    %c0_i32 = arith.constant 0 : i32
    return %arg0, %arg2 : i32, i32
  }
  func.func @transform_1(%arg0: i32, %arg1: i32, %arg2: i32) -> (i32, i32) {
    %c0_i32 = arith.constant 0 : i32
    return %arg2, %arg1 : i32, i32
  }
  func.func @transform_2(%arg0: i32, %arg1: i32, %arg2: i32) -> (i32, i32) {
    %c0_i32 = arith.constant 0 : i32
    %c0_i32_0 = arith.constant 0 : i32
    return %c0_i32, %arg1 : i32, i32
  }
  func.func @transform_3(%arg0: i32, %arg1: i32, %arg2: i32) -> (i32, i32) {
    %c0_i32 = arith.constant 0 : i32
    return %arg0, %arg1 : i32, i32
  }
}

module attributes {stable_mosaic.version = 11 : i64} {
  func.func @_reduce_max_kernel(%arg0: i32, %arg1: memref<9x128x64xf32, #tpu.memory_space<vmem>>, %arg2: memref<128x64xf32, #tpu.memory_space<vmem>>) attributes {dimension_semantics = [#tpu.dimension_semantics<parallel>], iteration_bounds = array<i64: 1>, scalar_prefetch = 0 : i64, scratch_operands = 0 : i64, tpu.core_type = #tpu.core_type<tc>, window_params = [{transform_indices = @transform_0, window_bounds = array<i64: 9, 128, 64>}, {transform_indices = @transform_1, window_bounds = array<i64: 128, 64>}]} {
    %c0 = arith.constant 0 : index
    %c0_0 = arith.constant 0 : index
    %c0_1 = arith.constant 0 : index
    %0 = vector.load %arg1[%c0, %c0_0, %c0_1] : memref<9x128x64xf32, #tpu.memory_space<vmem>>, vector<9x128x64xf32>
    %cst = arith.constant dense<0xFF800000> : vector<128x64xf32>
    %1 = vector.multi_reduction <maximumf>, %0, %cst [0] : vector<9x128x64xf32> to vector<128x64xf32>
    %c0_2 = arith.constant 0 : index
    %c0_3 = arith.constant 0 : index
    %2 = vector.load %arg2[%c0_2, %c0_3] : memref<128x64xf32, #tpu.memory_space<vmem>>, vector<128x64xf32>
    tpu.vector_store %arg2[%c0_2, %c0_3], %1 {strides = array<i32>} : memref<128x64xf32, #tpu.memory_space<vmem>>, vector<128x64xf32>,
    return
  }
  func.func @transform_0(%arg0: i32) -> (i32, i32, i32) {
    %c0_i32 = arith.constant 0 : i32
    %c0_i32_0 = arith.constant 0 : i32
    %c0_i32_1 = arith.constant 0 : i32
    return %c0_i32, %arg0, %c0_i32_0 : i32, i32, i32
  }
  func.func @transform_1(%arg0: i32) -> (i32, i32) {
    %c0_i32 = arith.constant 0 : i32
    %c0_i32_0 = arith.constant 0 : i32
    return %arg0, %c0_i32 : i32, i32
  }
}

module attributes {stable_mosaic.version = 11 : i64} {
  func.func @_mm_bn_kernel(%arg0: i32, %arg1: i32, %arg2: i32, %arg3: memref<128x256xbf16, #tpu.memory_space<vmem>>, %arg4: memref<256x128xbf16, #tpu.memory_space<vmem>>, %arg5: memref<1x128xf32, #tpu.memory_space<vmem>>, %arg6: memref<128x128xf32, #tpu.memory_space<vmem>>) attributes {dimension_semantics = [#tpu.dimension_semantics<parallel>, #tpu.dimension_semantics<parallel>, #tpu.dimension_semantics<arbitrary>], iteration_bounds = array<i64: 1, 1, 3>, scalar_prefetch = 0 : i64, scratch_operands = 0 : i64, tpu.core_type = #tpu.core_type<tc>, window_params = [{transform_indices = @transform_0, window_bounds = array<i64: 128, 256>}, {transform_indices = @transform_1, window_bounds = array<i64: 256, 128>}, {transform_indices = @transform_2, window_bounds = array<i64: 1, 128>}, {transform_indices = @transform_3, window_bounds = array<i64: 128, 128>}]} {
    %c0_i32 = arith.constant 0 : i32
    %0 = arith.cmpi eq, %arg2, %c0_i32 : i32
    %1 = arith.extui %0 : i1 to i32
    %c0_i32_0 = arith.constant 0 : i32
    %2 = arith.cmpi ne, %1, %c0_i32_0 : i32
    scf.if %2 {
      %cst_9 = arith.constant 0.000000e+00 : f32
      %12 = vector.broadcast %cst_9 : f32 to vector<128x128xf32>
      %c0_10 = arith.constant 0 : index
      %c0_11 = arith.constant 0 : index
      %13 = vector.load %arg6[%c0_10, %c0_11] : memref<128x128xf32, #tpu.memory_space<vmem>>, vector<128x128xf32>
      tpu.vector_store %arg6[%c0_10, %c0_11], %12 {strides = array<i32>} : memref<128x128xf32, #tpu.memory_space<vmem>>, vector<128x128xf32>,
    } else {
    }
    %c0 = arith.constant 0 : index
    %c0_1 = arith.constant 0 : index
    %3 = vector.load %arg6[%c0, %c0_1] : memref<128x128xf32, #tpu.memory_space<vmem>>, vector<128x128xf32>
    %c0_2 = arith.constant 0 : index
    %c0_3 = arith.constant 0 : index
    %4 = vector.load %arg3[%c0_2, %c0_3] : memref<128x256xbf16, #tpu.memory_space<vmem>>, vector<128x256xbf16>
    %c0_4 = arith.constant 0 : index
    %c0_5 = arith.constant 0 : index
    %5 = vector.load %arg4[%c0_4, %c0_5] : memref<256x128xbf16, #tpu.memory_space<vmem>>, vector<256x128xbf16>
    %cst = arith.constant dense<0.000000e+00> : vector<128x128xf32>
    %6 = tpu.matmul %4, %5, %cst {dimension_numbers = #tpu.dot_dimension_numbers<[1], [0], [0], [1], [0, 0, 1, 1], [], []>} : vector<128x256xbf16>, vector<256x128xbf16>, vector<128x128xf32> -> vector<128x128xf32>
    %7 = arith.addf %3, %6 : vector<128x128xf32>
    %c0_6 = arith.constant 0 : index
    %c0_7 = arith.constant 0 : index
    %8 = vector.load %arg6[%c0_6, %c0_7] : memref<128x128xf32, #tpu.memory_space<vmem>>, vector<128x128xf32>
    tpu.vector_store %arg6[%c0_6, %c0_7], %7 {strides = array<i32>} : memref<128x128xf32, #tpu.memory_space<vmem>>, vector<128x128xf32>,
    %c2_i32 = arith.constant 2 : i32
    %9 = arith.cmpi eq, %arg2, %c2_i32 : i32
    %10 = arith.extui %9 : i1 to i32
    %c0_i32_8 = arith.constant 0 : i32
    %11 = arith.cmpi ne, %10, %c0_i32_8 : i32
    scf.if %11 {
      %c0_9 = arith.constant 0 : index
      %c0_10 = arith.constant 0 : index
      %12 = vector.load %arg6[%c0_9, %c0_10] : memref<128x128xf32, #tpu.memory_space<vmem>>, vector<128x128xf32>
      %c0_11 = arith.constant 0 : index
      %c0_12 = arith.constant 0 : index
      %13 = vector.load %arg5[%c0_11, %c0_12] : memref<1x128xf32, #tpu.memory_space<vmem>>, vector<1x128xf32>
      %14 = vector.broadcast %13 : vector<1x128xf32> to vector<128x128xf32>
      %15 = arith.addf %12, %14 : vector<128x128xf32>
      %cst_13 = arith.constant 0.000000e+00 : f32
      %16 = vector.broadcast %cst_13 : f32 to vector<128x128xf32>
      %17 = arith.maximumf %15, %16 : vector<128x128xf32>
      %c0_14 = arith.constant 0 : index
      %c0_15 = arith.constant 0 : index
      %18 = vector.load %arg6[%c0_14, %c0_15] : memref<128x128xf32, #tpu.memory_space<vmem>>, vector<128x128xf32>
      tpu.vector_store %arg6[%c0_14, %c0_15], %17 {strides = array<i32>} : memref<128x128xf32, #tpu.memory_space<vmem>>, vector<128x128xf32>,
    } else {
    }
    return
  }
  func.func @transform_0(%arg0: i32, %arg1: i32, %arg2: i32) -> (i32, i32) {
    %c0_i32 = arith.constant 0 : i32
    return %arg0, %arg2 : i32, i32
  }
  func.func @transform_1(%arg0: i32, %arg1: i32, %arg2: i32) -> (i32, i32) {
    %c0_i32 = arith.constant 0 : i32
    return %arg2, %arg1 : i32, i32
  }
  func.func @transform_2(%arg0: i32, %arg1: i32, %arg2: i32) -> (i32, i32) {
    %c0_i32 = arith.constant 0 : i32
    %c0_i32_0 = arith.constant 0 : i32
    return %c0_i32, %arg1 : i32, i32
  }
  func.func @transform_3(%arg0: i32, %arg1: i32, %arg2: i32) -> (i32, i32) {
    %c0_i32 = arith.constant 0 : i32
    return %arg0, %arg1 : i32, i32
  }
}

module attributes {stable_mosaic.version = 11 : i64} {
  func.func @_mm_bn_kernel(%arg0: i32, %arg1: i32, %arg2: i32, %arg3: memref<128x256xbf16, #tpu.memory_space<vmem>>, %arg4: memref<256x128xbf16, #tpu.memory_space<vmem>>, %arg5: memref<1x128xf32, #tpu.memory_space<vmem>>, %arg6: memref<128x128xf32, #tpu.memory_space<vmem>>, %arg7: memref<128x128xf32, #tpu.memory_space<vmem>>) attributes {dimension_semantics = [#tpu.dimension_semantics<parallel>, #tpu.dimension_semantics<parallel>, #tpu.dimension_semantics<arbitrary>], iteration_bounds = array<i64: 1, 1, 3>, scalar_prefetch = 0 : i64, scratch_operands = 0 : i64, tpu.core_type = #tpu.core_type<tc>, window_params = [{transform_indices = @transform_0, window_bounds = array<i64: 128, 256>}, {transform_indices = @transform_1, window_bounds = array<i64: 256, 128>}, {transform_indices = @transform_2, window_bounds = array<i64: 1, 128>}, {transform_indices = @transform_3, window_bounds = array<i64: 128, 128>}, {transform_indices = @transform_4, window_bounds = array<i64: 128, 128>}]} {
    %c0_i32 = arith.constant 0 : i32
    %0 = arith.cmpi eq, %arg2, %c0_i32 : i32
    %1 = arith.extui %0 : i1 to i32
    %c0_i32_0 = arith.constant 0 : i32
    %2 = arith.cmpi ne, %1, %c0_i32_0 : i32
    scf.if %2 {
      %cst_9 = arith.constant 0.000000e+00 : f32
      %12 = vector.broadcast %cst_9 : f32 to vector<128x128xf32>
      %c0_10 = arith.constant 0 : index
      %c0_11 = arith.constant 0 : index
      %13 = vector.load %arg7[%c0_10, %c0_11] : memref<128x128xf32, #tpu.memory_space<vmem>>, vector<128x128xf32>
      tpu.vector_store %arg7[%c0_10, %c0_11], %12 {strides = array<i32>} : memref<128x128xf32, #tpu.memory_space<vmem>>, vector<128x128xf32>,
    } else {
    }
    %c0 = arith.constant 0 : index
    %c0_1 = arith.constant 0 : index
    %3 = vector.load %arg7[%c0, %c0_1] : memref<128x128xf32, #tpu.memory_space<vmem>>, vector<128x128xf32>
    %c0_2 = arith.constant 0 : index
    %c0_3 = arith.constant 0 : index
    %4 = vector.load %arg3[%c0_2, %c0_3] : memref<128x256xbf16, #tpu.memory_space<vmem>>, vector<128x256xbf16>
    %c0_4 = arith.constant 0 : index
    %c0_5 = arith.constant 0 : index
    %5 = vector.load %arg4[%c0_4, %c0_5] : memref<256x128xbf16, #tpu.memory_space<vmem>>, vector<256x128xbf16>
    %cst = arith.constant dense<0.000000e+00> : vector<128x128xf32>
    %6 = tpu.matmul %4, %5, %cst {dimension_numbers = #tpu.dot_dimension_numbers<[1], [0], [0], [1], [0, 0, 1, 1], [], []>} : vector<128x256xbf16>, vector<256x128xbf16>, vector<128x128xf32> -> vector<128x128xf32>
    %7 = arith.addf %3, %6 : vector<128x128xf32>
    %c0_6 = arith.constant 0 : index
    %c0_7 = arith.constant 0 : index
    %8 = vector.load %arg7[%c0_6, %c0_7] : memref<128x128xf32, #tpu.memory_space<vmem>>, vector<128x128xf32>
    tpu.vector_store %arg7[%c0_6, %c0_7], %7 {strides = array<i32>} : memref<128x128xf32, #tpu.memory_space<vmem>>, vector<128x128xf32>,
    %c2_i32 = arith.constant 2 : i32
    %9 = arith.cmpi eq, %arg2, %c2_i32 : i32
    %10 = arith.extui %9 : i1 to i32
    %c0_i32_8 = arith.constant 0 : i32
    %11 = arith.cmpi ne, %10, %c0_i32_8 : i32
    scf.if %11 {
      %c0_9 = arith.constant 0 : index
      %c0_10 = arith.constant 0 : index
      %12 = vector.load %arg7[%c0_9, %c0_10] : memref<128x128xf32, #tpu.memory_space<vmem>>, vector<128x128xf32>
      %c0_11 = arith.constant 0 : index
      %c0_12 = arith.constant 0 : index
      %13 = vector.load %arg5[%c0_11, %c0_12] : memref<1x128xf32, #tpu.memory_space<vmem>>, vector<1x128xf32>
      %14 = vector.broadcast %13 : vector<1x128xf32> to vector<128x128xf32>
      %15 = arith.addf %12, %14 : vector<128x128xf32>
      %c0_13 = arith.constant 0 : index
      %c0_14 = arith.constant 0 : index
      %16 = vector.load %arg6[%c0_13, %c0_14] : memref<128x128xf32, #tpu.memory_space<vmem>>, vector<128x128xf32>
      %17 = arith.addf %15, %16 : vector<128x128xf32>
      %cst_15 = arith.constant 0.000000e+00 : f32
      %18 = vector.broadcast %cst_15 : f32 to vector<128x128xf32>
      %19 = arith.maximumf %17, %18 : vector<128x128xf32>
      %c0_16 = arith.constant 0 : index
      %c0_17 = arith.constant 0 : index
      %20 = vector.load %arg7[%c0_16, %c0_17] : memref<128x128xf32, #tpu.memory_space<vmem>>, vector<128x128xf32>
      tpu.vector_store %arg7[%c0_16, %c0_17], %19 {strides = array<i32>} : memref<128x128xf32, #tpu.memory_space<vmem>>, vector<128x128xf32>,
    } else {
    }
    return
  }
  func.func @transform_0(%arg0: i32, %arg1: i32, %arg2: i32) -> (i32, i32) {
    %c0_i32 = arith.constant 0 : i32
    return %arg0, %arg2 : i32, i32
  }
  func.func @transform_1(%arg0: i32, %arg1: i32, %arg2: i32) -> (i32, i32) {
    %c0_i32 = arith.constant 0 : i32
    return %arg2, %arg1 : i32, i32
  }
  func.func @transform_2(%arg0: i32, %arg1: i32, %arg2: i32) -> (i32, i32) {
    %c0_i32 = arith.constant 0 : i32
    %c0_i32_0 = arith.constant 0 : i32
    return %c0_i32, %arg1 : i32, i32
  }
  func.func @transform_3(%arg0: i32, %arg1: i32, %arg2: i32) -> (i32, i32) {
    %c0_i32 = arith.constant 0 : i32
    return %arg0, %arg1 : i32, i32
  }
  func.func @transform_4(%arg0: i32, %arg1: i32, %arg2: i32) -> (i32, i32) {
    %c0_i32 = arith.constant 0 : i32
    return %arg0, %arg1 : i32, i32
  }
}

module attributes {stable_mosaic.version = 11 : i64} {
  func.func @_mm_bn_kernel(%arg0: i32, %arg1: i32, %arg2: i32, %arg3: memref<32x256xbf16, #tpu.memory_space<vmem>>, %arg4: memref<256x128xbf16, #tpu.memory_space<vmem>>, %arg5: memref<1x128xf32, #tpu.memory_space<vmem>>, %arg6: memref<32x128xf32, #tpu.memory_space<vmem>>) attributes {dimension_semantics = [#tpu.dimension_semantics<parallel>, #tpu.dimension_semantics<parallel>, #tpu.dimension_semantics<arbitrary>], iteration_bounds = array<i64: 1, 1, 3>, scalar_prefetch = 0 : i64, scratch_operands = 0 : i64, tpu.core_type = #tpu.core_type<tc>, window_params = [{transform_indices = @transform_0, window_bounds = array<i64: 32, 256>}, {transform_indices = @transform_1, window_bounds = array<i64: 256, 128>}, {transform_indices = @transform_2, window_bounds = array<i64: 1, 128>}, {transform_indices = @transform_3, window_bounds = array<i64: 32, 128>}]} {
    %c0_i32 = arith.constant 0 : i32
    %0 = arith.cmpi eq, %arg2, %c0_i32 : i32
    %1 = arith.extui %0 : i1 to i32
    %c0_i32_0 = arith.constant 0 : i32
    %2 = arith.cmpi ne, %1, %c0_i32_0 : i32
    scf.if %2 {
      %cst_9 = arith.constant 0.000000e+00 : f32
      %12 = vector.broadcast %cst_9 : f32 to vector<32x128xf32>
      %c0_10 = arith.constant 0 : index
      %c0_11 = arith.constant 0 : index
      %13 = vector.load %arg6[%c0_10, %c0_11] : memref<32x128xf32, #tpu.memory_space<vmem>>, vector<32x128xf32>
      tpu.vector_store %arg6[%c0_10, %c0_11], %12 {strides = array<i32>} : memref<32x128xf32, #tpu.memory_space<vmem>>, vector<32x128xf32>,
    } else {
    }
    %c0 = arith.constant 0 : index
    %c0_1 = arith.constant 0 : index
    %3 = vector.load %arg6[%c0, %c0_1] : memref<32x128xf32, #tpu.memory_space<vmem>>, vector<32x128xf32>
    %c0_2 = arith.constant 0 : index
    %c0_3 = arith.constant 0 : index
    %4 = vector.load %arg3[%c0_2, %c0_3] : memref<32x256xbf16, #tpu.memory_space<vmem>>, vector<32x256xbf16>
    %c0_4 = arith.constant 0 : index
    %c0_5 = arith.constant 0 : index
    %5 = vector.load %arg4[%c0_4, %c0_5] : memref<256x128xbf16, #tpu.memory_space<vmem>>, vector<256x128xbf16>
    %cst = arith.constant dense<0.000000e+00> : vector<32x128xf32>
    %6 = tpu.matmul %4, %5, %cst {dimension_numbers = #tpu.dot_dimension_numbers<[1], [0], [0], [1], [0, 0, 1, 1], [], []>} : vector<32x256xbf16>, vector<256x128xbf16>, vector<32x128xf32> -> vector<32x128xf32>
    %7 = arith.addf %3, %6 : vector<32x128xf32>
    %c0_6 = arith.constant 0 : index
    %c0_7 = arith.constant 0 : index
    %8 = vector.load %arg6[%c0_6, %c0_7] : memref<32x128xf32, #tpu.memory_space<vmem>>, vector<32x128xf32>
    tpu.vector_store %arg6[%c0_6, %c0_7], %7 {strides = array<i32>} : memref<32x128xf32, #tpu.memory_space<vmem>>, vector<32x128xf32>,
    %c2_i32 = arith.constant 2 : i32
    %9 = arith.cmpi eq, %arg2, %c2_i32 : i32
    %10 = arith.extui %9 : i1 to i32
    %c0_i32_8 = arith.constant 0 : i32
    %11 = arith.cmpi ne, %10, %c0_i32_8 : i32
    scf.if %11 {
      %c0_9 = arith.constant 0 : index
      %c0_10 = arith.constant 0 : index
      %12 = vector.load %arg6[%c0_9, %c0_10] : memref<32x128xf32, #tpu.memory_space<vmem>>, vector<32x128xf32>
      %c0_11 = arith.constant 0 : index
      %c0_12 = arith.constant 0 : index
      %13 = vector.load %arg5[%c0_11, %c0_12] : memref<1x128xf32, #tpu.memory_space<vmem>>, vector<1x128xf32>
      %14 = vector.broadcast %13 : vector<1x128xf32> to vector<32x128xf32>
      %15 = arith.addf %12, %14 : vector<32x128xf32>
      %cst_13 = arith.constant 0.000000e+00 : f32
      %16 = vector.broadcast %cst_13 : f32 to vector<32x128xf32>
      %17 = arith.maximumf %15, %16 : vector<32x128xf32>
      %c0_14 = arith.constant 0 : index
      %c0_15 = arith.constant 0 : index
      %18 = vector.load %arg6[%c0_14, %c0_15] : memref<32x128xf32, #tpu.memory_space<vmem>>, vector<32x128xf32>
      tpu.vector_store %arg6[%c0_14, %c0_15], %17 {strides = array<i32>} : memref<32x128xf32, #tpu.memory_space<vmem>>, vector<32x128xf32>,
    } else {
    }
    return
  }
  func.func @transform_0(%arg0: i32, %arg1: i32, %arg2: i32) -> (i32, i32) {
    %c0_i32 = arith.constant 0 : i32
    return %arg0, %arg2 : i32, i32
  }
  func.func @transform_1(%arg0: i32, %arg1: i32, %arg2: i32) -> (i32, i32) {
    %c0_i32 = arith.constant 0 : i32
    return %arg2, %arg1 : i32, i32
  }
  func.func @transform_2(%arg0: i32, %arg1: i32, %arg2: i32) -> (i32, i32) {
    %c0_i32 = arith.constant 0 : i32
    %c0_i32_0 = arith.constant 0 : i32
    return %c0_i32, %arg1 : i32, i32
  }
  func.func @transform_3(%arg0: i32, %arg1: i32, %arg2: i32) -> (i32, i32) {
    %c0_i32 = arith.constant 0 : i32
    return %arg0, %arg1 : i32, i32
  }
}

module attributes {stable_mosaic.version = 11 : i64} {
  func.func @_mm_bn_kernel(%arg0: i32, %arg1: i32, %arg2: i32, %arg3: memref<32x256xbf16, #tpu.memory_space<vmem>>, %arg4: memref<256x128xbf16, #tpu.memory_space<vmem>>, %arg5: memref<1x128xf32, #tpu.memory_space<vmem>>, %arg6: memref<32x128xf32, #tpu.memory_space<vmem>>, %arg7: memref<32x128xf32, #tpu.memory_space<vmem>>) attributes {dimension_semantics = [#tpu.dimension_semantics<parallel>, #tpu.dimension_semantics<parallel>, #tpu.dimension_semantics<arbitrary>], iteration_bounds = array<i64: 1, 1, 5>, scalar_prefetch = 0 : i64, scratch_operands = 0 : i64, tpu.core_type = #tpu.core_type<tc>, window_params = [{transform_indices = @transform_0, window_bounds = array<i64: 32, 256>}, {transform_indices = @transform_1, window_bounds = array<i64: 256, 128>}, {transform_indices = @transform_2, window_bounds = array<i64: 1, 128>}, {transform_indices = @transform_3, window_bounds = array<i64: 32, 128>}, {transform_indices = @transform_4, window_bounds = array<i64: 32, 128>}]} {
    %c0_i32 = arith.constant 0 : i32
    %0 = arith.cmpi eq, %arg2, %c0_i32 : i32
    %1 = arith.extui %0 : i1 to i32
    %c0_i32_0 = arith.constant 0 : i32
    %2 = arith.cmpi ne, %1, %c0_i32_0 : i32
    scf.if %2 {
      %cst_9 = arith.constant 0.000000e+00 : f32
      %12 = vector.broadcast %cst_9 : f32 to vector<32x128xf32>
      %c0_10 = arith.constant 0 : index
      %c0_11 = arith.constant 0 : index
      %13 = vector.load %arg7[%c0_10, %c0_11] : memref<32x128xf32, #tpu.memory_space<vmem>>, vector<32x128xf32>
      tpu.vector_store %arg7[%c0_10, %c0_11], %12 {strides = array<i32>} : memref<32x128xf32, #tpu.memory_space<vmem>>, vector<32x128xf32>,
    } else {
    }
    %c0 = arith.constant 0 : index
    %c0_1 = arith.constant 0 : index
    %3 = vector.load %arg7[%c0, %c0_1] : memref<32x128xf32, #tpu.memory_space<vmem>>, vector<32x128xf32>
    %c0_2 = arith.constant 0 : index
    %c0_3 = arith.constant 0 : index
    %4 = vector.load %arg3[%c0_2, %c0_3] : memref<32x256xbf16, #tpu.memory_space<vmem>>, vector<32x256xbf16>
    %c0_4 = arith.constant 0 : index
    %c0_5 = arith.constant 0 : index
    %5 = vector.load %arg4[%c0_4, %c0_5] : memref<256x128xbf16, #tpu.memory_space<vmem>>, vector<256x128xbf16>
    %cst = arith.constant dense<0.000000e+00> : vector<32x128xf32>
    %6 = tpu.matmul %4, %5, %cst {dimension_numbers = #tpu.dot_dimension_numbers<[1], [0], [0], [1], [0, 0, 1, 1], [], []>} : vector<32x256xbf16>, vector<256x128xbf16>, vector<32x128xf32> -> vector<32x128xf32>
    %7 = arith.addf %3, %6 : vector<32x128xf32>
    %c0_6 = arith.constant 0 : index
    %c0_7 = arith.constant 0 : index
    %8 = vector.load %arg7[%c0_6, %c0_7] : memref<32x128xf32, #tpu.memory_space<vmem>>, vector<32x128xf32>
    tpu.vector_store %arg7[%c0_6, %c0_7], %7 {strides = array<i32>} : memref<32x128xf32, #tpu.memory_space<vmem>>, vector<32x128xf32>,
    %c4_i32 = arith.constant 4 : i32
    %9 = arith.cmpi eq, %arg2, %c4_i32 : i32
    %10 = arith.extui %9 : i1 to i32
    %c0_i32_8 = arith.constant 0 : i32
    %11 = arith.cmpi ne, %10, %c0_i32_8 : i32
    scf.if %11 {
      %c0_9 = arith.constant 0 : index
      %c0_10 = arith.constant 0 : index
      %12 = vector.load %arg7[%c0_9, %c0_10] : memref<32x128xf32, #tpu.memory_space<vmem>>, vector<32x128xf32>
      %c0_11 = arith.constant 0 : index
      %c0_12 = arith.constant 0 : index
      %13 = vector.load %arg5[%c0_11, %c0_12] : memref<1x128xf32, #tpu.memory_space<vmem>>, vector<1x128xf32>
      %14 = vector.broadcast %13 : vector<1x128xf32> to vector<32x128xf32>
      %15 = arith.addf %12, %14 : vector<32x128xf32>
      %c0_13 = arith.constant 0 : index
      %c0_14 = arith.constant 0 : index
      %16 = vector.load %arg6[%c0_13, %c0_14] : memref<32x128xf32, #tpu.memory_space<vmem>>, vector<32x128xf32>
      %17 = arith.addf %15, %16 : vector<32x128xf32>
      %cst_15 = arith.constant 0.000000e+00 : f32
      %18 = vector.broadcast %cst_15 : f32 to vector<32x128xf32>
      %19 = arith.maximumf %17, %18 : vector<32x128xf32>
      %c0_16 = arith.constant 0 : index
      %c0_17 = arith.constant 0 : index
      %20 = vector.load %arg7[%c0_16, %c0_17] : memref<32x128xf32, #tpu.memory_space<vmem>>, vector<32x128xf32>
      tpu.vector_store %arg7[%c0_16, %c0_17], %19 {strides = array<i32>} : memref<32x128xf32, #tpu.memory_space<vmem>>, vector<32x128xf32>,
    } else {
    }
    return
  }
  func.func @transform_0(%arg0: i32, %arg1: i32, %arg2: i32) -> (i32, i32) {
    %c0_i32 = arith.constant 0 : i32
    return %arg0, %arg2 : i32, i32
  }
  func.func @transform_1(%arg0: i32, %arg1: i32, %arg2: i32) -> (i32, i32) {
    %c0_i32 = arith.constant 0 : i32
    return %arg2, %arg1 : i32, i32
  }
  func.func @transform_2(%arg0: i32, %arg1: i32, %arg2: i32) -> (i32, i32) {
    %c0_i32 = arith.constant 0 : i32
    %c0_i32_0 = arith.constant 0 : i32
    return %c0_i32, %arg1 : i32, i32
  }
  func.func @transform_3(%arg0: i32, %arg1: i32, %arg2: i32) -> (i32, i32) {
    %c0_i32 = arith.constant 0 : i32
    return %arg0, %arg1 : i32, i32
  }
  func.func @transform_4(%arg0: i32, %arg1: i32, %arg2: i32) -> (i32, i32) {
    %c0_i32 = arith.constant 0 : i32
    return %arg0, %arg1 : i32, i32
  }
}

module attributes {stable_mosaic.version = 11 : i64} {
  func.func @_mm_bn_kernel(%arg0: i32, %arg1: i32, %arg2: i32, %arg3: memref<32x128xbf16, #tpu.memory_space<vmem>>, %arg4: memref<128x128xbf16, #tpu.memory_space<vmem>>, %arg5: memref<1x128xf32, #tpu.memory_space<vmem>>, %arg6: memref<32x128xf32, #tpu.memory_space<vmem>>) attributes {dimension_semantics = [#tpu.dimension_semantics<parallel>, #tpu.dimension_semantics<parallel>, #tpu.dimension_semantics<arbitrary>], iteration_bounds = array<i64: 1, 1, 1>, scalar_prefetch = 0 : i64, scratch_operands = 0 : i64, tpu.core_type = #tpu.core_type<tc>, window_params = [{transform_indices = @transform_0, window_bounds = array<i64: 32, 128>}, {transform_indices = @transform_1, window_bounds = array<i64: 128, 128>}, {transform_indices = @transform_2, window_bounds = array<i64: 1, 128>}, {transform_indices = @transform_3, window_bounds = array<i64: 32, 128>}]} {
    %c0_i32 = arith.constant 0 : i32
    %0 = arith.cmpi eq, %arg2, %c0_i32 : i32
    %1 = arith.extui %0 : i1 to i32
    %c0_i32_0 = arith.constant 0 : i32
    %2 = arith.cmpi ne, %1, %c0_i32_0 : i32
    scf.if %2 {
      %cst_10 = arith.constant 0.000000e+00 : f32
      %12 = vector.broadcast %cst_10 : f32 to vector<32x128xf32>
      %c0_11 = arith.constant 0 : index
      %c0_12 = arith.constant 0 : index
      %13 = vector.load %arg6[%c0_11, %c0_12] : memref<32x128xf32, #tpu.memory_space<vmem>>, vector<32x128xf32>
      tpu.vector_store %arg6[%c0_11, %c0_12], %12 {strides = array<i32>} : memref<32x128xf32, #tpu.memory_space<vmem>>, vector<32x128xf32>,
    } else {
    }
    %c0 = arith.constant 0 : index
    %c0_1 = arith.constant 0 : index
    %3 = vector.load %arg6[%c0, %c0_1] : memref<32x128xf32, #tpu.memory_space<vmem>>, vector<32x128xf32>
    %c0_2 = arith.constant 0 : index
    %c0_3 = arith.constant 0 : index
    %4 = vector.load %arg3[%c0_2, %c0_3] : memref<32x128xbf16, #tpu.memory_space<vmem>>, vector<32x128xbf16>
    %c0_4 = arith.constant 0 : index
    %c0_5 = arith.constant 0 : index
    %5 = vector.load %arg4[%c0_4, %c0_5] : memref<128x128xbf16, #tpu.memory_space<vmem>>, vector<128x128xbf16>
    %cst = arith.constant dense<0.000000e+00> : vector<32x128xf32>
    %6 = tpu.matmul %4, %5, %cst {dimension_numbers = #tpu.dot_dimension_numbers<[1], [0], [0], [1], [0, 0, 1, 1], [], []>} : vector<32x128xbf16>, vector<128x128xbf16>, vector<32x128xf32> -> vector<32x128xf32>
    %7 = arith.addf %3, %6 : vector<32x128xf32>
    %c0_6 = arith.constant 0 : index
    %c0_7 = arith.constant 0 : index
    %8 = vector.load %arg6[%c0_6, %c0_7] : memref<32x128xf32, #tpu.memory_space<vmem>>, vector<32x128xf32>
    tpu.vector_store %arg6[%c0_6, %c0_7], %7 {strides = array<i32>} : memref<32x128xf32, #tpu.memory_space<vmem>>, vector<32x128xf32>,
    %c0_i32_8 = arith.constant 0 : i32
    %9 = arith.cmpi eq, %arg2, %c0_i32_8 : i32
    %10 = arith.extui %9 : i1 to i32
    %c0_i32_9 = arith.constant 0 : i32
    %11 = arith.cmpi ne, %10, %c0_i32_9 : i32
    scf.if %11 {
      %c0_10 = arith.constant 0 : index
      %c0_11 = arith.constant 0 : index
      %12 = vector.load %arg6[%c0_10, %c0_11] : memref<32x128xf32, #tpu.memory_space<vmem>>, vector<32x128xf32>
      %c0_12 = arith.constant 0 : index
      %c0_13 = arith.constant 0 : index
      %13 = vector.load %arg5[%c0_12, %c0_13] : memref<1x128xf32, #tpu.memory_space<vmem>>, vector<1x128xf32>
      %14 = vector.broadcast %13 : vector<1x128xf32> to vector<32x128xf32>
      %15 = arith.addf %12, %14 : vector<32x128xf32>
      %c0_14 = arith.constant 0 : index
      %c0_15 = arith.constant 0 : index
      %16 = vector.load %arg6[%c0_14, %c0_15] : memref<32x128xf32, #tpu.memory_space<vmem>>, vector<32x128xf32>
      tpu.vector_store %arg6[%c0_14, %c0_15], %15 {strides = array<i32>} : memref<32x128xf32, #tpu.memory_space<vmem>>, vector<32x128xf32>,
    } else {
    }
    return
  }
  func.func @transform_0(%arg0: i32, %arg1: i32, %arg2: i32) -> (i32, i32) {
    %c0_i32 = arith.constant 0 : i32
    return %arg0, %arg2 : i32, i32
  }
  func.func @transform_1(%arg0: i32, %arg1: i32, %arg2: i32) -> (i32, i32) {
    %c0_i32 = arith.constant 0 : i32
    return %arg2, %arg1 : i32, i32
  }
  func.func @transform_2(%arg0: i32, %arg1: i32, %arg2: i32) -> (i32, i32) {
    %c0_i32 = arith.constant 0 : i32
    %c0_i32_0 = arith.constant 0 : i32
    return %c0_i32, %arg1 : i32, i32
  }
  func.func @transform_3(%arg0: i32, %arg1: i32, %arg2: i32) -> (i32, i32) {
    %c0_i32 = arith.constant 0 : i32
    return %arg0, %arg1 : i32, i32
  }
}

module attributes {stable_mosaic.version = 11 : i64} {
  func.func @_mm_bn_kernel(%arg0: i32, %arg1: i32, %arg2: i32, %arg3: memref<8x256xbf16, #tpu.memory_space<vmem>>, %arg4: memref<256x128xbf16, #tpu.memory_space<vmem>>, %arg5: memref<1x128xf32, #tpu.memory_space<vmem>>, %arg6: memref<8x128xf32, #tpu.memory_space<vmem>>) attributes {dimension_semantics = [#tpu.dimension_semantics<parallel>, #tpu.dimension_semantics<parallel>, #tpu.dimension_semantics<arbitrary>], iteration_bounds = array<i64: 1, 1, 5>, scalar_prefetch = 0 : i64, scratch_operands = 0 : i64, tpu.core_type = #tpu.core_type<tc>, window_params = [{transform_indices = @transform_0, window_bounds = array<i64: 8, 256>}, {transform_indices = @transform_1, window_bounds = array<i64: 256, 128>}, {transform_indices = @transform_2, window_bounds = array<i64: 1, 128>}, {transform_indices = @transform_3, window_bounds = array<i64: 8, 128>}]} {
    %c0_i32 = arith.constant 0 : i32
    %0 = arith.cmpi eq, %arg2, %c0_i32 : i32
    %1 = arith.extui %0 : i1 to i32
    %c0_i32_0 = arith.constant 0 : i32
    %2 = arith.cmpi ne, %1, %c0_i32_0 : i32
    scf.if %2 {
      %cst_9 = arith.constant 0.000000e+00 : f32
      %12 = vector.broadcast %cst_9 : f32 to vector<8x128xf32>
      %c0_10 = arith.constant 0 : index
      %c0_11 = arith.constant 0 : index
      %13 = vector.load %arg6[%c0_10, %c0_11] : memref<8x128xf32, #tpu.memory_space<vmem>>, vector<8x128xf32>
      tpu.vector_store %arg6[%c0_10, %c0_11], %12 {strides = array<i32>} : memref<8x128xf32, #tpu.memory_space<vmem>>, vector<8x128xf32>,
    } else {
    }
    %c0 = arith.constant 0 : index
    %c0_1 = arith.constant 0 : index
    %3 = vector.load %arg6[%c0, %c0_1] : memref<8x128xf32, #tpu.memory_space<vmem>>, vector<8x128xf32>
    %c0_2 = arith.constant 0 : index
    %c0_3 = arith.constant 0 : index
    %4 = vector.load %arg3[%c0_2, %c0_3] : memref<8x256xbf16, #tpu.memory_space<vmem>>, vector<8x256xbf16>
    %c0_4 = arith.constant 0 : index
    %c0_5 = arith.constant 0 : index
    %5 = vector.load %arg4[%c0_4, %c0_5] : memref<256x128xbf16, #tpu.memory_space<vmem>>, vector<256x128xbf16>
    %cst = arith.constant dense<0.000000e+00> : vector<8x128xf32>
    %6 = tpu.matmul %4, %5, %cst {dimension_numbers = #tpu.dot_dimension_numbers<[1], [0], [0], [1], [0, 0, 1, 1], [], []>} : vector<8x256xbf16>, vector<256x128xbf16>, vector<8x128xf32> -> vector<8x128xf32>
    %7 = arith.addf %3, %6 : vector<8x128xf32>
    %c0_6 = arith.constant 0 : index
    %c0_7 = arith.constant 0 : index
    %8 = vector.load %arg6[%c0_6, %c0_7] : memref<8x128xf32, #tpu.memory_space<vmem>>, vector<8x128xf32>
    tpu.vector_store %arg6[%c0_6, %c0_7], %7 {strides = array<i32>} : memref<8x128xf32, #tpu.memory_space<vmem>>, vector<8x128xf32>,
    %c4_i32 = arith.constant 4 : i32
    %9 = arith.cmpi eq, %arg2, %c4_i32 : i32
    %10 = arith.extui %9 : i1 to i32
    %c0_i32_8 = arith.constant 0 : i32
    %11 = arith.cmpi ne, %10, %c0_i32_8 : i32
    scf.if %11 {
      %c0_9 = arith.constant 0 : index
      %c0_10 = arith.constant 0 : index
      %12 = vector.load %arg6[%c0_9, %c0_10] : memref<8x128xf32, #tpu.memory_space<vmem>>, vector<8x128xf32>
      %c0_11 = arith.constant 0 : index
      %c0_12 = arith.constant 0 : index
      %13 = vector.load %arg5[%c0_11, %c0_12] : memref<1x128xf32, #tpu.memory_space<vmem>>, vector<1x128xf32>
      %14 = vector.broadcast %13 : vector<1x128xf32> to vector<8x128xf32>
      %15 = arith.addf %12, %14 : vector<8x128xf32>
      %cst_13 = arith.constant 0.000000e+00 : f32
      %16 = vector.broadcast %cst_13 : f32 to vector<8x128xf32>
      %17 = arith.maximumf %15, %16 : vector<8x128xf32>
      %c0_14 = arith.constant 0 : index
      %c0_15 = arith.constant 0 : index
      %18 = vector.load %arg6[%c0_14, %c0_15] : memref<8x128xf32, #tpu.memory_space<vmem>>, vector<8x128xf32>
      tpu.vector_store %arg6[%c0_14, %c0_15], %17 {strides = array<i32>} : memref<8x128xf32, #tpu.memory_space<vmem>>, vector<8x128xf32>,
    } else {
    }
    return
  }
  func.func @transform_0(%arg0: i32, %arg1: i32, %arg2: i32) -> (i32, i32) {
    %c0_i32 = arith.constant 0 : i32
    return %arg0, %arg2 : i32, i32
  }
  func.func @transform_1(%arg0: i32, %arg1: i32, %arg2: i32) -> (i32, i32) {
    %c0_i32 = arith.constant 0 : i32
    return %arg2, %arg1 : i32, i32
  }
  func.func @transform_2(%arg0: i32, %arg1: i32, %arg2: i32) -> (i32, i32) {
    %c0_i32 = arith.constant 0 : i32
    %c0_i32_0 = arith.constant 0 : i32
    return %c0_i32, %arg1 : i32, i32
  }
  func.func @transform_3(%arg0: i32, %arg1: i32, %arg2: i32) -> (i32, i32) {
    %c0_i32 = arith.constant 0 : i32
    return %arg0, %arg1 : i32, i32
  }
}

module attributes {stable_mosaic.version = 11 : i64} {
  func.func @_mm_bn_kernel(%arg0: i32, %arg1: i32, %arg2: i32, %arg3: memref<8x256xbf16, #tpu.memory_space<vmem>>, %arg4: memref<256x128xbf16, #tpu.memory_space<vmem>>, %arg5: memref<1x128xf32, #tpu.memory_space<vmem>>, %arg6: memref<8x128xf32, #tpu.memory_space<vmem>>, %arg7: memref<8x128xf32, #tpu.memory_space<vmem>>) attributes {dimension_semantics = [#tpu.dimension_semantics<parallel>, #tpu.dimension_semantics<parallel>, #tpu.dimension_semantics<arbitrary>], iteration_bounds = array<i64: 1, 1, 5>, scalar_prefetch = 0 : i64, scratch_operands = 0 : i64, tpu.core_type = #tpu.core_type<tc>, window_params = [{transform_indices = @transform_0, window_bounds = array<i64: 8, 256>}, {transform_indices = @transform_1, window_bounds = array<i64: 256, 128>}, {transform_indices = @transform_2, window_bounds = array<i64: 1, 128>}, {transform_indices = @transform_3, window_bounds = array<i64: 8, 128>}, {transform_indices = @transform_4, window_bounds = array<i64: 8, 128>}]} {
    %c0_i32 = arith.constant 0 : i32
    %0 = arith.cmpi eq, %arg2, %c0_i32 : i32
    %1 = arith.extui %0 : i1 to i32
    %c0_i32_0 = arith.constant 0 : i32
    %2 = arith.cmpi ne, %1, %c0_i32_0 : i32
    scf.if %2 {
      %cst_9 = arith.constant 0.000000e+00 : f32
      %12 = vector.broadcast %cst_9 : f32 to vector<8x128xf32>
      %c0_10 = arith.constant 0 : index
      %c0_11 = arith.constant 0 : index
      %13 = vector.load %arg7[%c0_10, %c0_11] : memref<8x128xf32, #tpu.memory_space<vmem>>, vector<8x128xf32>
      tpu.vector_store %arg7[%c0_10, %c0_11], %12 {strides = array<i32>} : memref<8x128xf32, #tpu.memory_space<vmem>>, vector<8x128xf32>,
    } else {
    }
    %c0 = arith.constant 0 : index
    %c0_1 = arith.constant 0 : index
    %3 = vector.load %arg7[%c0, %c0_1] : memref<8x128xf32, #tpu.memory_space<vmem>>, vector<8x128xf32>
    %c0_2 = arith.constant 0 : index
    %c0_3 = arith.constant 0 : index
    %4 = vector.load %arg3[%c0_2, %c0_3] : memref<8x256xbf16, #tpu.memory_space<vmem>>, vector<8x256xbf16>
    %c0_4 = arith.constant 0 : index
    %c0_5 = arith.constant 0 : index
    %5 = vector.load %arg4[%c0_4, %c0_5] : memref<256x128xbf16, #tpu.memory_space<vmem>>, vector<256x128xbf16>
    %cst = arith.constant dense<0.000000e+00> : vector<8x128xf32>
    %6 = tpu.matmul %4, %5, %cst {dimension_numbers = #tpu.dot_dimension_numbers<[1], [0], [0], [1], [0, 0, 1, 1], [], []>} : vector<8x256xbf16>, vector<256x128xbf16>, vector<8x128xf32> -> vector<8x128xf32>
    %7 = arith.addf %3, %6 : vector<8x128xf32>
    %c0_6 = arith.constant 0 : index
    %c0_7 = arith.constant 0 : index
    %8 = vector.load %arg7[%c0_6, %c0_7] : memref<8x128xf32, #tpu.memory_space<vmem>>, vector<8x128xf32>
    tpu.vector_store %arg7[%c0_6, %c0_7], %7 {strides = array<i32>} : memref<8x128xf32, #tpu.memory_space<vmem>>, vector<8x128xf32>,
    %c4_i32 = arith.constant 4 : i32
    %9 = arith.cmpi eq, %arg2, %c4_i32 : i32
    %10 = arith.extui %9 : i1 to i32
    %c0_i32_8 = arith.constant 0 : i32
    %11 = arith.cmpi ne, %10, %c0_i32_8 : i32
    scf.if %11 {
      %c0_9 = arith.constant 0 : index
      %c0_10 = arith.constant 0 : index
      %12 = vector.load %arg7[%c0_9, %c0_10] : memref<8x128xf32, #tpu.memory_space<vmem>>, vector<8x128xf32>
      %c0_11 = arith.constant 0 : index
      %c0_12 = arith.constant 0 : index
      %13 = vector.load %arg5[%c0_11, %c0_12] : memref<1x128xf32, #tpu.memory_space<vmem>>, vector<1x128xf32>
      %14 = vector.broadcast %13 : vector<1x128xf32> to vector<8x128xf32>
      %15 = arith.addf %12, %14 : vector<8x128xf32>
      %c0_13 = arith.constant 0 : index
      %c0_14 = arith.constant 0 : index
      %16 = vector.load %arg6[%c0_13, %c0_14] : memref<8x128xf32, #tpu.memory_space<vmem>>, vector<8x128xf32>
      %17 = arith.addf %15, %16 : vector<8x128xf32>
      %cst_15 = arith.constant 0.000000e+00 : f32
      %18 = vector.broadcast %cst_15 : f32 to vector<8x128xf32>
      %19 = arith.maximumf %17, %18 : vector<8x128xf32>
      %c0_16 = arith.constant 0 : index
      %c0_17 = arith.constant 0 : index
      %20 = vector.load %arg7[%c0_16, %c0_17] : memref<8x128xf32, #tpu.memory_space<vmem>>, vector<8x128xf32>
      tpu.vector_store %arg7[%c0_16, %c0_17], %19 {strides = array<i32>} : memref<8x128xf32, #tpu.memory_space<vmem>>, vector<8x128xf32>,
    } else {
    }
    return
  }
  func.func @transform_0(%arg0: i32, %arg1: i32, %arg2: i32) -> (i32, i32) {
    %c0_i32 = arith.constant 0 : i32
    return %arg0, %arg2 : i32, i32
  }
  func.func @transform_1(%arg0: i32, %arg1: i32, %arg2: i32) -> (i32, i32) {
    %c0_i32 = arith.constant 0 : i32
    return %arg2, %arg1 : i32, i32
  }
  func.func @transform_2(%arg0: i32, %arg1: i32, %arg2: i32) -> (i32, i32) {
    %c0_i32 = arith.constant 0 : i32
    %c0_i32_0 = arith.constant 0 : i32
    return %c0_i32, %arg1 : i32, i32
  }
  func.func @transform_3(%arg0: i32, %arg1: i32, %arg2: i32) -> (i32, i32) {
    %c0_i32 = arith.constant 0 : i32
    return %arg0, %arg1 : i32, i32
  }
  func.func @transform_4(%arg0: i32, %arg1: i32, %arg2: i32) -> (i32, i32) {
    %c0_i32 = arith.constant 0 : i32
    return %arg0, %arg1 : i32, i32
  }
}

module attributes {stable_mosaic.version = 11 : i64} {
  func.func @_mm_bn_kernel(%arg0: i32, %arg1: i32, %arg2: i32, %arg3: memref<8x128xbf16, #tpu.memory_space<vmem>>, %arg4: memref<128x128xbf16, #tpu.memory_space<vmem>>, %arg5: memref<1x128xf32, #tpu.memory_space<vmem>>, %arg6: memref<8x128xf32, #tpu.memory_space<vmem>>) attributes {dimension_semantics = [#tpu.dimension_semantics<parallel>, #tpu.dimension_semantics<parallel>, #tpu.dimension_semantics<arbitrary>], iteration_bounds = array<i64: 1, 1, 1>, scalar_prefetch = 0 : i64, scratch_operands = 0 : i64, tpu.core_type = #tpu.core_type<tc>, window_params = [{transform_indices = @transform_0, window_bounds = array<i64: 8, 128>}, {transform_indices = @transform_1, window_bounds = array<i64: 128, 128>}, {transform_indices = @transform_2, window_bounds = array<i64: 1, 128>}, {transform_indices = @transform_3, window_bounds = array<i64: 8, 128>}]} {
    %c0_i32 = arith.constant 0 : i32
    %0 = arith.cmpi eq, %arg2, %c0_i32 : i32
    %1 = arith.extui %0 : i1 to i32
    %c0_i32_0 = arith.constant 0 : i32
    %2 = arith.cmpi ne, %1, %c0_i32_0 : i32
    scf.if %2 {
      %cst_10 = arith.constant 0.000000e+00 : f32
      %12 = vector.broadcast %cst_10 : f32 to vector<8x128xf32>
      %c0_11 = arith.constant 0 : index
      %c0_12 = arith.constant 0 : index
      %13 = vector.load %arg6[%c0_11, %c0_12] : memref<8x128xf32, #tpu.memory_space<vmem>>, vector<8x128xf32>
      tpu.vector_store %arg6[%c0_11, %c0_12], %12 {strides = array<i32>} : memref<8x128xf32, #tpu.memory_space<vmem>>, vector<8x128xf32>,
    } else {
    }
    %c0 = arith.constant 0 : index
    %c0_1 = arith.constant 0 : index
    %3 = vector.load %arg6[%c0, %c0_1] : memref<8x128xf32, #tpu.memory_space<vmem>>, vector<8x128xf32>
    %c0_2 = arith.constant 0 : index
    %c0_3 = arith.constant 0 : index
    %4 = vector.load %arg3[%c0_2, %c0_3] : memref<8x128xbf16, #tpu.memory_space<vmem>>, vector<8x128xbf16>
    %c0_4 = arith.constant 0 : index
    %c0_5 = arith.constant 0 : index
    %5 = vector.load %arg4[%c0_4, %c0_5] : memref<128x128xbf16, #tpu.memory_space<vmem>>, vector<128x128xbf16>
    %cst = arith.constant dense<0.000000e+00> : vector<8x128xf32>
    %6 = tpu.matmul %4, %5, %cst {dimension_numbers = #tpu.dot_dimension_numbers<[1], [0], [0], [1], [0, 0, 1, 1], [], []>} : vector<8x128xbf16>, vector<128x128xbf16>, vector<8x128xf32> -> vector<8x128xf32>
    %7 = arith.addf %3, %6 : vector<8x128xf32>
    %c0_6 = arith.constant 0 : index
    %c0_7 = arith.constant 0 : index
    %8 = vector.load %arg6[%c0_6, %c0_7] : memref<8x128xf32, #tpu.memory_space<vmem>>, vector<8x128xf32>
    tpu.vector_store %arg6[%c0_6, %c0_7], %7 {strides = array<i32>} : memref<8x128xf32, #tpu.memory_space<vmem>>, vector<8x128xf32>,
    %c0_i32_8 = arith.constant 0 : i32
    %9 = arith.cmpi eq, %arg2, %c0_i32_8 : i32
    %10 = arith.extui %9 : i1 to i32
    %c0_i32_9 = arith.constant 0 : i32
    %11 = arith.cmpi ne, %10, %c0_i32_9 : i32
    scf.if %11 {
      %c0_10 = arith.constant 0 : index
      %c0_11 = arith.constant 0 : index
      %12 = vector.load %arg6[%c0_10, %c0_11] : memref<8x128xf32, #tpu.memory_space<vmem>>, vector<8x128xf32>
      %c0_12 = arith.constant 0 : index
      %c0_13 = arith.constant 0 : index
      %13 = vector.load %arg5[%c0_12, %c0_13] : memref<1x128xf32, #tpu.memory_space<vmem>>, vector<1x128xf32>
      %14 = vector.broadcast %13 : vector<1x128xf32> to vector<8x128xf32>
      %15 = arith.addf %12, %14 : vector<8x128xf32>
      %c0_14 = arith.constant 0 : index
      %c0_15 = arith.constant 0 : index
      %16 = vector.load %arg6[%c0_14, %c0_15] : memref<8x128xf32, #tpu.memory_space<vmem>>, vector<8x128xf32>
      tpu.vector_store %arg6[%c0_14, %c0_15], %15 {strides = array<i32>} : memref<8x128xf32, #tpu.memory_space<vmem>>, vector<8x128xf32>,
    } else {
    }
    return
  }
  func.func @transform_0(%arg0: i32, %arg1: i32, %arg2: i32) -> (i32, i32) {
    %c0_i32 = arith.constant 0 : i32
    return %arg0, %arg2 : i32, i32
  }
  func.func @transform_1(%arg0: i32, %arg1: i32, %arg2: i32) -> (i32, i32) {
    %c0_i32 = arith.constant 0 : i32
    return %arg2, %arg1 : i32, i32
  }
  func.func @transform_2(%arg0: i32, %arg1: i32, %arg2: i32) -> (i32, i32) {
    %c0_i32 = arith.constant 0 : i32
    %c0_i32_0 = arith.constant 0 : i32
    return %c0_i32, %arg1 : i32, i32
  }
  func.func @transform_3(%arg0: i32, %arg1: i32, %arg2: i32) -> (i32, i32) {
    %c0_i32 = arith.constant 0 : i32
    return %arg0, %arg1 : i32, i32
  }
}

module attributes {stable_mosaic.version = 11 : i64} {
  func.func @_mm_bn_kernel(%arg0: i32, %arg1: i32, %arg2: i32, %arg3: memref<8x256xbf16, #tpu.memory_space<vmem>>, %arg4: memref<256x256xbf16, #tpu.memory_space<vmem>>, %arg5: memref<1x256xf32, #tpu.memory_space<vmem>>, %arg6: memref<8x256xf32, #tpu.memory_space<vmem>>) attributes {dimension_semantics = [#tpu.dimension_semantics<parallel>, #tpu.dimension_semantics<parallel>, #tpu.dimension_semantics<arbitrary>], iteration_bounds = array<i64: 1, 1, 5>, scalar_prefetch = 0 : i64, scratch_operands = 0 : i64, tpu.core_type = #tpu.core_type<tc>, window_params = [{transform_indices = @transform_0, window_bounds = array<i64: 8, 256>}, {transform_indices = @transform_1, window_bounds = array<i64: 256, 256>}, {transform_indices = @transform_2, window_bounds = array<i64: 1, 256>}, {transform_indices = @transform_3, window_bounds = array<i64: 8, 256>}]} {
    %c0_i32 = arith.constant 0 : i32
    %0 = arith.cmpi eq, %arg2, %c0_i32 : i32
    %1 = arith.extui %0 : i1 to i32
    %c0_i32_0 = arith.constant 0 : i32
    %2 = arith.cmpi ne, %1, %c0_i32_0 : i32
    scf.if %2 {
      %cst_9 = arith.constant 0.000000e+00 : f32
      %12 = vector.broadcast %cst_9 : f32 to vector<8x256xf32>
      %c0_10 = arith.constant 0 : index
      %c0_11 = arith.constant 0 : index
      %13 = vector.load %arg6[%c0_10, %c0_11] : memref<8x256xf32, #tpu.memory_space<vmem>>, vector<8x256xf32>
      tpu.vector_store %arg6[%c0_10, %c0_11], %12 {strides = array<i32>} : memref<8x256xf32, #tpu.memory_space<vmem>>, vector<8x256xf32>,
    } else {
    }
    %c0 = arith.constant 0 : index
    %c0_1 = arith.constant 0 : index
    %3 = vector.load %arg6[%c0, %c0_1] : memref<8x256xf32, #tpu.memory_space<vmem>>, vector<8x256xf32>
    %c0_2 = arith.constant 0 : index
    %c0_3 = arith.constant 0 : index
    %4 = vector.load %arg3[%c0_2, %c0_3] : memref<8x256xbf16, #tpu.memory_space<vmem>>, vector<8x256xbf16>
    %c0_4 = arith.constant 0 : index
    %c0_5 = arith.constant 0 : index
    %5 = vector.load %arg4[%c0_4, %c0_5] : memref<256x256xbf16, #tpu.memory_space<vmem>>, vector<256x256xbf16>
    %cst = arith.constant dense<0.000000e+00> : vector<8x256xf32>
    %6 = tpu.matmul %4, %5, %cst {dimension_numbers = #tpu.dot_dimension_numbers<[1], [0], [0], [1], [0, 0, 1, 1], [], []>} : vector<8x256xbf16>, vector<256x256xbf16>, vector<8x256xf32> -> vector<8x256xf32>
    %7 = arith.addf %3, %6 : vector<8x256xf32>
    %c0_6 = arith.constant 0 : index
    %c0_7 = arith.constant 0 : index
    %8 = vector.load %arg6[%c0_6, %c0_7] : memref<8x256xf32, #tpu.memory_space<vmem>>, vector<8x256xf32>
    tpu.vector_store %arg6[%c0_6, %c0_7], %7 {strides = array<i32>} : memref<8x256xf32, #tpu.memory_space<vmem>>, vector<8x256xf32>,
    %c4_i32 = arith.constant 4 : i32
    %9 = arith.cmpi eq, %arg2, %c4_i32 : i32
    %10 = arith.extui %9 : i1 to i32
    %c0_i32_8 = arith.constant 0 : i32
    %11 = arith.cmpi ne, %10, %c0_i32_8 : i32
    scf.if %11 {
      %c0_9 = arith.constant 0 : index
      %c0_10 = arith.constant 0 : index
      %12 = vector.load %arg6[%c0_9, %c0_10] : memref<8x256xf32, #tpu.memory_space<vmem>>, vector<8x256xf32>
      %c0_11 = arith.constant 0 : index
      %c0_12 = arith.constant 0 : index
      %13 = vector.load %arg5[%c0_11, %c0_12] : memref<1x256xf32, #tpu.memory_space<vmem>>, vector<1x256xf32>
      %14 = vector.broadcast %13 : vector<1x256xf32> to vector<8x256xf32>
      %15 = arith.addf %12, %14 : vector<8x256xf32>
      %cst_13 = arith.constant 0.000000e+00 : f32
      %16 = vector.broadcast %cst_13 : f32 to vector<8x256xf32>
      %17 = arith.maximumf %15, %16 : vector<8x256xf32>
      %c0_14 = arith.constant 0 : index
      %c0_15 = arith.constant 0 : index
      %18 = vector.load %arg6[%c0_14, %c0_15] : memref<8x256xf32, #tpu.memory_space<vmem>>, vector<8x256xf32>
      tpu.vector_store %arg6[%c0_14, %c0_15], %17 {strides = array<i32>} : memref<8x256xf32, #tpu.memory_space<vmem>>, vector<8x256xf32>,
    } else {
    }
    return
  }
  func.func @transform_0(%arg0: i32, %arg1: i32, %arg2: i32) -> (i32, i32) {
    %c0_i32 = arith.constant 0 : i32
    return %arg0, %arg2 : i32, i32
  }
  func.func @transform_1(%arg0: i32, %arg1: i32, %arg2: i32) -> (i32, i32) {
    %c0_i32 = arith.constant 0 : i32
    return %arg2, %arg1 : i32, i32
  }
  func.func @transform_2(%arg0: i32, %arg1: i32, %arg2: i32) -> (i32, i32) {
    %c0_i32 = arith.constant 0 : i32
    %c0_i32_0 = arith.constant 0 : i32
    return %c0_i32, %arg1 : i32, i32
  }
  func.func @transform_3(%arg0: i32, %arg1: i32, %arg2: i32) -> (i32, i32) {
    %c0_i32 = arith.constant 0 : i32
    return %arg0, %arg1 : i32, i32
  }
}

module attributes {stable_mosaic.version = 11 : i64} {
  func.func @_mm_bn_kernel(%arg0: i32, %arg1: i32, %arg2: i32, %arg3: memref<8x128xbf16, #tpu.memory_space<vmem>>, %arg4: memref<128x256xbf16, #tpu.memory_space<vmem>>, %arg5: memref<1x256xf32, #tpu.memory_space<vmem>>, %arg6: memref<8x256xf32, #tpu.memory_space<vmem>>) attributes {dimension_semantics = [#tpu.dimension_semantics<parallel>, #tpu.dimension_semantics<parallel>, #tpu.dimension_semantics<arbitrary>], iteration_bounds = array<i64: 1, 1, 1>, scalar_prefetch = 0 : i64, scratch_operands = 0 : i64, tpu.core_type = #tpu.core_type<tc>, window_params = [{transform_indices = @transform_0, window_bounds = array<i64: 8, 128>}, {transform_indices = @transform_1, window_bounds = array<i64: 128, 256>}, {transform_indices = @transform_2, window_bounds = array<i64: 1, 256>}, {transform_indices = @transform_3, window_bounds = array<i64: 8, 256>}]} {
    %c0_i32 = arith.constant 0 : i32
    %0 = arith.cmpi eq, %arg2, %c0_i32 : i32
    %1 = arith.extui %0 : i1 to i32
    %c0_i32_0 = arith.constant 0 : i32
    %2 = arith.cmpi ne, %1, %c0_i32_0 : i32
    scf.if %2 {
      %cst_10 = arith.constant 0.000000e+00 : f32
      %12 = vector.broadcast %cst_10 : f32 to vector<8x256xf32>
      %c0_11 = arith.constant 0 : index
      %c0_12 = arith.constant 0 : index
      %13 = vector.load %arg6[%c0_11, %c0_12] : memref<8x256xf32, #tpu.memory_space<vmem>>, vector<8x256xf32>
      tpu.vector_store %arg6[%c0_11, %c0_12], %12 {strides = array<i32>} : memref<8x256xf32, #tpu.memory_space<vmem>>, vector<8x256xf32>,
    } else {
    }
    %c0 = arith.constant 0 : index
    %c0_1 = arith.constant 0 : index
    %3 = vector.load %arg6[%c0, %c0_1] : memref<8x256xf32, #tpu.memory_space<vmem>>, vector<8x256xf32>
    %c0_2 = arith.constant 0 : index
    %c0_3 = arith.constant 0 : index
    %4 = vector.load %arg3[%c0_2, %c0_3] : memref<8x128xbf16, #tpu.memory_space<vmem>>, vector<8x128xbf16>
    %c0_4 = arith.constant 0 : index
    %c0_5 = arith.constant 0 : index
    %5 = vector.load %arg4[%c0_4, %c0_5] : memref<128x256xbf16, #tpu.memory_space<vmem>>, vector<128x256xbf16>
    %cst = arith.constant dense<0.000000e+00> : vector<8x256xf32>
    %6 = tpu.matmul %4, %5, %cst {dimension_numbers = #tpu.dot_dimension_numbers<[1], [0], [0], [1], [0, 0, 1, 1], [], []>} : vector<8x128xbf16>, vector<128x256xbf16>, vector<8x256xf32> -> vector<8x256xf32>
    %7 = arith.addf %3, %6 : vector<8x256xf32>
    %c0_6 = arith.constant 0 : index
    %c0_7 = arith.constant 0 : index
    %8 = vector.load %arg6[%c0_6, %c0_7] : memref<8x256xf32, #tpu.memory_space<vmem>>, vector<8x256xf32>
    tpu.vector_store %arg6[%c0_6, %c0_7], %7 {strides = array<i32>} : memref<8x256xf32, #tpu.memory_space<vmem>>, vector<8x256xf32>,
    %c0_i32_8 = arith.constant 0 : i32
    %9 = arith.cmpi eq, %arg2, %c0_i32_8 : i32
    %10 = arith.extui %9 : i1 to i32
    %c0_i32_9 = arith.constant 0 : i32
    %11 = arith.cmpi ne, %10, %c0_i32_9 : i32
    scf.if %11 {
      %c0_10 = arith.constant 0 : index
      %c0_11 = arith.constant 0 : index
      %12 = vector.load %arg6[%c0_10, %c0_11] : memref<8x256xf32, #tpu.memory_space<vmem>>, vector<8x256xf32>
      %c0_12 = arith.constant 0 : index
      %c0_13 = arith.constant 0 : index
      %13 = vector.load %arg5[%c0_12, %c0_13] : memref<1x256xf32, #tpu.memory_space<vmem>>, vector<1x256xf32>
      %14 = vector.broadcast %13 : vector<1x256xf32> to vector<8x256xf32>
      %15 = arith.addf %12, %14 : vector<8x256xf32>
      %c0_14 = arith.constant 0 : index
      %c0_15 = arith.constant 0 : index
      %16 = vector.load %arg6[%c0_14, %c0_15] : memref<8x256xf32, #tpu.memory_space<vmem>>, vector<8x256xf32>
      tpu.vector_store %arg6[%c0_14, %c0_15], %15 {strides = array<i32>} : memref<8x256xf32, #tpu.memory_space<vmem>>, vector<8x256xf32>,
    } else {
    }
    return
  }
  func.func @transform_0(%arg0: i32, %arg1: i32, %arg2: i32) -> (i32, i32) {
    %c0_i32 = arith.constant 0 : i32
    return %arg0, %arg2 : i32, i32
  }
  func.func @transform_1(%arg0: i32, %arg1: i32, %arg2: i32) -> (i32, i32) {
    %c0_i32 = arith.constant 0 : i32
    return %arg2, %arg1 : i32, i32
  }
  func.func @transform_2(%arg0: i32, %arg1: i32, %arg2: i32) -> (i32, i32) {
    %c0_i32 = arith.constant 0 : i32
    %c0_i32_0 = arith.constant 0 : i32
    return %c0_i32, %arg1 : i32, i32
  }
  func.func @transform_3(%arg0: i32, %arg1: i32, %arg2: i32) -> (i32, i32) {
    %c0_i32 = arith.constant 0 : i32
    return %arg0, %arg1 : i32, i32
  }
}

module attributes {stable_mosaic.version = 11 : i64} {
  func.func @_mm_bn_kernel(%arg0: i32, %arg1: i32, %arg2: i32, %arg3: memref<8x256xbf16, #tpu.memory_space<vmem>>, %arg4: memref<256x256xbf16, #tpu.memory_space<vmem>>, %arg5: memref<1x256xf32, #tpu.memory_space<vmem>>, %arg6: memref<8x256xf32, #tpu.memory_space<vmem>>, %arg7: memref<8x256xf32, #tpu.memory_space<vmem>>) attributes {dimension_semantics = [#tpu.dimension_semantics<parallel>, #tpu.dimension_semantics<parallel>, #tpu.dimension_semantics<arbitrary>], iteration_bounds = array<i64: 1, 1, 9>, scalar_prefetch = 0 : i64, scratch_operands = 0 : i64, tpu.core_type = #tpu.core_type<tc>, window_params = [{transform_indices = @transform_0, window_bounds = array<i64: 8, 256>}, {transform_indices = @transform_1, window_bounds = array<i64: 256, 256>}, {transform_indices = @transform_2, window_bounds = array<i64: 1, 256>}, {transform_indices = @transform_3, window_bounds = array<i64: 8, 256>}, {transform_indices = @transform_4, window_bounds = array<i64: 8, 256>}]} {
    %c0_i32 = arith.constant 0 : i32
    %0 = arith.cmpi eq, %arg2, %c0_i32 : i32
    %1 = arith.extui %0 : i1 to i32
    %c0_i32_0 = arith.constant 0 : i32
    %2 = arith.cmpi ne, %1, %c0_i32_0 : i32
    scf.if %2 {
      %cst_9 = arith.constant 0.000000e+00 : f32
      %12 = vector.broadcast %cst_9 : f32 to vector<8x256xf32>
      %c0_10 = arith.constant 0 : index
      %c0_11 = arith.constant 0 : index
      %13 = vector.load %arg7[%c0_10, %c0_11] : memref<8x256xf32, #tpu.memory_space<vmem>>, vector<8x256xf32>
      tpu.vector_store %arg7[%c0_10, %c0_11], %12 {strides = array<i32>} : memref<8x256xf32, #tpu.memory_space<vmem>>, vector<8x256xf32>,
    } else {
    }
    %c0 = arith.constant 0 : index
    %c0_1 = arith.constant 0 : index
    %3 = vector.load %arg7[%c0, %c0_1] : memref<8x256xf32, #tpu.memory_space<vmem>>, vector<8x256xf32>
    %c0_2 = arith.constant 0 : index
    %c0_3 = arith.constant 0 : index
    %4 = vector.load %arg3[%c0_2, %c0_3] : memref<8x256xbf16, #tpu.memory_space<vmem>>, vector<8x256xbf16>
    %c0_4 = arith.constant 0 : index
    %c0_5 = arith.constant 0 : index
    %5 = vector.load %arg4[%c0_4, %c0_5] : memref<256x256xbf16, #tpu.memory_space<vmem>>, vector<256x256xbf16>
    %cst = arith.constant dense<0.000000e+00> : vector<8x256xf32>
    %6 = tpu.matmul %4, %5, %cst {dimension_numbers = #tpu.dot_dimension_numbers<[1], [0], [0], [1], [0, 0, 1, 1], [], []>} : vector<8x256xbf16>, vector<256x256xbf16>, vector<8x256xf32> -> vector<8x256xf32>
    %7 = arith.addf %3, %6 : vector<8x256xf32>
    %c0_6 = arith.constant 0 : index
    %c0_7 = arith.constant 0 : index
    %8 = vector.load %arg7[%c0_6, %c0_7] : memref<8x256xf32, #tpu.memory_space<vmem>>, vector<8x256xf32>
    tpu.vector_store %arg7[%c0_6, %c0_7], %7 {strides = array<i32>} : memref<8x256xf32, #tpu.memory_space<vmem>>, vector<8x256xf32>,
    %c8_i32 = arith.constant 8 : i32
    %9 = arith.cmpi eq, %arg2, %c8_i32 : i32
    %10 = arith.extui %9 : i1 to i32
    %c0_i32_8 = arith.constant 0 : i32
    %11 = arith.cmpi ne, %10, %c0_i32_8 : i32
    scf.if %11 {
      %c0_9 = arith.constant 0 : index
      %c0_10 = arith.constant 0 : index
      %12 = vector.load %arg7[%c0_9, %c0_10] : memref<8x256xf32, #tpu.memory_space<vmem>>, vector<8x256xf32>
      %c0_11 = arith.constant 0 : index
      %c0_12 = arith.constant 0 : index
      %13 = vector.load %arg5[%c0_11, %c0_12] : memref<1x256xf32, #tpu.memory_space<vmem>>, vector<1x256xf32>
      %14 = vector.broadcast %13 : vector<1x256xf32> to vector<8x256xf32>
      %15 = arith.addf %12, %14 : vector<8x256xf32>
      %c0_13 = arith.constant 0 : index
      %c0_14 = arith.constant 0 : index
      %16 = vector.load %arg6[%c0_13, %c0_14] : memref<8x256xf32, #tpu.memory_space<vmem>>, vector<8x256xf32>
      %17 = arith.addf %15, %16 : vector<8x256xf32>
      %cst_15 = arith.constant 0.000000e+00 : f32
      %18 = vector.broadcast %cst_15 : f32 to vector<8x256xf32>
      %19 = arith.maximumf %17, %18 : vector<8x256xf32>
      %c0_16 = arith.constant 0 : index
      %c0_17 = arith.constant 0 : index
      %20 = vector.load %arg7[%c0_16, %c0_17] : memref<8x256xf32, #tpu.memory_space<vmem>>, vector<8x256xf32>
      tpu.vector_store %arg7[%c0_16, %c0_17], %19 {strides = array<i32>} : memref<8x256xf32, #tpu.memory_space<vmem>>, vector<8x256xf32>,
    } else {
    }
    return
  }
  func.func @transform_0(%arg0: i32, %arg1: i32, %arg2: i32) -> (i32, i32) {
    %c0_i32 = arith.constant 0 : i32
    return %arg0, %arg2 : i32, i32
  }
  func.func @transform_1(%arg0: i32, %arg1: i32, %arg2: i32) -> (i32, i32) {
    %c0_i32 = arith.constant 0 : i32
    return %arg2, %arg1 : i32, i32
  }
  func.func @transform_2(%arg0: i32, %arg1: i32, %arg2: i32) -> (i32, i32) {
    %c0_i32 = arith.constant 0 : i32
    %c0_i32_0 = arith.constant 0 : i32
    return %c0_i32, %arg1 : i32, i32
  }
  func.func @transform_3(%arg0: i32, %arg1: i32, %arg2: i32) -> (i32, i32) {
    %c0_i32 = arith.constant 0 : i32
    return %arg0, %arg1 : i32, i32
  }
  func.func @transform_4(%arg0: i32, %arg1: i32, %arg2: i32) -> (i32, i32) {
    %c0_i32 = arith.constant 0 : i32
    return %arg0, %arg1 : i32, i32
  }
}

module attributes {stable_mosaic.version = 11 : i64} {
  func.func @_mm_bn_kernel(%arg0: i32, %arg1: i32, %arg2: i32, %arg3: memref<8x256xbf16, #tpu.memory_space<vmem>>, %arg4: memref<256x256xbf16, #tpu.memory_space<vmem>>, %arg5: memref<1x256xf32, #tpu.memory_space<vmem>>, %arg6: memref<8x256xf32, #tpu.memory_space<vmem>>) attributes {dimension_semantics = [#tpu.dimension_semantics<parallel>, #tpu.dimension_semantics<parallel>, #tpu.dimension_semantics<arbitrary>], iteration_bounds = array<i64: 1, 1, 9>, scalar_prefetch = 0 : i64, scratch_operands = 0 : i64, tpu.core_type = #tpu.core_type<tc>, window_params = [{transform_indices = @transform_0, window_bounds = array<i64: 8, 256>}, {transform_indices = @transform_1, window_bounds = array<i64: 256, 256>}, {transform_indices = @transform_2, window_bounds = array<i64: 1, 256>}, {transform_indices = @transform_3, window_bounds = array<i64: 8, 256>}]} {
    %c0_i32 = arith.constant 0 : i32
    %0 = arith.cmpi eq, %arg2, %c0_i32 : i32
    %1 = arith.extui %0 : i1 to i32
    %c0_i32_0 = arith.constant 0 : i32
    %2 = arith.cmpi ne, %1, %c0_i32_0 : i32
    scf.if %2 {
      %cst_9 = arith.constant 0.000000e+00 : f32
      %12 = vector.broadcast %cst_9 : f32 to vector<8x256xf32>
      %c0_10 = arith.constant 0 : index
      %c0_11 = arith.constant 0 : index
      %13 = vector.load %arg6[%c0_10, %c0_11] : memref<8x256xf32, #tpu.memory_space<vmem>>, vector<8x256xf32>
      tpu.vector_store %arg6[%c0_10, %c0_11], %12 {strides = array<i32>} : memref<8x256xf32, #tpu.memory_space<vmem>>, vector<8x256xf32>,
    } else {
    }
    %c0 = arith.constant 0 : index
    %c0_1 = arith.constant 0 : index
    %3 = vector.load %arg6[%c0, %c0_1] : memref<8x256xf32, #tpu.memory_space<vmem>>, vector<8x256xf32>
    %c0_2 = arith.constant 0 : index
    %c0_3 = arith.constant 0 : index
    %4 = vector.load %arg3[%c0_2, %c0_3] : memref<8x256xbf16, #tpu.memory_space<vmem>>, vector<8x256xbf16>
    %c0_4 = arith.constant 0 : index
    %c0_5 = arith.constant 0 : index
    %5 = vector.load %arg4[%c0_4, %c0_5] : memref<256x256xbf16, #tpu.memory_space<vmem>>, vector<256x256xbf16>
    %cst = arith.constant dense<0.000000e+00> : vector<8x256xf32>
    %6 = tpu.matmul %4, %5, %cst {dimension_numbers = #tpu.dot_dimension_numbers<[1], [0], [0], [1], [0, 0, 1, 1], [], []>} : vector<8x256xbf16>, vector<256x256xbf16>, vector<8x256xf32> -> vector<8x256xf32>
    %7 = arith.addf %3, %6 : vector<8x256xf32>
    %c0_6 = arith.constant 0 : index
    %c0_7 = arith.constant 0 : index
    %8 = vector.load %arg6[%c0_6, %c0_7] : memref<8x256xf32, #tpu.memory_space<vmem>>, vector<8x256xf32>
    tpu.vector_store %arg6[%c0_6, %c0_7], %7 {strides = array<i32>} : memref<8x256xf32, #tpu.memory_space<vmem>>, vector<8x256xf32>,
    %c8_i32 = arith.constant 8 : i32
    %9 = arith.cmpi eq, %arg2, %c8_i32 : i32
    %10 = arith.extui %9 : i1 to i32
    %c0_i32_8 = arith.constant 0 : i32
    %11 = arith.cmpi ne, %10, %c0_i32_8 : i32
    scf.if %11 {
      %c0_9 = arith.constant 0 : index
      %c0_10 = arith.constant 0 : index
      %12 = vector.load %arg6[%c0_9, %c0_10] : memref<8x256xf32, #tpu.memory_space<vmem>>, vector<8x256xf32>
      %c0_11 = arith.constant 0 : index
      %c0_12 = arith.constant 0 : index
      %13 = vector.load %arg5[%c0_11, %c0_12] : memref<1x256xf32, #tpu.memory_space<vmem>>, vector<1x256xf32>
      %14 = vector.broadcast %13 : vector<1x256xf32> to vector<8x256xf32>
      %15 = arith.addf %12, %14 : vector<8x256xf32>
      %cst_13 = arith.constant 0.000000e+00 : f32
      %16 = vector.broadcast %cst_13 : f32 to vector<8x256xf32>
      %17 = arith.maximumf %15, %16 : vector<8x256xf32>
      %c0_14 = arith.constant 0 : index
      %c0_15 = arith.constant 0 : index
      %18 = vector.load %arg6[%c0_14, %c0_15] : memref<8x256xf32, #tpu.memory_space<vmem>>, vector<8x256xf32>
      tpu.vector_store %arg6[%c0_14, %c0_15], %17 {strides = array<i32>} : memref<8x256xf32, #tpu.memory_space<vmem>>, vector<8x256xf32>,
    } else {
    }
    return
  }
  func.func @transform_0(%arg0: i32, %arg1: i32, %arg2: i32) -> (i32, i32) {
    %c0_i32 = arith.constant 0 : i32
    return %arg0, %arg2 : i32, i32
  }
  func.func @transform_1(%arg0: i32, %arg1: i32, %arg2: i32) -> (i32, i32) {
    %c0_i32 = arith.constant 0 : i32
    return %arg2, %arg1 : i32, i32
  }
  func.func @transform_2(%arg0: i32, %arg1: i32, %arg2: i32) -> (i32, i32) {
    %c0_i32 = arith.constant 0 : i32
    %c0_i32_0 = arith.constant 0 : i32
    return %c0_i32, %arg1 : i32, i32
  }
  func.func @transform_3(%arg0: i32, %arg1: i32, %arg2: i32) -> (i32, i32) {
    %c0_i32 = arith.constant 0 : i32
    return %arg0, %arg1 : i32, i32
  }
}

module attributes {stable_mosaic.version = 11 : i64} {
  func.func @_mm_bn_kernel(%arg0: i32, %arg1: i32, %arg2: i32, %arg3: memref<8x256xbf16, #tpu.memory_space<vmem>>, %arg4: memref<256x256xbf16, #tpu.memory_space<vmem>>, %arg5: memref<1x256xf32, #tpu.memory_space<vmem>>, %arg6: memref<8x256xf32, #tpu.memory_space<vmem>>) attributes {dimension_semantics = [#tpu.dimension_semantics<parallel>, #tpu.dimension_semantics<parallel>, #tpu.dimension_semantics<arbitrary>], iteration_bounds = array<i64: 1, 1, 1>, scalar_prefetch = 0 : i64, scratch_operands = 0 : i64, tpu.core_type = #tpu.core_type<tc>, window_params = [{transform_indices = @transform_0, window_bounds = array<i64: 8, 256>}, {transform_indices = @transform_1, window_bounds = array<i64: 256, 256>}, {transform_indices = @transform_2, window_bounds = array<i64: 1, 256>}, {transform_indices = @transform_3, window_bounds = array<i64: 8, 256>}]} {
    %c0_i32 = arith.constant 0 : i32
    %0 = arith.cmpi eq, %arg2, %c0_i32 : i32
    %1 = arith.extui %0 : i1 to i32
    %c0_i32_0 = arith.constant 0 : i32
    %2 = arith.cmpi ne, %1, %c0_i32_0 : i32
    scf.if %2 {
      %cst_10 = arith.constant 0.000000e+00 : f32
      %12 = vector.broadcast %cst_10 : f32 to vector<8x256xf32>
      %c0_11 = arith.constant 0 : index
      %c0_12 = arith.constant 0 : index
      %13 = vector.load %arg6[%c0_11, %c0_12] : memref<8x256xf32, #tpu.memory_space<vmem>>, vector<8x256xf32>
      tpu.vector_store %arg6[%c0_11, %c0_12], %12 {strides = array<i32>} : memref<8x256xf32, #tpu.memory_space<vmem>>, vector<8x256xf32>,
    } else {
    }
    %c0 = arith.constant 0 : index
    %c0_1 = arith.constant 0 : index
    %3 = vector.load %arg6[%c0, %c0_1] : memref<8x256xf32, #tpu.memory_space<vmem>>, vector<8x256xf32>
    %c0_2 = arith.constant 0 : index
    %c0_3 = arith.constant 0 : index
    %4 = vector.load %arg3[%c0_2, %c0_3] : memref<8x256xbf16, #tpu.memory_space<vmem>>, vector<8x256xbf16>
    %c0_4 = arith.constant 0 : index
    %c0_5 = arith.constant 0 : index
    %5 = vector.load %arg4[%c0_4, %c0_5] : memref<256x256xbf16, #tpu.memory_space<vmem>>, vector<256x256xbf16>
    %cst = arith.constant dense<0.000000e+00> : vector<8x256xf32>
    %6 = tpu.matmul %4, %5, %cst {dimension_numbers = #tpu.dot_dimension_numbers<[1], [0], [0], [1], [0, 0, 1, 1], [], []>} : vector<8x256xbf16>, vector<256x256xbf16>, vector<8x256xf32> -> vector<8x256xf32>
    %7 = arith.addf %3, %6 : vector<8x256xf32>
    %c0_6 = arith.constant 0 : index
    %c0_7 = arith.constant 0 : index
    %8 = vector.load %arg6[%c0_6, %c0_7] : memref<8x256xf32, #tpu.memory_space<vmem>>, vector<8x256xf32>
    tpu.vector_store %arg6[%c0_6, %c0_7], %7 {strides = array<i32>} : memref<8x256xf32, #tpu.memory_space<vmem>>, vector<8x256xf32>,
    %c0_i32_8 = arith.constant 0 : i32
    %9 = arith.cmpi eq, %arg2, %c0_i32_8 : i32
    %10 = arith.extui %9 : i1 to i32
    %c0_i32_9 = arith.constant 0 : i32
    %11 = arith.cmpi ne, %10, %c0_i32_9 : i32
    scf.if %11 {
      %c0_10 = arith.constant 0 : index
      %c0_11 = arith.constant 0 : index
      %12 = vector.load %arg6[%c0_10, %c0_11] : memref<8x256xf32, #tpu.memory_space<vmem>>, vector<8x256xf32>
      %c0_12 = arith.constant 0 : index
      %c0_13 = arith.constant 0 : index
      %13 = vector.load %arg5[%c0_12, %c0_13] : memref<1x256xf32, #tpu.memory_space<vmem>>, vector<1x256xf32>
      %14 = vector.broadcast %13 : vector<1x256xf32> to vector<8x256xf32>
      %15 = arith.addf %12, %14 : vector<8x256xf32>
      %c0_14 = arith.constant 0 : index
      %c0_15 = arith.constant 0 : index
      %16 = vector.load %arg6[%c0_14, %c0_15] : memref<8x256xf32, #tpu.memory_space<vmem>>, vector<8x256xf32>
      tpu.vector_store %arg6[%c0_14, %c0_15], %15 {strides = array<i32>} : memref<8x256xf32, #tpu.memory_space<vmem>>, vector<8x256xf32>,
    } else {
    }
    return
  }
  func.func @transform_0(%arg0: i32, %arg1: i32, %arg2: i32) -> (i32, i32) {
    %c0_i32 = arith.constant 0 : i32
    return %arg0, %arg2 : i32, i32
  }
  func.func @transform_1(%arg0: i32, %arg1: i32, %arg2: i32) -> (i32, i32) {
    %c0_i32 = arith.constant 0 : i32
    return %arg2, %arg1 : i32, i32
  }
  func.func @transform_2(%arg0: i32, %arg1: i32, %arg2: i32) -> (i32, i32) {
    %c0_i32 = arith.constant 0 : i32
    %c0_i32_0 = arith.constant 0 : i32
    return %c0_i32, %arg1 : i32, i32
  }
  func.func @transform_3(%arg0: i32, %arg1: i32, %arg2: i32) -> (i32, i32) {
    %c0_i32 = arith.constant 0 : i32
    return %arg0, %arg1 : i32, i32
  }
}

module attributes {stable_mosaic.version = 11 : i64} {
  func.func @_mm_bn_kernel(%arg0: i32, %arg1: i32, %arg2: i32, %arg3: memref<8x256xbf16, #tpu.memory_space<vmem>>, %arg4: memref<256x256xbf16, #tpu.memory_space<vmem>>, %arg5: memref<1x256xf32, #tpu.memory_space<vmem>>, %arg6: memref<8x256xf32, #tpu.memory_space<vmem>>) attributes {dimension_semantics = [#tpu.dimension_semantics<parallel>, #tpu.dimension_semantics<parallel>, #tpu.dimension_semantics<arbitrary>], iteration_bounds = array<i64: 1, 2, 9>, scalar_prefetch = 0 : i64, scratch_operands = 0 : i64, tpu.core_type = #tpu.core_type<tc>, window_params = [{transform_indices = @transform_0, window_bounds = array<i64: 8, 256>}, {transform_indices = @transform_1, window_bounds = array<i64: 256, 256>}, {transform_indices = @transform_2, window_bounds = array<i64: 1, 256>}, {transform_indices = @transform_3, window_bounds = array<i64: 8, 256>}]} {
    %c0_i32 = arith.constant 0 : i32
    %0 = arith.cmpi eq, %arg2, %c0_i32 : i32
    %1 = arith.extui %0 : i1 to i32
    %c0_i32_0 = arith.constant 0 : i32
    %2 = arith.cmpi ne, %1, %c0_i32_0 : i32
    scf.if %2 {
      %cst_9 = arith.constant 0.000000e+00 : f32
      %12 = vector.broadcast %cst_9 : f32 to vector<8x256xf32>
      %c0_10 = arith.constant 0 : index
      %c0_11 = arith.constant 0 : index
      %13 = vector.load %arg6[%c0_10, %c0_11] : memref<8x256xf32, #tpu.memory_space<vmem>>, vector<8x256xf32>
      tpu.vector_store %arg6[%c0_10, %c0_11], %12 {strides = array<i32>} : memref<8x256xf32, #tpu.memory_space<vmem>>, vector<8x256xf32>,
    } else {
    }
    %c0 = arith.constant 0 : index
    %c0_1 = arith.constant 0 : index
    %3 = vector.load %arg6[%c0, %c0_1] : memref<8x256xf32, #tpu.memory_space<vmem>>, vector<8x256xf32>
    %c0_2 = arith.constant 0 : index
    %c0_3 = arith.constant 0 : index
    %4 = vector.load %arg3[%c0_2, %c0_3] : memref<8x256xbf16, #tpu.memory_space<vmem>>, vector<8x256xbf16>
    %c0_4 = arith.constant 0 : index
    %c0_5 = arith.constant 0 : index
    %5 = vector.load %arg4[%c0_4, %c0_5] : memref<256x256xbf16, #tpu.memory_space<vmem>>, vector<256x256xbf16>
    %cst = arith.constant dense<0.000000e+00> : vector<8x256xf32>
    %6 = tpu.matmul %4, %5, %cst {dimension_numbers = #tpu.dot_dimension_numbers<[1], [0], [0], [1], [0, 0, 1, 1], [], []>} : vector<8x256xbf16>, vector<256x256xbf16>, vector<8x256xf32> -> vector<8x256xf32>
    %7 = arith.addf %3, %6 : vector<8x256xf32>
    %c0_6 = arith.constant 0 : index
    %c0_7 = arith.constant 0 : index
    %8 = vector.load %arg6[%c0_6, %c0_7] : memref<8x256xf32, #tpu.memory_space<vmem>>, vector<8x256xf32>
    tpu.vector_store %arg6[%c0_6, %c0_7], %7 {strides = array<i32>} : memref<8x256xf32, #tpu.memory_space<vmem>>, vector<8x256xf32>,
    %c8_i32 = arith.constant 8 : i32
    %9 = arith.cmpi eq, %arg2, %c8_i32 : i32
    %10 = arith.extui %9 : i1 to i32
    %c0_i32_8 = arith.constant 0 : i32
    %11 = arith.cmpi ne, %10, %c0_i32_8 : i32
    scf.if %11 {
      %c0_9 = arith.constant 0 : index
      %c0_10 = arith.constant 0 : index
      %12 = vector.load %arg6[%c0_9, %c0_10] : memref<8x256xf32, #tpu.memory_space<vmem>>, vector<8x256xf32>
      %c0_11 = arith.constant 0 : index
      %c0_12 = arith.constant 0 : index
      %13 = vector.load %arg5[%c0_11, %c0_12] : memref<1x256xf32, #tpu.memory_space<vmem>>, vector<1x256xf32>
      %14 = vector.broadcast %13 : vector<1x256xf32> to vector<8x256xf32>
      %15 = arith.addf %12, %14 : vector<8x256xf32>
      %cst_13 = arith.constant 0.000000e+00 : f32
      %16 = vector.broadcast %cst_13 : f32 to vector<8x256xf32>
      %17 = arith.maximumf %15, %16 : vector<8x256xf32>
      %c0_14 = arith.constant 0 : index
      %c0_15 = arith.constant 0 : index
      %18 = vector.load %arg6[%c0_14, %c0_15] : memref<8x256xf32, #tpu.memory_space<vmem>>, vector<8x256xf32>
      tpu.vector_store %arg6[%c0_14, %c0_15], %17 {strides = array<i32>} : memref<8x256xf32, #tpu.memory_space<vmem>>, vector<8x256xf32>,
    } else {
    }
    return
  }
  func.func @transform_0(%arg0: i32, %arg1: i32, %arg2: i32) -> (i32, i32) {
    %c0_i32 = arith.constant 0 : i32
    return %arg0, %arg2 : i32, i32
  }
  func.func @transform_1(%arg0: i32, %arg1: i32, %arg2: i32) -> (i32, i32) {
    %c0_i32 = arith.constant 0 : i32
    return %arg2, %arg1 : i32, i32
  }
  func.func @transform_2(%arg0: i32, %arg1: i32, %arg2: i32) -> (i32, i32) {
    %c0_i32 = arith.constant 0 : i32
    %c0_i32_0 = arith.constant 0 : i32
    return %c0_i32, %arg1 : i32, i32
  }
  func.func @transform_3(%arg0: i32, %arg1: i32, %arg2: i32) -> (i32, i32) {
    %c0_i32 = arith.constant 0 : i32
    return %arg0, %arg1 : i32, i32
  }
}

module attributes {stable_mosaic.version = 11 : i64} {
  func.func @_mm_bn_kernel(%arg0: i32, %arg1: i32, %arg2: i32, %arg3: memref<8x256xbf16, #tpu.memory_space<vmem>>, %arg4: memref<256x256xbf16, #tpu.memory_space<vmem>>, %arg5: memref<1x256xf32, #tpu.memory_space<vmem>>, %arg6: memref<8x256xf32, #tpu.memory_space<vmem>>) attributes {dimension_semantics = [#tpu.dimension_semantics<parallel>, #tpu.dimension_semantics<parallel>, #tpu.dimension_semantics<arbitrary>], iteration_bounds = array<i64: 1, 2, 1>, scalar_prefetch = 0 : i64, scratch_operands = 0 : i64, tpu.core_type = #tpu.core_type<tc>, window_params = [{transform_indices = @transform_0, window_bounds = array<i64: 8, 256>}, {transform_indices = @transform_1, window_bounds = array<i64: 256, 256>}, {transform_indices = @transform_2, window_bounds = array<i64: 1, 256>}, {transform_indices = @transform_3, window_bounds = array<i64: 8, 256>}]} {
    %c0_i32 = arith.constant 0 : i32
    %0 = arith.cmpi eq, %arg2, %c0_i32 : i32
    %1 = arith.extui %0 : i1 to i32
    %c0_i32_0 = arith.constant 0 : i32
    %2 = arith.cmpi ne, %1, %c0_i32_0 : i32
    scf.if %2 {
      %cst_10 = arith.constant 0.000000e+00 : f32
      %12 = vector.broadcast %cst_10 : f32 to vector<8x256xf32>
      %c0_11 = arith.constant 0 : index
      %c0_12 = arith.constant 0 : index
      %13 = vector.load %arg6[%c0_11, %c0_12] : memref<8x256xf32, #tpu.memory_space<vmem>>, vector<8x256xf32>
      tpu.vector_store %arg6[%c0_11, %c0_12], %12 {strides = array<i32>} : memref<8x256xf32, #tpu.memory_space<vmem>>, vector<8x256xf32>,
    } else {
    }
    %c0 = arith.constant 0 : index
    %c0_1 = arith.constant 0 : index
    %3 = vector.load %arg6[%c0, %c0_1] : memref<8x256xf32, #tpu.memory_space<vmem>>, vector<8x256xf32>
    %c0_2 = arith.constant 0 : index
    %c0_3 = arith.constant 0 : index
    %4 = vector.load %arg3[%c0_2, %c0_3] : memref<8x256xbf16, #tpu.memory_space<vmem>>, vector<8x256xbf16>
    %c0_4 = arith.constant 0 : index
    %c0_5 = arith.constant 0 : index
    %5 = vector.load %arg4[%c0_4, %c0_5] : memref<256x256xbf16, #tpu.memory_space<vmem>>, vector<256x256xbf16>
    %cst = arith.constant dense<0.000000e+00> : vector<8x256xf32>
    %6 = tpu.matmul %4, %5, %cst {dimension_numbers = #tpu.dot_dimension_numbers<[1], [0], [0], [1], [0, 0, 1, 1], [], []>} : vector<8x256xbf16>, vector<256x256xbf16>, vector<8x256xf32> -> vector<8x256xf32>
    %7 = arith.addf %3, %6 : vector<8x256xf32>
    %c0_6 = arith.constant 0 : index
    %c0_7 = arith.constant 0 : index
    %8 = vector.load %arg6[%c0_6, %c0_7] : memref<8x256xf32, #tpu.memory_space<vmem>>, vector<8x256xf32>
    tpu.vector_store %arg6[%c0_6, %c0_7], %7 {strides = array<i32>} : memref<8x256xf32, #tpu.memory_space<vmem>>, vector<8x256xf32>,
    %c0_i32_8 = arith.constant 0 : i32
    %9 = arith.cmpi eq, %arg2, %c0_i32_8 : i32
    %10 = arith.extui %9 : i1 to i32
    %c0_i32_9 = arith.constant 0 : i32
    %11 = arith.cmpi ne, %10, %c0_i32_9 : i32
    scf.if %11 {
      %c0_10 = arith.constant 0 : index
      %c0_11 = arith.constant 0 : index
      %12 = vector.load %arg6[%c0_10, %c0_11] : memref<8x256xf32, #tpu.memory_space<vmem>>, vector<8x256xf32>
      %c0_12 = arith.constant 0 : index
      %c0_13 = arith.constant 0 : index
      %13 = vector.load %arg5[%c0_12, %c0_13] : memref<1x256xf32, #tpu.memory_space<vmem>>, vector<1x256xf32>
      %14 = vector.broadcast %13 : vector<1x256xf32> to vector<8x256xf32>
      %15 = arith.addf %12, %14 : vector<8x256xf32>
      %c0_14 = arith.constant 0 : index
      %c0_15 = arith.constant 0 : index
      %16 = vector.load %arg6[%c0_14, %c0_15] : memref<8x256xf32, #tpu.memory_space<vmem>>, vector<8x256xf32>
      tpu.vector_store %arg6[%c0_14, %c0_15], %15 {strides = array<i32>} : memref<8x256xf32, #tpu.memory_space<vmem>>, vector<8x256xf32>,
    } else {
    }
    return
  }
  func.func @transform_0(%arg0: i32, %arg1: i32, %arg2: i32) -> (i32, i32) {
    %c0_i32 = arith.constant 0 : i32
    return %arg0, %arg2 : i32, i32
  }
  func.func @transform_1(%arg0: i32, %arg1: i32, %arg2: i32) -> (i32, i32) {
    %c0_i32 = arith.constant 0 : i32
    return %arg2, %arg1 : i32, i32
  }
  func.func @transform_2(%arg0: i32, %arg1: i32, %arg2: i32) -> (i32, i32) {
    %c0_i32 = arith.constant 0 : i32
    %c0_i32_0 = arith.constant 0 : i32
    return %c0_i32, %arg1 : i32, i32
  }
  func.func @transform_3(%arg0: i32, %arg1: i32, %arg2: i32) -> (i32, i32) {
    %c0_i32 = arith.constant 0 : i32
    return %arg0, %arg1 : i32, i32
  }
}

module attributes {stable_mosaic.version = 11 : i64} {
  func.func @_mm_bn_kernel(%arg0: i32, %arg1: i32, %arg2: i32, %arg3: memref<8x256xbf16, #tpu.memory_space<vmem>>, %arg4: memref<256x256xbf16, #tpu.memory_space<vmem>>, %arg5: memref<1x256xf32, #tpu.memory_space<vmem>>, %arg6: memref<8x256xf32, #tpu.memory_space<vmem>>, %arg7: memref<8x256xf32, #tpu.memory_space<vmem>>) attributes {dimension_semantics = [#tpu.dimension_semantics<parallel>, #tpu.dimension_semantics<parallel>, #tpu.dimension_semantics<arbitrary>], iteration_bounds = array<i64: 1, 2, 18>, scalar_prefetch = 0 : i64, scratch_operands = 0 : i64, tpu.core_type = #tpu.core_type<tc>, window_params = [{transform_indices = @transform_0, window_bounds = array<i64: 8, 256>}, {transform_indices = @transform_1, window_bounds = array<i64: 256, 256>}, {transform_indices = @transform_2, window_bounds = array<i64: 1, 256>}, {transform_indices = @transform_3, window_bounds = array<i64: 8, 256>}, {transform_indices = @transform_4, window_bounds = array<i64: 8, 256>}]} {
    %c0_i32 = arith.constant 0 : i32
    %0 = arith.cmpi eq, %arg2, %c0_i32 : i32
    %1 = arith.extui %0 : i1 to i32
    %c0_i32_0 = arith.constant 0 : i32
    %2 = arith.cmpi ne, %1, %c0_i32_0 : i32
    scf.if %2 {
      %cst_9 = arith.constant 0.000000e+00 : f32
      %12 = vector.broadcast %cst_9 : f32 to vector<8x256xf32>
      %c0_10 = arith.constant 0 : index
      %c0_11 = arith.constant 0 : index
      %13 = vector.load %arg7[%c0_10, %c0_11] : memref<8x256xf32, #tpu.memory_space<vmem>>, vector<8x256xf32>
      tpu.vector_store %arg7[%c0_10, %c0_11], %12 {strides = array<i32>} : memref<8x256xf32, #tpu.memory_space<vmem>>, vector<8x256xf32>,
    } else {
    }
    %c0 = arith.constant 0 : index
    %c0_1 = arith.constant 0 : index
    %3 = vector.load %arg7[%c0, %c0_1] : memref<8x256xf32, #tpu.memory_space<vmem>>, vector<8x256xf32>
    %c0_2 = arith.constant 0 : index
    %c0_3 = arith.constant 0 : index
    %4 = vector.load %arg3[%c0_2, %c0_3] : memref<8x256xbf16, #tpu.memory_space<vmem>>, vector<8x256xbf16>
    %c0_4 = arith.constant 0 : index
    %c0_5 = arith.constant 0 : index
    %5 = vector.load %arg4[%c0_4, %c0_5] : memref<256x256xbf16, #tpu.memory_space<vmem>>, vector<256x256xbf16>
    %cst = arith.constant dense<0.000000e+00> : vector<8x256xf32>
    %6 = tpu.matmul %4, %5, %cst {dimension_numbers = #tpu.dot_dimension_numbers<[1], [0], [0], [1], [0, 0, 1, 1], [], []>} : vector<8x256xbf16>, vector<256x256xbf16>, vector<8x256xf32> -> vector<8x256xf32>
    %7 = arith.addf %3, %6 : vector<8x256xf32>
    %c0_6 = arith.constant 0 : index
    %c0_7 = arith.constant 0 : index
    %8 = vector.load %arg7[%c0_6, %c0_7] : memref<8x256xf32, #tpu.memory_space<vmem>>, vector<8x256xf32>
    tpu.vector_store %arg7[%c0_6, %c0_7], %7 {strides = array<i32>} : memref<8x256xf32, #tpu.memory_space<vmem>>, vector<8x256xf32>,
    %c17_i32 = arith.constant 17 : i32
    %9 = arith.cmpi eq, %arg2, %c17_i32 : i32
    %10 = arith.extui %9 : i1 to i32
    %c0_i32_8 = arith.constant 0 : i32
    %11 = arith.cmpi ne, %10, %c0_i32_8 : i32
    scf.if %11 {
      %c0_9 = arith.constant 0 : index
      %c0_10 = arith.constant 0 : index
      %12 = vector.load %arg7[%c0_9, %c0_10] : memref<8x256xf32, #tpu.memory_space<vmem>>, vector<8x256xf32>
      %c0_11 = arith.constant 0 : index
      %c0_12 = arith.constant 0 : index
      %13 = vector.load %arg5[%c0_11, %c0_12] : memref<1x256xf32, #tpu.memory_space<vmem>>, vector<1x256xf32>
      %14 = vector.broadcast %13 : vector<1x256xf32> to vector<8x256xf32>
      %15 = arith.addf %12, %14 : vector<8x256xf32>
      %c0_13 = arith.constant 0 : index
      %c0_14 = arith.constant 0 : index
      %16 = vector.load %arg6[%c0_13, %c0_14] : memref<8x256xf32, #tpu.memory_space<vmem>>, vector<8x256xf32>
      %17 = arith.addf %15, %16 : vector<8x256xf32>
      %cst_15 = arith.constant 0.000000e+00 : f32
      %18 = vector.broadcast %cst_15 : f32 to vector<8x256xf32>
      %19 = arith.maximumf %17, %18 : vector<8x256xf32>
      %c0_16 = arith.constant 0 : index
      %c0_17 = arith.constant 0 : index
      %20 = vector.load %arg7[%c0_16, %c0_17] : memref<8x256xf32, #tpu.memory_space<vmem>>, vector<8x256xf32>
      tpu.vector_store %arg7[%c0_16, %c0_17], %19 {strides = array<i32>} : memref<8x256xf32, #tpu.memory_space<vmem>>, vector<8x256xf32>,
    } else {
    }
    return
  }
  func.func @transform_0(%arg0: i32, %arg1: i32, %arg2: i32) -> (i32, i32) {
    %c0_i32 = arith.constant 0 : i32
    return %arg0, %arg2 : i32, i32
  }
  func.func @transform_1(%arg0: i32, %arg1: i32, %arg2: i32) -> (i32, i32) {
    %c0_i32 = arith.constant 0 : i32
    return %arg2, %arg1 : i32, i32
  }
  func.func @transform_2(%arg0: i32, %arg1: i32, %arg2: i32) -> (i32, i32) {
    %c0_i32 = arith.constant 0 : i32
    %c0_i32_0 = arith.constant 0 : i32
    return %c0_i32, %arg1 : i32, i32
  }
  func.func @transform_3(%arg0: i32, %arg1: i32, %arg2: i32) -> (i32, i32) {
    %c0_i32 = arith.constant 0 : i32
    return %arg0, %arg1 : i32, i32
  }
  func.func @transform_4(%arg0: i32, %arg1: i32, %arg2: i32) -> (i32, i32) {
    %c0_i32 = arith.constant 0 : i32
    return %arg0, %arg1 : i32, i32
  }
}

module attributes {stable_mosaic.version = 11 : i64} {
  func.func @_mm_bn_kernel(%arg0: i32, %arg1: i32, %arg2: i32, %arg3: memref<8x256xbf16, #tpu.memory_space<vmem>>, %arg4: memref<256x256xbf16, #tpu.memory_space<vmem>>, %arg5: memref<1x256xf32, #tpu.memory_space<vmem>>, %arg6: memref<8x256xf32, #tpu.memory_space<vmem>>) attributes {dimension_semantics = [#tpu.dimension_semantics<parallel>, #tpu.dimension_semantics<parallel>, #tpu.dimension_semantics<arbitrary>], iteration_bounds = array<i64: 1, 2, 18>, scalar_prefetch = 0 : i64, scratch_operands = 0 : i64, tpu.core_type = #tpu.core_type<tc>, window_params = [{transform_indices = @transform_0, window_bounds = array<i64: 8, 256>}, {transform_indices = @transform_1, window_bounds = array<i64: 256, 256>}, {transform_indices = @transform_2, window_bounds = array<i64: 1, 256>}, {transform_indices = @transform_3, window_bounds = array<i64: 8, 256>}]} {
    %c0_i32 = arith.constant 0 : i32
    %0 = arith.cmpi eq, %arg2, %c0_i32 : i32
    %1 = arith.extui %0 : i1 to i32
    %c0_i32_0 = arith.constant 0 : i32
    %2 = arith.cmpi ne, %1, %c0_i32_0 : i32
    scf.if %2 {
      %cst_9 = arith.constant 0.000000e+00 : f32
      %12 = vector.broadcast %cst_9 : f32 to vector<8x256xf32>
      %c0_10 = arith.constant 0 : index
      %c0_11 = arith.constant 0 : index
      %13 = vector.load %arg6[%c0_10, %c0_11] : memref<8x256xf32, #tpu.memory_space<vmem>>, vector<8x256xf32>
      tpu.vector_store %arg6[%c0_10, %c0_11], %12 {strides = array<i32>} : memref<8x256xf32, #tpu.memory_space<vmem>>, vector<8x256xf32>,
    } else {
    }
    %c0 = arith.constant 0 : index
    %c0_1 = arith.constant 0 : index
    %3 = vector.load %arg6[%c0, %c0_1] : memref<8x256xf32, #tpu.memory_space<vmem>>, vector<8x256xf32>
    %c0_2 = arith.constant 0 : index
    %c0_3 = arith.constant 0 : index
    %4 = vector.load %arg3[%c0_2, %c0_3] : memref<8x256xbf16, #tpu.memory_space<vmem>>, vector<8x256xbf16>
    %c0_4 = arith.constant 0 : index
    %c0_5 = arith.constant 0 : index
    %5 = vector.load %arg4[%c0_4, %c0_5] : memref<256x256xbf16, #tpu.memory_space<vmem>>, vector<256x256xbf16>
    %cst = arith.constant dense<0.000000e+00> : vector<8x256xf32>
    %6 = tpu.matmul %4, %5, %cst {dimension_numbers = #tpu.dot_dimension_numbers<[1], [0], [0], [1], [0, 0, 1, 1], [], []>} : vector<8x256xbf16>, vector<256x256xbf16>, vector<8x256xf32> -> vector<8x256xf32>
    %7 = arith.addf %3, %6 : vector<8x256xf32>
    %c0_6 = arith.constant 0 : index
    %c0_7 = arith.constant 0 : index
    %8 = vector.load %arg6[%c0_6, %c0_7] : memref<8x256xf32, #tpu.memory_space<vmem>>, vector<8x256xf32>
    tpu.vector_store %arg6[%c0_6, %c0_7], %7 {strides = array<i32>} : memref<8x256xf32, #tpu.memory_space<vmem>>, vector<8x256xf32>,
    %c17_i32 = arith.constant 17 : i32
    %9 = arith.cmpi eq, %arg2, %c17_i32 : i32
    %10 = arith.extui %9 : i1 to i32
    %c0_i32_8 = arith.constant 0 : i32
    %11 = arith.cmpi ne, %10, %c0_i32_8 : i32
    scf.if %11 {
      %c0_9 = arith.constant 0 : index
      %c0_10 = arith.constant 0 : index
      %12 = vector.load %arg6[%c0_9, %c0_10] : memref<8x256xf32, #tpu.memory_space<vmem>>, vector<8x256xf32>
      %c0_11 = arith.constant 0 : index
      %c0_12 = arith.constant 0 : index
      %13 = vector.load %arg5[%c0_11, %c0_12] : memref<1x256xf32, #tpu.memory_space<vmem>>, vector<1x256xf32>
      %14 = vector.broadcast %13 : vector<1x256xf32> to vector<8x256xf32>
      %15 = arith.addf %12, %14 : vector<8x256xf32>
      %cst_13 = arith.constant 0.000000e+00 : f32
      %16 = vector.broadcast %cst_13 : f32 to vector<8x256xf32>
      %17 = arith.maximumf %15, %16 : vector<8x256xf32>
      %c0_14 = arith.constant 0 : index
      %c0_15 = arith.constant 0 : index
      %18 = vector.load %arg6[%c0_14, %c0_15] : memref<8x256xf32, #tpu.memory_space<vmem>>, vector<8x256xf32>
      tpu.vector_store %arg6[%c0_14, %c0_15], %17 {strides = array<i32>} : memref<8x256xf32, #tpu.memory_space<vmem>>, vector<8x256xf32>,
    } else {
    }
    return
  }
  func.func @transform_0(%arg0: i32, %arg1: i32, %arg2: i32) -> (i32, i32) {
    %c0_i32 = arith.constant 0 : i32
    return %arg0, %arg2 : i32, i32
  }
  func.func @transform_1(%arg0: i32, %arg1: i32, %arg2: i32) -> (i32, i32) {
    %c0_i32 = arith.constant 0 : i32
    return %arg2, %arg1 : i32, i32
  }
  func.func @transform_2(%arg0: i32, %arg1: i32, %arg2: i32) -> (i32, i32) {
    %c0_i32 = arith.constant 0 : i32
    %c0_i32_0 = arith.constant 0 : i32
    return %c0_i32, %arg1 : i32, i32
  }
  func.func @transform_3(%arg0: i32, %arg1: i32, %arg2: i32) -> (i32, i32) {
    %c0_i32 = arith.constant 0 : i32
    return %arg0, %arg1 : i32, i32
  }
}

module attributes {stable_mosaic.version = 11 : i64} {
  func.func @_mm_bn_kernel(%arg0: i32, %arg1: i32, %arg2: i32, %arg3: memref<8x256xbf16, #tpu.memory_space<vmem>>, %arg4: memref<256x256xbf16, #tpu.memory_space<vmem>>, %arg5: memref<1x256xf32, #tpu.memory_space<vmem>>, %arg6: memref<8x256xf32, #tpu.memory_space<vmem>>) attributes {dimension_semantics = [#tpu.dimension_semantics<parallel>, #tpu.dimension_semantics<parallel>, #tpu.dimension_semantics<arbitrary>], iteration_bounds = array<i64: 1, 2, 2>, scalar_prefetch = 0 : i64, scratch_operands = 0 : i64, tpu.core_type = #tpu.core_type<tc>, window_params = [{transform_indices = @transform_0, window_bounds = array<i64: 8, 256>}, {transform_indices = @transform_1, window_bounds = array<i64: 256, 256>}, {transform_indices = @transform_2, window_bounds = array<i64: 1, 256>}, {transform_indices = @transform_3, window_bounds = array<i64: 8, 256>}]} {
    %c0_i32 = arith.constant 0 : i32
    %0 = arith.cmpi eq, %arg2, %c0_i32 : i32
    %1 = arith.extui %0 : i1 to i32
    %c0_i32_0 = arith.constant 0 : i32
    %2 = arith.cmpi ne, %1, %c0_i32_0 : i32
    scf.if %2 {
      %cst_9 = arith.constant 0.000000e+00 : f32
      %12 = vector.broadcast %cst_9 : f32 to vector<8x256xf32>
      %c0_10 = arith.constant 0 : index
      %c0_11 = arith.constant 0 : index
      %13 = vector.load %arg6[%c0_10, %c0_11] : memref<8x256xf32, #tpu.memory_space<vmem>>, vector<8x256xf32>
      tpu.vector_store %arg6[%c0_10, %c0_11], %12 {strides = array<i32>} : memref<8x256xf32, #tpu.memory_space<vmem>>, vector<8x256xf32>,
    } else {
    }
    %c0 = arith.constant 0 : index
    %c0_1 = arith.constant 0 : index
    %3 = vector.load %arg6[%c0, %c0_1] : memref<8x256xf32, #tpu.memory_space<vmem>>, vector<8x256xf32>
    %c0_2 = arith.constant 0 : index
    %c0_3 = arith.constant 0 : index
    %4 = vector.load %arg3[%c0_2, %c0_3] : memref<8x256xbf16, #tpu.memory_space<vmem>>, vector<8x256xbf16>
    %c0_4 = arith.constant 0 : index
    %c0_5 = arith.constant 0 : index
    %5 = vector.load %arg4[%c0_4, %c0_5] : memref<256x256xbf16, #tpu.memory_space<vmem>>, vector<256x256xbf16>
    %cst = arith.constant dense<0.000000e+00> : vector<8x256xf32>
    %6 = tpu.matmul %4, %5, %cst {dimension_numbers = #tpu.dot_dimension_numbers<[1], [0], [0], [1], [0, 0, 1, 1], [], []>} : vector<8x256xbf16>, vector<256x256xbf16>, vector<8x256xf32> -> vector<8x256xf32>
    %7 = arith.addf %3, %6 : vector<8x256xf32>
    %c0_6 = arith.constant 0 : index
    %c0_7 = arith.constant 0 : index
    %8 = vector.load %arg6[%c0_6, %c0_7] : memref<8x256xf32, #tpu.memory_space<vmem>>, vector<8x256xf32>
    tpu.vector_store %arg6[%c0_6, %c0_7], %7 {strides = array<i32>} : memref<8x256xf32, #tpu.memory_space<vmem>>, vector<8x256xf32>,
    %c1_i32 = arith.constant 1 : i32
    %9 = arith.cmpi eq, %arg2, %c1_i32 : i32
    %10 = arith.extui %9 : i1 to i32
    %c0_i32_8 = arith.constant 0 : i32
    %11 = arith.cmpi ne, %10, %c0_i32_8 : i32
    scf.if %11 {
      %c0_9 = arith.constant 0 : index
      %c0_10 = arith.constant 0 : index
      %12 = vector.load %arg6[%c0_9, %c0_10] : memref<8x256xf32, #tpu.memory_space<vmem>>, vector<8x256xf32>
      %c0_11 = arith.constant 0 : index
      %c0_12 = arith.constant 0 : index
      %13 = vector.load %arg5[%c0_11, %c0_12] : memref<1x256xf32, #tpu.memory_space<vmem>>, vector<1x256xf32>
      %14 = vector.broadcast %13 : vector<1x256xf32> to vector<8x256xf32>
      %15 = arith.addf %12, %14 : vector<8x256xf32>
      %c0_13 = arith.constant 0 : index
      %c0_14 = arith.constant 0 : index
      %16 = vector.load %arg6[%c0_13, %c0_14] : memref<8x256xf32, #tpu.memory_space<vmem>>, vector<8x256xf32>
      tpu.vector_store %arg6[%c0_13, %c0_14], %15 {strides = array<i32>} : memref<8x256xf32, #tpu.memory_space<vmem>>, vector<8x256xf32>,
    } else {
    }
    return
  }
  func.func @transform_0(%arg0: i32, %arg1: i32, %arg2: i32) -> (i32, i32) {
    %c0_i32 = arith.constant 0 : i32
    return %arg0, %arg2 : i32, i32
  }
  func.func @transform_1(%arg0: i32, %arg1: i32, %arg2: i32) -> (i32, i32) {
    %c0_i32 = arith.constant 0 : i32
    return %arg2, %arg1 : i32, i32
  }
  func.func @transform_2(%arg0: i32, %arg1: i32, %arg2: i32) -> (i32, i32) {
    %c0_i32 = arith.constant 0 : i32
    %c0_i32_0 = arith.constant 0 : i32
    return %c0_i32, %arg1 : i32, i32
  }
  func.func @transform_3(%arg0: i32, %arg1: i32, %arg2: i32) -> (i32, i32) {
    %c0_i32 = arith.constant 0 : i32
    return %arg0, %arg1 : i32, i32
  }
}

module attributes {stable_mosaic.version = 11 : i64} {
  func.func @_mm_bn_kernel(%arg0: i32, %arg1: i32, %arg2: i32, %arg3: memref<8x256xbf16, #tpu.memory_space<vmem>>, %arg4: memref<256x128xbf16, #tpu.memory_space<vmem>>, %arg5: memref<1x128xf32, #tpu.memory_space<vmem>>, %arg6: memref<8x128xf32, #tpu.memory_space<vmem>>) attributes {dimension_semantics = [#tpu.dimension_semantics<parallel>, #tpu.dimension_semantics<parallel>, #tpu.dimension_semantics<arbitrary>], iteration_bounds = array<i64: 1, 1, 2>, scalar_prefetch = 0 : i64, scratch_operands = 0 : i64, tpu.core_type = #tpu.core_type<tc>, window_params = [{transform_indices = @transform_0, window_bounds = array<i64: 8, 256>}, {transform_indices = @transform_1, window_bounds = array<i64: 256, 128>}, {transform_indices = @transform_2, window_bounds = array<i64: 1, 128>}, {transform_indices = @transform_3, window_bounds = array<i64: 8, 128>}]} {
    %c0_i32 = arith.constant 0 : i32
    %0 = arith.cmpi eq, %arg2, %c0_i32 : i32
    %1 = arith.extui %0 : i1 to i32
    %c0_i32_0 = arith.constant 0 : i32
    %2 = arith.cmpi ne, %1, %c0_i32_0 : i32
    scf.if %2 {
      %cst_9 = arith.constant 0.000000e+00 : f32
      %12 = vector.broadcast %cst_9 : f32 to vector<8x128xf32>
      %c0_10 = arith.constant 0 : index
      %c0_11 = arith.constant 0 : index
      %13 = vector.load %arg6[%c0_10, %c0_11] : memref<8x128xf32, #tpu.memory_space<vmem>>, vector<8x128xf32>
      tpu.vector_store %arg6[%c0_10, %c0_11], %12 {strides = array<i32>} : memref<8x128xf32, #tpu.memory_space<vmem>>, vector<8x128xf32>,
    } else {
    }
    %c0 = arith.constant 0 : index
    %c0_1 = arith.constant 0 : index
    %3 = vector.load %arg6[%c0, %c0_1] : memref<8x128xf32, #tpu.memory_space<vmem>>, vector<8x128xf32>
    %c0_2 = arith.constant 0 : index
    %c0_3 = arith.constant 0 : index
    %4 = vector.load %arg3[%c0_2, %c0_3] : memref<8x256xbf16, #tpu.memory_space<vmem>>, vector<8x256xbf16>
    %c0_4 = arith.constant 0 : index
    %c0_5 = arith.constant 0 : index
    %5 = vector.load %arg4[%c0_4, %c0_5] : memref<256x128xbf16, #tpu.memory_space<vmem>>, vector<256x128xbf16>
    %cst = arith.constant dense<0.000000e+00> : vector<8x128xf32>
    %6 = tpu.matmul %4, %5, %cst {dimension_numbers = #tpu.dot_dimension_numbers<[1], [0], [0], [1], [0, 0, 1, 1], [], []>} : vector<8x256xbf16>, vector<256x128xbf16>, vector<8x128xf32> -> vector<8x128xf32>
    %7 = arith.addf %3, %6 : vector<8x128xf32>
    %c0_6 = arith.constant 0 : index
    %c0_7 = arith.constant 0 : index
    %8 = vector.load %arg6[%c0_6, %c0_7] : memref<8x128xf32, #tpu.memory_space<vmem>>, vector<8x128xf32>
    tpu.vector_store %arg6[%c0_6, %c0_7], %7 {strides = array<i32>} : memref<8x128xf32, #tpu.memory_space<vmem>>, vector<8x128xf32>,
    %c1_i32 = arith.constant 1 : i32
    %9 = arith.cmpi eq, %arg2, %c1_i32 : i32
    %10 = arith.extui %9 : i1 to i32
    %c0_i32_8 = arith.constant 0 : i32
    %11 = arith.cmpi ne, %10, %c0_i32_8 : i32
    scf.if %11 {
      %c0_9 = arith.constant 0 : index
      %c0_10 = arith.constant 0 : index
      %12 = vector.load %arg6[%c0_9, %c0_10] : memref<8x128xf32, #tpu.memory_space<vmem>>, vector<8x128xf32>
      %c0_11 = arith.constant 0 : index
      %c0_12 = arith.constant 0 : index
      %13 = vector.load %arg5[%c0_11, %c0_12] : memref<1x128xf32, #tpu.memory_space<vmem>>, vector<1x128xf32>
      %14 = vector.broadcast %13 : vector<1x128xf32> to vector<8x128xf32>
      %15 = arith.addf %12, %14 : vector<8x128xf32>
      %c0_13 = arith.constant 0 : index
      %c0_14 = arith.constant 0 : index
      %16 = vector.load %arg6[%c0_13, %c0_14] : memref<8x128xf32, #tpu.memory_space<vmem>>, vector<8x128xf32>
      tpu.vector_store %arg6[%c0_13, %c0_14], %15 {strides = array<i32>} : memref<8x128xf32, #tpu.memory_space<vmem>>, vector<8x128xf32>,
    } else {
    }
    return
  }
  func.func @transform_0(%arg0: i32, %arg1: i32, %arg2: i32) -> (i32, i32) {
    %c0_i32 = arith.constant 0 : i32
    return %arg0, %arg2 : i32, i32
  }
  func.func @transform_1(%arg0: i32, %arg1: i32, %arg2: i32) -> (i32, i32) {
    %c0_i32 = arith.constant 0 : i32
    return %arg2, %arg1 : i32, i32
  }
  func.func @transform_2(%arg0: i32, %arg1: i32, %arg2: i32) -> (i32, i32) {
    %c0_i32 = arith.constant 0 : i32
    %c0_i32_0 = arith.constant 0 : i32
    return %c0_i32, %arg1 : i32, i32
  }
  func.func @transform_3(%arg0: i32, %arg1: i32, %arg2: i32) -> (i32, i32) {
    %c0_i32 = arith.constant 0 : i32
    return %arg0, %arg1 : i32, i32
  }
}

</mosaic_0001>

<bundles_post_ra>
// kernel: resnet18_forward.25
= control target key start
LH: loop header
LB: loop body
LE: loop exit
PB: predicated region body
PF: predicated region fallthrough
CT: control target
= control target key end

     0   :  { %s1458_s12 = smov 0   ;;  %s1460_s13 = smov 0   ;;  %s1651_s0 = inlined_call_operand.vmem [shape: bf16[512,256], index: 0, kind: input, shape index: {}]   ;;  %s1652_s1 = inlined_call_operand.vmem [shape: bf16[256,128], index: 1, kind: input, shape index: {}]   ;;  %s1653_s2 = inlined_call_operand.vmem [shape: f32[1,128], index: 2, kind: input, shape index: {}]   ;;  %s1654_s3 = inlined_call_operand.vmem [shape: f32[512,128], index: 3, kind: output, shape index: {}]  }
   0x1   :  { %s1462_s14 = smov 0  }
   0x2 LB: > { %s32_s15 = sadd.s32 1, %s1432_s13  ;;  %p1139_p0 = scmp.ge.s32.totalorder %s1436_s14, 1  ;;  %s1436_s14 = sphi %s1462_s14, %s13_s14   ;;  %s1432_s13 = sphi %s1460_s13, %s1656_s13   ;;  %s1428_s12 = sphi %s1458_s12, %s1655_s12  }
   0x3   : > { %p34_p1 = scmp.ge.s32.totalorder %s32_s15, 2  ;;  %p191_p2 = scmp.lt.s32.totalorder %s1436_s14, 3 }
   0x5   : > { %s1658_s15 = smov (%p34_p1, %s32_s15), 0  ;;  %p192_p3 = pnand %p1139_p0, %p191_p2 }
   0x6   : > { %v1350_v0 = vld [vmem:[%s1652_s1 + $0x40] sm:$0xff] (!%p192_p3)   ;;  %s1140_s18 = sshll.u32 (!%p192_p3), %s1428_s12, 5  ;;  %v1352_v2 = vld [vmem:[%s1652_s1 + $0x48] sm:$0xff] (!%p192_p3)   ;;  %v1354_v4 = vld [vmem:[%s1652_s1 + $0x50] sm:$0xff] (!%p192_p3)  }
   0x7   : > { %195 = sbr.rel (%p192_p3) target bundleno = 317 (0x13d), region = 32  ;;  %v1351_v1 = vld [vmem:[%s1652_s1] sm:$0xff] (!%p192_p3)   ;;  %1197 = vmatprep.subr.bf16.mxu0 (!%p192_p3), %v1350_v0  ;;  %1309 = vmatprep.subr.bf16.mxu1 (!%p192_p3), %v1350_v0  ;;  %v1353_v3 = vld [vmem:[%s1652_s1 + $0x8] sm:$0xff] (!%p192_p3)   ;;  %p236_p4 = scmp.lt.s32.totalorder (!%p192_p3), %s1140_s18, 63  ;;  %v1355_v5 = vld [vmem:[%s1652_s1 + $0x10] sm:$0xff] (!%p192_p3)  }
   0x8   : > { %1198 = vmatpush3.bf16.msra.mxu0 (!%p192_p3), %v1351_v1  ;;  %1317 = vmatpush3.bf16.msra.mxu1 (!%p192_p3), %v1351_v1  ;;  %v1356_v6 = vld [vmem:[%s1652_s1 + $0x58] sm:$0xff] (!%p192_p3)   ;;  %v1358_v8 = vld [vmem:[%s1652_s1 + $0x60] sm:$0xff] (!%p192_p3)   ;;  %v1360_v10 = vld [vmem:[%s1652_s1 + $0x68] sm:$0xff] (!%p192_p3)  }
   0x9   : > { %1199 = vmatprep.subr.bf16.mxu0 (!%p192_p3), %v1352_v2  ;;  %1310 = vmatprep.subr.bf16.mxu1 (!%p192_p3), %v1352_v2  ;;  %v1357_v7 = vld [vmem:[%s1652_s1 + $0x18] sm:$0xff] (!%p192_p3)   ;;  %v1359_v9 = vld [vmem:[%s1652_s1 + $0x20] sm:$0xff] (!%p192_p3)   ;;  %v1361_v13 = vld [vmem:[%s1652_s1 + $0x28] sm:$0xff] (!%p192_p3)  }
   0xa   : > { %v1362_v14 = vld [vmem:[%s1652_s1 + $0x70] sm:$0xff] (!%p192_p3)   ;;  %v1364_v16 = vld [vmem:[%s1652_s1 + $0x78] sm:$0xff] (!%p192_p3)   ;;  %v1569_v56 = vld [vmem:[%s1653_s2] ss:$0 sm:$0xff] (!%p192_p3) }
   0xb   : > { %v1363_v15 = vld [vmem:[%s1652_s1 + $0x30] sm:$0xff] (!%p192_p3)   ;;  %v1365_v17 = vld [vmem:[%s1652_s1 + $0x38] sm:$0xff] (!%p192_p3)  }
   0xc   : > { %1200 = vmatpush3.bf16.msra.mxu0 (!%p192_p3), %v1353_v3  ;;  %1318 = vmatpush3.bf16.msra.mxu1 (!%p192_p3), %v1353_v3 }
   0xd   : > { %1201 = vmatprep.subr.bf16.mxu0 (!%p192_p3), %v1354_v4  ;;  %1311 = vmatprep.subr.bf16.mxu1 (!%p192_p3), %v1354_v4 }
   0xe   : > { %s1660_s18 = smov (!%p236_p4, %s1140_s18), 63 }
   0xf   : > { %s1196_s6 = sshll.u32 %s1660_s18, 3 }
  0x10   : > { %1202 = vmatpush3.bf16.msra.mxu0 %v1355_v5  ;;  %1319 = vmatpush3.bf16.msra.mxu1 %v1355_v5  ;;  %s1511_s11 = scalar_lea.vmem %s1651_s0, %s1196_s6  ;;  %s1578_s8 = scalar_lea.vmem %s1654_s3, %s1196_s6 }
  0x11   : > { %1203 = vmatprep.subr.bf16.mxu0 %v1356_v6  ;;  %1312 = vmatprep.subr.bf16.mxu1 %v1356_v6  ;;  %v1368_v11 = vld [vmem:[%s1511_s11 + $0x4] ss:$8 sps:$4 sm:$0xff]   ;;  %v1366_v18 = vld [vmem:[%s1511_s11] ss:$8 sps:$4 sm:$0xff]   ;;  %v1372_v20 = vld [vmem:[%s1511_s11 + $0x14] ss:$8 sps:$4 sm:$0xff]  }
  0x12   : > { %v1371_v12 = vld [vmem:[%s1511_s11 + $0x84] ss:$8 sps:$4 sm:$0xff]   ;;  %688 = vmatprep.mubr.bf16.mxu0 %v1368_v11  ;;  %v1369_v19 = vld [vmem:[%s1511_s11 + $0x80] ss:$8 sps:$4 sm:$0xff]   ;;  %v1374_v21 = vld [vmem:[%s1511_s11 + $0x94] ss:$8 sps:$4 sm:$0xff]  }
  0x13   : > { %752 = vmatprep.mubr.bf16.mxu1 %v1371_v12  ;;  %v1376_v22 = vld [vmem:[%s1511_s11 + $0x10] ss:$8 sps:$4 sm:$0xff]   ;;  %v1378_v24 = vld [vmem:[%s1511_s11 + $0x24] ss:$8 sps:$4 sm:$0xff]   ;;  %v1382_v26 = vld [vmem:[%s1511_s11 + $0x20] ss:$8 sps:$4 sm:$0xff]  }
  0x14   : > { %1204 = vmatpush3.bf16.msra.mxu0 %v1357_v7  ;;  %1320 = vmatpush3.bf16.msra.mxu1 %v1357_v7  ;;  %v1377_v23 = vld [vmem:[%s1511_s11 + $0x90] ss:$8 sps:$4 sm:$0xff]   ;;  %v1380_v25 = vld [vmem:[%s1511_s11 + $0xa4] ss:$8 sps:$4 sm:$0xff]   ;;  %v1383_v27 = vld [vmem:[%s1511_s11 + $0xa0] ss:$8 sps:$4 sm:$0xff]  }
  0x15   : > { %1205 = vmatprep.subr.bf16.mxu0 %v1358_v8  ;;  %1313 = vmatprep.subr.bf16.mxu1 %v1358_v8  ;;  %v1384_v28 = vld [vmem:[%s1511_s11 + $0x34] ss:$8 sps:$4 sm:$0xff]   ;;  %v1388_v30 = vld [vmem:[%s1511_s11 + $0x30] ss:$8 sps:$4 sm:$0xff]   ;;  %v1390_v32 = vld [vmem:[%s1511_s11 + $0x44] ss:$8 sps:$4 sm:$0xff]  }
  0x16   : > { %v1386_v29 = vld [vmem:[%s1511_s11 + $0xb4] ss:$8 sps:$4 sm:$0xff]   ;;  %v1389_v31 = vld [vmem:[%s1511_s11 + $0xb0] ss:$8 sps:$4 sm:$0xff]   ;;  %v1392_v33 = vld [vmem:[%s1511_s11 + $0xc4] ss:$8 sps:$4 sm:$0xff]  }
  0x17   : > { %v1394_v34 = vld [vmem:[%s1511_s11 + $0x40] ss:$8 sps:$4 sm:$0xff]   ;;  %v1396_v36 = vld [vmem:[%s1511_s11 + $0x54] ss:$8 sps:$4 sm:$0xff]   ;;  %v1400_v38 = vld [vmem:[%s1511_s11 + $0x50] ss:$8 sps:$4 sm:$0xff]  }
  0x18   : > { %1206 = vmatpush3.bf16.msra.mxu0 %v1359_v9  ;;  %1321 = vmatpush3.bf16.msra.mxu1 %v1359_v9  ;;  %v1395_v35 = vld [vmem:[%s1511_s11 + $0xc0] ss:$8 sps:$4 sm:$0xff]   ;;  %v1398_v37 = vld [vmem:[%s1511_s11 + $0xd4] ss:$8 sps:$4 sm:$0xff]   ;;  %v1401_v39 = vld [vmem:[%s1511_s11 + $0xd0] ss:$8 sps:$4 sm:$0xff]  }
  0x19   : > { %1207 = vmatprep.subr.bf16.mxu0 %v1360_v10  ;;  %1314 = vmatprep.subr.bf16.mxu1 %v1360_v10  ;;  %v1402_v40 = vld [vmem:[%s1511_s11 + $0x64] ss:$8 sps:$4 sm:$0xff]   ;;  %v1406_v42 = vld [vmem:[%s1511_s11 + $0x60] ss:$8 sps:$4 sm:$0xff]   ;;  %v1408_v44 = vld [vmem:[%s1511_s11 + $0x74] ss:$8 sps:$4 sm:$0xff]  }
  0x1a   : > { %v1404_v41 = vld [vmem:[%s1511_s11 + $0xe4] ss:$8 sps:$4 sm:$0xff]   ;;  %v1407_v43 = vld [vmem:[%s1511_s11 + $0xe0] ss:$8 sps:$4 sm:$0xff]   ;;  %v1410_v45 = vld [vmem:[%s1511_s11 + $0xf4] ss:$8 sps:$4 sm:$0xff]  }
  0x1b   : > { %v1412_v46 = vld [vmem:[%s1511_s11 + $0x70] ss:$8 sps:$4 sm:$0xff]  }
  0x1c   : > { %1208 = vmatpush3.bf16.msra.mxu0 %v1361_v13  ;;  %1322 = vmatpush3.bf16.msra.mxu1 %v1361_v13  ;;  %v1413_v47 = vld [vmem:[%s1511_s11 + $0xf0] ss:$8 sps:$4 sm:$0xff]  }
  0x1d   : > { %1209 = vmatprep.subr.bf16.mxu0 %v1362_v14  ;;  %1315 = vmatprep.subr.bf16.mxu1 %v1362_v14 }
  0x20   : > { %1210 = vmatpush3.bf16.msra.mxu0 %v1363_v15  ;;  %1323 = vmatpush3.bf16.msra.mxu1 %v1363_v15 }
  0x21   : > { %1211 = vmatprep.subr.bf16.mxu0 %v1364_v16  ;;  %1316 = vmatprep.subr.bf16.mxu1 %v1364_v16 }
  0x24   : > { %1212 = vmatpush3.bf16.msra.mxu0 %v1365_v17  ;;  %1324 = vmatpush3.bf16.msra.mxu1 %v1365_v17 }
  0x27   : > { %689 = vmatmul.mubr.bf16.vlgmr.msra.gmra.mrb[0].mxu0 %v1366_v18  ;;  %753 = vmatmul.mubr.bf16.vlgmr.msra.gmra.mrb[0].mxu1 %v1369_v19 }
  0x28   : > { %696 = vmatprep.mubr.bf16.mxu0 %v1372_v20  ;;  %760 = vmatprep.mubr.bf16.mxu1 %v1374_v21 }
  0x2f   : > { %697 = vmatmul.mubr.bf16.gmra.mrb[4].mxu0 %v1376_v22  ;;  %761 = vmatmul.mubr.bf16.gmra.mrb[4].mxu1 %v1377_v23 }
  0x30   : > { %704 = vmatprep.mubr.bf16.mxu0 %v1378_v24  ;;  %768 = vmatprep.mubr.bf16.mxu1 %v1380_v25 }
  0x37   : > { %705 = vmatmul.mubr.bf16.gmra.mrb[8].mxu0 %v1382_v26  ;;  %769 = vmatmul.mubr.bf16.gmra.mrb[8].mxu1 %v1383_v27 }
  0x38   : > { %712 = vmatprep.mubr.bf16.mxu0 %v1384_v28  ;;  %776 = vmatprep.mubr.bf16.mxu1 %v1386_v29 }
  0x3f   : > { %713 = vmatmul.mubr.bf16.gmra.mrb[12].mxu0 %v1388_v30  ;;  %777 = vmatmul.mubr.bf16.gmra.mrb[12].mxu1 %v1389_v31 }
  0x40   : > { %720 = vmatprep.mubr.bf16.mxu0 %v1390_v32  ;;  %784 = vmatprep.mubr.bf16.mxu1 %v1392_v33 }
  0x47   : > { %721 = vmatmul.mubr.bf16.gmra.mrb[16].mxu0 %v1394_v34  ;;  %785 = vmatmul.mubr.bf16.gmra.mrb[16].mxu1 %v1395_v35 }
  0x48   : > { %728 = vmatprep.mubr.bf16.mxu0 %v1396_v36  ;;  %792 = vmatprep.mubr.bf16.mxu1 %v1398_v37 }
  0x4f   : > { %729 = vmatmul.mubr.bf16.gmra.mrb[20].mxu0 %v1400_v38  ;;  %793 = vmatmul.mubr.bf16.gmra.mrb[20].mxu1 %v1401_v39 }
  0x50   : > { %736 = vmatprep.mubr.bf16.mxu0 %v1402_v40  ;;  %800 = vmatprep.mubr.bf16.mxu1 %v1404_v41 }
  0x57   : > { %737 = vmatmul.mubr.bf16.gmra.mrb[24].mxu0 %v1406_v42  ;;  %801 = vmatmul.mubr.bf16.gmra.mrb[24].mxu1 %v1407_v43 }
  0x58   : > { %744 = vmatprep.mubr.bf16.mxu0 %v1408_v44  ;;  %808 = vmatprep.mubr.bf16.mxu1 %v1410_v45 }
  0x5f   : > { %745 = vmatmul.mubr.bf16.gmra.mrb[28].mxu0 %v1412_v46  ;;  %809 = vmatmul.mubr.bf16.gmra.mrb[28].mxu1 %v1413_v47 }
  0xfa   : > { %v1213_v48 = vpop.f32.mrb[0].mxu0  ;;  %v1261_v49 = vpop.f32.mrb[0].mxu1 }
  0xfb   : > { %v1214_v50 = vpop.f32.mrb[1].mxu0  ;;  %v1262_v51 = vpop.f32.mrb[1].mxu1 }
  0xfc   : > { %v1215_v52 = vadd.f32 %v1214_v50, %v1213_v48  ;;  %v1263_v53 = vadd.f32 %v1262_v51, %v1261_v49  ;;  %v1216_v54 = vpop.f32.mrb[2].mxu0  ;;  %v1264_v55 = vpop.f32.mrb[2].mxu1 }
  0xfd   : > { %v1217_v57 = vpop.f32.mrb[3].mxu0  ;;  %v1265_v58 = vpop.f32.mrb[3].mxu1 }
  0xfe   : > { %v1218_v59 = vadd.f32 %v1217_v57, %v1216_v54  ;;  %v1266_v60 = vadd.f32 %v1265_v58, %v1264_v55  ;;  %v923_v61 = vadd.f32 %v1215_v52, %v1569_v56  ;;  %v939_v62 = vadd.f32 %v1263_v53, %v1569_v56 }
 0x100   : > { %v955_v63 = vmax.f32 %v923_v61, 0.0  ;;  %v971_v0 = vmax.f32 %v939_v62, 0.0  ;;  %v924_v1 = vadd.f32 %v1218_v59, %v1569_v56  ;;  %v940_v2 = vadd.f32 %v1266_v60, %v1569_v56 }
 0x102   : > { %v1219_v3 = vpop.f32.mrb[4].mxu0  ;;  %v1267_v4 = vpop.f32.mrb[4].mxu1  ;;  %987 = vst [vmem:[%s1578_s8] sm:$0xff] %v955_v63  ;;  %1003 = vst [vmem:[%s1578_s8 + $0x80] sm:$0xff] %v971_v0  ;;  %v956_v7 = vmax.f32 %v924_v1, 0.0  ;;  %v972_v8 = vmax.f32 %v940_v2, 0.0 }
 0x103   : > { %v1220_v5 = vpop.f32.mrb[5].mxu0  ;;  %v1268_v6 = vpop.f32.mrb[5].mxu1 }
 0x104   : > { %v1221_v9 = vadd.f32 %v1220_v5, %v1219_v3  ;;  %v1269_v10 = vadd.f32 %v1268_v6, %v1267_v4  ;;  %v1222_v11 = vpop.f32.mrb[6].mxu0  ;;  %v1270_v12 = vpop.f32.mrb[6].mxu1  ;;  %988 = vst [vmem:[%s1578_s8 + $0x8] sm:$0xff] %v956_v7  ;;  %1004 = vst [vmem:[%s1578_s8 + $0x88] sm:$0xff] %v972_v8 }
 0x105   : > { %v1223_v13 = vpop.f32.mrb[7].mxu0  ;;  %v1271_v14 = vpop.f32.mrb[7].mxu1 }
 0x106   : > { %v1224_v15 = vadd.f32 %v1223_v13, %v1222_v11  ;;  %v1272_v16 = vadd.f32 %v1271_v14, %v1270_v12  ;;  %v925_v17 = vadd.f32 %v1221_v9, %v1569_v56  ;;  %v941_v18 = vadd.f32 %v1269_v10, %v1569_v56 }
 0x108   : > { %v957_v19 = vmax.f32 %v925_v17, 0.0  ;;  %v973_v20 = vmax.f32 %v941_v18, 0.0  ;;  %v926_v21 = vadd.f32 %v1224_v15, %v1569_v56  ;;  %v942_v22 = vadd.f32 %v1272_v16, %v1569_v56 }
 0x10a   : > { %v1225_v23 = vpop.f32.mrb[8].mxu0  ;;  %v1273_v24 = vpop.f32.mrb[8].mxu1  ;;  %989 = vst [vmem:[%s1578_s8 + $0x10] sm:$0xff] %v957_v19  ;;  %1005 = vst [vmem:[%s1578_s8 + $0x90] sm:$0xff] %v973_v20  ;;  %v958_v27 = vmax.f32 %v926_v21, 0.0  ;;  %v974_v28 = vmax.f32 %v942_v22, 0.0 }
 0x10b   : > { %v1226_v25 = vpop.f32.mrb[9].mxu0  ;;  %v1274_v26 = vpop.f32.mrb[9].mxu1 }
 0x10c   : > { %v1227_v29 = vadd.f32 %v1226_v25, %v1225_v23  ;;  %v1275_v30 = vadd.f32 %v1274_v26, %v1273_v24  ;;  %v1228_v31 = vpop.f32.mrb[10].mxu0  ;;  %v1276_v32 = vpop.f32.mrb[10].mxu1  ;;  %990 = vst [vmem:[%s1578_s8 + $0x18] sm:$0xff] %v958_v27  ;;  %1006 = vst [vmem:[%s1578_s8 + $0x98] sm:$0xff] %v974_v28 }
 0x10d   : > { %v1229_v33 = vpop.f32.mrb[11].mxu0  ;;  %v1277_v34 = vpop.f32.mrb[11].mxu1 }
 0x10e   : > { %v1230_v35 = vadd.f32 %v1229_v33, %v1228_v31  ;;  %v1278_v36 = vadd.f32 %v1277_v34, %v1276_v32  ;;  %v927_v37 = vadd.f32 %v1227_v29, %v1569_v56  ;;  %v943_v38 = vadd.f32 %v1275_v30, %v1569_v56 }
 0x110   : > { %v959_v39 = vmax.f32 %v927_v37, 0.0  ;;  %v975_v40 = vmax.f32 %v943_v38, 0.0  ;;  %v928_v41 = vadd.f32 %v1230_v35, %v1569_v56  ;;  %v944_v42 = vadd.f32 %v1278_v36, %v1569_v56 }
 0x112   : > { %v1231_v43 = vpop.f32.mrb[12].mxu0  ;;  %v1279_v44 = vpop.f32.mrb[12].mxu1  ;;  %991 = vst [vmem:[%s1578_s8 + $0x20] sm:$0xff] %v959_v39  ;;  %1007 = vst [vmem:[%s1578_s8 + $0xa0] sm:$0xff] %v975_v40  ;;  %v960_v47 = vmax.f32 %v928_v41, 0.0  ;;  %v976_v48 = vmax.f32 %v944_v42, 0.0 }
 0x113   : > { %v1232_v45 = vpop.f32.mrb[13].mxu0  ;;  %v1280_v46 = vpop.f32.mrb[13].mxu1 }
 0x114   : > { %v1233_v49 = vadd.f32 %v1232_v45, %v1231_v43  ;;  %v1281_v50 = vadd.f32 %v1280_v46, %v1279_v44  ;;  %v1234_v51 = vpop.f32.mrb[14].mxu0  ;;  %v1282_v52 = vpop.f32.mrb[14].mxu1  ;;  %992 = vst [vmem:[%s1578_s8 + $0x28] sm:$0xff] %v960_v47  ;;  %1008 = vst [vmem:[%s1578_s8 + $0xa8] sm:$0xff] %v976_v48 }
 0x115   : > { %v1235_v53 = vpop.f32.mrb[15].mxu0  ;;  %v1283_v54 = vpop.f32.mrb[15].mxu1 }
 0x116   : > { %v1236_v55 = vadd.f32 %v1235_v53, %v1234_v51  ;;  %v1284_v57 = vadd.f32 %v1283_v54, %v1282_v52  ;;  %v929_v58 = vadd.f32 %v1233_v49, %v1569_v56  ;;  %v945_v59 = vadd.f32 %v1281_v50, %v1569_v56 }
 0x118   : > { %v961_v60 = vmax.f32 %v929_v58, 0.0  ;;  %v977_v61 = vmax.f32 %v945_v59, 0.0  ;;  %v930_v62 = vadd.f32 %v1236_v55, %v1569_v56  ;;  %v946_v63 = vadd.f32 %v1284_v57, %v1569_v56 }
 0x11a   : > { %v1237_v0 = vpop.f32.mrb[16].mxu0  ;;  %v1285_v1 = vpop.f32.mrb[16].mxu1  ;;  %993 = vst [vmem:[%s1578_s8 + $0x30] sm:$0xff] %v961_v60  ;;  %1009 = vst [vmem:[%s1578_s8 + $0xb0] sm:$0xff] %v977_v61  ;;  %v962_v4 = vmax.f32 %v930_v62, 0.0  ;;  %v978_v5 = vmax.f32 %v946_v63, 0.0 }
 0x11b   : > { %v1238_v2 = vpop.f32.mrb[17].mxu0  ;;  %v1286_v3 = vpop.f32.mrb[17].mxu1 }
 0x11c   : > { %v1239_v6 = vadd.f32 %v1238_v2, %v1237_v0  ;;  %v1287_v7 = vadd.f32 %v1286_v3, %v1285_v1  ;;  %v1240_v8 = vpop.f32.mrb[18].mxu0  ;;  %v1288_v9 = vpop.f32.mrb[18].mxu1  ;;  %994 = vst [vmem:[%s1578_s8 + $0x38] sm:$0xff] %v962_v4  ;;  %1010 = vst [vmem:[%s1578_s8 + $0xb8] sm:$0xff] %v978_v5 }
 0x11d   : > { %v1241_v10 = vpop.f32.mrb[19].mxu0  ;;  %v1289_v11 = vpop.f32.mrb[19].mxu1 }
 0x11e   : > { %v1242_v12 = vadd.f32 %v1241_v10, %v1240_v8  ;;  %v1290_v13 = vadd.f32 %v1289_v11, %v1288_v9  ;;  %v931_v14 = vadd.f32 %v1239_v6, %v1569_v56  ;;  %v947_v15 = vadd.f32 %v1287_v7, %v1569_v56 }
 0x120   : > { %v963_v16 = vmax.f32 %v931_v14, 0.0  ;;  %v979_v17 = vmax.f32 %v947_v15, 0.0  ;;  %v932_v18 = vadd.f32 %v1242_v12, %v1569_v56  ;;  %v948_v19 = vadd.f32 %v1290_v13, %v1569_v56 }
 0x122   : > { %v1243_v20 = vpop.f32.mrb[20].mxu0  ;;  %v1291_v21 = vpop.f32.mrb[20].mxu1  ;;  %995 = vst [vmem:[%s1578_s8 + $0x40] sm:$0xff] %v963_v16  ;;  %1011 = vst [vmem:[%s1578_s8 + $0xc0] sm:$0xff] %v979_v17  ;;  %v964_v24 = vmax.f32 %v932_v18, 0.0  ;;  %v980_v25 = vmax.f32 %v948_v19, 0.0 }
 0x123   : > { %v1244_v22 = vpop.f32.mrb[21].mxu0  ;;  %v1292_v23 = vpop.f32.mrb[21].mxu1 }
 0x124   : > { %v1245_v26 = vadd.f32 %v1244_v22, %v1243_v20  ;;  %v1293_v27 = vadd.f32 %v1292_v23, %v1291_v21  ;;  %v1246_v28 = vpop.f32.mrb[22].mxu0  ;;  %v1294_v29 = vpop.f32.mrb[22].mxu1  ;;  %996 = vst [vmem:[%s1578_s8 + $0x48] sm:$0xff] %v964_v24  ;;  %1012 = vst [vmem:[%s1578_s8 + $0xc8] sm:$0xff] %v980_v25 }
 0x125   : > { %v1247_v30 = vpop.f32.mrb[23].mxu0  ;;  %v1295_v31 = vpop.f32.mrb[23].mxu1 }
 0x126   : > { %v1248_v32 = vadd.f32 %v1247_v30, %v1246_v28  ;;  %v1296_v33 = vadd.f32 %v1295_v31, %v1294_v29  ;;  %v933_v34 = vadd.f32 %v1245_v26, %v1569_v56  ;;  %v949_v35 = vadd.f32 %v1293_v27, %v1569_v56 }
 0x128   : > { %v965_v36 = vmax.f32 %v933_v34, 0.0  ;;  %v981_v37 = vmax.f32 %v949_v35, 0.0  ;;  %v934_v38 = vadd.f32 %v1248_v32, %v1569_v56  ;;  %v950_v39 = vadd.f32 %v1296_v33, %v1569_v56 }
 0x12a   : > { %v1249_v40 = vpop.f32.mrb[24].mxu0  ;;  %v1297_v41 = vpop.f32.mrb[24].mxu1  ;;  %997 = vst [vmem:[%s1578_s8 + $0x50] sm:$0xff] %v965_v36  ;;  %1013 = vst [vmem:[%s1578_s8 + $0xd0] sm:$0xff] %v981_v37  ;;  %v966_v44 = vmax.f32 %v934_v38, 0.0  ;;  %v982_v45 = vmax.f32 %v950_v39, 0.0 }
 0x12b   : > { %v1250_v42 = vpop.f32.mrb[25].mxu0  ;;  %v1298_v43 = vpop.f32.mrb[25].mxu1 }
 0x12c   : > { %v1251_v46 = vadd.f32 %v1250_v42, %v1249_v40  ;;  %v1299_v47 = vadd.f32 %v1298_v43, %v1297_v41  ;;  %v1252_v48 = vpop.f32.mrb[26].mxu0  ;;  %v1300_v49 = vpop.f32.mrb[26].mxu1  ;;  %998 = vst [vmem:[%s1578_s8 + $0x58] sm:$0xff] %v966_v44  ;;  %1014 = vst [vmem:[%s1578_s8 + $0xd8] sm:$0xff] %v982_v45 }
 0x12d   : > { %v1253_v50 = vpop.f32.mrb[27].mxu0  ;;  %v1301_v51 = vpop.f32.mrb[27].mxu1 }
 0x12e   : > { %v1254_v52 = vadd.f32 %v1253_v50, %v1252_v48  ;;  %v1302_v53 = vadd.f32 %v1301_v51, %v1300_v49  ;;  %v935_v54 = vadd.f32 %v1251_v46, %v1569_v56  ;;  %v951_v55 = vadd.f32 %v1299_v47, %v1569_v56 }
 0x130   : > { %v967_v57 = vmax.f32 %v935_v54, 0.0  ;;  %v983_v58 = vmax.f32 %v951_v55, 0.0  ;;  %v936_v59 = vadd.f32 %v1254_v52, %v1569_v56  ;;  %v952_v60 = vadd.f32 %v1302_v53, %v1569_v56 }
 0x132   : > { %v1255_v61 = vpop.f32.mrb[28].mxu0  ;;  %v1303_v62 = vpop.f32.mrb[28].mxu1  ;;  %999 = vst [vmem:[%s1578_s8 + $0x60] sm:$0xff] %v967_v57  ;;  %1015 = vst [vmem:[%s1578_s8 + $0xe0] sm:$0xff] %v983_v58  ;;  %v968_v1 = vmax.f32 %v936_v59, 0.0  ;;  %v984_v2 = vmax.f32 %v952_v60, 0.0 }
 0x133   : > { %v1256_v63 = vpop.f32.mrb[29].mxu0  ;;  %v1304_v0 = vpop.f32.mrb[29].mxu1 }
 0x134   : > { %v1257_v3 = vadd.f32 %v1256_v63, %v1255_v61  ;;  %v1305_v4 = vadd.f32 %v1304_v0, %v1303_v62  ;;  %v1258_v5 = vpop.f32.mrb[30].mxu0  ;;  %v1306_v6 = vpop.f32.mrb[30].mxu1  ;;  %1000 = vst [vmem:[%s1578_s8 + $0x68] sm:$0xff] %v968_v1  ;;  %1016 = vst [vmem:[%s1578_s8 + $0xe8] sm:$0xff] %v984_v2 }
 0x135   : > { %v1259_v7 = vpop.f32.mrb[31].mxu0  ;;  %v1307_v8 = vpop.f32.mrb[31].mxu1 }
 0x136   : > { %v1260_v9 = vadd.f32 %v1259_v7, %v1258_v5  ;;  %v1308_v10 = vadd.f32 %v1307_v8, %v1306_v6  ;;  %v937_v11 = vadd.f32 %v1257_v3, %v1569_v56  ;;  %v953_v12 = vadd.f32 %v1305_v4, %v1569_v56 }
 0x138   : > { %v969_v13 = vmax.f32 %v937_v11, 0.0  ;;  %v985_v14 = vmax.f32 %v953_v12, 0.0  ;;  %v938_v15 = vadd.f32 %v1260_v9, %v1569_v56  ;;  %v954_v16 = vadd.f32 %v1308_v10, %v1569_v56 }
 0x13a   : > { %1001 = vst [vmem:[%s1578_s8 + $0x70] sm:$0xff] %v969_v13  ;;  %1017 = vst [vmem:[%s1578_s8 + $0xf0] sm:$0xff] %v985_v14  ;;  %v970_v17 = vmax.f32 %v938_v15, 0.0  ;;  %v986_v18 = vmax.f32 %v954_v16, 0.0 }
 0x13c   : > { %1002 = vst [vmem:[%s1578_s8 + $0x78] sm:$0xff] %v970_v17  ;;  %1018 = vst [vmem:[%s1578_s8 + $0xf8] sm:$0xff] %v986_v18 }
 0x13d PF: > { %s13_s14 = sadd.s32 1, %s1436_s14   ;;  %s1655_s12 = smov %s1432_s13 }
 0x13e   : > { %p10_p5 = scmp.ge.s32.totalorder %s13_s14, 4   ;;  %s1656_s13 = smov %s1658_s15 }
 0x140   :  { %12 = sbr.rel (!%p10_p5) target bundleno = 2 (0x2), region = 76 }

// kernel: resnet18_forward.26
= control target key start
LH: loop header
LB: loop body
LE: loop exit
PB: predicated region body
PF: predicated region fallthrough
CT: control target
= control target key end

     0   :  { %vm152_vm0 = vcmask 523264   ;;  %s1095_s0 = inlined_call_operand.vmem [shape: f32[9,128,64], index: 0, kind: input, shape index: {}]   ;;  %s1096_s1 = inlined_call_operand.vmem [shape: f32[128,64], index: 1, kind: output, shape index: {}]  }
   0x1   :  { %v8_v0 = vld [vmem:[%s1095_s0] sm:$0xff]  ;;  %v9_v13 = vld [vmem:[%s1095_s0 + $0x8] sm:$0xff]  ;;  %v10_v32 = vld [vmem:[%s1095_s0 + $0x10] sm:$0xff] }
   0x2   :  { %v24_v1 = vld [vmem:[%s1095_s0 + $0x80] sm:$0xff]  ;;  %v153_v5 = vsel %vm152_vm0, %v8_v0, -inf  ;;  %v25_v14 = vld [vmem:[%s1095_s0 + $0x88] sm:$0xff]  ;;  %v170_v19 = vsel %vm152_vm0, %v9_v13, -inf  ;;  %v26_v33 = vld [vmem:[%s1095_s0 + $0x90] sm:$0xff]  ;;  %v187_v38 = vsel %vm152_vm0, %v10_v32, -inf }
   0x3   :  { %v40_v2 = vld [vmem:[%s1095_s0 + $0x100] sm:$0xff]  ;;  %v154_v6 = vsel %vm152_vm0, %v24_v1, -inf  ;;  %v41_v15 = vld [vmem:[%s1095_s0 + $0x108] sm:$0xff]  ;;  %v171_v20 = vsel %vm152_vm0, %v25_v14, -inf  ;;  %v42_v34 = vld [vmem:[%s1095_s0 + $0x110] sm:$0xff]  ;;  %v188_v39 = vsel %vm152_vm0, %v26_v33, -inf }
   0x4   :  { %v56_v3 = vld [vmem:[%s1095_s0 + $0x180] sm:$0xff]  ;;  %v156_v7 = vsel %vm152_vm0, %v40_v2, -inf  ;;  %v155_v11 = vmax.f32 %v153_v5, %v154_v6  ;;  %v57_v18 = vld [vmem:[%s1095_s0 + $0x188] sm:$0xff]  ;;  %v173_v21 = vsel %vm152_vm0, %v41_v15, -inf  ;;  %v172_v27 = vmax.f32 %v170_v19, %v171_v20  ;;  %v58_v37 = vld [vmem:[%s1095_s0 + $0x190] sm:$0xff] }
   0x5   :  { %v72_v4 = vld [vmem:[%s1095_s0 + $0x200] sm:$0xff]  ;;  %v158_v12 = vsel %vm152_vm0, %v56_v3, -inf  ;;  %v73_v24 = vld [vmem:[%s1095_s0 + $0x208] sm:$0xff]  ;;  %v175_v31 = vsel %vm152_vm0, %v57_v18, -inf  ;;  %v190_v40 = vsel %vm152_vm0, %v42_v34, -inf  ;;  %v74_v45 = vld [vmem:[%s1095_s0 + $0x210] sm:$0xff]  ;;  %v189_v46 = vmax.f32 %v187_v38, %v188_v39 }
   0x6   :  { %v88_v8 = vld [vmem:[%s1095_s0 + $0x280] sm:$0xff]  ;;  %v157_v17 = vmax.f32 %v155_v11, %v156_v7  ;;  %v160_v22 = vsel %vm152_vm0, %v72_v4, -inf  ;;  %v89_v25 = vld [vmem:[%s1095_s0 + $0x288] sm:$0xff]  ;;  %v174_v36 = vmax.f32 %v172_v27, %v173_v21  ;;  %v177_v44 = vsel %vm152_vm0, %v73_v24, -inf  ;;  %v11_v51 = vld [vmem:[%s1095_s0 + $0x18] sm:$0xff] }
   0x7   :  { %v104_v9 = vld [vmem:[%s1095_s0 + $0x300] sm:$0xff]  ;;  %v162_v23 = vsel %vm152_vm0, %v88_v8, -inf  ;;  %v105_v26 = vld [vmem:[%s1095_s0 + $0x308] sm:$0xff]  ;;  %v179_v48 = vsel %vm152_vm0, %v89_v25, -inf  ;;  %v192_v50 = vsel %vm152_vm0, %v58_v37, -inf  ;;  %v27_v52 = vld [vmem:[%s1095_s0 + $0x98] sm:$0xff]  ;;  %v191_v58 = vmax.f32 %v189_v46, %v190_v40 }
   0x8   :  { %v120_v10 = vld [vmem:[%s1095_s0 + $0x380] sm:$0xff]  ;;  %v159_v28 = vmax.f32 %v157_v17, %v158_v12  ;;  %v164_v29 = vsel %vm152_vm0, %v104_v9, -inf  ;;  %v121_v35 = vld [vmem:[%s1095_s0 + $0x388] sm:$0xff]  ;;  %v176_v47 = vmax.f32 %v174_v36, %v175_v31  ;;  %v181_v49 = vsel %vm152_vm0, %v105_v26, -inf  ;;  %v43_v53 = vld [vmem:[%s1095_s0 + $0x118] sm:$0xff] }
   0x9   :  { %v136_v16 = vld [vmem:[%s1095_s0 + $0x400] sm:$0xff]  ;;  %v166_v30 = vsel %vm152_vm0, %v120_v10, -inf  ;;  %v137_v43 = vld [vmem:[%s1095_s0 + $0x408] sm:$0xff]  ;;  %v183_v55 = vsel %vm152_vm0, %v121_v35, -inf  ;;  %v90_v56 = vld [vmem:[%s1095_s0 + $0x290] sm:$0xff]  ;;  %v204_v60 = vsel %vm152_vm0, %v11_v51, -inf  ;;  %v193_v4 = vmax.f32 %v191_v58, %v192_v50 }
   0xa   :  { %v161_v41 = vmax.f32 %v159_v28, %v160_v22  ;;  %v168_v42 = vsel %vm152_vm0, %v136_v16, -inf  ;;  %v106_v57 = vld [vmem:[%s1095_s0 + $0x310] sm:$0xff]  ;;  %v59_v59 = vld [vmem:[%s1095_s0 + $0x198] sm:$0xff]  ;;  %v178_v61 = vmax.f32 %v176_v47, %v177_v44  ;;  %v194_v62 = vsel %vm152_vm0, %v74_v45, -inf  ;;  %v12_v6 = vld [vmem:[%s1095_s0 + $0x20] sm:$0xff] }
   0xb   :  { %v75_v63 = vld [vmem:[%s1095_s0 + $0x218] sm:$0xff]  ;;  %v205_v0 = vsel %vm152_vm0, %v27_v52, -inf  ;;  %v207_v1 = vsel %vm152_vm0, %v43_v53, -inf  ;;  %v185_v3 = vsel %vm152_vm0, %v137_v43, -inf  ;;  %v28_v7 = vld [vmem:[%s1095_s0 + $0xa0] sm:$0xff]  ;;  %v196_v10 = vsel %vm152_vm0, %v90_v56, -inf }
   0xc   :  { %v163_v54 = vmax.f32 %v161_v41, %v162_v23  ;;  %v206_v5 = vmax.f32 %v204_v60, %v205_v0  ;;  %v44_v8 = vld [vmem:[%s1095_s0 + $0x120] sm:$0xff]  ;;  %v180_v9 = vmax.f32 %v178_v61, %v179_v48  ;;  %v198_v11 = vsel %vm152_vm0, %v106_v57, -inf  ;;  %v122_v14 = vld [vmem:[%s1095_s0 + $0x390] sm:$0xff]  ;;  %v91_v16 = vld [vmem:[%s1095_s0 + $0x298] sm:$0xff] }
   0xd   :  { %v209_v12 = vsel %vm152_vm0, %v59_v59, -inf  ;;  %v195_v15 = vmax.f32 %v193_v4, %v194_v62  ;;  %v211_v18 = vsel %vm152_vm0, %v75_v63, -inf  ;;  %v60_v19 = vld [vmem:[%s1095_s0 + $0x1a0] sm:$0xff]  ;;  %v138_v21 = vld [vmem:[%s1095_s0 + $0x410] sm:$0xff]  ;;  %v221_v22 = vsel %vm152_vm0, %v12_v6, -inf  ;;  %v107_v27 = vld [vmem:[%s1095_s0 + $0x318] sm:$0xff] }
   0xe   :  { %v165_v2 = vmax.f32 %v163_v54, %v164_v29  ;;  %v208_v17 = vmax.f32 %v206_v5, %v207_v1  ;;  %v182_v20 = vmax.f32 %v180_v9, %v181_v49  ;;  %v222_v23 = vsel %vm152_vm0, %v28_v7, -inf  ;;  %v76_v29 = vld [vmem:[%s1095_s0 + $0x220] sm:$0xff]  ;;  %v13_v31 = vld [vmem:[%s1095_s0 + $0x28] sm:$0xff]  ;;  %v123_v39 = vld [vmem:[%s1095_s0 + $0x398] sm:$0xff] }
   0xf   :  { %v224_v24 = vsel %vm152_vm0, %v44_v8, -inf  ;;  %v197_v26 = vmax.f32 %v195_v15, %v196_v10  ;;  %v200_v33 = vsel %vm152_vm0, %v122_v14, -inf  ;;  %v213_v34 = vsel %vm152_vm0, %v91_v16, -inf  ;;  %v29_v36 = vld [vmem:[%s1095_s0 + $0xa8] sm:$0xff]  ;;  %v92_v41 = vld [vmem:[%s1095_s0 + $0x2a0] sm:$0xff]  ;;  %v139_v50 = vld [vmem:[%s1095_s0 + $0x418] sm:$0xff] }
  0x10   :  { %v167_v13 = vmax.f32 %v165_v2, %v166_v30  ;;  %v210_v28 = vmax.f32 %v208_v17, %v209_v12  ;;  %v223_v30 = vmax.f32 %v221_v22, %v222_v23  ;;  %v184_v32 = vmax.f32 %v182_v20, %v183_v55  ;;  %v45_v43 = vld [vmem:[%s1095_s0 + $0x128] sm:$0xff]  ;;  %v108_v52 = vld [vmem:[%s1095_s0 + $0x320] sm:$0xff]  ;;  %v14_v60 = vld [vmem:[%s1095_s0 + $0x30] sm:$0xff] }
  0x11   :  { %v226_v35 = vsel %vm152_vm0, %v60_v19, -inf  ;;  %v199_v37 = vmax.f32 %v197_v26, %v198_v11  ;;  %v202_v38 = vsel %vm152_vm0, %v138_v21, -inf  ;;  %v215_v45 = vsel %vm152_vm0, %v107_v27, -inf  ;;  %v61_v47 = vld [vmem:[%s1095_s0 + $0x1a8] sm:$0xff]  ;;  %v30_v61 = vld [vmem:[%s1095_s0 + $0xb0] sm:$0xff]  ;;  %v124_v0 = vld [vmem:[%s1095_s0 + $0x3a0] sm:$0xff] }
  0x12   :  { %v169_v25 = vmax.f32 %v167_v13, %v168_v42  ;;  %v212_v40 = vmax.f32 %v210_v28, %v211_v18  ;;  %v225_v42 = vmax.f32 %v223_v30, %v224_v24  ;;  %v186_v44 = vmax.f32 %v184_v32, %v185_v3  ;;  %v77_v54 = vld [vmem:[%s1095_s0 + $0x228] sm:$0xff]  ;;  %v46_v3 = vld [vmem:[%s1095_s0 + $0x130] sm:$0xff]  ;;  %v140_v11 = vld [vmem:[%s1095_s0 + $0x420] sm:$0xff] }
  0x13   :  { %v228_v46 = vsel %vm152_vm0, %v76_v29, -inf  ;;  %v238_v48 = vsel %vm152_vm0, %v13_v31, -inf  ;;  %v201_v49 = vmax.f32 %v199_v37, %v200_v33  ;;  %v239_v55 = vsel %vm152_vm0, %v29_v36, -inf  ;;  %v93_v6 = vld [vmem:[%s1095_s0 + $0x2a8] sm:$0xff]  ;;  %v62_v9 = vld [vmem:[%s1095_s0 + $0x1b0] sm:$0xff]  ;;  %v15_v21 = vld [vmem:[%s1095_s0 + $0x38] sm:$0xff] }
  0x14   :  { %425 = vst.msk [vmem:[%s1096_s1] sm:$0xff] %vm152_vm0, %v169_v25  ;;  %v214_v51 = vmax.f32 %v212_v40, %v213_v34  ;;  %v227_v53 = vmax.f32 %v225_v42, %v226_v35  ;;  %426 = vst.msk [vmem:[%s1096_s1 + $0x8] sm:$0xff] %vm152_vm0, %v186_v44  ;;  %v217_v56 = vsel %vm152_vm0, %v123_v39, -inf  ;;  %v230_v57 = vsel %vm152_vm0, %v92_v41, -inf  ;;  %v109_v13 = vld [vmem:[%s1095_s0 + $0x328] sm:$0xff]  ;;  %v78_v18 = vld [vmem:[%s1095_s0 + $0x230] sm:$0xff] }
  0x15   :  { %v240_v58 = vmax.f32 %v238_v48, %v239_v55  ;;  %v241_v59 = vsel %vm152_vm0, %v45_v43, -inf  ;;  %v203_v62 = vmax.f32 %v201_v49, %v202_v38  ;;  %v243_v2 = vsel %vm152_vm0, %v61_v47, -inf  ;;  %v31_v22 = vld [vmem:[%s1095_s0 + $0xb8] sm:$0xff]  ;;  %v125_v29 = vld [vmem:[%s1095_s0 + $0x3a8] sm:$0xff]  ;;  %v94_v32 = vld [vmem:[%s1095_s0 + $0x2b0] sm:$0xff] }
  0x16   :  { %v216_v63 = vmax.f32 %v214_v51, %v215_v45  ;;  %v229_v1 = vmax.f32 %v227_v53, %v228_v46  ;;  %v219_v4 = vsel %vm152_vm0, %v139_v50, -inf  ;;  %v232_v5 = vsel %vm152_vm0, %v108_v52, -inf  ;;  %v47_v27 = vld [vmem:[%s1095_s0 + $0x138] sm:$0xff]  ;;  %v141_v36 = vld [vmem:[%s1095_s0 + $0x428] sm:$0xff]  ;;  %v110_v37 = vld [vmem:[%s1095_s0 + $0x330] sm:$0xff] }
  0x17   :  { %v242_v7 = vmax.f32 %v240_v58, %v241_v59  ;;  %v245_v8 = vsel %vm152_vm0, %v77_v54, -inf  ;;  %427 = vst.msk [vmem:[%s1096_s1 + $0x10] sm:$0xff] %vm152_vm0, %v203_v62  ;;  %v255_v14 = vsel %vm152_vm0, %v14_v60, -inf  ;;  %v256_v15 = vsel %vm152_vm0, %v30_v61, -inf  ;;  %v63_v34 = vld [vmem:[%s1095_s0 + $0x1b8] sm:$0xff]  ;;  %v16_v46 = vld [vmem:[%s1095_s0 + $0x40] sm:$0xff] }
  0x18   :  { %v218_v10 = vmax.f32 %v216_v63, %v217_v56  ;;  %v231_v12 = vmax.f32 %v229_v1, %v230_v57  ;;  %v234_v16 = vsel %vm152_vm0, %v124_v0, -inf  ;;  %v257_v19 = vmax.f32 %v255_v14, %v256_v15  ;;  %v79_v43 = vld [vmem:[%s1095_s0 + $0x238] sm:$0xff]  ;;  %v32_v47 = vld [vmem:[%s1095_s0 + $0xc0] sm:$0xff]  ;;  %v126_v50 = vld [vmem:[%s1095_s0 + $0x3b0] sm:$0xff] }
  0x19   :  { %v244_v17 = vmax.f32 %v242_v7, %v243_v2  ;;  %v258_v20 = vsel %vm152_vm0, %v46_v3, -inf  ;;  %v247_v25 = vsel %vm152_vm0, %v93_v6, -inf  ;;  %v260_v26 = vsel %vm152_vm0, %v62_v9, -inf  ;;  %v95_v56 = vld [vmem:[%s1095_s0 + $0x2b8] sm:$0xff]  ;;  %v48_v58 = vld [vmem:[%s1095_s0 + $0x140] sm:$0xff]  ;;  %v142_v60 = vld [vmem:[%s1095_s0 + $0x430] sm:$0xff] }
  0x1a   :  { %v220_v23 = vmax.f32 %v218_v10, %v219_v4  ;;  %v233_v24 = vmax.f32 %v231_v12, %v232_v5  ;;  %v236_v28 = vsel %vm152_vm0, %v140_v11, -inf  ;;  %v249_v31 = vsel %vm152_vm0, %v109_v13, -inf  ;;  %v64_v59 = vld [vmem:[%s1095_s0 + $0x1c0] sm:$0xff]  ;;  %v111_v3 = vld [vmem:[%s1095_s0 + $0x338] sm:$0xff]  ;;  %v17_v7 = vld [vmem:[%s1095_s0 + $0x48] sm:$0xff] }
  0x1b   :  { %v246_v30 = vmax.f32 %v244_v17, %v245_v8  ;;  %v259_v33 = vmax.f32 %v257_v19, %v258_v20  ;;  %v262_v38 = vsel %vm152_vm0, %v78_v18, -inf  ;;  %v272_v39 = vsel %vm152_vm0, %v15_v21, -inf  ;;  %v80_v5 = vld [vmem:[%s1095_s0 + $0x240] sm:$0xff]  ;;  %v33_v12 = vld [vmem:[%s1095_s0 + $0xc8] sm:$0xff]  ;;  %v127_v15 = vld [vmem:[%s1095_s0 + $0x3b8] sm:$0xff] }
  0x1c   :  { %428 = vst.msk [vmem:[%s1096_s1 + $0x18] sm:$0xff] %vm152_vm0, %v220_v23  ;;  %v235_v35 = vmax.f32 %v233_v24, %v234_v16  ;;  %v273_v40 = vsel %vm152_vm0, %v31_v22, -inf  ;;  %v275_v45 = vsel %vm152_vm0, %v47_v27, -inf  ;;  %v251_v49 = vsel %vm152_vm0, %v125_v29, -inf  ;;  %v96_v17 = vld [vmem:[%s1095_s0 + $0x2c0] sm:$0xff]  ;;  %v49_v19 = vld [vmem:[%s1095_s0 + $0x148] sm:$0xff] }
  0x1d   :  { %v248_v41 = vmax.f32 %v246_v30, %v247_v25  ;;  %v261_v42 = vmax.f32 %v259_v33, %v260_v26  ;;  %v274_v44 = vmax.f32 %v272_v39, %v273_v40  ;;  %v264_v51 = vsel %vm152_vm0, %v94_v32, -inf  ;;  %v65_v23 = vld [vmem:[%s1095_s0 + $0x1c8] sm:$0xff]  ;;  %v143_v26 = vld [vmem:[%s1095_s0 + $0x438] sm:$0xff]  ;;  %v128_v40 = vld [vmem:[%s1095_s0 + $0x3c0] sm:$0xff] }
  0x1e   :  { %v237_v48 = vmax.f32 %v235_v35, %v236_v28  ;;  %v277_v52 = vsel %vm152_vm0, %v63_v34, -inf  ;;  %v253_v54 = vsel %vm152_vm0, %v141_v36, -inf  ;;  %v266_v61 = vsel %vm152_vm0, %v110_v37, -inf  ;;  %v112_v28 = vld [vmem:[%s1095_s0 + $0x340] sm:$0xff]  ;;  %v81_v30 = vld [vmem:[%s1095_s0 + $0x248] sm:$0xff]  ;;  %v18_v36 = vld [vmem:[%s1095_s0 + $0x50] sm:$0xff] }
  0x1f   :  { %v250_v53 = vmax.f32 %v248_v41, %v249_v31  ;;  %v263_v55 = vmax.f32 %v261_v42, %v262_v38  ;;  %v276_v57 = vmax.f32 %v274_v44, %v275_v45  ;;  %v279_v62 = vsel %vm152_vm0, %v79_v43, -inf  ;;  %v34_v37 = vld [vmem:[%s1095_s0 + $0xd0] sm:$0xff] }
  0x20   :  { %429 = vst.msk [vmem:[%s1096_s1 + $0x20] sm:$0xff] %vm152_vm0, %v237_v48  ;;  %v289_v63 = vsel %vm152_vm0, %v16_v46, -inf  ;;  %v290_v0 = vsel %vm152_vm0, %v32_v47, -inf  ;;  %v268_v8 = vsel %vm152_vm0, %v126_v50, -inf  ;;  %v281_v9 = vsel %vm152_vm0, %v95_v56, -inf  ;;  %v50_v43 = vld [vmem:[%s1095_s0 + $0x150] sm:$0xff] }
  0x21   :  { %v252_v1 = vmax.f32 %v250_v53, %v251_v49  ;;  %v265_v2 = vmax.f32 %v263_v55, %v264_v51  ;;  %v278_v4 = vmax.f32 %v276_v57, %v277_v52  ;;  %v291_v6 = vmax.f32 %v289_v63, %v290_v0  ;;  %v97_v46 = vld [vmem:[%s1095_s0 + $0x2c8] sm:$0xff]  ;;  %v66_v49 = vld [vmem:[%s1095_s0 + $0x1d0] sm:$0xff]  ;;  %v144_v51 = vld [vmem:[%s1095_s0 + $0x440] sm:$0xff] }
  0x22   :  { %v292_v10 = vsel %vm152_vm0, %v48_v58, -inf  ;;  %v294_v11 = vsel %vm152_vm0, %v64_v59, -inf  ;;  %v270_v20 = vsel %vm152_vm0, %v142_v60, -inf  ;;  %v283_v21 = vsel %vm152_vm0, %v111_v3, -inf  ;;  %v113_v53 = vld [vmem:[%s1095_s0 + $0x348] sm:$0xff]  ;;  %v82_v58 = vld [vmem:[%s1095_s0 + $0x250] sm:$0xff] }
  0x23   :  { %v254_v13 = vmax.f32 %v252_v1, %v253_v54  ;;  %v267_v14 = vmax.f32 %v265_v2, %v266_v61  ;;  %v280_v16 = vmax.f32 %v278_v4, %v279_v62  ;;  %v293_v18 = vmax.f32 %v291_v6, %v292_v10  ;;  %v19_v61 = vld [vmem:[%s1095_s0 + $0x58] sm:$0xff] }
  0x24   :  { %v296_v22 = vsel %vm152_vm0, %v80_v5, -inf  ;;  %v306_v24 = vsel %vm152_vm0, %v17_v7, -inf  ;;  %v307_v31 = vsel %vm152_vm0, %v33_v12, -inf  ;;  %v285_v32 = vsel %vm152_vm0, %v127_v15, -inf  ;;  %v35_v62 = vld [vmem:[%s1095_s0 + $0xd8] sm:$0xff]  ;;  %v129_v5 = vld [vmem:[%s1095_s0 + $0x3c8] sm:$0xff] }
  0x25   :  { %430 = vst.msk [vmem:[%s1096_s1 + $0x28] sm:$0xff] %vm152_vm0, %v254_v13  ;;  %v269_v25 = vmax.f32 %v267_v14, %v268_v8  ;;  %v282_v27 = vmax.f32 %v280_v16, %v281_v9  ;;  %v295_v29 = vmax.f32 %v293_v18, %v294_v11  ;;  %v298_v33 = vsel %vm152_vm0, %v96_v17, -inf  ;;  %v51_v3 = vld [vmem:[%s1095_s0 + $0x158] sm:$0xff]  ;;  %v98_v8 = vld [vmem:[%s1095_s0 + $0x2d0] sm:$0xff]  ;;  %v145_v12 = vld [vmem:[%s1095_s0 + $0x448] sm:$0xff] }
  0x26   :  { %v308_v34 = vmax.f32 %v306_v24, %v307_v31  ;;  %v309_v35 = vsel %vm152_vm0, %v49_v19, -inf  ;;  %v311_v42 = vsel %vm152_vm0, %v65_v23, -inf  ;;  %v287_v44 = vsel %vm152_vm0, %v143_v26, -inf  ;;  %v67_v10 = vld [vmem:[%s1095_s0 + $0x1d8] sm:$0xff]  ;;  %v114_v13 = vld [vmem:[%s1095_s0 + $0x350] sm:$0xff]  ;;  %v36_v23 = vld [vmem:[%s1095_s0 + $0xe0] sm:$0xff] }
  0x27   :  { %v271_v38 = vmax.f32 %v269_v25, %v270_v20  ;;  %v284_v39 = vmax.f32 %v282_v27, %v283_v21  ;;  %v297_v41 = vmax.f32 %v295_v29, %v296_v22  ;;  %v300_v45 = vsel %vm152_vm0, %v112_v28, -inf  ;;  %v83_v19 = vld [vmem:[%s1095_s0 + $0x258] sm:$0xff]  ;;  %v20_v22 = vld [vmem:[%s1095_s0 + $0x60] sm:$0xff]  ;;  %v130_v26 = vld [vmem:[%s1095_s0 + $0x3d0] sm:$0xff] }
  0x28   :  { %v310_v47 = vmax.f32 %v308_v34, %v309_v35  ;;  %v313_v48 = vsel %vm152_vm0, %v81_v30, -inf  ;;  %v323_v54 = vsel %vm152_vm0, %v18_v36, -inf  ;;  %v324_v55 = vsel %vm152_vm0, %v34_v37, -inf  ;;  %v52_v34 = vld [vmem:[%s1095_s0 + $0x160] sm:$0xff]  ;;  %v146_v36 = vld [vmem:[%s1095_s0 + $0x450] sm:$0xff] }
  0x29   :  { %431 = vst.msk [vmem:[%s1096_s1 + $0x30] sm:$0xff] %vm152_vm0, %v271_v38  ;;  %v286_v50 = vmax.f32 %v284_v39, %v285_v32  ;;  %v299_v52 = vmax.f32 %v297_v41, %v298_v33  ;;  %v302_v56 = vsel %vm152_vm0, %v128_v40, -inf  ;;  %v325_v59 = vmax.f32 %v323_v54, %v324_v55  ;;  %v99_v32 = vld [vmem:[%s1095_s0 + $0x2d8] sm:$0xff]  ;;  %v68_v35 = vld [vmem:[%s1095_s0 + $0x1e0] sm:$0xff] }
  0x2a   :  { %v312_v57 = vmax.f32 %v310_v47, %v311_v42  ;;  %v326_v60 = vsel %vm152_vm0, %v50_v43, -inf  ;;  %v315_v1 = vsel %vm152_vm0, %v97_v46, -inf  ;;  %v328_v2 = vsel %vm152_vm0, %v66_v49, -inf  ;;  %v115_v43 = vld [vmem:[%s1095_s0 + $0x358] sm:$0xff]  ;;  %v21_v47 = vld [vmem:[%s1095_s0 + $0x68] sm:$0xff] }
  0x2b   :  { %v288_v63 = vmax.f32 %v286_v50, %v287_v44  ;;  %v301_v0 = vmax.f32 %v299_v52, %v300_v45  ;;  %v304_v4 = vsel %vm152_vm0, %v144_v51, -inf  ;;  %v317_v7 = vsel %vm152_vm0, %v113_v53, -inf  ;;  %v84_v45 = vld [vmem:[%s1095_s0 + $0x260] sm:$0xff]  ;;  %v37_v52 = vld [vmem:[%s1095_s0 + $0xe8] sm:$0xff]  ;;  %v131_v55 = vld [vmem:[%s1095_s0 + $0x3d8] sm:$0xff] }
  0x2c   :  { %v314_v6 = vmax.f32 %v312_v57, %v313_v48  ;;  %v327_v9 = vmax.f32 %v325_v59, %v326_v60  ;;  %v330_v14 = vsel %vm152_vm0, %v82_v58, -inf  ;;  %v340_v15 = vsel %vm152_vm0, %v19_v61, -inf  ;;  %v100_v57 = vld [vmem:[%s1095_s0 + $0x2e0] sm:$0xff]  ;;  %v53_v59 = vld [vmem:[%s1095_s0 + $0x168] sm:$0xff] }
  0x2d   :  { %432 = vst.msk [vmem:[%s1096_s1 + $0x38] sm:$0xff] %vm152_vm0, %v288_v63  ;;  %v303_v11 = vmax.f32 %v301_v0, %v302_v56  ;;  %v341_v16 = vsel %vm152_vm0, %v35_v62, -inf  ;;  %v343_v21 = vsel %vm152_vm0, %v51_v3, -inf  ;;  %v319_v25 = vsel %vm152_vm0, %v129_v5, -inf  ;;  %v69_v63 = vld [vmem:[%s1095_s0 + $0x1e8] sm:$0xff] }
  0x2e   :  { %v316_v17 = vmax.f32 %v314_v6, %v315_v1  ;;  %v329_v18 = vmax.f32 %v327_v9, %v328_v2  ;;  %v342_v20 = vmax.f32 %v340_v15, %v341_v16  ;;  %v332_v27 = vsel %vm152_vm0, %v98_v8, -inf  ;;  %v147_v2 = vld [vmem:[%s1095_s0 + $0x458] sm:$0xff]  ;;  %v85_v6 = vld [vmem:[%s1095_s0 + $0x268] sm:$0xff]  ;;  %v132_v16 = vld [vmem:[%s1095_s0 + $0x3e0] sm:$0xff] }
  0x2f   :  { %v305_v24 = vmax.f32 %v303_v11, %v304_v4  ;;  %v345_v28 = vsel %vm152_vm0, %v67_v10, -inf  ;;  %v321_v30 = vsel %vm152_vm0, %v145_v12, -inf  ;;  %v334_v37 = vsel %vm152_vm0, %v114_v13, -inf  ;;  %v116_v4 = vld [vmem:[%s1095_s0 + $0x360] sm:$0xff]  ;;  %v22_v12 = vld [vmem:[%s1095_s0 + $0x70] sm:$0xff] }
  0x30   :  { %v318_v29 = vmax.f32 %v316_v17, %v317_v7  ;;  %v331_v31 = vmax.f32 %v329_v18, %v330_v14  ;;  %v344_v33 = vmax.f32 %v342_v20, %v343_v21  ;;  %v347_v38 = vsel %vm152_vm0, %v83_v19, -inf  ;;  %v38_v13 = vld [vmem:[%s1095_s0 + $0xf0] sm:$0xff] }
  0x31   :  { %433 = vst.msk [vmem:[%s1096_s1 + $0x40] sm:$0xff] %vm152_vm0, %v305_v24  ;;  %v357_v39 = vsel %vm152_vm0, %v20_v22, -inf  ;;  %v358_v40 = vsel %vm152_vm0, %v36_v23, -inf  ;;  %v336_v48 = vsel %vm152_vm0, %v130_v26, -inf  ;;  %v349_v49 = vsel %vm152_vm0, %v99_v32, -inf  ;;  %v54_v19 = vld [vmem:[%s1095_s0 + $0x170] sm:$0xff] }
  0x32   :  { %v320_v41 = vmax.f32 %v318_v29, %v319_v25  ;;  %v333_v42 = vmax.f32 %v331_v31, %v332_v27  ;;  %v346_v44 = vmax.f32 %v344_v33, %v345_v28  ;;  %v359_v46 = vmax.f32 %v357_v39, %v358_v40  ;;  %v101_v22 = vld [vmem:[%s1095_s0 + $0x2e8] sm:$0xff]  ;;  %v70_v25 = vld [vmem:[%s1095_s0 + $0x1f0] sm:$0xff]  ;;  %v148_v27 = vld [vmem:[%s1095_s0 + $0x460] sm:$0xff] }
  0x33   :  { %v360_v50 = vsel %vm152_vm0, %v52_v34, -inf  ;;  %v362_v51 = vsel %vm152_vm0, %v68_v35, -inf  ;;  %v338_v60 = vsel %vm152_vm0, %v146_v36, -inf  ;;  %v351_v61 = vsel %vm152_vm0, %v115_v43, -inf  ;;  %v117_v29 = vld [vmem:[%s1095_s0 + $0x368] sm:$0xff]  ;;  %v86_v34 = vld [vmem:[%s1095_s0 + $0x270] sm:$0xff] }
  0x34   :  { %v322_v53 = vmax.f32 %v320_v41, %v321_v30  ;;  %v335_v54 = vmax.f32 %v333_v42, %v334_v37  ;;  %v348_v56 = vmax.f32 %v346_v44, %v347_v38  ;;  %v361_v58 = vmax.f32 %v359_v46, %v360_v50  ;;  %v23_v37 = vld [vmem:[%s1095_s0 + $0x78] sm:$0xff] }
  0x35   :  { %v364_v62 = vsel %vm152_vm0, %v84_v45, -inf  ;;  %v374_v0 = vsel %vm152_vm0, %v21_v47, -inf  ;;  %v375_v7 = vsel %vm152_vm0, %v37_v52, -inf  ;;  %v353_v8 = vsel %vm152_vm0, %v131_v55, -inf  ;;  %v39_v38 = vld [vmem:[%s1095_s0 + $0xf8] sm:$0xff]  ;;  %v133_v45 = vld [vmem:[%s1095_s0 + $0x3e8] sm:$0xff] }
  0x36   :  { %434 = vst.msk [vmem:[%s1096_s1 + $0x48] sm:$0xff] %vm152_vm0, %v322_v53  ;;  %v337_v1 = vmax.f32 %v335_v54, %v336_v48  ;;  %v350_v3 = vmax.f32 %v348_v56, %v349_v49  ;;  %v363_v5 = vmax.f32 %v361_v58, %v362_v51  ;;  %v366_v9 = vsel %vm152_vm0, %v100_v57, -inf  ;;  %v55_v43 = vld [vmem:[%s1095_s0 + $0x178] sm:$0xff]  ;;  %v102_v48 = vld [vmem:[%s1095_s0 + $0x2f0] sm:$0xff]  ;;  %v149_v55 = vld [vmem:[%s1095_s0 + $0x468] sm:$0xff] }
  0x37   :  { %v376_v10 = vmax.f32 %v374_v0, %v375_v7  ;;  %v377_v11 = vsel %vm152_vm0, %v53_v59, -inf  ;;  %v379_v18 = vsel %vm152_vm0, %v69_v63, -inf  ;;  %v355_v20 = vsel %vm152_vm0, %v147_v2, -inf  ;;  %v71_v50 = vld [vmem:[%s1095_s0 + $0x1f8] sm:$0xff]  ;;  %v118_v57 = vld [vmem:[%s1095_s0 + $0x370] sm:$0xff] }
  0x38   :  { %v339_v14 = vmax.f32 %v337_v1, %v338_v60  ;;  %v352_v15 = vmax.f32 %v350_v3, %v351_v61  ;;  %v365_v17 = vmax.f32 %v363_v5, %v364_v62  ;;  %v368_v21 = vsel %vm152_vm0, %v116_v4, -inf  ;;  %v87_v59 = vld [vmem:[%s1095_s0 + $0x278] sm:$0xff]  ;;  %v134_v3 = vld [vmem:[%s1095_s0 + $0x3f0] sm:$0xff] }
  0x39   :  { %v378_v23 = vmax.f32 %v376_v10, %v377_v11  ;;  %v381_v24 = vsel %vm152_vm0, %v85_v6, -inf  ;;  %v391_v30 = vsel %vm152_vm0, %v22_v12, -inf  ;;  %v392_v31 = vsel %vm152_vm0, %v38_v13, -inf  ;;  %v103_v5 = vld [vmem:[%s1095_s0 + $0x2f8] sm:$0xff]  ;;  %v150_v11 = vld [vmem:[%s1095_s0 + $0x470] sm:$0xff] }
  0x3a   :  { %435 = vst.msk [vmem:[%s1096_s1 + $0x50] sm:$0xff] %vm152_vm0, %v339_v14  ;;  %v354_v26 = vmax.f32 %v352_v15, %v353_v8  ;;  %v367_v28 = vmax.f32 %v365_v17, %v366_v9  ;;  %v370_v32 = vsel %vm152_vm0, %v132_v16, -inf  ;;  %v393_v35 = vmax.f32 %v391_v30, %v392_v31  ;;  %v119_v13 = vld [vmem:[%s1095_s0 + $0x378] sm:$0xff] }
  0x3b   :  { %v380_v33 = vmax.f32 %v378_v23, %v379_v18  ;;  %v394_v36 = vsel %vm152_vm0, %v54_v19, -inf  ;;  %v383_v41 = vsel %vm152_vm0, %v101_v22, -inf  ;;  %v396_v42 = vsel %vm152_vm0, %v70_v25, -inf  ;;  %v135_v19 = vld [vmem:[%s1095_s0 + $0x3f8] sm:$0xff] }
  0x3c   :  { %v356_v39 = vmax.f32 %v354_v26, %v355_v20  ;;  %v369_v40 = vmax.f32 %v367_v28, %v368_v21  ;;  %v372_v44 = vsel %vm152_vm0, %v148_v27, -inf  ;;  %v385_v47 = vsel %vm152_vm0, %v117_v29, -inf }
  0x3d   :  { %v382_v46 = vmax.f32 %v380_v33, %v381_v24  ;;  %v395_v49 = vmax.f32 %v393_v35, %v394_v36  ;;  %v398_v52 = vsel %vm152_vm0, %v86_v34, -inf  ;;  %v408_v53 = vsel %vm152_vm0, %v23_v37, -inf  ;;  %v151_v24 = vld [vmem:[%s1095_s0 + $0x478] sm:$0xff] }
  0x3e   :  { %436 = vst.msk [vmem:[%s1096_s1 + $0x58] sm:$0xff] %vm152_vm0, %v356_v39  ;;  %v371_v51 = vmax.f32 %v369_v40, %v370_v32  ;;  %v409_v54 = vsel %vm152_vm0, %v39_v38, -inf  ;;  %v411_v61 = vsel %vm152_vm0, %v55_v43, -inf  ;;  %v387_v63 = vsel %vm152_vm0, %v133_v45, -inf }
  0x3f   :  { %v384_v56 = vmax.f32 %v382_v46, %v383_v41  ;;  %v397_v58 = vmax.f32 %v395_v49, %v396_v42  ;;  %v410_v60 = vmax.f32 %v408_v53, %v409_v54  ;;  %v400_v0 = vsel %vm152_vm0, %v102_v48, -inf }
  0x40   :  { %v373_v62 = vmax.f32 %v371_v51, %v372_v44  ;;  %v413_v1 = vsel %vm152_vm0, %v71_v50, -inf  ;;  %v389_v7 = vsel %vm152_vm0, %v149_v55, -inf  ;;  %v402_v8 = vsel %vm152_vm0, %v118_v57, -inf }
  0x41   :  { %v386_v2 = vmax.f32 %v384_v56, %v385_v47  ;;  %v399_v4 = vmax.f32 %v397_v58, %v398_v52  ;;  %v412_v6 = vmax.f32 %v410_v60, %v411_v61  ;;  %v415_v9 = vsel %vm152_vm0, %v87_v59, -inf }
  0x42   :  { %437 = vst.msk [vmem:[%s1096_s1 + $0x60] sm:$0xff] %vm152_vm0, %v373_v62  ;;  %v404_v15 = vsel %vm152_vm0, %v134_v3, -inf  ;;  %v417_v16 = vsel %vm152_vm0, %v103_v5, -inf  ;;  %v406_v21 = vsel %vm152_vm0, %v150_v11, -inf  ;;  %v419_v22 = vsel %vm152_vm0, %v119_v13, -inf }
  0x43   :  { %v388_v10 = vmax.f32 %v386_v2, %v387_v63  ;;  %v401_v12 = vmax.f32 %v399_v4, %v400_v0  ;;  %v414_v14 = vmax.f32 %v412_v6, %v413_v1  ;;  %v421_v26 = vsel %vm152_vm0, %v135_v19, -inf }
  0x44   :  { %v423_v29 = vsel %vm152_vm0, %v151_v24, -inf }
  0x45   :  { %v390_v17 = vmax.f32 %v388_v10, %v389_v7  ;;  %v403_v18 = vmax.f32 %v401_v12, %v402_v8  ;;  %v416_v20 = vmax.f32 %v414_v14, %v415_v9 }
  0x47   :  { %438 = vst.msk [vmem:[%s1096_s1 + $0x68] sm:$0xff] %vm152_vm0, %v390_v17  ;;  %v405_v23 = vmax.f32 %v403_v18, %v404_v15  ;;  %v418_v25 = vmax.f32 %v416_v20, %v417_v16 }
  0x49   :  { %v407_v27 = vmax.f32 %v405_v23, %v406_v21  ;;  %v420_v28 = vmax.f32 %v418_v25, %v419_v22 }
  0x4b   :  { %439 = vst.msk [vmem:[%s1096_s1 + $0x70] sm:$0xff] %vm152_vm0, %v407_v27  ;;  %v422_v30 = vmax.f32 %v420_v28, %v421_v26 }
  0x4d   :  { %v424_v31 = vmax.f32 %v422_v30, %v423_v29 }
  0x4f   :  { %440 = vst.msk [vmem:[%s1096_s1 + $0x78] sm:$0xff] %vm152_vm0, %v424_v31 }

// kernel: resnet18_forward.27
= control target key start
LH: loop header
LB: loop body
LE: loop exit
PB: predicated region body
PF: predicated region fallthrough
CT: control target
= control target key end

     0   :  { %s1197_s12 = smov 0   ;;  %s1199_s13 = smov 0   ;;  %s1561_s0 = inlined_call_operand.vmem [shape: bf16[128,768], index: 0, kind: input, shape index: {}]   ;;  %s1562_s1 = inlined_call_operand.vmem [shape: bf16[768,128], index: 1, kind: input, shape index: {}]   ;;  %s1563_s2 = inlined_call_operand.vmem [shape: f32[1,128], index: 2, kind: input, shape index: {}]   ;;  %s1564_s3 = inlined_call_operand.vmem [shape: f32[128,128], index: 3, kind: output, shape index: {}]  }
   0x1   :  { %s1201_s14 = smov 0   ;;  %s1203_s15 = smov 0  }
   0x2   :  { %s1205_s16 = smov 0  }
   0x3 LB: > { %s25_s17 = sadd.s32 1, %s1170_s15  ;;  %p48_p1 = scmp.ne.s32.totalorder %s1162_s13, %s1158_s12  ;;  %s1174_s16 = sphi %s1205_s16, %s13_s16   ;;  %s1170_s15 = sphi %s1203_s15, %s1568_s15   ;;  %s1166_s14 = sphi %s1201_s14, %s1567_s14   ;;  %s1162_s13 = sphi %s1199_s13, %s1566_s13   ;;  %s1158_s12 = sphi %s1197_s12, %s1565_s12  }
   0x4   : > { %p26_p0 = scmp.ge.s32.totalorder %s25_s17, 3  ;;  %p49_p2 = scmp.eq.s32.totalorder %s1174_s16, 0 }
   0x5   : > { %s41_s19 = sadd.s32 1, %s1162_s13  ;;  %p927_p5 = scmp.ge.s32.totalorder %s1174_s16, 3 }
   0x6   : > { %s1570_s17 = smov (%p26_p0, %s25_s17), 0  ;;  %p50_p3 = por %p49_p2, %p48_p1 }
   0x7   : > { %s37_s18 = ssub.s32 %s1170_s15, %s1570_s17  ;;  %162 = sbr.rel (%p927_p5) target bundleno = 26 (0x1a), region = 20 }
   0x8   : > { %p39_p4 = scmp.eq.s32.totalorder %s37_s18, 0 }
   0xa   : > { %s1232_s20 = scalar_select %p39_p4, %s1162_s13, %s41_s19  }
   0xe   : > { %165 = sbr.rel (!%p50_p3) target bundleno = 26 (0x1a), region = 24  ;;  %s167_s21 = sand.u32 (%p50_p3), 1, %s1162_s13  }
   0xf   : > { %s974_s22 = sshll.u32 (%p50_p3), %s1170_s15, 3  ;;  %s928_s23 = sshll.u32 (%p50_p3), %s167_s21, 7 }
  0x10   : > { %s1240_s26 = scalar_lea.vmem (%p50_p3), %s1561_s0, %s974_s22  ;;  %s169_s27 = scalar_lea.vmem (%p50_p3), [#allocation2], %s928_s23 }
  0x11   : > { %v233_v0 = vld [vmem:[%s1240_s26] sm:$0xff] (%p50_p3)  ;;  %v235_v1 = vld [vmem:[%s1240_s26 + $0x18] sm:$0xff] (%p50_p3)  ;;  %v237_v2 = vld [vmem:[%s1240_s26 + $0x30] sm:$0xff] (%p50_p3) }
  0x12   : > { %234 = vst [vmem:[%s169_s27] sm:$0xff] (%p50_p3), %v233_v0  ;;  %236 = vst [vmem:[%s169_s27 + $0x8] sm:$0xff] (%p50_p3), %v235_v1  ;;  %v239_v3 = vld [vmem:[%s1240_s26 + $0x48] sm:$0xff] (%p50_p3)  ;;  %v241_v4 = vld [vmem:[%s1240_s26 + $0x60] sm:$0xff] (%p50_p3) }
  0x13   : > { %238 = vst [vmem:[%s169_s27 + $0x10] sm:$0xff] (%p50_p3), %v237_v2  ;;  %v243_v5 = vld [vmem:[%s1240_s26 + $0x78] sm:$0xff] (%p50_p3)  ;;  %240 = vst [vmem:[%s169_s27 + $0x18] sm:$0xff] (%p50_p3), %v239_v3  ;;  %v245_v6 = vld [vmem:[%s1240_s26 + $0x90] sm:$0xff] (%p50_p3) }
  0x14   : > { %242 = vst [vmem:[%s169_s27 + $0x20] sm:$0xff] (%p50_p3), %v241_v4  ;;  %244 = vst [vmem:[%s169_s27 + $0x28] sm:$0xff] (%p50_p3), %v243_v5  ;;  %v247_v7 = vld [vmem:[%s1240_s26 + $0xa8] sm:$0xff] (%p50_p3)  ;;  %v249_v8 = vld [vmem:[%s1240_s26 + $0xc0] sm:$0xff] (%p50_p3) }
  0x15   : > { %246 = vst [vmem:[%s169_s27 + $0x30] sm:$0xff] %v245_v6  ;;  %248 = vst [vmem:[%s169_s27 + $0x38] sm:$0xff] %v247_v7  ;;  %v251_v9 = vld [vmem:[%s1240_s26 + $0xd8] sm:$0xff]  ;;  %v253_v10 = vld [vmem:[%s1240_s26 + $0xf0] sm:$0xff] }
  0x16   : > { %250 = vst [vmem:[%s169_s27 + $0x40] sm:$0xff] %v249_v8  ;;  %v255_v11 = vld [vmem:[%s1240_s26 + $0x108] sm:$0xff]  ;;  %252 = vst [vmem:[%s169_s27 + $0x48] sm:$0xff] %v251_v9  ;;  %v257_v12 = vld [vmem:[%s1240_s26 + $0x120] sm:$0xff] }
  0x17   : > { %254 = vst [vmem:[%s169_s27 + $0x50] sm:$0xff] %v253_v10  ;;  %256 = vst [vmem:[%s169_s27 + $0x58] sm:$0xff] %v255_v11  ;;  %v259_v13 = vld [vmem:[%s1240_s26 + $0x138] sm:$0xff]  ;;  %v261_v14 = vld [vmem:[%s1240_s26 + $0x150] sm:$0xff] }
  0x18   : > { %258 = vst [vmem:[%s169_s27 + $0x60] sm:$0xff] %v257_v12  ;;  %260 = vst [vmem:[%s169_s27 + $0x68] sm:$0xff] %v259_v13  ;;  %v263_v15 = vld [vmem:[%s1240_s26 + $0x168] sm:$0xff] }
  0x19   : > { %262 = vst [vmem:[%s169_s27 + $0x70] sm:$0xff] %v261_v14  ;;  %264 = vst [vmem:[%s169_s27 + $0x78] sm:$0xff] %v263_v15 }
  0x1a PF: > { %p931_p6 = scmp.ge.s32.totalorder %s1174_s16, 1  ;;  %p281_p7 = scmp.lt.s32.totalorder %s1174_s16, 4 }
  0x1c   : > { %p282_p8 = pnand %p931_p6, %p281_p7 }
  0x1d   : > { %s288_s28 = sand.u32 (!%p282_p8), 1, %s1158_s12   ;;  %s933_s29 = sshll.u32 (!%p282_p8), %s1166_s14, 5 }
  0x1e   : > { %285 = sbr.rel (%p282_p8) target bundleno = 337 (0x151), region = 66  ;;  %s932_s30 = sshll.u32 (!%p282_p8), %s288_s28, 7 }
  0x1f   : > { %p328_p9 = scmp.lt.s32.totalorder (!%p282_p8), %s933_s29, 95  ;;  %s1267_s8 = scalar_lea.vmem (!%p282_p8), [#allocation2], %s932_s30 }
  0x20   : > { %p935_p10 = scmp.ne.s32.totalorder (!%p282_p8), %s1166_s14, 0 }
  0x25   : > { %s1572_s29 = smov (!%p328_p9, %s933_s29), 95  ;;  %352 = sbr.rel (%p935_p10) target bundleno = 47 (0x2f), region = 74 }
  0x26   : > { %s934_s4 = sshll.u32 %s1572_s29, 2  ;;  %v1176_v16 = vmov (!%p935_p10), 0.0  }
  0x27   : > { %s1265_s7 = scalar_lea.vmem %s1562_s1, %s934_s4  ;;  %353 = vst [vmem:[%s1564_s3] sm:$0xff] (!%p935_p10), %v1176_v16  ;;  %354 = vst [vmem:[%s1564_s3 + $0x8] sm:$0xff] (!%p935_p10), %v1176_v16 }
  0x28   : > { %355 = vst [vmem:[%s1564_s3 + $0x10] sm:$0xff] (!%p935_p10), %v1176_v16  ;;  %356 = vst [vmem:[%s1564_s3 + $0x18] sm:$0xff] (!%p935_p10), %v1176_v16 }
  0x29   : > { %357 = vst [vmem:[%s1564_s3 + $0x20] sm:$0xff] (!%p935_p10), %v1176_v16  ;;  %358 = vst [vmem:[%s1564_s3 + $0x28] sm:$0xff] (!%p935_p10), %v1176_v16 }
  0x2a   : > { %359 = vst [vmem:[%s1564_s3 + $0x30] sm:$0xff] (!%p935_p10), %v1176_v16  ;;  %360 = vst [vmem:[%s1564_s3 + $0x38] sm:$0xff] (!%p935_p10), %v1176_v16 }
  0x2b   : > { %361 = vst [vmem:[%s1564_s3 + $0x40] sm:$0xff] (!%p935_p10), %v1176_v16  ;;  %362 = vst [vmem:[%s1564_s3 + $0x48] sm:$0xff] (!%p935_p10), %v1176_v16 }
  0x2c   : > { %363 = vst [vmem:[%s1564_s3 + $0x50] sm:$0xff] %v1176_v16  ;;  %364 = vst [vmem:[%s1564_s3 + $0x58] sm:$0xff] %v1176_v16 }
  0x2d   : > { %365 = vst [vmem:[%s1564_s3 + $0x60] sm:$0xff] %v1176_v16  ;;  %366 = vst [vmem:[%s1564_s3 + $0x68] sm:$0xff] %v1176_v16 }
  0x2e   : > { %367 = vst [vmem:[%s1564_s3 + $0x70] sm:$0xff] %v1176_v16  ;;  %368 = vst [vmem:[%s1564_s3 + $0x78] sm:$0xff] %v1176_v16 }
  0x2f PF: > { %v1096_v17 = vld [vmem:[%s1265_s7 + $0x40] sm:$0xff]   ;;  %v1098_v19 = vld [vmem:[%s1265_s7 + $0x48] sm:$0xff]   ;;  %v1100_v21 = vld [vmem:[%s1265_s7 + $0x50] sm:$0xff]   ;;  %p968_p11 = scmp.ne.s32.totalorder %s1166_s14, 2 }
  0x30   : > { %v1097_v18 = vld [vmem:[%s1265_s7] sm:$0xff]   ;;  %975 = vmatprep.subr.bf16.mxu0 %v1096_v17  ;;  %1039 = vmatprep.subr.bf16.mxu1 %v1096_v17  ;;  %v1099_v20 = vld [vmem:[%s1265_s7 + $0x8] sm:$0xff]   ;;  %v1101_v22 = vld [vmem:[%s1265_s7 + $0x10] sm:$0xff]  }
  0x31   : > { %976 = vmatpush3.bf16.msra.mxu0 %v1097_v18  ;;  %1047 = vmatpush3.bf16.msra.mxu1 %v1097_v18  ;;  %v1102_v23 = vld [vmem:[%s1265_s7 + $0x58] sm:$0xff]   ;;  %v1104_v25 = vld [vmem:[%s1265_s7 + $0x60] sm:$0xff]   ;;  %v1106_v27 = vld [vmem:[%s1265_s7 + $0x68] sm:$0xff]  }
  0x32   : > { %977 = vmatprep.subr.bf16.mxu0 %v1098_v19  ;;  %1040 = vmatprep.subr.bf16.mxu1 %v1098_v19  ;;  %v1103_v24 = vld [vmem:[%s1265_s7 + $0x18] sm:$0xff]   ;;  %v1105_v26 = vld [vmem:[%s1265_s7 + $0x20] sm:$0xff]   ;;  %v1107_v30 = vld [vmem:[%s1265_s7 + $0x28] sm:$0xff]  }
  0x33   : > { %v1114_v28 = vld [vmem:[%s1267_s8 + $0x4] ss:$8 sps:$4 sm:$0xff]   ;;  %v1108_v31 = vld [vmem:[%s1265_s7 + $0x70] sm:$0xff]   ;;  %v1110_v33 = vld [vmem:[%s1265_s7 + $0x78] sm:$0xff]  }
  0x34   : > { %v1117_v29 = vld [vmem:[%s1267_s8 + $0x44] ss:$8 sps:$4 sm:$0xff]   ;;  %641 = vmatprep.mubr.bf16.mxu0 %v1114_v28  ;;  %v1109_v32 = vld [vmem:[%s1265_s7 + $0x30] sm:$0xff]   ;;  %v1111_v34 = vld [vmem:[%s1265_s7 + $0x38] sm:$0xff]  }
  0x35   : > { %978 = vmatpush3.bf16.msra.mxu0 %v1099_v20  ;;  %1048 = vmatpush3.bf16.msra.mxu1 %v1099_v20  ;;  %v1112_v35 = vld [vmem:[%s1267_s8] ss:$8 sps:$4 sm:$0xff]   ;;  %v1118_v37 = vld [vmem:[%s1267_s8 + $0x14] ss:$8 sps:$4 sm:$0xff]   ;;  %v1122_v39 = vld [vmem:[%s1267_s8 + $0x10] ss:$8 sps:$4 sm:$0xff]  }
  0x36   : > { %979 = vmatprep.subr.bf16.mxu0 %v1100_v21  ;;  %1041 = vmatprep.subr.bf16.mxu1 %v1100_v21  ;;  %v1115_v36 = vld [vmem:[%s1267_s8 + $0x40] ss:$8 sps:$4 sm:$0xff]   ;;  %v1120_v38 = vld [vmem:[%s1267_s8 + $0x54] ss:$8 sps:$4 sm:$0xff]   ;;  %v1123_v40 = vld [vmem:[%s1267_s8 + $0x50] ss:$8 sps:$4 sm:$0xff]  }
  0x37   : > { %673 = vmatprep.mubr.bf16.mxu1 %v1117_v29  ;;  %v1124_v41 = vld [vmem:[%s1267_s8 + $0x24] ss:$8 sps:$4 sm:$0xff]   ;;  %v1128_v43 = vld [vmem:[%s1267_s8 + $0x20] ss:$8 sps:$4 sm:$0xff]   ;;  %v1130_v45 = vld [vmem:[%s1267_s8 + $0x34] ss:$8 sps:$4 sm:$0xff]  }
  0x38   : > { %v1126_v42 = vld [vmem:[%s1267_s8 + $0x64] ss:$8 sps:$4 sm:$0xff]   ;;  %v1129_v44 = vld [vmem:[%s1267_s8 + $0x60] ss:$8 sps:$4 sm:$0xff]   ;;  %v1132_v46 = vld [vmem:[%s1267_s8 + $0x74] ss:$8 sps:$4 sm:$0xff]  }
  0x39   : > { %980 = vmatpush3.bf16.msra.mxu0 %v1101_v22  ;;  %1049 = vmatpush3.bf16.msra.mxu1 %v1101_v22  ;;  %v1134_v47 = vld [vmem:[%s1267_s8 + $0x30] ss:$8 sps:$4 sm:$0xff]   ;;  %v369_v51 = vld [vmem:[%s1564_s3] sm:$0xff]  ;;  %v370_v59 = vld [vmem:[%s1564_s3 + $0x8] sm:$0xff] }
  0x3a   : > { %981 = vmatprep.subr.bf16.mxu0 %v1102_v23  ;;  %1042 = vmatprep.subr.bf16.mxu1 %v1102_v23  ;;  %v1135_v48 = vld [vmem:[%s1267_s8 + $0x70] ss:$8 sps:$4 sm:$0xff]   ;;  %v377_v53 = vld [vmem:[%s1564_s3 + $0x40] sm:$0xff]  ;;  %v378_v61 = vld [vmem:[%s1564_s3 + $0x48] sm:$0xff] }
  0x3b   : > { %v371_v7 = vld [vmem:[%s1564_s3 + $0x10] sm:$0xff]  ;;  %v372_v15 = vld [vmem:[%s1564_s3 + $0x18] sm:$0xff]  ;;  %v381_v29 = vld [vmem:[%s1564_s3 + $0x60] sm:$0xff] }
  0x3c   : > { %v379_v9 = vld [vmem:[%s1564_s3 + $0x50] sm:$0xff]  ;;  %v380_v17 = vld [vmem:[%s1564_s3 + $0x58] sm:$0xff] }
  0x3d   : > { %982 = vmatpush3.bf16.msra.mxu0 %v1103_v24  ;;  %1050 = vmatpush3.bf16.msra.mxu1 %v1103_v24 }
  0x3e   : > { %983 = vmatprep.subr.bf16.mxu0 %v1104_v25  ;;  %1043 = vmatprep.subr.bf16.mxu1 %v1104_v25 }
  0x41   : > { %984 = vmatpush3.bf16.msra.mxu0 %v1105_v26  ;;  %1051 = vmatpush3.bf16.msra.mxu1 %v1105_v26 }
  0x42   : > { %985 = vmatprep.subr.bf16.mxu0 %v1106_v27  ;;  %1044 = vmatprep.subr.bf16.mxu1 %v1106_v27  ;;  %v373_v27 = vld [vmem:[%s1564_s3 + $0x20] sm:$0xff] }
  0x45   : > { %986 = vmatpush3.bf16.msra.mxu0 %v1107_v30  ;;  %1052 = vmatpush3.bf16.msra.mxu1 %v1107_v30 }
  0x46   : > { %987 = vmatprep.subr.bf16.mxu0 %v1108_v31  ;;  %1045 = vmatprep.subr.bf16.mxu1 %v1108_v31 }
  0x49   : > { %988 = vmatpush3.bf16.msra.mxu0 %v1109_v32  ;;  %1053 = vmatpush3.bf16.msra.mxu1 %v1109_v32 }
  0x4a   : > { %989 = vmatprep.subr.bf16.mxu0 %v1110_v33  ;;  %1046 = vmatprep.subr.bf16.mxu1 %v1110_v33 }
  0x4d   : > { %990 = vmatpush3.bf16.msra.mxu0 %v1111_v34  ;;  %1054 = vmatpush3.bf16.msra.mxu1 %v1111_v34 }
  0x50   : > { %642 = vmatmul.mubr.bf16.vlgmr.msra.gmra.mrb[0].mxu0 %v1112_v35  ;;  %674 = vmatmul.mubr.bf16.vlgmr.msra.gmra.mrb[0].mxu1 %v1115_v36  ;;  %v374_v35 = vld [vmem:[%s1564_s3 + $0x28] sm:$0xff] }
  0x51   : > { %649 = vmatprep.mubr.bf16.mxu0 %v1118_v37  ;;  %681 = vmatprep.mubr.bf16.mxu1 %v1120_v38  ;;  %v382_v37 = vld [vmem:[%s1564_s3 + $0x68] sm:$0xff] }
  0x58   : > { %650 = vmatmul.mubr.bf16.gmra.mrb[4].mxu0 %v1122_v39  ;;  %682 = vmatmul.mubr.bf16.gmra.mrb[4].mxu1 %v1123_v40 }
  0x59   : > { %657 = vmatprep.mubr.bf16.mxu0 %v1124_v41  ;;  %689 = vmatprep.mubr.bf16.mxu1 %v1126_v42 }
  0x60   : > { %658 = vmatmul.mubr.bf16.gmra.mrb[8].mxu0 %v1128_v43  ;;  %690 = vmatmul.mubr.bf16.gmra.mrb[8].mxu1 %v1129_v44 }
  0x61   : > { %665 = vmatprep.mubr.bf16.mxu0 %v1130_v45  ;;  %697 = vmatprep.mubr.bf16.mxu1 %v1132_v46 }
  0x68   : > { %666 = vmatmul.mubr.bf16.gmra.mrb[12].mxu0 %v1134_v47  ;;  %698 = vmatmul.mubr.bf16.gmra.mrb[12].mxu1 %v1135_v48  ;;  %v375_v47 = vld [vmem:[%s1564_s3 + $0x30] sm:$0xff] }
 0x123   : > { %v991_v49 = vpop.f32.mrb[0].mxu0  ;;  %v1015_v50 = vpop.f32.mrb[0].mxu1 }
 0x124   : > { %v992_v52 = vpop.f32.mrb[1].mxu0  ;;  %v1016_v54 = vpop.f32.mrb[1].mxu1 }
 0x125   : > { %v993_v55 = vadd.f32 %v992_v52, %v991_v49  ;;  %v1017_v56 = vadd.f32 %v1016_v54, %v1015_v50  ;;  %v994_v57 = vpop.f32.mrb[2].mxu0  ;;  %v1018_v58 = vpop.f32.mrb[2].mxu1  ;;  %v383_v49 = vld [vmem:[%s1564_s3 + $0x70] sm:$0xff] }
 0x126   : > { %v995_v60 = vpop.f32.mrb[3].mxu0  ;;  %v1019_v62 = vpop.f32.mrb[3].mxu1 }
 0x127   : > { %v706_v63 = vadd.f32 %v993_v55, %v369_v51  ;;  %v714_v0 = vadd.f32 %v1017_v56, %v377_v53  ;;  %v996_v1 = vadd.f32 %v995_v60, %v994_v57  ;;  %v1020_v2 = vadd.f32 %v1019_v62, %v1018_v58  ;;  %v376_v55 = vld [vmem:[%s1564_s3 + $0x38] sm:$0xff] }
 0x128   : > { %v384_v57 = vld [vmem:[%s1564_s3 + $0x78] sm:$0xff] }
 0x129   : > { %722 = vst [vmem:[%s1564_s3] sm:$0xff] %v706_v63  ;;  %730 = vst [vmem:[%s1564_s3 + $0x40] sm:$0xff] %v714_v0  ;;  %v707_v3 = vadd.f32 %v996_v1, %v370_v59  ;;  %v715_v4 = vadd.f32 %v1020_v2, %v378_v61  ;;  %v969_v2 = vld [vmem:[%s1563_s2] ss:$0 sm:$0xff] (!%p968_p11) }
 0x12b   : > { %723 = vst [vmem:[%s1564_s3 + $0x8] sm:$0xff] %v707_v3  ;;  %731 = vst [vmem:[%s1564_s3 + $0x48] sm:$0xff] %v715_v4  ;;  %v997_v5 = vpop.f32.mrb[4].mxu0  ;;  %v1021_v6 = vpop.f32.mrb[4].mxu1 }
 0x12c   : > { %v998_v8 = vpop.f32.mrb[5].mxu0  ;;  %v1022_v10 = vpop.f32.mrb[5].mxu1 }
 0x12d   : > { %v999_v11 = vadd.f32 %v998_v8, %v997_v5  ;;  %v1023_v12 = vadd.f32 %v1022_v10, %v1021_v6  ;;  %v1000_v13 = vpop.f32.mrb[6].mxu0  ;;  %v1024_v14 = vpop.f32.mrb[6].mxu1 }
 0x12e   : > { %v1001_v16 = vpop.f32.mrb[7].mxu0  ;;  %v1025_v18 = vpop.f32.mrb[7].mxu1 }
 0x12f   : > { %v708_v19 = vadd.f32 %v999_v11, %v371_v7  ;;  %v716_v20 = vadd.f32 %v1023_v12, %v379_v9  ;;  %v1002_v21 = vadd.f32 %v1001_v16, %v1000_v13  ;;  %v1026_v22 = vadd.f32 %v1025_v18, %v1024_v14 }
 0x130   : > { %v742_v1 = vld [vmem:[%s1564_s3] sm:$0xff] (!%p968_p11) }
 0x131   : > { %724 = vst [vmem:[%s1564_s3 + $0x10] sm:$0xff] %v708_v19  ;;  %732 = vst [vmem:[%s1564_s3 + $0x50] sm:$0xff] %v716_v20  ;;  %v709_v23 = vadd.f32 %v1002_v21, %v372_v15  ;;  %v717_v24 = vadd.f32 %v1026_v22, %v380_v17  ;;  %v765_v4 = vadd.f32 (!%p968_p11), %v969_v2, %v742_v1  ;;  %v750_v19 = vld [vmem:[%s1564_s3 + $0x40] sm:$0xff] (!%p968_p11) }
 0x132   : > { %v743_v3 = vld [vmem:[%s1564_s3 + $0x8] sm:$0xff] (!%p968_p11) }
 0x133   : > { %725 = vst [vmem:[%s1564_s3 + $0x18] sm:$0xff] %v709_v23  ;;  %733 = vst [vmem:[%s1564_s3 + $0x58] sm:$0xff] %v717_v24  ;;  %v1003_v25 = vpop.f32.mrb[8].mxu0  ;;  %v1027_v26 = vpop.f32.mrb[8].mxu1  ;;  %v766_v5 = vadd.f32 (!%p968_p11), %v969_v2, %v743_v3  ;;  %v781_v15 = vmax.f32 (!%p968_p11), %v765_v4, 0.0  ;;  %v751_v20 = vld [vmem:[%s1564_s3 + $0x48] sm:$0xff] (!%p968_p11) }
 0x134   : > { %v1004_v28 = vpop.f32.mrb[9].mxu0  ;;  %v1028_v30 = vpop.f32.mrb[9].mxu1 }
 0x135   : > { %v1005_v31 = vadd.f32 %v1004_v28, %v1003_v25  ;;  %v1029_v32 = vadd.f32 %v1028_v30, %v1027_v26  ;;  %v1006_v33 = vpop.f32.mrb[10].mxu0  ;;  %v1030_v34 = vpop.f32.mrb[10].mxu1  ;;  %v782_v16 = vmax.f32 (!%p968_p11), %v766_v5, 0.0  ;;  %797 = vst [vmem:[%s1564_s3] sm:$0xff] (!%p968_p11), %v781_v15 }
 0x136   : > { %v1007_v36 = vpop.f32.mrb[11].mxu0  ;;  %v1031_v38 = vpop.f32.mrb[11].mxu1 }
 0x137   : > { %v710_v39 = vadd.f32 %v1005_v31, %v373_v27  ;;  %v718_v40 = vadd.f32 %v1029_v32, %v381_v29  ;;  %v1008_v41 = vadd.f32 %v1007_v36, %v1006_v33  ;;  %v1032_v42 = vadd.f32 %v1031_v38, %v1030_v34  ;;  %798 = vst [vmem:[%s1564_s3 + $0x8] sm:$0xff] (!%p968_p11), %v782_v16 }
 0x138   : > { %v744_v6 = vld [vmem:[%s1564_s3 + $0x10] sm:$0xff] (!%p968_p11)  ;;  %v773_v31 = vadd.f32 (!%p968_p11), %v969_v2, %v750_v19  ;;  %v774_v32 = vadd.f32 (!%p968_p11), %v969_v2, %v751_v20 }
 0x139   : > { %726 = vst [vmem:[%s1564_s3 + $0x20] sm:$0xff] %v710_v39  ;;  %734 = vst [vmem:[%s1564_s3 + $0x60] sm:$0xff] %v718_v40  ;;  %v711_v43 = vadd.f32 %v1008_v41, %v374_v35  ;;  %v719_v44 = vadd.f32 %v1032_v42, %v382_v37  ;;  %v767_v9 = vadd.f32 (!%p968_p11), %v969_v2, %v744_v6  ;;  %v752_v21 = vld [vmem:[%s1564_s3 + $0x50] sm:$0xff] (!%p968_p11) }
 0x13a   : > { %v745_v7 = vld [vmem:[%s1564_s3 + $0x18] sm:$0xff] (!%p968_p11)  ;;  %v775_v36 = vadd.f32 (!%p968_p11), %v969_v2, %v752_v21  ;;  %v789_v39 = vmax.f32 (!%p968_p11), %v773_v31, 0.0  ;;  %v790_v40 = vmax.f32 (!%p968_p11), %v774_v32, 0.0 }
 0x13b   : > { %727 = vst [vmem:[%s1564_s3 + $0x28] sm:$0xff] %v711_v43  ;;  %735 = vst [vmem:[%s1564_s3 + $0x68] sm:$0xff] %v719_v44  ;;  %v1009_v45 = vpop.f32.mrb[12].mxu0  ;;  %v1033_v46 = vpop.f32.mrb[12].mxu1  ;;  %v768_v10 = vadd.f32 (!%p968_p11), %v969_v2, %v745_v7  ;;  %v783_v22 = vmax.f32 (!%p968_p11), %v767_v9, 0.0  ;;  %v753_v26 = vld [vmem:[%s1564_s3 + $0x58] sm:$0xff] (!%p968_p11) }
 0x13c   : > { %v1010_v48 = vpop.f32.mrb[13].mxu0  ;;  %v1034_v50 = vpop.f32.mrb[13].mxu1  ;;  %v776_v37 = vadd.f32 (!%p968_p11), %v969_v2, %v753_v26  ;;  %v791_v43 = vmax.f32 (!%p968_p11), %v775_v36, 0.0  ;;  %805 = vst [vmem:[%s1564_s3 + $0x40] sm:$0xff] (!%p968_p11), %v789_v39  ;;  %806 = vst [vmem:[%s1564_s3 + $0x48] sm:$0xff] (!%p968_p11), %v790_v40 }
 0x13d   : > { %v1011_v51 = vadd.f32 %v1010_v48, %v1009_v45  ;;  %v1035_v52 = vadd.f32 %v1034_v50, %v1033_v46  ;;  %v1012_v53 = vpop.f32.mrb[14].mxu0  ;;  %v1036_v54 = vpop.f32.mrb[14].mxu1  ;;  %741 = sbr.rel (%p968_p11) target bundleno = 337 (0x151), region = 78  ;;  %v784_v23 = vmax.f32 (!%p968_p11), %v768_v10, 0.0  ;;  %799 = vst [vmem:[%s1564_s3 + $0x10] sm:$0xff] (!%p968_p11), %v783_v22 }
 0x13e   : > { %v1013_v56 = vpop.f32.mrb[15].mxu0  ;;  %v1037_v58 = vpop.f32.mrb[15].mxu1  ;;  %v792_v44 = vmax.f32 (!%p968_p11), %v776_v37, 0.0  ;;  %807 = vst [vmem:[%s1564_s3 + $0x50] sm:$0xff] (!%p968_p11), %v791_v43 }
 0x13f   : > { %v712_v59 = vadd.f32 %v1011_v51, %v375_v47  ;;  %v720_v60 = vadd.f32 %v1035_v52, %v383_v49  ;;  %v1014_v61 = vadd.f32 %v1013_v56, %v1012_v53  ;;  %v1038_v62 = vadd.f32 %v1037_v58, %v1036_v54  ;;  %800 = vst [vmem:[%s1564_s3 + $0x18] sm:$0xff] (!%p968_p11), %v784_v23 }
 0x140   : > { %v746_v8 = vld [vmem:[%s1564_s3 + $0x20] sm:$0xff] (!%p968_p11)  ;;  %808 = vst [vmem:[%s1564_s3 + $0x58] sm:$0xff] (!%p968_p11), %v792_v44 }
 0x141   : > { %728 = vst [vmem:[%s1564_s3 + $0x30] sm:$0xff] %v712_v59  ;;  %736 = vst [vmem:[%s1564_s3 + $0x70] sm:$0xff] %v720_v60  ;;  %v713_v63 = vadd.f32 %v1014_v61, %v376_v55  ;;  %v721_v0 = vadd.f32 %v1038_v62, %v384_v57  ;;  %v769_v11 = vadd.f32 (!%p968_p11), %v969_v2, %v746_v8  ;;  %v754_v27 = vld [vmem:[%s1564_s3 + $0x60] sm:$0xff] (!%p968_p11) }
 0x142   : > { %v747_v12 = vld [vmem:[%s1564_s3 + $0x28] sm:$0xff] (!%p968_p11)  ;;  %v777_v38 = vadd.f32 (!%p968_p11), %v969_v2, %v754_v27 }
 0x143   : > { %729 = vst [vmem:[%s1564_s3 + $0x38] sm:$0xff] %v713_v63  ;;  %737 = vst [vmem:[%s1564_s3 + $0x78] sm:$0xff] %v721_v0  ;;  %v770_v17 = vadd.f32 (!%p968_p11), %v969_v2, %v747_v12  ;;  %v785_v24 = vmax.f32 (!%p968_p11), %v769_v11, 0.0  ;;  %v755_v28 = vld [vmem:[%s1564_s3 + $0x68] sm:$0xff] (!%p968_p11) }
 0x144   : > { %v778_v41 = vadd.f32 %v969_v2, %v755_v28  ;;  %v793_v45 = vmax.f32 %v777_v38, 0.0 }
 0x145   : > { %v786_v29 = vmax.f32 %v770_v17, 0.0  ;;  %801 = vst [vmem:[%s1564_s3 + $0x20] sm:$0xff] %v785_v24 }
 0x146   : > { %v794_v47 = vmax.f32 %v778_v41, 0.0  ;;  %809 = vst [vmem:[%s1564_s3 + $0x60] sm:$0xff] %v793_v45 }
 0x147   : > { %802 = vst [vmem:[%s1564_s3 + $0x28] sm:$0xff] %v786_v29 }
 0x148   : > { %v748_v13 = vld [vmem:[%s1564_s3 + $0x30] sm:$0xff]  ;;  %810 = vst [vmem:[%s1564_s3 + $0x68] sm:$0xff] %v794_v47 }
 0x149   : > { %v771_v18 = vadd.f32 %v969_v2, %v748_v13  ;;  %v756_v33 = vld [vmem:[%s1564_s3 + $0x70] sm:$0xff] }
 0x14a   : > { %v749_v14 = vld [vmem:[%s1564_s3 + $0x38] sm:$0xff]  ;;  %v779_v42 = vadd.f32 %v969_v2, %v756_v33 }
 0x14b   : > { %v772_v25 = vadd.f32 %v969_v2, %v749_v14  ;;  %v787_v30 = vmax.f32 %v771_v18, 0.0  ;;  %v757_v34 = vld [vmem:[%s1564_s3 + $0x78] sm:$0xff] }
 0x14c   : > { %v780_v46 = vadd.f32 %v969_v2, %v757_v34  ;;  %v795_v48 = vmax.f32 %v779_v42, 0.0 }
 0x14d   : > { %v788_v35 = vmax.f32 %v772_v25, 0.0  ;;  %803 = vst [vmem:[%s1564_s3 + $0x30] sm:$0xff] %v787_v30 }
 0x14e   : > { %v796_v49 = vmax.f32 %v780_v46, 0.0  ;;  %811 = vst [vmem:[%s1564_s3 + $0x70] sm:$0xff] %v795_v48 }
 0x14f   : > { %804 = vst [vmem:[%s1564_s3 + $0x38] sm:$0xff] %v788_v35 }
 0x150   : > { %812 = vst [vmem:[%s1564_s3 + $0x78] sm:$0xff] %v796_v49 }
 0x151 PF: > { %s13_s16 = sadd.s32 1, %s1174_s16   ;;  %s1565_s12 = smov %s1162_s13 }
 0x152   : > { %p10_p12 = scmp.ge.s32.totalorder %s13_s16, 5   ;;  %s1566_s13 = smov %s1232_s20 }
 0x153   : > { %s1567_s14 = smov %s1170_s15  ;;  %s1568_s15 = smov %s1570_s17 }
 0x154   :  { %12 = sbr.rel (!%p10_p12) target bundleno = 3 (0x3), region = 119 }

// kernel: resnet18_forward.28
= control target key start
LH: loop header
LB: loop body
LE: loop exit
PB: predicated region body
PF: predicated region fallthrough
CT: control target
= control target key end

     0   :  { %s1313_s15 = smov 0   ;;  %s1315_s16 = smov 0   ;;  %s1743_s0 = inlined_call_operand.vmem [shape: bf16[128,768], index: 0, kind: input, shape index: {}]   ;;  %s1744_s1 = inlined_call_operand.vmem [shape: bf16[768,128], index: 1, kind: input, shape index: {}]   ;;  %s1745_s2 = inlined_call_operand.vmem [shape: f32[1,128], index: 2, kind: input, shape index: {}]   ;;  %s1746_s3 = inlined_call_operand.vmem [shape: f32[128,128], index: 3, kind: input, shape index: {}]   ;;  %s1747_s4 = inlined_call_operand.vmem [shape: f32[128,128], index: 4, kind: output, shape index: {}]  }
   0x1   :  { %s1317_s17 = smov 0   ;;  %s1319_s18 = smov 0  }
   0x2   :  { %s1321_s19 = smov 0  }
   0x3 LB: > { %s26_s20 = sadd.s32 1, %s1281_s18  ;;  %p49_p1 = scmp.ne.s32.totalorder %s1273_s16, %s1269_s15  ;;  %s1285_s19 = sphi %s1321_s19, %s14_s19   ;;  %s1281_s18 = sphi %s1319_s18, %s1751_s18   ;;  %s1277_s17 = sphi %s1317_s17, %s1750_s17   ;;  %s1273_s16 = sphi %s1315_s16, %s1749_s16   ;;  %s1269_s15 = sphi %s1313_s15, %s1748_s15  }
   0x4   : > { %p27_p0 = scmp.ge.s32.totalorder %s26_s20, 3  ;;  %p50_p2 = scmp.eq.s32.totalorder %s1285_s19, 0 }
   0x5   : > { %s42_s22 = sadd.s32 1, %s1273_s16  ;;  %p1038_p5 = scmp.ge.s32.totalorder %s1285_s19, 3 }
   0x6   : > { %s1753_s20 = smov (%p27_p0, %s26_s20), 0  ;;  %p51_p3 = por %p50_p2, %p49_p1 }
   0x7   : > { %s38_s21 = ssub.s32 %s1281_s18, %s1753_s20  ;;  %203 = sbr.rel (%p1038_p5) target bundleno = 26 (0x1a), region = 24 }
   0x8   : > { %p40_p4 = scmp.eq.s32.totalorder %s38_s21, 0 }
   0xa   : > { %s1348_s23 = scalar_select %p40_p4, %s1273_s16, %s42_s22  }
   0xe   : > { %206 = sbr.rel (!%p51_p3) target bundleno = 26 (0x1a), region = 28  ;;  %s208_s24 = sand.u32 (%p51_p3), 1, %s1273_s16  }
   0xf   : > { %s1085_s25 = sshll.u32 (%p51_p3), %s1281_s18, 3  ;;  %s1039_s26 = sshll.u32 (%p51_p3), %s208_s24, 7 }
  0x10   : > { %s1356_s29 = scalar_lea.vmem (%p51_p3), %s1743_s0, %s1085_s25  ;;  %s210_s30 = scalar_lea.vmem (%p51_p3), [#allocation2], %s1039_s26 }
  0x11   : > { %v274_v0 = vld [vmem:[%s1356_s29] sm:$0xff] (%p51_p3)  ;;  %v276_v1 = vld [vmem:[%s1356_s29 + $0x18] sm:$0xff] (%p51_p3)  ;;  %v278_v2 = vld [vmem:[%s1356_s29 + $0x30] sm:$0xff] (%p51_p3) }
  0x12   : > { %275 = vst [vmem:[%s210_s30] sm:$0xff] (%p51_p3), %v274_v0  ;;  %277 = vst [vmem:[%s210_s30 + $0x8] sm:$0xff] (%p51_p3), %v276_v1  ;;  %v280_v3 = vld [vmem:[%s1356_s29 + $0x48] sm:$0xff] (%p51_p3)  ;;  %v282_v4 = vld [vmem:[%s1356_s29 + $0x60] sm:$0xff] (%p51_p3) }
  0x13   : > { %279 = vst [vmem:[%s210_s30 + $0x10] sm:$0xff] (%p51_p3), %v278_v2  ;;  %v284_v5 = vld [vmem:[%s1356_s29 + $0x78] sm:$0xff] (%p51_p3)  ;;  %281 = vst [vmem:[%s210_s30 + $0x18] sm:$0xff] (%p51_p3), %v280_v3  ;;  %v286_v6 = vld [vmem:[%s1356_s29 + $0x90] sm:$0xff] (%p51_p3) }
  0x14   : > { %283 = vst [vmem:[%s210_s30 + $0x20] sm:$0xff] (%p51_p3), %v282_v4  ;;  %285 = vst [vmem:[%s210_s30 + $0x28] sm:$0xff] (%p51_p3), %v284_v5  ;;  %v288_v7 = vld [vmem:[%s1356_s29 + $0xa8] sm:$0xff] (%p51_p3)  ;;  %v290_v8 = vld [vmem:[%s1356_s29 + $0xc0] sm:$0xff] (%p51_p3) }
  0x15   : > { %287 = vst [vmem:[%s210_s30 + $0x30] sm:$0xff] %v286_v6  ;;  %289 = vst [vmem:[%s210_s30 + $0x38] sm:$0xff] %v288_v7  ;;  %v292_v9 = vld [vmem:[%s1356_s29 + $0xd8] sm:$0xff]  ;;  %v294_v10 = vld [vmem:[%s1356_s29 + $0xf0] sm:$0xff] }
  0x16   : > { %291 = vst [vmem:[%s210_s30 + $0x40] sm:$0xff] %v290_v8  ;;  %v296_v11 = vld [vmem:[%s1356_s29 + $0x108] sm:$0xff]  ;;  %293 = vst [vmem:[%s210_s30 + $0x48] sm:$0xff] %v292_v9  ;;  %v298_v12 = vld [vmem:[%s1356_s29 + $0x120] sm:$0xff] }
  0x17   : > { %295 = vst [vmem:[%s210_s30 + $0x50] sm:$0xff] %v294_v10  ;;  %297 = vst [vmem:[%s210_s30 + $0x58] sm:$0xff] %v296_v11  ;;  %v300_v13 = vld [vmem:[%s1356_s29 + $0x138] sm:$0xff]  ;;  %v302_v14 = vld [vmem:[%s1356_s29 + $0x150] sm:$0xff] }
  0x18   : > { %299 = vst [vmem:[%s210_s30 + $0x60] sm:$0xff] %v298_v12  ;;  %301 = vst [vmem:[%s210_s30 + $0x68] sm:$0xff] %v300_v13  ;;  %v304_v15 = vld [vmem:[%s1356_s29 + $0x168] sm:$0xff] }
  0x19   : > { %303 = vst [vmem:[%s210_s30 + $0x70] sm:$0xff] %v302_v14  ;;  %305 = vst [vmem:[%s210_s30 + $0x78] sm:$0xff] %v304_v15 }
  0x1a PF: > { %p1042_p6 = scmp.ge.s32.totalorder %s1285_s19, 1  ;;  %p322_p7 = scmp.lt.s32.totalorder %s1285_s19, 4 }
  0x1c   : > { %p323_p8 = pnand %p1042_p6, %p322_p7 }
  0x1d   : > { %s329_s5 = sand.u32 (!%p323_p8), 1, %s1269_s15   ;;  %s1044_s6 = sshll.u32 (!%p323_p8), %s1277_s17, 5 }
  0x1e   : > { %326 = sbr.rel (%p323_p8) target bundleno = 339 (0x153), region = 70  ;;  %s1043_s7 = sshll.u32 (!%p323_p8), %s329_s5, 7 }
  0x1f   : > { %p379_p9 = scmp.lt.s32.totalorder (!%p323_p8), %s1044_s6, 95  ;;  %s1383_s12 = scalar_lea.vmem (!%p323_p8), [#allocation2], %s1043_s7 }
  0x20   : > { %p1046_p10 = scmp.ne.s32.totalorder (!%p323_p8), %s1277_s17, 0 }
  0x25   : > { %s1755_s6 = smov (!%p379_p9, %s1044_s6), 95  ;;  %412 = sbr.rel (%p1046_p10) target bundleno = 47 (0x2f), region = 78 }
  0x26   : > { %s1045_s8 = sshll.u32 %s1755_s6, 2  ;;  %v1287_v16 = vmov (!%p1046_p10), 0.0  }
  0x27   : > { %s1381_s11 = scalar_lea.vmem %s1744_s1, %s1045_s8  ;;  %413 = vst [vmem:[%s1747_s4] sm:$0xff] (!%p1046_p10), %v1287_v16  ;;  %414 = vst [vmem:[%s1747_s4 + $0x8] sm:$0xff] (!%p1046_p10), %v1287_v16 }
  0x28   : > { %415 = vst [vmem:[%s1747_s4 + $0x10] sm:$0xff] (!%p1046_p10), %v1287_v16  ;;  %416 = vst [vmem:[%s1747_s4 + $0x18] sm:$0xff] (!%p1046_p10), %v1287_v16 }
  0x29   : > { %417 = vst [vmem:[%s1747_s4 + $0x20] sm:$0xff] (!%p1046_p10), %v1287_v16  ;;  %418 = vst [vmem:[%s1747_s4 + $0x28] sm:$0xff] (!%p1046_p10), %v1287_v16 }
  0x2a   : > { %419 = vst [vmem:[%s1747_s4 + $0x30] sm:$0xff] (!%p1046_p10), %v1287_v16  ;;  %420 = vst [vmem:[%s1747_s4 + $0x38] sm:$0xff] (!%p1046_p10), %v1287_v16 }
  0x2b   : > { %421 = vst [vmem:[%s1747_s4 + $0x40] sm:$0xff] (!%p1046_p10), %v1287_v16  ;;  %422 = vst [vmem:[%s1747_s4 + $0x48] sm:$0xff] (!%p1046_p10), %v1287_v16 }
  0x2c   : > { %423 = vst [vmem:[%s1747_s4 + $0x50] sm:$0xff] %v1287_v16  ;;  %424 = vst [vmem:[%s1747_s4 + $0x58] sm:$0xff] %v1287_v16 }
  0x2d   : > { %425 = vst [vmem:[%s1747_s4 + $0x60] sm:$0xff] %v1287_v16  ;;  %426 = vst [vmem:[%s1747_s4 + $0x68] sm:$0xff] %v1287_v16 }
  0x2e   : > { %427 = vst [vmem:[%s1747_s4 + $0x70] sm:$0xff] %v1287_v16  ;;  %428 = vst [vmem:[%s1747_s4 + $0x78] sm:$0xff] %v1287_v16 }
  0x2f PF: > { %v1207_v17 = vld [vmem:[%s1381_s11 + $0x40] sm:$0xff]   ;;  %v1209_v19 = vld [vmem:[%s1381_s11 + $0x48] sm:$0xff]   ;;  %v1211_v21 = vld [vmem:[%s1381_s11 + $0x50] sm:$0xff]   ;;  %p1079_p11 = scmp.ne.s32.totalorder %s1277_s17, 2 }
  0x30   : > { %v1208_v18 = vld [vmem:[%s1381_s11] sm:$0xff]   ;;  %1086 = vmatprep.subr.bf16.mxu0 %v1207_v17  ;;  %1150 = vmatprep.subr.bf16.mxu1 %v1207_v17  ;;  %v1210_v20 = vld [vmem:[%s1381_s11 + $0x8] sm:$0xff]   ;;  %v1212_v22 = vld [vmem:[%s1381_s11 + $0x10] sm:$0xff]  }
  0x31   : > { %1087 = vmatpush3.bf16.msra.mxu0 %v1208_v18  ;;  %1158 = vmatpush3.bf16.msra.mxu1 %v1208_v18  ;;  %v1213_v23 = vld [vmem:[%s1381_s11 + $0x58] sm:$0xff]   ;;  %v1215_v25 = vld [vmem:[%s1381_s11 + $0x60] sm:$0xff]   ;;  %v1217_v27 = vld [vmem:[%s1381_s11 + $0x68] sm:$0xff]  }
  0x32   : > { %1088 = vmatprep.subr.bf16.mxu0 %v1209_v19  ;;  %1151 = vmatprep.subr.bf16.mxu1 %v1209_v19  ;;  %v1214_v24 = vld [vmem:[%s1381_s11 + $0x18] sm:$0xff]   ;;  %v1216_v26 = vld [vmem:[%s1381_s11 + $0x20] sm:$0xff]   ;;  %v1218_v30 = vld [vmem:[%s1381_s11 + $0x28] sm:$0xff]  }
  0x33   : > { %v1225_v28 = vld [vmem:[%s1383_s12 + $0x4] ss:$8 sps:$4 sm:$0xff]   ;;  %v1219_v31 = vld [vmem:[%s1381_s11 + $0x70] sm:$0xff]   ;;  %v1221_v33 = vld [vmem:[%s1381_s11 + $0x78] sm:$0xff]  }
  0x34   : > { %v1228_v29 = vld [vmem:[%s1383_s12 + $0x44] ss:$8 sps:$4 sm:$0xff]   ;;  %701 = vmatprep.mubr.bf16.mxu0 %v1225_v28  ;;  %v1220_v32 = vld [vmem:[%s1381_s11 + $0x30] sm:$0xff]   ;;  %v1222_v34 = vld [vmem:[%s1381_s11 + $0x38] sm:$0xff]  }
  0x35   : > { %1089 = vmatpush3.bf16.msra.mxu0 %v1210_v20  ;;  %1159 = vmatpush3.bf16.msra.mxu1 %v1210_v20  ;;  %v1223_v35 = vld [vmem:[%s1383_s12] ss:$8 sps:$4 sm:$0xff]   ;;  %v1229_v37 = vld [vmem:[%s1383_s12 + $0x14] ss:$8 sps:$4 sm:$0xff]   ;;  %v1233_v39 = vld [vmem:[%s1383_s12 + $0x10] ss:$8 sps:$4 sm:$0xff]  }
  0x36   : > { %1090 = vmatprep.subr.bf16.mxu0 %v1211_v21  ;;  %1152 = vmatprep.subr.bf16.mxu1 %v1211_v21  ;;  %v1226_v36 = vld [vmem:[%s1383_s12 + $0x40] ss:$8 sps:$4 sm:$0xff]   ;;  %v1231_v38 = vld [vmem:[%s1383_s12 + $0x54] ss:$8 sps:$4 sm:$0xff]   ;;  %v1234_v40 = vld [vmem:[%s1383_s12 + $0x50] ss:$8 sps:$4 sm:$0xff]  }
  0x37   : > { %733 = vmatprep.mubr.bf16.mxu1 %v1228_v29  ;;  %v1235_v41 = vld [vmem:[%s1383_s12 + $0x24] ss:$8 sps:$4 sm:$0xff]   ;;  %v1239_v43 = vld [vmem:[%s1383_s12 + $0x20] ss:$8 sps:$4 sm:$0xff]   ;;  %v1241_v45 = vld [vmem:[%s1383_s12 + $0x34] ss:$8 sps:$4 sm:$0xff]  }
  0x38   : > { %v1237_v42 = vld [vmem:[%s1383_s12 + $0x64] ss:$8 sps:$4 sm:$0xff]   ;;  %v1240_v44 = vld [vmem:[%s1383_s12 + $0x60] ss:$8 sps:$4 sm:$0xff]   ;;  %v1243_v46 = vld [vmem:[%s1383_s12 + $0x74] ss:$8 sps:$4 sm:$0xff]  }
  0x39   : > { %1091 = vmatpush3.bf16.msra.mxu0 %v1212_v22  ;;  %1160 = vmatpush3.bf16.msra.mxu1 %v1212_v22  ;;  %v1245_v47 = vld [vmem:[%s1383_s12 + $0x30] ss:$8 sps:$4 sm:$0xff]   ;;  %v429_v51 = vld [vmem:[%s1747_s4] sm:$0xff]  ;;  %v430_v59 = vld [vmem:[%s1747_s4 + $0x8] sm:$0xff] }
  0x3a   : > { %1092 = vmatprep.subr.bf16.mxu0 %v1213_v23  ;;  %1153 = vmatprep.subr.bf16.mxu1 %v1213_v23  ;;  %v1246_v48 = vld [vmem:[%s1383_s12 + $0x70] ss:$8 sps:$4 sm:$0xff]   ;;  %v437_v53 = vld [vmem:[%s1747_s4 + $0x40] sm:$0xff]  ;;  %v438_v61 = vld [vmem:[%s1747_s4 + $0x48] sm:$0xff] }
  0x3b   : > { %v431_v7 = vld [vmem:[%s1747_s4 + $0x10] sm:$0xff]  ;;  %v432_v15 = vld [vmem:[%s1747_s4 + $0x18] sm:$0xff]  ;;  %v441_v29 = vld [vmem:[%s1747_s4 + $0x60] sm:$0xff] }
  0x3c   : > { %v439_v9 = vld [vmem:[%s1747_s4 + $0x50] sm:$0xff]  ;;  %v440_v17 = vld [vmem:[%s1747_s4 + $0x58] sm:$0xff] }
  0x3d   : > { %1093 = vmatpush3.bf16.msra.mxu0 %v1214_v24  ;;  %1161 = vmatpush3.bf16.msra.mxu1 %v1214_v24 }
  0x3e   : > { %1094 = vmatprep.subr.bf16.mxu0 %v1215_v25  ;;  %1154 = vmatprep.subr.bf16.mxu1 %v1215_v25 }
  0x41   : > { %1095 = vmatpush3.bf16.msra.mxu0 %v1216_v26  ;;  %1162 = vmatpush3.bf16.msra.mxu1 %v1216_v26 }
  0x42   : > { %1096 = vmatprep.subr.bf16.mxu0 %v1217_v27  ;;  %1155 = vmatprep.subr.bf16.mxu1 %v1217_v27  ;;  %v433_v27 = vld [vmem:[%s1747_s4 + $0x20] sm:$0xff] }
  0x45   : > { %1097 = vmatpush3.bf16.msra.mxu0 %v1218_v30  ;;  %1163 = vmatpush3.bf16.msra.mxu1 %v1218_v30 }
  0x46   : > { %1098 = vmatprep.subr.bf16.mxu0 %v1219_v31  ;;  %1156 = vmatprep.subr.bf16.mxu1 %v1219_v31 }
  0x49   : > { %1099 = vmatpush3.bf16.msra.mxu0 %v1220_v32  ;;  %1164 = vmatpush3.bf16.msra.mxu1 %v1220_v32 }
  0x4a   : > { %1100 = vmatprep.subr.bf16.mxu0 %v1221_v33  ;;  %1157 = vmatprep.subr.bf16.mxu1 %v1221_v33 }
  0x4d   : > { %1101 = vmatpush3.bf16.msra.mxu0 %v1222_v34  ;;  %1165 = vmatpush3.bf16.msra.mxu1 %v1222_v34 }
  0x50   : > { %702 = vmatmul.mubr.bf16.vlgmr.msra.gmra.mrb[0].mxu0 %v1223_v35  ;;  %734 = vmatmul.mubr.bf16.vlgmr.msra.gmra.mrb[0].mxu1 %v1226_v36  ;;  %v434_v35 = vld [vmem:[%s1747_s4 + $0x28] sm:$0xff] }
  0x51   : > { %709 = vmatprep.mubr.bf16.mxu0 %v1229_v37  ;;  %741 = vmatprep.mubr.bf16.mxu1 %v1231_v38  ;;  %v442_v37 = vld [vmem:[%s1747_s4 + $0x68] sm:$0xff] }
  0x58   : > { %710 = vmatmul.mubr.bf16.gmra.mrb[4].mxu0 %v1233_v39  ;;  %742 = vmatmul.mubr.bf16.gmra.mrb[4].mxu1 %v1234_v40 }
  0x59   : > { %717 = vmatprep.mubr.bf16.mxu0 %v1235_v41  ;;  %749 = vmatprep.mubr.bf16.mxu1 %v1237_v42 }
  0x60   : > { %718 = vmatmul.mubr.bf16.gmra.mrb[8].mxu0 %v1239_v43  ;;  %750 = vmatmul.mubr.bf16.gmra.mrb[8].mxu1 %v1240_v44 }
  0x61   : > { %725 = vmatprep.mubr.bf16.mxu0 %v1241_v45  ;;  %757 = vmatprep.mubr.bf16.mxu1 %v1243_v46 }
  0x68   : > { %726 = vmatmul.mubr.bf16.gmra.mrb[12].mxu0 %v1245_v47  ;;  %758 = vmatmul.mubr.bf16.gmra.mrb[12].mxu1 %v1246_v48  ;;  %v435_v47 = vld [vmem:[%s1747_s4 + $0x30] sm:$0xff] }
 0x123   : > { %v1102_v49 = vpop.f32.mrb[0].mxu0  ;;  %v1126_v50 = vpop.f32.mrb[0].mxu1 }
 0x124   : > { %v1103_v52 = vpop.f32.mrb[1].mxu0  ;;  %v1127_v54 = vpop.f32.mrb[1].mxu1 }
 0x125   : > { %v1104_v55 = vadd.f32 %v1103_v52, %v1102_v49  ;;  %v1128_v56 = vadd.f32 %v1127_v54, %v1126_v50  ;;  %v1105_v57 = vpop.f32.mrb[2].mxu0  ;;  %v1129_v58 = vpop.f32.mrb[2].mxu1  ;;  %v443_v49 = vld [vmem:[%s1747_s4 + $0x70] sm:$0xff] }
 0x126   : > { %v1106_v60 = vpop.f32.mrb[3].mxu0  ;;  %v1130_v62 = vpop.f32.mrb[3].mxu1 }
 0x127   : > { %v766_v63 = vadd.f32 %v1104_v55, %v429_v51  ;;  %v774_v0 = vadd.f32 %v1128_v56, %v437_v53  ;;  %v1107_v1 = vadd.f32 %v1106_v60, %v1105_v57  ;;  %v1131_v2 = vadd.f32 %v1130_v62, %v1129_v58  ;;  %v436_v55 = vld [vmem:[%s1747_s4 + $0x38] sm:$0xff] }
 0x128   : > { %v444_v57 = vld [vmem:[%s1747_s4 + $0x78] sm:$0xff] }
 0x129   : > { %782 = vst [vmem:[%s1747_s4] sm:$0xff] %v766_v63  ;;  %790 = vst [vmem:[%s1747_s4 + $0x40] sm:$0xff] %v774_v0  ;;  %v767_v3 = vadd.f32 %v1107_v1, %v430_v59  ;;  %v775_v4 = vadd.f32 %v1131_v2, %v438_v61  ;;  %v1569_v2 = vld [vmem:[%s1745_s2] ss:$0 sm:$0xff] (!%p1079_p11) }
 0x12b   : > { %783 = vst [vmem:[%s1747_s4 + $0x8] sm:$0xff] %v767_v3  ;;  %791 = vst [vmem:[%s1747_s4 + $0x48] sm:$0xff] %v775_v4  ;;  %v1108_v5 = vpop.f32.mrb[4].mxu0  ;;  %v1132_v6 = vpop.f32.mrb[4].mxu1  ;;  %v841_v3 = vld [vmem:[%s1746_s3] sm:$0xff] (!%p1079_p11) }
 0x12c   : > { %v1109_v8 = vpop.f32.mrb[5].mxu0  ;;  %v1133_v10 = vpop.f32.mrb[5].mxu1 }
 0x12d   : > { %v1110_v11 = vadd.f32 %v1109_v8, %v1108_v5  ;;  %v1134_v12 = vadd.f32 %v1133_v10, %v1132_v6  ;;  %v1111_v13 = vpop.f32.mrb[6].mxu0  ;;  %v1135_v14 = vpop.f32.mrb[6].mxu1  ;;  %v842_v6 = vld [vmem:[%s1746_s3 + $0x8] sm:$0xff] (!%p1079_p11)  ;;  %v843_v10 = vld [vmem:[%s1746_s3 + $0x10] sm:$0xff] (!%p1079_p11) }
 0x12e   : > { %v1112_v16 = vpop.f32.mrb[7].mxu0  ;;  %v1136_v18 = vpop.f32.mrb[7].mxu1 }
 0x12f   : > { %v768_v19 = vadd.f32 %v1110_v11, %v431_v7  ;;  %v776_v20 = vadd.f32 %v1134_v12, %v439_v9  ;;  %v1113_v21 = vadd.f32 %v1112_v16, %v1111_v13  ;;  %v1137_v22 = vadd.f32 %v1136_v18, %v1135_v14  ;;  %v844_v12 = vld [vmem:[%s1746_s3 + $0x18] sm:$0xff] (!%p1079_p11)  ;;  %v845_v16 = vld [vmem:[%s1746_s3 + $0x20] sm:$0xff] (!%p1079_p11) }
 0x130   : > { %v802_v1 = vld [vmem:[%s1747_s4] sm:$0xff] (!%p1079_p11) }
 0x131   : > { %784 = vst [vmem:[%s1747_s4 + $0x10] sm:$0xff] %v768_v19  ;;  %792 = vst [vmem:[%s1747_s4 + $0x50] sm:$0xff] %v776_v20  ;;  %v769_v23 = vadd.f32 %v1113_v21, %v432_v15  ;;  %v777_v24 = vadd.f32 %v1137_v22, %v440_v17  ;;  %v825_v4 = vadd.f32 (!%p1079_p11), %v1569_v2, %v802_v1  ;;  %v846_v22 = vld [vmem:[%s1746_s3 + $0x28] sm:$0xff] (!%p1079_p11) }
 0x132   : > { %v803_v5 = vld [vmem:[%s1747_s4 + $0x8] sm:$0xff] (!%p1079_p11) }
 0x133   : > { %785 = vst [vmem:[%s1747_s4 + $0x18] sm:$0xff] %v769_v23  ;;  %793 = vst [vmem:[%s1747_s4 + $0x58] sm:$0xff] %v777_v24  ;;  %v1114_v25 = vpop.f32.mrb[8].mxu0  ;;  %v1138_v26 = vpop.f32.mrb[8].mxu1  ;;  %v826_v8 = vadd.f32 (!%p1079_p11), %v1569_v2, %v803_v5  ;;  %v857_v13 = vadd.f32 (!%p1079_p11), %v841_v3, %v825_v4  ;;  %v847_v24 = vld [vmem:[%s1746_s3 + $0x30] sm:$0xff] (!%p1079_p11) }
 0x134   : > { %v1115_v28 = vpop.f32.mrb[9].mxu0  ;;  %v1139_v30 = vpop.f32.mrb[9].mxu1 }
 0x135   : > { %v1116_v31 = vadd.f32 %v1115_v28, %v1114_v25  ;;  %v1140_v32 = vadd.f32 %v1139_v30, %v1138_v26  ;;  %v1117_v33 = vpop.f32.mrb[10].mxu0  ;;  %v1141_v34 = vpop.f32.mrb[10].mxu1  ;;  %v858_v18 = vadd.f32 (!%p1079_p11), %v842_v6, %v826_v8  ;;  %v873_v25 = vmax.f32 (!%p1079_p11), %v857_v13, 0.0  ;;  %v810_v30 = vld [vmem:[%s1747_s4 + $0x40] sm:$0xff] (!%p1079_p11) }
 0x136   : > { %v1118_v36 = vpop.f32.mrb[11].mxu0  ;;  %v1142_v38 = vpop.f32.mrb[11].mxu1 }
 0x137   : > { %v770_v39 = vadd.f32 %v1116_v31, %v433_v27  ;;  %v778_v40 = vadd.f32 %v1140_v32, %v441_v29  ;;  %v1119_v41 = vadd.f32 %v1118_v36, %v1117_v33  ;;  %v1143_v42 = vadd.f32 %v1142_v38, %v1141_v34  ;;  %v848_v29 = vld [vmem:[%s1746_s3 + $0x38] sm:$0xff] (!%p1079_p11)  ;;  %v811_v36 = vld [vmem:[%s1747_s4 + $0x48] sm:$0xff] (!%p1079_p11)  ;;  %889 = vst [vmem:[%s1747_s4] sm:$0xff] (!%p1079_p11), %v873_v25 }
 0x138   : > { %v804_v7 = vld [vmem:[%s1747_s4 + $0x10] sm:$0xff] (!%p1079_p11)  ;;  %v874_v31 = vmax.f32 (!%p1079_p11), %v858_v18, 0.0 }
 0x139   : > { %786 = vst [vmem:[%s1747_s4 + $0x20] sm:$0xff] %v770_v39  ;;  %794 = vst [vmem:[%s1747_s4 + $0x60] sm:$0xff] %v778_v40  ;;  %v771_v43 = vadd.f32 %v1119_v41, %v434_v35  ;;  %v779_v44 = vadd.f32 %v1143_v42, %v442_v37  ;;  %v827_v9 = vadd.f32 (!%p1079_p11), %v1569_v2, %v804_v7  ;;  %v849_v35 = vld [vmem:[%s1746_s3 + $0x40] sm:$0xff] (!%p1079_p11)  ;;  %v850_v37 = vld [vmem:[%s1746_s3 + $0x48] sm:$0xff] (!%p1079_p11) }
 0x13a   : > { %v805_v11 = vld [vmem:[%s1747_s4 + $0x18] sm:$0xff] (!%p1079_p11)  ;;  %v833_v41 = vadd.f32 (!%p1079_p11), %v1569_v2, %v810_v30  ;;  %v812_v42 = vld [vmem:[%s1747_s4 + $0x50] sm:$0xff] (!%p1079_p11)  ;;  %890 = vst [vmem:[%s1747_s4 + $0x8] sm:$0xff] (!%p1079_p11), %v874_v31 }
 0x13b   : > { %787 = vst [vmem:[%s1747_s4 + $0x28] sm:$0xff] %v771_v43  ;;  %795 = vst [vmem:[%s1747_s4 + $0x68] sm:$0xff] %v779_v44  ;;  %v1120_v45 = vpop.f32.mrb[12].mxu0  ;;  %v1144_v46 = vpop.f32.mrb[12].mxu1  ;;  %v828_v14 = vadd.f32 (!%p1079_p11), %v1569_v2, %v805_v11  ;;  %v859_v19 = vadd.f32 (!%p1079_p11), %v843_v10, %v827_v9  ;;  %v851_v43 = vld [vmem:[%s1746_s3 + $0x50] sm:$0xff] (!%p1079_p11)  ;;  %v813_v44 = vld [vmem:[%s1747_s4 + $0x58] sm:$0xff] (!%p1079_p11) }
 0x13c   : > { %v1121_v48 = vpop.f32.mrb[13].mxu0  ;;  %v1145_v50 = vpop.f32.mrb[13].mxu1  ;;  %v856_v10 = vld [vmem:[%s1746_s3 + $0x78] sm:$0xff] (!%p1079_p11) }
 0x13d   : > { %v1122_v51 = vadd.f32 %v1121_v48, %v1120_v45  ;;  %v1146_v52 = vadd.f32 %v1145_v50, %v1144_v46  ;;  %v1123_v53 = vpop.f32.mrb[14].mxu0  ;;  %v1147_v54 = vpop.f32.mrb[14].mxu1  ;;  %801 = sbr.rel (%p1079_p11) target bundleno = 339 (0x153), region = 82  ;;  %v860_v26 = vadd.f32 (!%p1079_p11), %v844_v12, %v828_v14  ;;  %v875_v32 = vmax.f32 (!%p1079_p11), %v859_v19, 0.0 }
 0x13e   : > { %v1124_v56 = vpop.f32.mrb[15].mxu0  ;;  %v1148_v58 = vpop.f32.mrb[15].mxu1  ;;  %v835_v48 = vadd.f32 (!%p1079_p11), %v1569_v2, %v812_v42 }
 0x13f   : > { %v772_v59 = vadd.f32 %v1122_v51, %v435_v47  ;;  %v780_v60 = vadd.f32 %v1146_v52, %v443_v49  ;;  %v1125_v61 = vadd.f32 %v1124_v56, %v1123_v53  ;;  %v1149_v62 = vadd.f32 %v1148_v58, %v1147_v54  ;;  %891 = vst [vmem:[%s1747_s4 + $0x10] sm:$0xff] (!%p1079_p11), %v875_v32  ;;  %v852_v49 = vld [vmem:[%s1746_s3 + $0x58] sm:$0xff] (!%p1079_p11)  ;;  %v853_v51 = vld [vmem:[%s1746_s3 + $0x60] sm:$0xff] (!%p1079_p11) }
 0x140   : > { %v806_v15 = vld [vmem:[%s1747_s4 + $0x20] sm:$0xff] (!%p1079_p11)  ;;  %v876_v38 = vmax.f32 (!%p1079_p11), %v860_v26, 0.0  ;;  %v834_v47 = vadd.f32 (!%p1079_p11), %v1569_v2, %v811_v36  ;;  %v865_v54 = vadd.f32 (!%p1079_p11), %v849_v35, %v833_v41 }
 0x141   : > { %788 = vst [vmem:[%s1747_s4 + $0x30] sm:$0xff] %v772_v59  ;;  %796 = vst [vmem:[%s1747_s4 + $0x70] sm:$0xff] %v780_v60  ;;  %v773_v63 = vadd.f32 %v1125_v61, %v436_v55  ;;  %v781_v0 = vadd.f32 %v1149_v62, %v444_v57  ;;  %v829_v20 = vadd.f32 (!%p1079_p11), %v1569_v2, %v806_v15  ;;  %v814_v50 = vld [vmem:[%s1747_s4 + $0x60] sm:$0xff] (!%p1079_p11)  ;;  %v854_v57 = vld [vmem:[%s1746_s3 + $0x68] sm:$0xff] (!%p1079_p11) }
 0x142   : > { %v807_v17 = vld [vmem:[%s1747_s4 + $0x28] sm:$0xff] (!%p1079_p11)  ;;  %892 = vst [vmem:[%s1747_s4 + $0x18] sm:$0xff] (!%p1079_p11), %v876_v38  ;;  %v836_v55 = vadd.f32 (!%p1079_p11), %v1569_v2, %v813_v44  ;;  %v866_v59 = vadd.f32 (!%p1079_p11), %v850_v37, %v834_v47  ;;  %v867_v60 = vadd.f32 (!%p1079_p11), %v851_v43, %v835_v48  ;;  %v837_v61 = vadd.f32 (!%p1079_p11), %v1569_v2, %v814_v50 }
 0x143   : > { %789 = vst [vmem:[%s1747_s4 + $0x38] sm:$0xff] %v773_v63  ;;  %797 = vst [vmem:[%s1747_s4 + $0x78] sm:$0xff] %v781_v0  ;;  %v830_v21 = vadd.f32 (!%p1079_p11), %v1569_v2, %v807_v17  ;;  %v861_v33 = vadd.f32 (!%p1079_p11), %v845_v16, %v829_v20  ;;  %v815_v56 = vld [vmem:[%s1747_s4 + $0x68] sm:$0xff] (!%p1079_p11)  ;;  %v855_v63 = vld [vmem:[%s1746_s3 + $0x70] sm:$0xff] (!%p1079_p11)  ;;  %v881_v3 = vmax.f32 (!%p1079_p11), %v865_v54, 0.0 }
 0x144   : > { %v838_v62 = vadd.f32 %v1569_v2, %v815_v56  ;;  %v868_v4 = vadd.f32 %v852_v49, %v836_v55  ;;  %v882_v6 = vmax.f32 %v866_v59, 0.0  ;;  %v883_v7 = vmax.f32 %v867_v60, 0.0 }
 0x145   : > { %v862_v34 = vadd.f32 %v846_v22, %v830_v21  ;;  %v877_v45 = vmax.f32 %v861_v33, 0.0  ;;  %v869_v8 = vadd.f32 %v853_v51, %v837_v61  ;;  %897 = vst [vmem:[%s1747_s4 + $0x40] sm:$0xff] %v881_v3 }
 0x146   : > { %v870_v9 = vadd.f32 %v854_v57, %v838_v62  ;;  %v884_v11 = vmax.f32 %v868_v4, 0.0  ;;  %898 = vst [vmem:[%s1747_s4 + $0x48] sm:$0xff] %v882_v6  ;;  %899 = vst [vmem:[%s1747_s4 + $0x50] sm:$0xff] %v883_v7 }
 0x147   : > { %v878_v46 = vmax.f32 %v862_v34, 0.0  ;;  %893 = vst [vmem:[%s1747_s4 + $0x20] sm:$0xff] %v877_v45  ;;  %v885_v14 = vmax.f32 %v869_v8, 0.0 }
 0x148   : > { %v808_v23 = vld [vmem:[%s1747_s4 + $0x30] sm:$0xff]  ;;  %v886_v15 = vmax.f32 %v870_v9, 0.0  ;;  %900 = vst [vmem:[%s1747_s4 + $0x58] sm:$0xff] %v884_v11 }
 0x149   : > { %v831_v27 = vadd.f32 %v1569_v2, %v808_v23  ;;  %v816_v58 = vld [vmem:[%s1747_s4 + $0x70] sm:$0xff]  ;;  %894 = vst [vmem:[%s1747_s4 + $0x28] sm:$0xff] %v878_v46  ;;  %901 = vst [vmem:[%s1747_s4 + $0x60] sm:$0xff] %v885_v14 }
 0x14a   : > { %v809_v28 = vld [vmem:[%s1747_s4 + $0x38] sm:$0xff]  ;;  %v839_v5 = vadd.f32 %v1569_v2, %v816_v58  ;;  %902 = vst [vmem:[%s1747_s4 + $0x68] sm:$0xff] %v886_v15 }
 0x14b   : > { %v863_v39 = vadd.f32 %v847_v24, %v831_v27  ;;  %v832_v40 = vadd.f32 %v1569_v2, %v809_v28  ;;  %v817_v0 = vld [vmem:[%s1747_s4 + $0x78] sm:$0xff] }
 0x14c   : > { %v871_v12 = vadd.f32 %v855_v63, %v839_v5  ;;  %v840_v13 = vadd.f32 %v1569_v2, %v817_v0 }
 0x14d   : > { %v879_v52 = vmax.f32 %v863_v39, 0.0  ;;  %v864_v53 = vadd.f32 %v848_v29, %v832_v40 }
 0x14e   : > { %v887_v16 = vmax.f32 %v871_v12, 0.0  ;;  %v872_v17 = vadd.f32 %v856_v10, %v840_v13 }
 0x14f   : > { %895 = vst [vmem:[%s1747_s4 + $0x30] sm:$0xff] %v879_v52  ;;  %v880_v1 = vmax.f32 %v864_v53, 0.0 }
 0x150   : > { %903 = vst [vmem:[%s1747_s4 + $0x70] sm:$0xff] %v887_v16  ;;  %v888_v2 = vmax.f32 %v872_v17, 0.0 }
 0x151   : > { %896 = vst [vmem:[%s1747_s4 + $0x38] sm:$0xff] %v880_v1 }
 0x152   : > { %904 = vst [vmem:[%s1747_s4 + $0x78] sm:$0xff] %v888_v2 }
 0x153 PF: > { %s14_s19 = sadd.s32 1, %s1285_s19   ;;  %s1748_s15 = smov %s1273_s16 }
 0x154   : > { %p11_p12 = scmp.ge.s32.totalorder %s14_s19, 5   ;;  %s1749_s16 = smov %s1348_s23 }
 0x155   : > { %s1750_s17 = smov %s1281_s18  ;;  %s1751_s18 = smov %s1753_s20 }
 0x156   :  { %13 = sbr.rel (!%p11_p12) target bundleno = 3 (0x3), region = 126 }

// kernel: resnet18_forward.31
= control target key start
LH: loop header
LB: loop body
LE: loop exit
PB: predicated region body
PF: predicated region fallthrough
CT: control target
= control target key end

     0   :  { %s867_s12 = smov 0   ;;  %s869_s13 = smov 0   ;;  %s1021_s0 = inlined_call_operand.vmem [shape: bf16[32,768], index: 0, kind: input, shape index: {}]   ;;  %s1022_s1 = inlined_call_operand.vmem [shape: bf16[768,128], index: 1, kind: input, shape index: {}]   ;;  %s1023_s2 = inlined_call_operand.vmem [shape: f32[1,128], index: 2, kind: input, shape index: {}]   ;;  %s1024_s3 = inlined_call_operand.vmem [shape: f32[32,128], index: 3, kind: output, shape index: {}]  }
   0x1   :  { %s871_s14 = smov 0   ;;  %s873_s15 = smov 0  }
   0x2   :  { %s875_s16 = smov 0  }
   0x3 LB: > { %s25_s17 = sadd.s32 1, %s840_s15  ;;  %p48_p1 = scmp.ne.s32.totalorder %s832_s13, %s828_s12  ;;  %s844_s16 = sphi %s875_s16, %s13_s16   ;;  %s840_s15 = sphi %s873_s15, %s1028_s15   ;;  %s836_s14 = sphi %s871_s14, %s1027_s14   ;;  %s832_s13 = sphi %s869_s13, %s1026_s13   ;;  %s828_s12 = sphi %s867_s12, %s1025_s12  }
   0x4   : > { %p26_p0 = scmp.ge.s32.totalorder %s25_s17, 3  ;;  %p49_p2 = scmp.eq.s32.totalorder %s844_s16, 0 }
   0x5   : > { %s41_s19 = sadd.s32 1, %s832_s13  ;;  %p663_p5 = scmp.ge.s32.totalorder %s844_s16, 3 }
   0x6   : > { %s1030_s17 = smov (%p26_p0, %s25_s17), 0  ;;  %p50_p3 = por %p49_p2, %p48_p1 }
   0x7   : > { %s37_s18 = ssub.s32 %s840_s15, %s1030_s17  ;;  %162 = sbr.rel (%p663_p5) target bundleno = 21 (0x15), region = 20 }
   0x8   : > { %p39_p4 = scmp.eq.s32.totalorder %s37_s18, 0 }
   0xa   : > { %s902_s20 = scalar_select %p39_p4, %s832_s13, %s41_s19  }
   0xe   : > { %165 = sbr.rel (!%p50_p3) target bundleno = 21 (0x15), region = 24  ;;  %s167_s21 = sand.u32 (%p50_p3), 1, %s832_s13  }
   0xf   : > { %s698_s22 = sshll.u32 (%p50_p3), %s840_s15, 3  ;;  %s664_s23 = sshll.u32 (%p50_p3), %s167_s21, 5 }
  0x10   : > { %s175_s26 = scalar_lea.vmem (%p50_p3), %s1021_s0, %s698_s22  ;;  %s169_s27 = scalar_lea.vmem (%p50_p3), [#allocation2], %s664_s23 }
  0x11   : > { %v209_v0 = vld [vmem:[%s175_s26] sm:$0xff] (%p50_p3)  ;;  %v211_v1 = vld [vmem:[%s175_s26 + $0x18] sm:$0xff] (%p50_p3)  ;;  %v213_v2 = vld [vmem:[%s175_s26 + $0x30] sm:$0xff] (%p50_p3) }
  0x12   : > { %210 = vst [vmem:[%s169_s27] sm:$0xff] (%p50_p3), %v209_v0  ;;  %212 = vst [vmem:[%s169_s27 + $0x8] sm:$0xff] (%p50_p3), %v211_v1  ;;  %v215_v3 = vld [vmem:[%s175_s26 + $0x48] sm:$0xff] (%p50_p3) }
  0x13   : > { %214 = vst [vmem:[%s169_s27 + $0x10] sm:$0xff] (%p50_p3), %v213_v2  ;;  %216 = vst [vmem:[%s169_s27 + $0x18] sm:$0xff] (%p50_p3), %v215_v3 }
  0x15 PF: > { %p667_p6 = scmp.ge.s32.totalorder %s844_s16, 1  ;;  %p233_p7 = scmp.lt.s32.totalorder %s844_s16, 4 }
  0x17   : > { %p234_p8 = pnand %p667_p6, %p233_p7 }
  0x18   : > { %s240_s28 = sand.u32 (!%p234_p8), 1, %s828_s12   ;;  %s669_s29 = sshll.u32 (!%p234_p8), %s836_s14, 5 }
  0x19   : > { %237 = sbr.rel (%p234_p8) target bundleno = 304 (0x130), region = 66  ;;  %s668_s30 = sshll.u32 (!%p234_p8), %s240_s28, 5 }
  0x1a   : > { %p280_p9 = scmp.lt.s32.totalorder (!%p234_p8), %s669_s29, 95  ;;  %s919_s8 = scalar_lea.vmem (!%p234_p8), [#allocation2], %s668_s30 }
  0x1b   : > { %p671_p10 = scmp.ne.s32.totalorder (!%p234_p8), %s836_s14, 0 }
  0x20   : > { %s1032_s29 = smov (!%p280_p9, %s669_s29), 95  ;;  %304 = sbr.rel (%p671_p10) target bundleno = 39 (0x27), region = 74 }
  0x21   : > { %s670_s4 = sshll.u32 %s1032_s29, 2  ;;  %v846_v4 = vmov (!%p671_p10), 0.0  }
  0x22   : > { %s917_s7 = scalar_lea.vmem %s1022_s1, %s670_s4  ;;  %305 = vst [vmem:[%s1024_s3] sm:$0xff] (!%p671_p10), %v846_v4  ;;  %306 = vst [vmem:[%s1024_s3 + $0x8] sm:$0xff] (!%p671_p10), %v846_v4 }
  0x23   : > { %307 = vst [vmem:[%s1024_s3 + $0x10] sm:$0xff] (!%p671_p10), %v846_v4  ;;  %308 = vst [vmem:[%s1024_s3 + $0x18] sm:$0xff] (!%p671_p10), %v846_v4 }
  0x27 PF: > { %v784_v5 = vld [vmem:[%s917_s7 + $0x40] sm:$0xff]   ;;  %v786_v7 = vld [vmem:[%s917_s7 + $0x48] sm:$0xff]   ;;  %v788_v9 = vld [vmem:[%s917_s7 + $0x50] sm:$0xff]   ;;  %p692_p11 = scmp.ne.s32.totalorder %s836_s14, 2 }
  0x28   : > { %v785_v6 = vld [vmem:[%s917_s7] sm:$0xff]   ;;  %699 = vmatprep.subr.bf16.mxu0 %v784_v5  ;;  %727 = vmatprep.subr.bf16.mxu1 %v784_v5  ;;  %v787_v8 = vld [vmem:[%s917_s7 + $0x8] sm:$0xff]   ;;  %v789_v10 = vld [vmem:[%s917_s7 + $0x10] sm:$0xff]  }
  0x29   : > { %700 = vmatpush3.bf16.msra.mxu0 %v785_v6  ;;  %735 = vmatpush3.bf16.msra.mxu1 %v785_v6  ;;  %v790_v11 = vld [vmem:[%s917_s7 + $0x58] sm:$0xff]   ;;  %v792_v13 = vld [vmem:[%s917_s7 + $0x60] sm:$0xff]   ;;  %v794_v15 = vld [vmem:[%s917_s7 + $0x68] sm:$0xff]  }
  0x2a   : > { %701 = vmatprep.subr.bf16.mxu0 %v786_v7  ;;  %728 = vmatprep.subr.bf16.mxu1 %v786_v7  ;;  %v791_v12 = vld [vmem:[%s917_s7 + $0x18] sm:$0xff]   ;;  %v793_v14 = vld [vmem:[%s917_s7 + $0x20] sm:$0xff]   ;;  %v795_v18 = vld [vmem:[%s917_s7 + $0x28] sm:$0xff]  }
  0x2b   : > { %v802_v16 = vld [vmem:[%s919_s8 + $0x4] ss:$8 sps:$4 sm:$0xff]   ;;  %v805_v17 = vld [vmem:[%s919_s8 + $0x14] ss:$8 sps:$4 sm:$0xff]   ;;  %v800_v23 = vld [vmem:[%s919_s8] ss:$8 sps:$4 sm:$0xff]  }
  0x2c   : > { %v796_v19 = vld [vmem:[%s917_s7 + $0x70] sm:$0xff]   ;;  %497 = vmatprep.mubr.bf16.mxu0 %v802_v16  ;;  %505 = vmatprep.mubr.bf16.mxu1 %v805_v17  ;;  %v798_v21 = vld [vmem:[%s917_s7 + $0x78] sm:$0xff]   ;;  %v309_v27 = vld [vmem:[%s1024_s3] sm:$0xff] }
  0x2d   : > { %702 = vmatpush3.bf16.msra.mxu0 %v787_v8  ;;  %736 = vmatpush3.bf16.msra.mxu1 %v787_v8  ;;  %v797_v20 = vld [vmem:[%s917_s7 + $0x30] sm:$0xff]   ;;  %v799_v22 = vld [vmem:[%s917_s7 + $0x38] sm:$0xff]   ;;  %v310_v35 = vld [vmem:[%s1024_s3 + $0x8] sm:$0xff] }
  0x2e   : > { %703 = vmatprep.subr.bf16.mxu0 %v788_v9  ;;  %729 = vmatprep.subr.bf16.mxu1 %v788_v9  ;;  %v803_v24 = vld [vmem:[%s919_s8 + $0x10] ss:$8 sps:$4 sm:$0xff]   ;;  %v693_v46 = vld [vmem:[%s1023_s2] ss:$0 sm:$0xff] (!%p692_p11) }
  0x2f   : > { %v311_v29 = vld [vmem:[%s1024_s3 + $0x10] sm:$0xff]  ;;  %v312_v37 = vld [vmem:[%s1024_s3 + $0x18] sm:$0xff] }
  0x31   : > { %704 = vmatpush3.bf16.msra.mxu0 %v789_v10  ;;  %737 = vmatpush3.bf16.msra.mxu1 %v789_v10 }
  0x32   : > { %705 = vmatprep.subr.bf16.mxu0 %v790_v11  ;;  %730 = vmatprep.subr.bf16.mxu1 %v790_v11 }
  0x35   : > { %706 = vmatpush3.bf16.msra.mxu0 %v791_v12  ;;  %738 = vmatpush3.bf16.msra.mxu1 %v791_v12 }
  0x36   : > { %707 = vmatprep.subr.bf16.mxu0 %v792_v13  ;;  %731 = vmatprep.subr.bf16.mxu1 %v792_v13 }
  0x39   : > { %708 = vmatpush3.bf16.msra.mxu0 %v793_v14  ;;  %739 = vmatpush3.bf16.msra.mxu1 %v793_v14 }
  0x3a   : > { %709 = vmatprep.subr.bf16.mxu0 %v794_v15  ;;  %732 = vmatprep.subr.bf16.mxu1 %v794_v15 }
  0x3d   : > { %710 = vmatpush3.bf16.msra.mxu0 %v795_v18  ;;  %740 = vmatpush3.bf16.msra.mxu1 %v795_v18 }
  0x3e   : > { %711 = vmatprep.subr.bf16.mxu0 %v796_v19  ;;  %733 = vmatprep.subr.bf16.mxu1 %v796_v19 }
  0x41   : > { %712 = vmatpush3.bf16.msra.mxu0 %v797_v20  ;;  %741 = vmatpush3.bf16.msra.mxu1 %v797_v20 }
  0x42   : > { %713 = vmatprep.subr.bf16.mxu0 %v798_v21  ;;  %734 = vmatprep.subr.bf16.mxu1 %v798_v21 }
  0x45   : > { %714 = vmatpush3.bf16.msra.mxu0 %v799_v22  ;;  %742 = vmatpush3.bf16.msra.mxu1 %v799_v22 }
  0x48   : > { %498 = vmatmul.mubr.bf16.vlgmr.msra.gmra.mrb[0].mxu0 %v800_v23  ;;  %506 = vmatmul.mubr.bf16.vlgmr.msra.gmra.mrb[0].mxu1 %v803_v24 }
 0x11b   : > { %v715_v25 = vpop.f32.mrb[0].mxu0  ;;  %v721_v26 = vpop.f32.mrb[0].mxu1 }
 0x11c   : > { %v716_v28 = vpop.f32.mrb[1].mxu0  ;;  %v722_v30 = vpop.f32.mrb[1].mxu1 }
 0x11d   : > { %v717_v31 = vadd.f32 %v716_v28, %v715_v25  ;;  %v723_v32 = vadd.f32 %v722_v30, %v721_v26  ;;  %v718_v33 = vpop.f32.mrb[2].mxu0  ;;  %v724_v34 = vpop.f32.mrb[2].mxu1  ;;  %525 = sbr.rel (%p692_p11) target bundleno = 304 (0x130), region = 78 }
 0x11e   : > { %v719_v36 = vpop.f32.mrb[3].mxu0  ;;  %v725_v38 = vpop.f32.mrb[3].mxu1 }
 0x11f   : > { %v514_v39 = vadd.f32 %v717_v31, %v309_v27  ;;  %v516_v40 = vadd.f32 %v723_v32, %v311_v29  ;;  %v720_v41 = vadd.f32 %v719_v36, %v718_v33  ;;  %v726_v42 = vadd.f32 %v725_v38, %v724_v34 }
 0x121   : > { %518 = vst [vmem:[%s1024_s3] sm:$0xff] %v514_v39  ;;  %520 = vst [vmem:[%s1024_s3 + $0x10] sm:$0xff] %v516_v40  ;;  %v515_v43 = vadd.f32 %v720_v41, %v310_v35  ;;  %v517_v44 = vadd.f32 %v726_v42, %v312_v37 }
 0x123   : > { %519 = vst [vmem:[%s1024_s3 + $0x8] sm:$0xff] %v515_v43  ;;  %521 = vst [vmem:[%s1024_s3 + $0x18] sm:$0xff] %v517_v44 }
 0x128   : > { %v526_v45 = vld [vmem:[%s1024_s3] sm:$0xff]  ;;  %v528_v50 = vld [vmem:[%s1024_s3 + $0x10] sm:$0xff] }
 0x129   : > { %v537_v48 = vadd.f32 %v693_v46, %v526_v45  ;;  %v539_v52 = vadd.f32 %v693_v46, %v528_v50 }
 0x12a   : > { %v527_v47 = vld [vmem:[%s1024_s3 + $0x8] sm:$0xff]  ;;  %v529_v51 = vld [vmem:[%s1024_s3 + $0x18] sm:$0xff] }
 0x12b   : > { %v538_v49 = vadd.f32 %v693_v46, %v527_v47  ;;  %v540_v53 = vadd.f32 %v693_v46, %v529_v51  ;;  %v541_v54 = vmax.f32 %v537_v48, 0.0  ;;  %v543_v56 = vmax.f32 %v539_v52, 0.0 }
 0x12d   : > { %v542_v55 = vmax.f32 %v538_v49, 0.0  ;;  %v544_v57 = vmax.f32 %v540_v53, 0.0  ;;  %545 = vst [vmem:[%s1024_s3] sm:$0xff] %v541_v54  ;;  %547 = vst [vmem:[%s1024_s3 + $0x10] sm:$0xff] %v543_v56 }
 0x12f   : > { %546 = vst [vmem:[%s1024_s3 + $0x8] sm:$0xff] %v542_v55  ;;  %548 = vst [vmem:[%s1024_s3 + $0x18] sm:$0xff] %v544_v57 }
 0x130 PF: > { %s13_s16 = sadd.s32 1, %s844_s16   ;;  %s1025_s12 = smov %s832_s13 }
 0x131   : > { %p10_p12 = scmp.ge.s32.totalorder %s13_s16, 5   ;;  %s1026_s13 = smov %s902_s20 }
 0x132   : > { %s1027_s14 = smov %s840_s15  ;;  %s1028_s15 = smov %s1030_s17 }
 0x133   :  { %12 = sbr.rel (!%p10_p12) target bundleno = 3 (0x3), region = 119 }

// kernel: resnet18_forward.33
= control target key start
LH: loop header
LB: loop body
LE: loop exit
PB: predicated region body
PF: predicated region fallthrough
CT: control target
= control target key end

     0   :  { %s959_s15 = smov 0   ;;  %s961_s16 = smov 0   ;;  %s1125_s0 = inlined_call_operand.vmem [shape: bf16[32,1280], index: 0, kind: input, shape index: {}]   ;;  %s1126_s1 = inlined_call_operand.vmem [shape: bf16[1280,128], index: 1, kind: input, shape index: {}]   ;;  %s1127_s2 = inlined_call_operand.vmem [shape: f32[1,128], index: 2, kind: input, shape index: {}]   ;;  %s1128_s3 = inlined_call_operand.vmem [shape: f32[32,128], index: 3, kind: input, shape index: {}]   ;;  %s1129_s4 = inlined_call_operand.vmem [shape: f32[32,128], index: 4, kind: output, shape index: {}]  }
   0x1   :  { %s963_s17 = smov 0   ;;  %s965_s18 = smov 0  }
   0x2   :  { %s967_s19 = smov 0  }
   0x3 LB: > { %s26_s20 = sadd.s32 1, %s927_s18  ;;  %p49_p1 = scmp.ne.s32.totalorder %s919_s16, %s915_s15  ;;  %s931_s19 = sphi %s967_s19, %s14_s19   ;;  %s927_s18 = sphi %s965_s18, %s1133_s18   ;;  %s923_s17 = sphi %s963_s17, %s1132_s17   ;;  %s919_s16 = sphi %s961_s16, %s1131_s16   ;;  %s915_s15 = sphi %s959_s15, %s1130_s15  }
   0x4   : > { %p27_p0 = scmp.ge.s32.totalorder %s26_s20, 5  ;;  %p50_p2 = scmp.eq.s32.totalorder %s931_s19, 0 }
   0x5   : > { %s42_s22 = sadd.s32 1, %s919_s16  ;;  %p750_p5 = scmp.ge.s32.totalorder %s931_s19, 5 }
   0x6   : > { %s1135_s20 = smov (%p27_p0, %s26_s20), 0  ;;  %p51_p3 = por %p50_p2, %p49_p1 }
   0x7   : > { %s38_s21 = ssub.s32 %s927_s18, %s1135_s20  ;;  %203 = sbr.rel (%p750_p5) target bundleno = 21 (0x15), region = 24 }
   0x8   : > { %p40_p4 = scmp.eq.s32.totalorder %s38_s21, 0 }
   0xa   : > { %s994_s23 = scalar_select %p40_p4, %s919_s16, %s42_s22  }
   0xe   : > { %206 = sbr.rel (!%p51_p3) target bundleno = 21 (0x15), region = 28  ;;  %s208_s24 = sand.u32 (%p51_p3), 1, %s919_s16  }
   0xf   : > { %s785_s25 = sshll.u32 (%p51_p3), %s927_s18, 3  ;;  %s751_s26 = sshll.u32 (%p51_p3), %s208_s24, 5 }
  0x10   : > { %s216_s29 = scalar_lea.vmem (%p51_p3), %s1125_s0, %s785_s25  ;;  %s210_s30 = scalar_lea.vmem (%p51_p3), [#allocation2], %s751_s26 }
  0x11   : > { %v250_v0 = vld [vmem:[%s216_s29] sm:$0xff] (%p51_p3)  ;;  %v252_v1 = vld [vmem:[%s216_s29 + $0x28] sm:$0xff] (%p51_p3)  ;;  %v254_v2 = vld [vmem:[%s216_s29 + $0x50] sm:$0xff] (%p51_p3) }
  0x12   : > { %251 = vst [vmem:[%s210_s30] sm:$0xff] (%p51_p3), %v250_v0  ;;  %253 = vst [vmem:[%s210_s30 + $0x8] sm:$0xff] (%p51_p3), %v252_v1  ;;  %v256_v3 = vld [vmem:[%s216_s29 + $0x78] sm:$0xff] (%p51_p3) }
  0x13   : > { %255 = vst [vmem:[%s210_s30 + $0x10] sm:$0xff] (%p51_p3), %v254_v2  ;;  %257 = vst [vmem:[%s210_s30 + $0x18] sm:$0xff] (%p51_p3), %v256_v3 }
  0x15 PF: > { %p754_p6 = scmp.ge.s32.totalorder %s931_s19, 1  ;;  %p274_p7 = scmp.lt.s32.totalorder %s931_s19, 6 }
  0x17   : > { %p275_p8 = pnand %p754_p6, %p274_p7 }
  0x18   : > { %s281_s5 = sand.u32 (!%p275_p8), 1, %s915_s15   ;;  %s756_s6 = sshll.u32 (!%p275_p8), %s923_s17, 5 }
  0x19   : > { %278 = sbr.rel (%p275_p8) target bundleno = 306 (0x132), region = 70  ;;  %s755_s7 = sshll.u32 (!%p275_p8), %s281_s5, 5 }
  0x1a   : > { %p331_p9 = scmp.lt.s32.totalorder (!%p275_p8), %s756_s6, 159  ;;  %s1011_s12 = scalar_lea.vmem (!%p275_p8), [#allocation2], %s755_s7 }
  0x1b   : > { %p758_p10 = scmp.ne.s32.totalorder (!%p275_p8), %s923_s17, 0 }
  0x20   : > { %s1137_s6 = smov (!%p331_p9, %s756_s6), 159  ;;  %364 = sbr.rel (%p758_p10) target bundleno = 39 (0x27), region = 78 }
  0x21   : > { %s757_s8 = sshll.u32 %s1137_s6, 2  ;;  %v933_v4 = vmov (!%p758_p10), 0.0  }
  0x22   : > { %s1009_s11 = scalar_lea.vmem %s1126_s1, %s757_s8  ;;  %365 = vst [vmem:[%s1129_s4] sm:$0xff] (!%p758_p10), %v933_v4  ;;  %366 = vst [vmem:[%s1129_s4 + $0x8] sm:$0xff] (!%p758_p10), %v933_v4 }
  0x23   : > { %367 = vst [vmem:[%s1129_s4 + $0x10] sm:$0xff] (!%p758_p10), %v933_v4  ;;  %368 = vst [vmem:[%s1129_s4 + $0x18] sm:$0xff] (!%p758_p10), %v933_v4 }
  0x27 PF: > { %v871_v5 = vld [vmem:[%s1009_s11 + $0x40] sm:$0xff]   ;;  %v873_v7 = vld [vmem:[%s1009_s11 + $0x48] sm:$0xff]   ;;  %v875_v9 = vld [vmem:[%s1009_s11 + $0x50] sm:$0xff]   ;;  %p779_p11 = scmp.ne.s32.totalorder %s923_s17, 4 }
  0x28   : > { %v872_v6 = vld [vmem:[%s1009_s11] sm:$0xff]   ;;  %786 = vmatprep.subr.bf16.mxu0 %v871_v5  ;;  %814 = vmatprep.subr.bf16.mxu1 %v871_v5  ;;  %v874_v8 = vld [vmem:[%s1009_s11 + $0x8] sm:$0xff]   ;;  %v876_v10 = vld [vmem:[%s1009_s11 + $0x10] sm:$0xff]  }
  0x29   : > { %787 = vmatpush3.bf16.msra.mxu0 %v872_v6  ;;  %822 = vmatpush3.bf16.msra.mxu1 %v872_v6  ;;  %v877_v11 = vld [vmem:[%s1009_s11 + $0x58] sm:$0xff]   ;;  %v879_v13 = vld [vmem:[%s1009_s11 + $0x60] sm:$0xff]   ;;  %v881_v15 = vld [vmem:[%s1009_s11 + $0x68] sm:$0xff]  }
  0x2a   : > { %788 = vmatprep.subr.bf16.mxu0 %v873_v7  ;;  %815 = vmatprep.subr.bf16.mxu1 %v873_v7  ;;  %v878_v12 = vld [vmem:[%s1009_s11 + $0x18] sm:$0xff]   ;;  %v880_v14 = vld [vmem:[%s1009_s11 + $0x20] sm:$0xff]   ;;  %v882_v18 = vld [vmem:[%s1009_s11 + $0x28] sm:$0xff]  }
  0x2b   : > { %v889_v16 = vld [vmem:[%s1011_s12 + $0x4] ss:$8 sps:$4 sm:$0xff]   ;;  %v892_v17 = vld [vmem:[%s1011_s12 + $0x14] ss:$8 sps:$4 sm:$0xff]   ;;  %v887_v23 = vld [vmem:[%s1011_s12] ss:$8 sps:$4 sm:$0xff]  }
  0x2c   : > { %v883_v19 = vld [vmem:[%s1009_s11 + $0x70] sm:$0xff]   ;;  %557 = vmatprep.mubr.bf16.mxu0 %v889_v16  ;;  %565 = vmatprep.mubr.bf16.mxu1 %v892_v17  ;;  %v885_v21 = vld [vmem:[%s1009_s11 + $0x78] sm:$0xff]   ;;  %v369_v27 = vld [vmem:[%s1129_s4] sm:$0xff] }
  0x2d   : > { %789 = vmatpush3.bf16.msra.mxu0 %v874_v8  ;;  %823 = vmatpush3.bf16.msra.mxu1 %v874_v8  ;;  %v884_v20 = vld [vmem:[%s1009_s11 + $0x30] sm:$0xff]   ;;  %v886_v22 = vld [vmem:[%s1009_s11 + $0x38] sm:$0xff]   ;;  %v370_v35 = vld [vmem:[%s1129_s4 + $0x8] sm:$0xff] }
  0x2e   : > { %790 = vmatprep.subr.bf16.mxu0 %v875_v9  ;;  %816 = vmatprep.subr.bf16.mxu1 %v875_v9  ;;  %v890_v24 = vld [vmem:[%s1011_s12 + $0x10] ss:$8 sps:$4 sm:$0xff]   ;;  %v780_v46 = vld [vmem:[%s1127_s2] ss:$0 sm:$0xff] (!%p779_p11)  ;;  %v602_v50 = vld [vmem:[%s1128_s3 + $0x8] sm:$0xff] (!%p779_p11) }
  0x2f   : > { %v371_v29 = vld [vmem:[%s1129_s4 + $0x10] sm:$0xff]  ;;  %v372_v37 = vld [vmem:[%s1129_s4 + $0x18] sm:$0xff]  ;;  %v601_v47 = vld [vmem:[%s1128_s3] sm:$0xff] (!%p779_p11) }
  0x30   : > { %v603_v54 = vld [vmem:[%s1128_s3 + $0x10] sm:$0xff] (!%p779_p11)  ;;  %v604_v56 = vld [vmem:[%s1128_s3 + $0x18] sm:$0xff] (!%p779_p11) }
  0x31   : > { %791 = vmatpush3.bf16.msra.mxu0 %v876_v10  ;;  %824 = vmatpush3.bf16.msra.mxu1 %v876_v10 }
  0x32   : > { %792 = vmatprep.subr.bf16.mxu0 %v877_v11  ;;  %817 = vmatprep.subr.bf16.mxu1 %v877_v11 }
  0x35   : > { %793 = vmatpush3.bf16.msra.mxu0 %v878_v12  ;;  %825 = vmatpush3.bf16.msra.mxu1 %v878_v12 }
  0x36   : > { %794 = vmatprep.subr.bf16.mxu0 %v879_v13  ;;  %818 = vmatprep.subr.bf16.mxu1 %v879_v13 }
  0x39   : > { %795 = vmatpush3.bf16.msra.mxu0 %v880_v14  ;;  %826 = vmatpush3.bf16.msra.mxu1 %v880_v14 }
  0x3a   : > { %796 = vmatprep.subr.bf16.mxu0 %v881_v15  ;;  %819 = vmatprep.subr.bf16.mxu1 %v881_v15 }
  0x3d   : > { %797 = vmatpush3.bf16.msra.mxu0 %v882_v18  ;;  %827 = vmatpush3.bf16.msra.mxu1 %v882_v18 }
  0x3e   : > { %798 = vmatprep.subr.bf16.mxu0 %v883_v19  ;;  %820 = vmatprep.subr.bf16.mxu1 %v883_v19 }
  0x41   : > { %799 = vmatpush3.bf16.msra.mxu0 %v884_v20  ;;  %828 = vmatpush3.bf16.msra.mxu1 %v884_v20 }
  0x42   : > { %800 = vmatprep.subr.bf16.mxu0 %v885_v21  ;;  %821 = vmatprep.subr.bf16.mxu1 %v885_v21 }
  0x45   : > { %801 = vmatpush3.bf16.msra.mxu0 %v886_v22  ;;  %829 = vmatpush3.bf16.msra.mxu1 %v886_v22 }
  0x48   : > { %558 = vmatmul.mubr.bf16.vlgmr.msra.gmra.mrb[0].mxu0 %v887_v23  ;;  %566 = vmatmul.mubr.bf16.vlgmr.msra.gmra.mrb[0].mxu1 %v890_v24 }
 0x11b   : > { %v802_v25 = vpop.f32.mrb[0].mxu0  ;;  %v808_v26 = vpop.f32.mrb[0].mxu1 }
 0x11c   : > { %v803_v28 = vpop.f32.mrb[1].mxu0  ;;  %v809_v30 = vpop.f32.mrb[1].mxu1 }
 0x11d   : > { %v804_v31 = vadd.f32 %v803_v28, %v802_v25  ;;  %v810_v32 = vadd.f32 %v809_v30, %v808_v26  ;;  %v805_v33 = vpop.f32.mrb[2].mxu0  ;;  %v811_v34 = vpop.f32.mrb[2].mxu1  ;;  %585 = sbr.rel (%p779_p11) target bundleno = 306 (0x132), region = 82 }
 0x11e   : > { %v806_v36 = vpop.f32.mrb[3].mxu0  ;;  %v812_v38 = vpop.f32.mrb[3].mxu1 }
 0x11f   : > { %v574_v39 = vadd.f32 %v804_v31, %v369_v27  ;;  %v576_v40 = vadd.f32 %v810_v32, %v371_v29  ;;  %v807_v41 = vadd.f32 %v806_v36, %v805_v33  ;;  %v813_v42 = vadd.f32 %v812_v38, %v811_v34 }
 0x121   : > { %578 = vst [vmem:[%s1129_s4] sm:$0xff] %v574_v39  ;;  %580 = vst [vmem:[%s1129_s4 + $0x10] sm:$0xff] %v576_v40  ;;  %v575_v43 = vadd.f32 %v807_v41, %v370_v35  ;;  %v577_v44 = vadd.f32 %v813_v42, %v372_v37 }
 0x123   : > { %579 = vst [vmem:[%s1129_s4 + $0x8] sm:$0xff] %v575_v43  ;;  %581 = vst [vmem:[%s1129_s4 + $0x18] sm:$0xff] %v577_v44 }
 0x128   : > { %v586_v45 = vld [vmem:[%s1129_s4] sm:$0xff]  ;;  %v588_v51 = vld [vmem:[%s1129_s4 + $0x10] sm:$0xff] }
 0x129   : > { %v597_v48 = vadd.f32 %v780_v46, %v586_v45  ;;  %v599_v53 = vadd.f32 %v780_v46, %v588_v51 }
 0x12a   : > { %v587_v49 = vld [vmem:[%s1129_s4 + $0x8] sm:$0xff]  ;;  %v589_v55 = vld [vmem:[%s1129_s4 + $0x18] sm:$0xff] }
 0x12b   : > { %v598_v52 = vadd.f32 %v780_v46, %v587_v49  ;;  %v605_v57 = vadd.f32 %v601_v47, %v597_v48  ;;  %v600_v58 = vadd.f32 %v780_v46, %v589_v55  ;;  %v607_v60 = vadd.f32 %v603_v54, %v599_v53 }
 0x12d   : > { %v606_v59 = vadd.f32 %v602_v50, %v598_v52  ;;  %v609_v61 = vmax.f32 %v605_v57, 0.0  ;;  %v608_v62 = vadd.f32 %v604_v56, %v600_v58  ;;  %v611_v0 = vmax.f32 %v607_v60, 0.0 }
 0x12f   : > { %v610_v63 = vmax.f32 %v606_v59, 0.0  ;;  %613 = vst [vmem:[%s1129_s4] sm:$0xff] %v609_v61  ;;  %v612_v1 = vmax.f32 %v608_v62, 0.0  ;;  %615 = vst [vmem:[%s1129_s4 + $0x10] sm:$0xff] %v611_v0 }
 0x131   : > { %614 = vst [vmem:[%s1129_s4 + $0x8] sm:$0xff] %v610_v63  ;;  %616 = vst [vmem:[%s1129_s4 + $0x18] sm:$0xff] %v612_v1 }
 0x132 PF: > { %s14_s19 = sadd.s32 1, %s931_s19   ;;  %s1130_s15 = smov %s919_s16 }
 0x133   : > { %p11_p12 = scmp.ge.s32.totalorder %s14_s19, 7   ;;  %s1131_s16 = smov %s994_s23 }
 0x134   : > { %s1132_s17 = smov %s927_s18  ;;  %s1133_s18 = smov %s1135_s20 }
 0x135   :  { %13 = sbr.rel (!%p11_p12) target bundleno = 3 (0x3), region = 126 }

// kernel: resnet18_forward.32
= control target key start
LH: loop header
LB: loop body
LE: loop exit
PB: predicated region body
PF: predicated region fallthrough
CT: control target
= control target key end

     0   :  { %s307_s1 = inlined_call_operand.vmem [shape: bf16[128,128], index: 1, kind: input, shape index: {}]   ;;  %s308_s0 = inlined_call_operand.vmem [shape: bf16[32,128], index: 0, kind: input, shape index: {}]   ;;  %s309_s2 = inlined_call_operand.vmem [shape: f32[1,128], index: 2, kind: input, shape index: {}]   ;;  %s310_s3 = inlined_call_operand.vmem [shape: f32[32,128], index: 3, kind: output, shape index: {}]  }
   0x1   :  { %v232_v0 = vld [vmem:[%s307_s1] sm:$0xff]   ;;  %v233_v1 = vld [vmem:[%s307_s1 + $0x8] sm:$0xff]   ;;  %v234_v2 = vld [vmem:[%s307_s1 + $0x10] sm:$0xff]  }
   0x2   :  { %211 = vmatprep.subr.bf16.mxu0 %v232_v0  ;;  %v235_v3 = vld [vmem:[%s307_s1 + $0x18] sm:$0xff]   ;;  %v240_v4 = vld [vmem:[%s308_s0] sm:$0xff]   ;;  %v237_v6 = vld [vmem:[%s307_s1 + $0x28] sm:$0xff]  }
   0x3   :  { %212 = vmatpush3.bf16.msra.mxu0 %v232_v0  ;;  %227 = vmatprep.mubr.bf16.mxu0 %v240_v4  ;;  %v236_v5 = vld [vmem:[%s307_s1 + $0x20] sm:$0xff]   ;;  %v238_v7 = vld [vmem:[%s307_s1 + $0x30] sm:$0xff]   ;;  %v239_v8 = vld [vmem:[%s307_s1 + $0x38] sm:$0xff]  }
   0x4   :  { %213 = vmatprep.subr.bf16.mxu0 %v233_v1  ;;  %v241_v9 = vld [vmem:[%s308_s0 + $0x8] sm:$0xff]   ;;  %v200_v11 = vld [vmem:[%s309_s2] ss:$0 sm:$0xff] }
   0x7   :  { %214 = vmatpush3.bf16.msra.mxu0 %v233_v1 }
   0x8   :  { %215 = vmatprep.subr.bf16.mxu0 %v234_v2 }
   0xb   :  { %216 = vmatpush3.bf16.msra.mxu0 %v234_v2 }
   0xc   :  { %217 = vmatprep.subr.bf16.mxu0 %v235_v3 }
   0xf   :  { %218 = vmatpush3.bf16.msra.mxu0 %v235_v3 }
  0x10   :  { %219 = vmatprep.subr.bf16.mxu0 %v236_v5 }
  0x13   :  { %220 = vmatpush3.bf16.msra.mxu0 %v236_v5 }
  0x14   :  { %221 = vmatprep.subr.bf16.mxu0 %v237_v6 }
  0x17   :  { %222 = vmatpush3.bf16.msra.mxu0 %v237_v6 }
  0x18   :  { %223 = vmatprep.subr.bf16.mxu0 %v238_v7 }
  0x1b   :  { %224 = vmatpush3.bf16.msra.mxu0 %v238_v7 }
  0x1c   :  { %225 = vmatprep.subr.bf16.mxu0 %v239_v8 }
  0x1f   :  { %226 = vmatpush3.bf16.msra.mxu0 %v239_v8 }
  0x22   :  { %228 = vmatmul.mubr.bf16.vlgmr.msra.gmra.mrb[0].mxu0 %v241_v9 }
  0xf5   :  { %v229_v10 = vpop.f32.mrb[0].mxu0 }
  0xf6   :  { %v141_v12 = vpop.f32.mrb[1].mxu0  ;;  %v180_v14 = vadd.f32 %v229_v10, %v200_v11 }
  0xf7   :  { %v230_v13 = vpop.f32.mrb[2].mxu0  ;;  %v178_v16 = vadd.f32 %v200_v11, %v141_v12 }
  0xf8   :  { %v144_v15 = vpop.f32.mrb[3].mxu0  ;;  %184 = vst [vmem:[%s310_s3 + $0x10] sm:$0xff] %v180_v14  ;;  %v181_v17 = vadd.f32 %v230_v13, %v200_v11 }
  0xf9   :  { %182 = vst [vmem:[%s310_s3] sm:$0xff] %v178_v16  ;;  %v179_v18 = vadd.f32 %v200_v11, %v144_v15 }
  0xfa   :  { %185 = vst [vmem:[%s310_s3 + $0x18] sm:$0xff] %v181_v17 }
  0xfb   :  { %183 = vst [vmem:[%s310_s3 + $0x8] sm:$0xff] %v179_v18 }

// kernel: resnet18_forward.34
= control target key start
LH: loop header
LB: loop body
LE: loop exit
PB: predicated region body
PF: predicated region fallthrough
CT: control target
= control target key end

     0   :  { %s707_s12 = smov 0   ;;  %s709_s13 = smov 0   ;;  %s782_s0 = inlined_call_operand.vmem [shape: bf16[8,1280], index: 0, kind: input, shape index: {}]   ;;  %s783_s1 = inlined_call_operand.vmem [shape: bf16[1280,128], index: 1, kind: input, shape index: {}]   ;;  %s784_s2 = inlined_call_operand.vmem [shape: f32[1,128], index: 2, kind: input, shape index: {}]   ;;  %s785_s3 = inlined_call_operand.vmem [shape: f32[8,128], index: 3, kind: output, shape index: {}]  }
   0x1   :  { %s711_s14 = smov 0  }
   0x2 LB: > { %s25_s15 = sadd.s32 1, %s680_s13  ;;  %p568_p0 = scmp.ge.s32.totalorder %s684_s14, 1  ;;  %s684_s14 = sphi %s711_s14, %s13_s14   ;;  %s680_s13 = sphi %s709_s13, %s787_s13   ;;  %s676_s12 = sphi %s707_s12, %s786_s12  }
   0x3   : > { %p26_p1 = scmp.ge.s32.totalorder %s25_s15, 5  ;;  %p189_p2 = scmp.lt.s32.totalorder %s684_s14, 6 }
   0x5   : > { %s789_s15 = smov (%p26_p1, %s25_s15), 0  ;;  %p190_p3 = pnand %p568_p0, %p189_p2 }
   0x6   : > { %s569_s16 = sshll.u32 (!%p190_p3), %s676_s12, 1  ;;  %s571_s17 = sshll.u32 (!%p190_p3), %s676_s12, 5 }
   0x7   : > { %193 = sbr.rel (%p190_p3) target bundleno = 287 (0x11f), region = 32  ;;  %p233_p4 = scmp.lt.s32.totalorder (!%p190_p3), %s569_s16, 9 }
   0x8   : > { %p241_p5 = scmp.lt.s32.totalorder (!%p190_p3), %s571_s17, 159  ;;  %p573_p6 = scmp.ne.s32.totalorder (!%p190_p3), %s676_s12, 0 }
   0xe   : > { %s791_s16 = smov (!%p233_p4, %s569_s16), 9  ;;  %s793_s17 = smov (!%p241_p5, %s571_s17), 159 }
   0xf   : > { %s570_s18 = sshll.u32 %s791_s16, 2  ;;  %s572_s22 = sshll.u32 %s793_s17, 2  ;;  %v686_v0 = vmov (!%p573_p6), 0.0  }
  0x10   : > { %s238_s21 = scalar_lea.vmem %s782_s0, %s570_s18  ;;  %s735_s25 = scalar_lea.vmem %s783_s1, %s572_s22  ;;  %264 = vst [vmem:[%s785_s3] sm:$0xff] (!%p573_p6), %v686_v0 }
  0x11   : > { %263 = sbr.rel (%p573_p6) target bundleno = 24 (0x18), region = 36 }
  0x18 PF: > { %v644_v1 = vld [vmem:[%s735_s25 + $0x40] sm:$0xff]   ;;  %v646_v3 = vld [vmem:[%s735_s25 + $0x48] sm:$0xff]   ;;  %v648_v5 = vld [vmem:[%s735_s25 + $0x50] sm:$0xff]   ;;  %p592_p7 = scmp.ne.s32.totalorder %s676_s12, 4 }
  0x19   : > { %v645_v2 = vld [vmem:[%s735_s25] sm:$0xff]   ;;  %597 = vmatprep.subr.bf16.mxu0 %v644_v1  ;;  %v647_v4 = vld [vmem:[%s735_s25 + $0x8] sm:$0xff]   ;;  %v649_v6 = vld [vmem:[%s735_s25 + $0x10] sm:$0xff]  }
  0x1a   : > { %598 = vmatpush3.bf16.msra.mxu0 %v645_v2  ;;  %v650_v7 = vld [vmem:[%s735_s25 + $0x58] sm:$0xff]   ;;  %v652_v9 = vld [vmem:[%s735_s25 + $0x60] sm:$0xff]   ;;  %v654_v11 = vld [vmem:[%s735_s25 + $0x68] sm:$0xff]  }
  0x1b   : > { %599 = vmatprep.subr.bf16.mxu0 %v646_v3  ;;  %v651_v8 = vld [vmem:[%s735_s25 + $0x18] sm:$0xff]   ;;  %v653_v10 = vld [vmem:[%s735_s25 + $0x20] sm:$0xff]   ;;  %v655_v14 = vld [vmem:[%s735_s25 + $0x28] sm:$0xff]  }
  0x1c   : > { %v266_v12 = vld [vmem:[%s238_s21] sm:$0xff]  ;;  %v656_v15 = vld [vmem:[%s735_s25 + $0x70] sm:$0xff]   ;;  %v658_v17 = vld [vmem:[%s735_s25 + $0x78] sm:$0xff]  }
  0x1d   : > { %v575_v13 = vcombine.high %v266_v12, %v266_v12  ;;  %v657_v16 = vld [vmem:[%s735_s25 + $0x30] sm:$0xff]   ;;  %v659_v18 = vld [vmem:[%s735_s25 + $0x38] sm:$0xff]   ;;  %v574_v19 = vcombine.low %v266_v12, %v266_v12  ;;  %v265_v21 = vld [vmem:[%s785_s3] sm:$0xff] }
  0x1e   : > { %600 = vmatpush3.bf16.msra.mxu0 %v647_v4  ;;  %v593_v28 = vld [vmem:[%s784_s2] ss:$0 sm:$0xff] (!%p592_p7) }
  0x1f   : > { %601 = vmatprep.subr.bf16.mxu0 %v648_v5  ;;  %434 = vmatprep.mubr.bf16.mxu0 %v575_v13 }
  0x22   : > { %602 = vmatpush3.bf16.msra.mxu0 %v649_v6 }
  0x23   : > { %603 = vmatprep.subr.bf16.mxu0 %v650_v7 }
  0x26   : > { %604 = vmatpush3.bf16.msra.mxu0 %v651_v8 }
  0x27   : > { %605 = vmatprep.subr.bf16.mxu0 %v652_v9 }
  0x2a   : > { %606 = vmatpush3.bf16.msra.mxu0 %v653_v10 }
  0x2b   : > { %607 = vmatprep.subr.bf16.mxu0 %v654_v11 }
  0x2e   : > { %608 = vmatpush3.bf16.msra.mxu0 %v655_v14 }
  0x2f   : > { %609 = vmatprep.subr.bf16.mxu0 %v656_v15 }
  0x32   : > { %610 = vmatpush3.bf16.msra.mxu0 %v657_v16 }
  0x33   : > { %611 = vmatprep.subr.bf16.mxu0 %v658_v17 }
  0x36   : > { %612 = vmatpush3.bf16.msra.mxu0 %v659_v18 }
  0x39   : > { %435 = vmatmul.mubr.bf16.vlgmr.msra.gmra.mrb[0].mxu0 %v574_v19 }
 0x10c   : > { %v613_v20 = vpop.f32.mrb[0].mxu0  ;;  %447 = sbr.rel (%p592_p7) target bundleno = 287 (0x11f), region = 40 }
 0x10d   : > { %v614_v22 = vpop.f32.mrb[1].mxu0 }
 0x10e   : > { %v615_v23 = vadd.f32 %v614_v22, %v613_v20  ;;  %v616_v24 = vpop.f32.mrb[2].mxu0 }
 0x10f   : > { %v617_v25 = vpop.f32.mrb[3].mxu0 }
 0x110   : > { %v442_v26 = vadd.f32 %v615_v23, %v265_v21 }
 0x112   : > { %443 = vst [vmem:[%s785_s3] sm:$0xff] %v442_v26 }
 0x119   : > { %v448_v27 = vld [vmem:[%s785_s3] sm:$0xff] }
 0x11a   : > { %v456_v29 = vadd.f32 %v593_v28, %v448_v27 }
 0x11c   : > { %v457_v30 = vmax.f32 %v456_v29, 0.0 }
 0x11e   : > { %458 = vst [vmem:[%s785_s3] sm:$0xff] %v457_v30 }
 0x11f PF: > { %s13_s14 = sadd.s32 1, %s684_s14   ;;  %s786_s12 = smov %s680_s13 }
 0x120   : > { %p10_p8 = scmp.ge.s32.totalorder %s13_s14, 7   ;;  %s787_s13 = smov %s789_s15 }
 0x122   :  { %12 = sbr.rel (!%p10_p8) target bundleno = 2 (0x2), region = 76 }

// kernel: resnet18_forward.36
= control target key start
LH: loop header
LB: loop body
LE: loop exit
PB: predicated region body
PF: predicated region fallthrough
CT: control target
= control target key end

     0   :  { %s788_s15 = smov 0   ;;  %s790_s16 = smov 0   ;;  %s866_s0 = inlined_call_operand.vmem [shape: bf16[8,1280], index: 0, kind: input, shape index: {}]   ;;  %s867_s1 = inlined_call_operand.vmem [shape: bf16[1280,128], index: 1, kind: input, shape index: {}]   ;;  %s868_s2 = inlined_call_operand.vmem [shape: f32[1,128], index: 2, kind: input, shape index: {}]   ;;  %s869_s3 = inlined_call_operand.vmem [shape: f32[8,128], index: 3, kind: input, shape index: {}]   ;;  %s870_s4 = inlined_call_operand.vmem [shape: f32[8,128], index: 4, kind: output, shape index: {}]  }
   0x1   :  { %s792_s17 = smov 0  }
   0x2 LB: > { %s26_s18 = sadd.s32 1, %s756_s16  ;;  %p644_p0 = scmp.ge.s32.totalorder %s760_s17, 1  ;;  %s760_s17 = sphi %s792_s17, %s14_s17   ;;  %s756_s16 = sphi %s790_s16, %s872_s16   ;;  %s752_s15 = sphi %s788_s15, %s871_s15  }
   0x3   : > { %p27_p1 = scmp.ge.s32.totalorder %s26_s18, 5  ;;  %p228_p2 = scmp.lt.s32.totalorder %s760_s17, 6 }
   0x5   : > { %s874_s18 = smov (%p27_p1, %s26_s18), 0  ;;  %p229_p3 = pnand %p644_p0, %p228_p2 }
   0x6   : > { %s645_s19 = sshll.u32 (!%p229_p3), %s752_s15, 1  ;;  %s647_s20 = sshll.u32 (!%p229_p3), %s752_s15, 5 }
   0x7   : > { %232 = sbr.rel (%p229_p3) target bundleno = 289 (0x121), region = 36  ;;  %p281_p4 = scmp.lt.s32.totalorder (!%p229_p3), %s645_s19, 9 }
   0x8   : > { %p289_p5 = scmp.lt.s32.totalorder (!%p229_p3), %s647_s20, 159  ;;  %p649_p6 = scmp.ne.s32.totalorder (!%p229_p3), %s752_s15, 0 }
   0xe   : > { %s876_s19 = smov (!%p281_p4, %s645_s19), 9  ;;  %s878_s20 = smov (!%p289_p5, %s647_s20), 159 }
   0xf   : > { %s646_s21 = sshll.u32 %s876_s19, 2  ;;  %s648_s25 = sshll.u32 %s878_s20, 2  ;;  %v762_v0 = vmov (!%p649_p6), 0.0  }
  0x10   : > { %s286_s24 = scalar_lea.vmem %s866_s0, %s646_s21  ;;  %s816_s28 = scalar_lea.vmem %s867_s1, %s648_s25  ;;  %319 = vst [vmem:[%s870_s4] sm:$0xff] (!%p649_p6), %v762_v0 }
  0x11   : > { %318 = sbr.rel (%p649_p6) target bundleno = 24 (0x18), region = 40 }
  0x18 PF: > { %v720_v1 = vld [vmem:[%s816_s28 + $0x40] sm:$0xff]   ;;  %v722_v3 = vld [vmem:[%s816_s28 + $0x48] sm:$0xff]   ;;  %v724_v5 = vld [vmem:[%s816_s28 + $0x50] sm:$0xff]   ;;  %p668_p7 = scmp.ne.s32.totalorder %s752_s15, 4 }
  0x19   : > { %v721_v2 = vld [vmem:[%s816_s28] sm:$0xff]   ;;  %673 = vmatprep.subr.bf16.mxu0 %v720_v1  ;;  %v723_v4 = vld [vmem:[%s816_s28 + $0x8] sm:$0xff]   ;;  %v725_v6 = vld [vmem:[%s816_s28 + $0x10] sm:$0xff]  }
  0x1a   : > { %674 = vmatpush3.bf16.msra.mxu0 %v721_v2  ;;  %v726_v7 = vld [vmem:[%s816_s28 + $0x58] sm:$0xff]   ;;  %v728_v9 = vld [vmem:[%s816_s28 + $0x60] sm:$0xff]   ;;  %v730_v11 = vld [vmem:[%s816_s28 + $0x68] sm:$0xff]  }
  0x1b   : > { %675 = vmatprep.subr.bf16.mxu0 %v722_v3  ;;  %v727_v8 = vld [vmem:[%s816_s28 + $0x18] sm:$0xff]   ;;  %v729_v10 = vld [vmem:[%s816_s28 + $0x20] sm:$0xff]   ;;  %v731_v14 = vld [vmem:[%s816_s28 + $0x28] sm:$0xff]  }
  0x1c   : > { %v321_v12 = vld [vmem:[%s286_s24] sm:$0xff]  ;;  %v732_v15 = vld [vmem:[%s816_s28 + $0x70] sm:$0xff]   ;;  %v734_v17 = vld [vmem:[%s816_s28 + $0x78] sm:$0xff]  }
  0x1d   : > { %v651_v13 = vcombine.high %v321_v12, %v321_v12  ;;  %v733_v16 = vld [vmem:[%s816_s28 + $0x30] sm:$0xff]   ;;  %v735_v18 = vld [vmem:[%s816_s28 + $0x38] sm:$0xff]   ;;  %v650_v19 = vcombine.low %v321_v12, %v321_v12  ;;  %v320_v21 = vld [vmem:[%s870_s4] sm:$0xff] }
  0x1e   : > { %676 = vmatpush3.bf16.msra.mxu0 %v723_v4  ;;  %v669_v28 = vld [vmem:[%s868_s2] ss:$0 sm:$0xff] (!%p668_p7) }
  0x1f   : > { %677 = vmatprep.subr.bf16.mxu0 %v724_v5  ;;  %489 = vmatprep.mubr.bf16.mxu0 %v651_v13  ;;  %v512_v29 = vld [vmem:[%s869_s3] sm:$0xff] (!%p668_p7) }
  0x22   : > { %678 = vmatpush3.bf16.msra.mxu0 %v725_v6 }
  0x23   : > { %679 = vmatprep.subr.bf16.mxu0 %v726_v7 }
  0x26   : > { %680 = vmatpush3.bf16.msra.mxu0 %v727_v8 }
  0x27   : > { %681 = vmatprep.subr.bf16.mxu0 %v728_v9 }
  0x2a   : > { %682 = vmatpush3.bf16.msra.mxu0 %v729_v10 }
  0x2b   : > { %683 = vmatprep.subr.bf16.mxu0 %v730_v11 }
  0x2e   : > { %684 = vmatpush3.bf16.msra.mxu0 %v731_v14 }
  0x2f   : > { %685 = vmatprep.subr.bf16.mxu0 %v732_v15 }
  0x32   : > { %686 = vmatpush3.bf16.msra.mxu0 %v733_v16 }
  0x33   : > { %687 = vmatprep.subr.bf16.mxu0 %v734_v17 }
  0x36   : > { %688 = vmatpush3.bf16.msra.mxu0 %v735_v18 }
  0x39   : > { %490 = vmatmul.mubr.bf16.vlgmr.msra.gmra.mrb[0].mxu0 %v650_v19 }
 0x10c   : > { %v689_v20 = vpop.f32.mrb[0].mxu0  ;;  %502 = sbr.rel (%p668_p7) target bundleno = 289 (0x121), region = 44 }
 0x10d   : > { %v690_v22 = vpop.f32.mrb[1].mxu0 }
 0x10e   : > { %v691_v23 = vadd.f32 %v690_v22, %v689_v20  ;;  %v692_v24 = vpop.f32.mrb[2].mxu0 }
 0x10f   : > { %v693_v25 = vpop.f32.mrb[3].mxu0 }
 0x110   : > { %v497_v26 = vadd.f32 %v691_v23, %v320_v21 }
 0x112   : > { %498 = vst [vmem:[%s870_s4] sm:$0xff] %v497_v26 }
 0x119   : > { %v503_v27 = vld [vmem:[%s870_s4] sm:$0xff] }
 0x11a   : > { %v511_v30 = vadd.f32 %v669_v28, %v503_v27 }
 0x11c   : > { %v513_v31 = vadd.f32 %v512_v29, %v511_v30 }
 0x11e   : > { %v514_v32 = vmax.f32 %v513_v31, 0.0 }
 0x120   : > { %515 = vst [vmem:[%s870_s4] sm:$0xff] %v514_v32 }
 0x121 PF: > { %s14_s17 = sadd.s32 1, %s760_s17   ;;  %s871_s15 = smov %s756_s16 }
 0x122   : > { %p11_p8 = scmp.ge.s32.totalorder %s14_s17, 7   ;;  %s872_s16 = smov %s874_s18 }
 0x124   :  { %13 = sbr.rel (!%p11_p8) target bundleno = 2 (0x2), region = 83 }

// kernel: resnet18_forward.35
= control target key start
LH: loop header
LB: loop body
LE: loop exit
PB: predicated region body
PF: predicated region fallthrough
CT: control target
= control target key end

     0   :  { %v193_v0 = vmov 0.0   ;;  %vm194_vm0 = vmmov 0   ;;  %s248_s1 = inlined_call_operand.vmem [shape: bf16[128,128], index: 1, kind: input, shape index: {}]   ;;  %s249_s0 = inlined_call_operand.vmem [shape: bf16[8,128], index: 0, kind: input, shape index: {}]   ;;  %s250_s2 = inlined_call_operand.vmem [shape: f32[1,128], index: 2, kind: input, shape index: {}]   ;;  %s251_s3 = inlined_call_operand.vmem [shape: f32[8,128], index: 3, kind: output, shape index: {}]  }
   0x1   :  { %163 = vmatprep.subr.bf16.mxu0 %v193_v0  ;;  %v185_v1 = vld [vmem:[%s248_s1] sm:$0xff]   ;;  %179 = vmatprep.mubr.msk.bf16.mxu0 %vm194_vm0, %v193_v0  ;;  %v186_v2 = vld [vmem:[%s248_s1 + $0x8] sm:$0xff]   ;;  %v187_v3 = vld [vmem:[%s248_s1 + $0x10] sm:$0xff]  }
   0x2   :  { %164 = vmatpush3.bf16.msra.mxu0 %v185_v1  ;;  %v188_v4 = vld [vmem:[%s248_s1 + $0x18] sm:$0xff]   ;;  %v189_v5 = vld [vmem:[%s248_s1 + $0x20] sm:$0xff]   ;;  %v190_v6 = vld [vmem:[%s248_s1 + $0x28] sm:$0xff]  }
   0x3   :  { %165 = vmatprep.subr.bf16.mxu0 %v193_v0  ;;  %v191_v7 = vld [vmem:[%s248_s1 + $0x30] sm:$0xff]   ;;  %v192_v8 = vld [vmem:[%s248_s1 + $0x38] sm:$0xff]   ;;  %v21_v9 = vld [vmem:[%s249_s0] sm:$0xf] }
   0x4   :  { %v153_v11 = vld [vmem:[%s250_s2] ss:$0 sm:$0xff] }
   0x6   :  { %166 = vmatpush3.bf16.msra.mxu0 %v186_v2 }
   0x7   :  { %167 = vmatprep.subr.bf16.mxu0 %v193_v0 }
   0xa   :  { %168 = vmatpush3.bf16.msra.mxu0 %v187_v3 }
   0xb   :  { %169 = vmatprep.subr.bf16.mxu0 %v193_v0 }
   0xe   :  { %170 = vmatpush3.bf16.msra.mxu0 %v188_v4 }
   0xf   :  { %171 = vmatprep.subr.bf16.mxu0 %v193_v0 }
  0x12   :  { %172 = vmatpush3.bf16.msra.mxu0 %v189_v5 }
  0x13   :  { %173 = vmatprep.subr.bf16.mxu0 %v193_v0 }
  0x16   :  { %174 = vmatpush3.bf16.msra.mxu0 %v190_v6 }
  0x17   :  { %175 = vmatprep.subr.bf16.mxu0 %v193_v0 }
  0x1a   :  { %176 = vmatpush3.bf16.msra.mxu0 %v191_v7 }
  0x1b   :  { %177 = vmatprep.subr.bf16.mxu0 %v193_v0 }
  0x1e   :  { %178 = vmatpush3.bf16.msra.mxu0 %v192_v8 }
  0x21   :  { %180 = vmatmul.mubr.bf16.vlgmr.msra.gmra.mrb[0].mxu0 %v21_v9 }
  0xf4   :  { %v120_v10 = vpop.f32.mrb[0].mxu0 }
  0xf5   :  { %v181_v12 = vpop.f32.mrb[1].mxu0  ;;  %v139_v14 = vadd.f32 %v153_v11, %v120_v10 }
  0xf6   :  { %v123_v13 = vpop.f32.mrb[2].mxu0 }
  0xf7   :  { %v182_v15 = vpop.f32.mrb[3].mxu0  ;;  %140 = vst [vmem:[%s251_s3] sm:$0xff] %v139_v14 }

// kernel: resnet18_forward.37
= control target key start
LH: loop header
LB: loop body
LE: loop exit
PB: predicated region body
PF: predicated region fallthrough
CT: control target
= control target key end

     0   :  { %s842_s12 = smov 0   ;;  %s844_s13 = smov 0   ;;  %s951_s0 = inlined_call_operand.vmem [shape: bf16[8,1280], index: 0, kind: input, shape index: {}]   ;;  %s952_s1 = inlined_call_operand.vmem [shape: bf16[1280,256], index: 1, kind: input, shape index: {}]   ;;  %s953_s2 = inlined_call_operand.vmem [shape: f32[1,256], index: 2, kind: input, shape index: {}]   ;;  %s954_s3 = inlined_call_operand.vmem [shape: f32[8,256], index: 3, kind: output, shape index: {}]  }
   0x1   :  { %s846_s14 = smov 0  }
   0x2 LB: > { %s25_s15 = sadd.s32 1, %s815_s13  ;;  %p675_p0 = scmp.ge.s32.totalorder %s819_s14, 1  ;;  %s819_s14 = sphi %s846_s14, %s13_s14   ;;  %s815_s13 = sphi %s844_s13, %s956_s13   ;;  %s811_s12 = sphi %s842_s12, %s955_s12  }
   0x3   : > { %p26_p1 = scmp.ge.s32.totalorder %s25_s15, 5  ;;  %p194_p2 = scmp.lt.s32.totalorder %s819_s14, 6 }
   0x5   : > { %s958_s15 = smov (%p26_p1, %s25_s15), 0  ;;  %p195_p3 = pnand %p675_p0, %p194_p2 }
   0x6   : > { %s676_s16 = sshll.u32 (!%p195_p3), %s811_s12, 1  ;;  %s678_s17 = sshll.u32 (!%p195_p3), %s811_s12, 5 }
   0x7   : > { %198 = sbr.rel (%p195_p3) target bundleno = 317 (0x13d), region = 32  ;;  %p243_p4 = scmp.lt.s32.totalorder (!%p195_p3), %s676_s16, 9 }
   0x8   : > { %p252_p5 = scmp.lt.s32.totalorder (!%p195_p3), %s678_s17, 159  ;;  %p681_p6 = scmp.ne.s32.totalorder (!%p195_p3), %s811_s12, 0 }
   0xe   : > { %s960_s16 = smov (!%p243_p4, %s676_s16), 9  ;;  %s962_s17 = smov (!%p252_p5, %s678_s17), 159 }
   0xf   : > { %s677_s18 = sshll.u32 %s960_s16, 2  ;;  %s721_s22 = sshll.u32 %s962_s17, 3  ;;  %v821_v0 = vmov (!%p681_p6), 0.0  }
  0x10   : > { %s867_s21 = scalar_lea.vmem %s951_s0, %s677_s18  ;;  %s872_s25 = scalar_lea.vmem %s952_s1, %s721_s22  ;;  %281 = vst [vmem:[%s954_s3] sm:$0xff] (!%p681_p6), %v821_v0  ;;  %282 = vst [vmem:[%s954_s3 + $0x8] sm:$0xff] (!%p681_p6), %v821_v0 }
  0x11   : > { %280 = sbr.rel (%p681_p6) target bundleno = 24 (0x18), region = 36 }
  0x18 PF: > { %v747_v1 = vld [vmem:[%s872_s25 + $0x4] ss:$8 sps:$4 sm:$0xff]   ;;  %v749_v2 = vld [vmem:[%s872_s25] ss:$8 sps:$4 sm:$0xff]   ;;  %v750_v3 = vld [vmem:[%s872_s25 + $0x14] ss:$8 sps:$4 sm:$0xff]  }
  0x19   : > { %485 = vmatprep.subr.bf16.mxu0 %v747_v1  ;;  %v752_v4 = vld [vmem:[%s872_s25 + $0x10] ss:$8 sps:$4 sm:$0xff]   ;;  %v753_v5 = vld [vmem:[%s872_s25 + $0x24] ss:$8 sps:$4 sm:$0xff]   ;;  %v755_v6 = vld [vmem:[%s872_s25 + $0x20] ss:$8 sps:$4 sm:$0xff]  }
  0x1a   : > { %486 = vmatpush1.bf16.msra.mxu0 %v749_v2  ;;  %v756_v7 = vld [vmem:[%s872_s25 + $0x34] ss:$8 sps:$4 sm:$0xff]   ;;  %v758_v8 = vld [vmem:[%s872_s25 + $0x30] ss:$8 sps:$4 sm:$0xff]   ;;  %v759_v9 = vld [vmem:[%s872_s25 + $0x44] ss:$8 sps:$4 sm:$0xff]  }
  0x1b   : > { %487 = vmatprep.subr.bf16.mxu0 %v750_v3  ;;  %v761_v10 = vld [vmem:[%s872_s25 + $0x40] ss:$8 sps:$4 sm:$0xff]   ;;  %v762_v11 = vld [vmem:[%s872_s25 + $0x54] ss:$8 sps:$4 sm:$0xff]   ;;  %v764_v12 = vld [vmem:[%s872_s25 + $0x50] ss:$8 sps:$4 sm:$0xff]  }
  0x1c   : > { %v765_v13 = vld [vmem:[%s872_s25 + $0x64] ss:$8 sps:$4 sm:$0xff]   ;;  %v767_v16 = vld [vmem:[%s872_s25 + $0x60] ss:$8 sps:$4 sm:$0xff]   ;;  %v768_v17 = vld [vmem:[%s872_s25 + $0x74] ss:$8 sps:$4 sm:$0xff]  }
  0x1d   : > { %v285_v14 = vld [vmem:[%s867_s21] sm:$0xff]  ;;  %v770_v18 = vld [vmem:[%s872_s25 + $0x70] ss:$8 sps:$4 sm:$0xff]   ;;  %v774_v21 = vld [vmem:[%s872_s25 + $0x94] ss:$8 sps:$4 sm:$0xff]   ;;  %p716_p7 = scmp.ne.s32.totalorder %s811_s12, 4 }
  0x1e   : > { %488 = vmatpush1.bf16.msra.mxu0 %v752_v4  ;;  %v683_v15 = vcombine.high %v285_v14, %v285_v14  ;;  %v771_v19 = vld [vmem:[%s872_s25 + $0x84] ss:$8 sps:$4 sm:$0xff]   ;;  %v773_v20 = vld [vmem:[%s872_s25 + $0x80] ss:$8 sps:$4 sm:$0xff]   ;;  %v776_v22 = vld [vmem:[%s872_s25 + $0x90] ss:$8 sps:$4 sm:$0xff]   ;;  %v682_v35 = vcombine.low %v285_v14, %v285_v14  ;;  %v538_v44 = vlaneseq (!%p716_p7) }
  0x1f   : > { %489 = vmatprep.subr.bf16.mxu0 %v753_v5  ;;  %v777_v23 = vld [vmem:[%s872_s25 + $0xa4] ss:$8 sps:$4 sm:$0xff]   ;;  %v779_v24 = vld [vmem:[%s872_s25 + $0xa0] ss:$8 sps:$4 sm:$0xff]   ;;  %v780_v25 = vld [vmem:[%s872_s25 + $0xb4] ss:$8 sps:$4 sm:$0xff]  }
  0x20   : > { %517 = vmatprep.mubr.bf16.mxu0 %v683_v15  ;;  %v782_v26 = vld [vmem:[%s872_s25 + $0xb0] ss:$8 sps:$4 sm:$0xff]   ;;  %v783_v27 = vld [vmem:[%s872_s25 + $0xc4] ss:$8 sps:$4 sm:$0xff]   ;;  %v785_v28 = vld [vmem:[%s872_s25 + $0xc0] ss:$8 sps:$4 sm:$0xff]  }
  0x21   : > { %v786_v29 = vld [vmem:[%s872_s25 + $0xd4] ss:$8 sps:$4 sm:$0xff]   ;;  %v788_v30 = vld [vmem:[%s872_s25 + $0xd0] ss:$8 sps:$4 sm:$0xff]   ;;  %v789_v31 = vld [vmem:[%s872_s25 + $0xe4] ss:$8 sps:$4 sm:$0xff]  }
  0x22   : > { %490 = vmatpush1.bf16.msra.mxu0 %v755_v6  ;;  %v791_v32 = vld [vmem:[%s872_s25 + $0xe0] ss:$8 sps:$4 sm:$0xff]   ;;  %v792_v33 = vld [vmem:[%s872_s25 + $0xf4] ss:$8 sps:$4 sm:$0xff]   ;;  %v794_v34 = vld [vmem:[%s872_s25 + $0xf0] ss:$8 sps:$4 sm:$0xff]  }
  0x23   : > { %491 = vmatprep.subr.bf16.mxu0 %v756_v7  ;;  %v283_v36 = vld [vmem:[%s954_s3] sm:$0xff]  ;;  %v284_v37 = vld [vmem:[%s954_s3 + $0x8] sm:$0xff]  ;;  %v539_v45 = vshrl.u32 (!%p716_p7), %v538_v44, 7 }
  0x24   : > { %v536_v46 = vld [vmem:[%s953_s2] sm:$0x3] (!%p716_p7) }
  0x25   : > { %v540_v47 = vsub.s32 (!%p716_p7), 0, %v539_v45  ;;  %v544_v48 = vsub.s32 (!%p716_p7), 1, %v539_v45 }
  0x26   : > { %492 = vmatpush1.bf16.msra.mxu0 %v758_v8 }
  0x27   : > { %493 = vmatprep.subr.bf16.mxu0 %v759_v9  ;;  %v541_v51 = vrot.slane (!%p716_p7), %v536_v46, %v540_v47  ;;  %v545_v52 = vrot.slane (!%p716_p7), %v536_v46, %v544_v48 }
  0x2a   : > { %494 = vmatpush1.bf16.msra.mxu0 %v761_v10 }
  0x2b   : > { %495 = vmatprep.subr.bf16.mxu0 %v762_v11 }
  0x2e   : > { %496 = vmatpush1.bf16.msra.mxu0 %v764_v12 }
  0x2f   : > { %497 = vmatprep.subr.bf16.mxu0 %v765_v13 }
  0x32   : > { %498 = vmatpush1.bf16.msra.mxu0 %v767_v16 }
  0x33   : > { %499 = vmatprep.subr.bf16.mxu0 %v768_v17 }
  0x36   : > { %500 = vmatpush1.bf16.msra.mxu0 %v770_v18 }
  0x37   : > { %501 = vmatprep.subr.bf16.mxu0 %v771_v19 }
  0x3a   : > { %502 = vmatpush1.bf16.msra.mxu0 %v773_v20 }
  0x3b   : > { %503 = vmatprep.subr.bf16.mxu0 %v774_v21 }
  0x3e   : > { %504 = vmatpush1.bf16.msra.mxu0 %v776_v22 }
  0x3f   : > { %505 = vmatprep.subr.bf16.mxu0 %v777_v23 }
  0x42   : > { %506 = vmatpush1.bf16.msra.mxu0 %v779_v24 }
  0x43   : > { %507 = vmatprep.subr.bf16.mxu0 %v780_v25 }
  0x46   : > { %508 = vmatpush1.bf16.msra.mxu0 %v782_v26 }
  0x47   : > { %509 = vmatprep.subr.bf16.mxu0 %v783_v27 }
  0x4a   : > { %510 = vmatpush1.bf16.msra.mxu0 %v785_v28 }
  0x4b   : > { %511 = vmatprep.subr.bf16.mxu0 %v786_v29 }
  0x4e   : > { %512 = vmatpush1.bf16.msra.mxu0 %v788_v30 }
  0x4f   : > { %513 = vmatprep.subr.bf16.mxu0 %v789_v31 }
  0x52   : > { %514 = vmatpush1.bf16.msra.mxu0 %v791_v32 }
  0x53   : > { %515 = vmatprep.subr.bf16.mxu0 %v792_v33 }
  0x56   : > { %516 = vmatpush1.bf16.msra.mxu0 %v794_v34 }
  0x59   : > { %518 = vmatmul.mubr.bf16.vlgmr.msra.gmra.mrb[0].mxu0 %v682_v35 }
 0x12a   : > { %533 = sbr.rel (%p716_p7) target bundleno = 317 (0x13d), region = 40 }
 0x12c   : > { %v519_v38 = vpop.f32.mrb[0].mxu0 }
 0x12d   : > { %v526_v39 = vadd.f32 %v519_v38, %v283_v36  ;;  %v521_v40 = vpop.f32.mrb[1].mxu0 }
 0x12e   : > { %v527_v41 = vadd.f32 %v521_v40, %v284_v37  ;;  %v523_v42 = vpop.f32.mrb[2].mxu0 }
 0x12f   : > { %528 = vst [vmem:[%s954_s3] sm:$0xff] %v526_v39  ;;  %v524_v43 = vpop.f32.mrb[3].mxu0 }
 0x130   : > { %529 = vst [vmem:[%s954_s3 + $0x8] sm:$0xff] %v527_v41 }
 0x136   : > { %v534_v49 = vld [vmem:[%s954_s3] sm:$0xff] }
 0x137   : > { %v535_v50 = vld [vmem:[%s954_s3 + $0x8] sm:$0xff]  ;;  %v548_v53 = vadd.f32 %v541_v51, %v534_v49 }
 0x138   : > { %v549_v54 = vadd.f32 %v545_v52, %v535_v50 }
 0x139   : > { %v550_v55 = vmax.f32 %v548_v53, 0.0 }
 0x13a   : > { %v551_v56 = vmax.f32 %v549_v54, 0.0 }
 0x13b   : > { %552 = vst [vmem:[%s954_s3] sm:$0xff] %v550_v55 }
 0x13c   : > { %553 = vst [vmem:[%s954_s3 + $0x8] sm:$0xff] %v551_v56 }
 0x13d PF: > { %s13_s14 = sadd.s32 1, %s819_s14   ;;  %s955_s12 = smov %s815_s13 }
 0x13e   : > { %p10_p8 = scmp.ge.s32.totalorder %s13_s14, 7   ;;  %s956_s13 = smov %s958_s15 }
 0x140   :  { %12 = sbr.rel (!%p10_p8) target bundleno = 2 (0x2), region = 76 }

// kernel: resnet18_forward.38
= control target key start
LH: loop header
LB: loop body
LE: loop exit
PB: predicated region body
PF: predicated region fallthrough
CT: control target
= control target key end

     0   :  { %v232_v1 = vmov 0   ;;  %v172_v18 = vlaneseq  ;;  %s313_s1 = inlined_call_operand.vmem [shape: bf16[128,256], index: 1, kind: input, shape index: {}]   ;;  %s314_s0 = inlined_call_operand.vmem [shape: bf16[8,128], index: 0, kind: input, shape index: {}]   ;;  %s315_s2 = inlined_call_operand.vmem [shape: f32[1,256], index: 2, kind: input, shape index: {}]   ;;  %s316_s3 = inlined_call_operand.vmem [shape: f32[8,256], index: 3, kind: output, shape index: {}]  }
   0x1   :  { %v208_v0 = vld [vmem:[%s313_s1 + $0x4] ss:$8 sps:$4 sm:$0xff]   ;;  %152 = vmatprep.mubr.bf16.mxu0 %v232_v1  ;;  %v210_v2 = vld [vmem:[%s313_s1] ss:$8 sps:$4 sm:$0xff]   ;;  %v211_v3 = vld [vmem:[%s313_s1 + $0x14] ss:$8 sps:$4 sm:$0xff]  }
   0x2   :  { %120 = vmatprep.subr.bf16.mxu0 %v208_v0  ;;  %v213_v4 = vld [vmem:[%s313_s1 + $0x10] ss:$8 sps:$4 sm:$0xff]   ;;  %v214_v5 = vld [vmem:[%s313_s1 + $0x24] ss:$8 sps:$4 sm:$0xff]   ;;  %v216_v6 = vld [vmem:[%s313_s1 + $0x20] ss:$8 sps:$4 sm:$0xff]  }
   0x3   :  { %121 = vmatpush1.bf16.msra.mxu0 %v210_v2  ;;  %v217_v7 = vld [vmem:[%s313_s1 + $0x34] ss:$8 sps:$4 sm:$0xff]   ;;  %v219_v8 = vld [vmem:[%s313_s1 + $0x30] ss:$8 sps:$4 sm:$0xff]   ;;  %v220_v9 = vld [vmem:[%s313_s1 + $0x44] ss:$8 sps:$4 sm:$0xff]  }
   0x4   :  { %122 = vmatprep.subr.bf16.mxu0 %v211_v3  ;;  %v222_v10 = vld [vmem:[%s313_s1 + $0x40] ss:$8 sps:$4 sm:$0xff]   ;;  %v223_v11 = vld [vmem:[%s313_s1 + $0x54] ss:$8 sps:$4 sm:$0xff]   ;;  %v225_v12 = vld [vmem:[%s313_s1 + $0x50] ss:$8 sps:$4 sm:$0xff]  }
   0x5   :  { %v226_v13 = vld [vmem:[%s313_s1 + $0x64] ss:$8 sps:$4 sm:$0xff]   ;;  %v228_v14 = vld [vmem:[%s313_s1 + $0x60] ss:$8 sps:$4 sm:$0xff]   ;;  %v229_v15 = vld [vmem:[%s313_s1 + $0x74] ss:$8 sps:$4 sm:$0xff]  }
   0x6   :  { %v231_v16 = vld [vmem:[%s313_s1 + $0x70] ss:$8 sps:$4 sm:$0xff]   ;;  %v23_v17 = vld [vmem:[%s314_s0] sm:$0xf]  ;;  %v173_v19 = vshrl.u32 %v172_v18, 7 }
   0x7   :  { %123 = vmatpush1.bf16.msra.mxu0 %v213_v4  ;;  %v170_v21 = vld [vmem:[%s315_s2] sm:$0x3] }
   0x8   :  { %124 = vmatprep.subr.bf16.mxu0 %v214_v5  ;;  %v174_v20 = vsub.s32 0, %v173_v19  ;;  %v178_v22 = vsub.s32 1, %v173_v19 }
   0xa   :  { %v175_v23 = vrot.slane %v170_v21, %v174_v20  ;;  %v179_v25 = vrot.slane %v170_v21, %v178_v22 }
   0xb   :  { %125 = vmatpush1.bf16.msra.mxu0 %v216_v6 }
   0xc   :  { %126 = vmatprep.subr.bf16.mxu0 %v217_v7 }
   0xf   :  { %127 = vmatpush1.bf16.msra.mxu0 %v219_v8 }
  0x10   :  { %128 = vmatprep.subr.bf16.mxu0 %v220_v9 }
  0x13   :  { %129 = vmatpush1.bf16.msra.mxu0 %v222_v10 }
  0x14   :  { %130 = vmatprep.subr.bf16.mxu0 %v223_v11 }
  0x17   :  { %131 = vmatpush1.bf16.msra.mxu0 %v225_v12 }
  0x18   :  { %132 = vmatprep.subr.bf16.mxu0 %v226_v13 }
  0x1b   :  { %133 = vmatpush1.bf16.msra.mxu0 %v228_v14 }
  0x1c   :  { %134 = vmatprep.subr.bf16.mxu0 %v229_v15 }
  0x1f   :  { %135 = vmatpush1.bf16.msra.mxu0 %v231_v16 }
  0x22   :  { %153 = vmatmul.mubr.bf16.vlgmr.msra.gmra.mrb[0].mxu0 %v23_v17 }
  0xf5   :  { %v154_v24 = vpop.f32.mrb[0].mxu0 }
  0xf6   :  { %v156_v26 = vpop.f32.mrb[1].mxu0  ;;  %v182_v28 = vadd.f32 %v175_v23, %v154_v24 }
  0xf7   :  { %v158_v27 = vpop.f32.mrb[2].mxu0  ;;  %v183_v30 = vadd.f32 %v179_v25, %v156_v26 }
  0xf8   :  { %v159_v29 = vpop.f32.mrb[3].mxu0  ;;  %184 = vst [vmem:[%s316_s3] sm:$0xff] %v182_v28 }
  0xf9   :  { %185 = vst [vmem:[%s316_s3 + $0x8] sm:$0xff] %v183_v30 }

// kernel: resnet18_forward.39
= control target key start
LH: loop header
LB: loop body
LE: loop exit
PB: predicated region body
PF: predicated region fallthrough
CT: control target
= control target key end

     0   :  { %s936_s15 = smov 0   ;;  %s938_s16 = smov 0   ;;  %s1051_s0 = inlined_call_operand.vmem [shape: bf16[8,2304], index: 0, kind: input, shape index: {}]   ;;  %s1052_s1 = inlined_call_operand.vmem [shape: bf16[2304,256], index: 1, kind: input, shape index: {}]   ;;  %s1053_s2 = inlined_call_operand.vmem [shape: f32[1,256], index: 2, kind: input, shape index: {}]   ;;  %s1054_s3 = inlined_call_operand.vmem [shape: f32[8,256], index: 3, kind: input, shape index: {}]   ;;  %s1055_s4 = inlined_call_operand.vmem [shape: f32[8,256], index: 4, kind: output, shape index: {}]  }
   0x1   :  { %s940_s17 = smov 0  }
   0x2 LB: > { %s26_s18 = sadd.s32 1, %s904_s16  ;;  %p764_p0 = scmp.ge.s32.totalorder %s908_s17, 1  ;;  %s908_s17 = sphi %s940_s17, %s14_s17   ;;  %s904_s16 = sphi %s938_s16, %s1057_s16   ;;  %s900_s15 = sphi %s936_s15, %s1056_s15  }
   0x3   : > { %p27_p1 = scmp.ge.s32.totalorder %s26_s18, 9  ;;  %p236_p2 = scmp.lt.s32.totalorder %s908_s17, 10 }
   0x5   : > { %s1059_s18 = smov (%p27_p1, %s26_s18), 0  ;;  %p237_p3 = pnand %p764_p0, %p236_p2 }
   0x6   : > { %s765_s19 = sshll.u32 (!%p237_p3), %s900_s15, 1  ;;  %s767_s20 = sshll.u32 (!%p237_p3), %s900_s15, 5 }
   0x7   : > { %240 = sbr.rel (%p237_p3) target bundleno = 319 (0x13f), region = 36  ;;  %p296_p4 = scmp.lt.s32.totalorder (!%p237_p3), %s765_s19, 17 }
   0x8   : > { %p305_p5 = scmp.lt.s32.totalorder (!%p237_p3), %s767_s20, 287  ;;  %p770_p6 = scmp.ne.s32.totalorder (!%p237_p3), %s900_s15, 0 }
   0xe   : > { %s1061_s19 = smov (!%p296_p4, %s765_s19), 17  ;;  %s1063_s20 = smov (!%p305_p5, %s767_s20), 287 }
   0xf   : > { %s766_s21 = sshll.u32 %s1061_s19, 2  ;;  %s810_s25 = sshll.u32 %s1063_s20, 3  ;;  %v910_v0 = vmov (!%p770_p6), 0.0  }
  0x10   : > { %s961_s24 = scalar_lea.vmem %s1051_s0, %s766_s21  ;;  %s966_s28 = scalar_lea.vmem %s1052_s1, %s810_s25  ;;  %344 = vst [vmem:[%s1055_s4] sm:$0xff] (!%p770_p6), %v910_v0  ;;  %345 = vst [vmem:[%s1055_s4 + $0x8] sm:$0xff] (!%p770_p6), %v910_v0 }
  0x11   : > { %343 = sbr.rel (%p770_p6) target bundleno = 24 (0x18), region = 40 }
  0x18 PF: > { %v836_v1 = vld [vmem:[%s966_s28 + $0x4] ss:$8 sps:$4 sm:$0xff]   ;;  %v838_v2 = vld [vmem:[%s966_s28] ss:$8 sps:$4 sm:$0xff]   ;;  %v839_v3 = vld [vmem:[%s966_s28 + $0x14] ss:$8 sps:$4 sm:$0xff]  }
  0x19   : > { %548 = vmatprep.subr.bf16.mxu0 %v836_v1  ;;  %v841_v4 = vld [vmem:[%s966_s28 + $0x10] ss:$8 sps:$4 sm:$0xff]   ;;  %v842_v5 = vld [vmem:[%s966_s28 + $0x24] ss:$8 sps:$4 sm:$0xff]   ;;  %v844_v6 = vld [vmem:[%s966_s28 + $0x20] ss:$8 sps:$4 sm:$0xff]  }
  0x1a   : > { %549 = vmatpush1.bf16.msra.mxu0 %v838_v2  ;;  %v845_v7 = vld [vmem:[%s966_s28 + $0x34] ss:$8 sps:$4 sm:$0xff]   ;;  %v847_v8 = vld [vmem:[%s966_s28 + $0x30] ss:$8 sps:$4 sm:$0xff]   ;;  %v848_v9 = vld [vmem:[%s966_s28 + $0x44] ss:$8 sps:$4 sm:$0xff]  }
  0x1b   : > { %550 = vmatprep.subr.bf16.mxu0 %v839_v3  ;;  %v850_v10 = vld [vmem:[%s966_s28 + $0x40] ss:$8 sps:$4 sm:$0xff]   ;;  %v851_v11 = vld [vmem:[%s966_s28 + $0x54] ss:$8 sps:$4 sm:$0xff]   ;;  %v853_v12 = vld [vmem:[%s966_s28 + $0x50] ss:$8 sps:$4 sm:$0xff]  }
  0x1c   : > { %v854_v13 = vld [vmem:[%s966_s28 + $0x64] ss:$8 sps:$4 sm:$0xff]   ;;  %v856_v16 = vld [vmem:[%s966_s28 + $0x60] ss:$8 sps:$4 sm:$0xff]   ;;  %v857_v17 = vld [vmem:[%s966_s28 + $0x74] ss:$8 sps:$4 sm:$0xff]  }
  0x1d   : > { %v348_v14 = vld [vmem:[%s961_s24] sm:$0xff]  ;;  %v859_v18 = vld [vmem:[%s966_s28 + $0x70] ss:$8 sps:$4 sm:$0xff]   ;;  %v863_v21 = vld [vmem:[%s966_s28 + $0x94] ss:$8 sps:$4 sm:$0xff]   ;;  %p805_p7 = scmp.ne.s32.totalorder %s900_s15, 8 }
  0x1e   : > { %551 = vmatpush1.bf16.msra.mxu0 %v841_v4  ;;  %v772_v15 = vcombine.high %v348_v14, %v348_v14  ;;  %v860_v19 = vld [vmem:[%s966_s28 + $0x84] ss:$8 sps:$4 sm:$0xff]   ;;  %v862_v20 = vld [vmem:[%s966_s28 + $0x80] ss:$8 sps:$4 sm:$0xff]   ;;  %v865_v22 = vld [vmem:[%s966_s28 + $0x90] ss:$8 sps:$4 sm:$0xff]   ;;  %v771_v35 = vcombine.low %v348_v14, %v348_v14  ;;  %v601_v44 = vlaneseq (!%p805_p7) }
  0x1f   : > { %552 = vmatprep.subr.bf16.mxu0 %v842_v5  ;;  %v866_v23 = vld [vmem:[%s966_s28 + $0xa4] ss:$8 sps:$4 sm:$0xff]   ;;  %v868_v24 = vld [vmem:[%s966_s28 + $0xa0] ss:$8 sps:$4 sm:$0xff]   ;;  %v869_v25 = vld [vmem:[%s966_s28 + $0xb4] ss:$8 sps:$4 sm:$0xff]  }
  0x20   : > { %580 = vmatprep.mubr.bf16.mxu0 %v772_v15  ;;  %v871_v26 = vld [vmem:[%s966_s28 + $0xb0] ss:$8 sps:$4 sm:$0xff]   ;;  %v872_v27 = vld [vmem:[%s966_s28 + $0xc4] ss:$8 sps:$4 sm:$0xff]   ;;  %v874_v28 = vld [vmem:[%s966_s28 + $0xc0] ss:$8 sps:$4 sm:$0xff]  }
  0x21   : > { %v875_v29 = vld [vmem:[%s966_s28 + $0xd4] ss:$8 sps:$4 sm:$0xff]   ;;  %v877_v30 = vld [vmem:[%s966_s28 + $0xd0] ss:$8 sps:$4 sm:$0xff]   ;;  %v878_v31 = vld [vmem:[%s966_s28 + $0xe4] ss:$8 sps:$4 sm:$0xff]  }
  0x22   : > { %553 = vmatpush1.bf16.msra.mxu0 %v844_v6  ;;  %v880_v32 = vld [vmem:[%s966_s28 + $0xe0] ss:$8 sps:$4 sm:$0xff]   ;;  %v881_v33 = vld [vmem:[%s966_s28 + $0xf4] ss:$8 sps:$4 sm:$0xff]   ;;  %v883_v34 = vld [vmem:[%s966_s28 + $0xf0] ss:$8 sps:$4 sm:$0xff]  }
  0x23   : > { %554 = vmatprep.subr.bf16.mxu0 %v845_v7  ;;  %v346_v36 = vld [vmem:[%s1055_s4] sm:$0xff]  ;;  %v347_v37 = vld [vmem:[%s1055_s4 + $0x8] sm:$0xff]  ;;  %v602_v45 = vshrl.u32 (!%p805_p7), %v601_v44, 7 }
  0x24   : > { %v599_v46 = vld [vmem:[%s1053_s2] sm:$0x3] (!%p805_p7)  ;;  %v614_v54 = vld [vmem:[%s1054_s3 + $0x8] sm:$0xff] (!%p805_p7) }
  0x25   : > { %v603_v47 = vsub.s32 (!%p805_p7), 0, %v602_v45  ;;  %v607_v48 = vsub.s32 (!%p805_p7), 1, %v602_v45  ;;  %v613_v53 = vld [vmem:[%s1054_s3] sm:$0xff] (!%p805_p7) }
  0x26   : > { %555 = vmatpush1.bf16.msra.mxu0 %v847_v8 }
  0x27   : > { %556 = vmatprep.subr.bf16.mxu0 %v848_v9  ;;  %v604_v51 = vrot.slane (!%p805_p7), %v599_v46, %v603_v47  ;;  %v608_v52 = vrot.slane (!%p805_p7), %v599_v46, %v607_v48 }
  0x2a   : > { %557 = vmatpush1.bf16.msra.mxu0 %v850_v10 }
  0x2b   : > { %558 = vmatprep.subr.bf16.mxu0 %v851_v11 }
  0x2e   : > { %559 = vmatpush1.bf16.msra.mxu0 %v853_v12 }
  0x2f   : > { %560 = vmatprep.subr.bf16.mxu0 %v854_v13 }
  0x32   : > { %561 = vmatpush1.bf16.msra.mxu0 %v856_v16 }
  0x33   : > { %562 = vmatprep.subr.bf16.mxu0 %v857_v17 }
  0x36   : > { %563 = vmatpush1.bf16.msra.mxu0 %v859_v18 }
  0x37   : > { %564 = vmatprep.subr.bf16.mxu0 %v860_v19 }
  0x3a   : > { %565 = vmatpush1.bf16.msra.mxu0 %v862_v20 }
  0x3b   : > { %566 = vmatprep.subr.bf16.mxu0 %v863_v21 }
  0x3e   : > { %567 = vmatpush1.bf16.msra.mxu0 %v865_v22 }
  0x3f   : > { %568 = vmatprep.subr.bf16.mxu0 %v866_v23 }
  0x42   : > { %569 = vmatpush1.bf16.msra.mxu0 %v868_v24 }
  0x43   : > { %570 = vmatprep.subr.bf16.mxu0 %v869_v25 }
  0x46   : > { %571 = vmatpush1.bf16.msra.mxu0 %v871_v26 }
  0x47   : > { %572 = vmatprep.subr.bf16.mxu0 %v872_v27 }
  0x4a   : > { %573 = vmatpush1.bf16.msra.mxu0 %v874_v28 }
  0x4b   : > { %574 = vmatprep.subr.bf16.mxu0 %v875_v29 }
  0x4e   : > { %575 = vmatpush1.bf16.msra.mxu0 %v877_v30 }
  0x4f   : > { %576 = vmatprep.subr.bf16.mxu0 %v878_v31 }
  0x52   : > { %577 = vmatpush1.bf16.msra.mxu0 %v880_v32 }
  0x53   : > { %578 = vmatprep.subr.bf16.mxu0 %v881_v33 }
  0x56   : > { %579 = vmatpush1.bf16.msra.mxu0 %v883_v34 }
  0x59   : > { %581 = vmatmul.mubr.bf16.vlgmr.msra.gmra.mrb[0].mxu0 %v771_v35 }
 0x12a   : > { %596 = sbr.rel (%p805_p7) target bundleno = 319 (0x13f), region = 44 }
 0x12c   : > { %v582_v38 = vpop.f32.mrb[0].mxu0 }
 0x12d   : > { %v589_v39 = vadd.f32 %v582_v38, %v346_v36  ;;  %v584_v40 = vpop.f32.mrb[1].mxu0 }
 0x12e   : > { %v590_v41 = vadd.f32 %v584_v40, %v347_v37  ;;  %v586_v42 = vpop.f32.mrb[2].mxu0 }
 0x12f   : > { %591 = vst [vmem:[%s1055_s4] sm:$0xff] %v589_v39  ;;  %v587_v43 = vpop.f32.mrb[3].mxu0 }
 0x130   : > { %592 = vst [vmem:[%s1055_s4 + $0x8] sm:$0xff] %v590_v41 }
 0x136   : > { %v597_v49 = vld [vmem:[%s1055_s4] sm:$0xff] }
 0x137   : > { %v598_v50 = vld [vmem:[%s1055_s4 + $0x8] sm:$0xff]  ;;  %v611_v55 = vadd.f32 %v604_v51, %v597_v49 }
 0x138   : > { %v612_v56 = vadd.f32 %v608_v52, %v598_v50 }
 0x139   : > { %v615_v57 = vadd.f32 %v613_v53, %v611_v55 }
 0x13a   : > { %v616_v58 = vadd.f32 %v614_v54, %v612_v56 }
 0x13b   : > { %v617_v59 = vmax.f32 %v615_v57, 0.0 }
 0x13c   : > { %v618_v60 = vmax.f32 %v616_v58, 0.0 }
 0x13d   : > { %619 = vst [vmem:[%s1055_s4] sm:$0xff] %v617_v59 }
 0x13e   : > { %620 = vst [vmem:[%s1055_s4 + $0x8] sm:$0xff] %v618_v60 }
 0x13f PF: > { %s14_s17 = sadd.s32 1, %s908_s17   ;;  %s1056_s15 = smov %s904_s16 }
 0x140   : > { %p11_p8 = scmp.ge.s32.totalorder %s14_s17, 11   ;;  %s1057_s16 = smov %s1059_s18 }
 0x142   :  { %13 = sbr.rel (!%p11_p8) target bundleno = 2 (0x2), region = 83 }

// kernel: resnet18_forward.40
= control target key start
LH: loop header
LB: loop body
LE: loop exit
PB: predicated region body
PF: predicated region fallthrough
CT: control target
= control target key end

     0   :  { %s842_s12 = smov 0   ;;  %s844_s13 = smov 0   ;;  %s951_s0 = inlined_call_operand.vmem [shape: bf16[8,2304], index: 0, kind: input, shape index: {}]   ;;  %s952_s1 = inlined_call_operand.vmem [shape: bf16[2304,256], index: 1, kind: input, shape index: {}]   ;;  %s953_s2 = inlined_call_operand.vmem [shape: f32[1,256], index: 2, kind: input, shape index: {}]   ;;  %s954_s3 = inlined_call_operand.vmem [shape: f32[8,256], index: 3, kind: output, shape index: {}]  }
   0x1   :  { %s846_s14 = smov 0  }
   0x2 LB: > { %s25_s15 = sadd.s32 1, %s815_s13  ;;  %p675_p0 = scmp.ge.s32.totalorder %s819_s14, 1  ;;  %s819_s14 = sphi %s846_s14, %s13_s14   ;;  %s815_s13 = sphi %s844_s13, %s956_s13   ;;  %s811_s12 = sphi %s842_s12, %s955_s12  }
   0x3   : > { %p26_p1 = scmp.ge.s32.totalorder %s25_s15, 9  ;;  %p194_p2 = scmp.lt.s32.totalorder %s819_s14, 10 }
   0x5   : > { %s958_s15 = smov (%p26_p1, %s25_s15), 0  ;;  %p195_p3 = pnand %p675_p0, %p194_p2 }
   0x6   : > { %s676_s16 = sshll.u32 (!%p195_p3), %s811_s12, 1  ;;  %s678_s17 = sshll.u32 (!%p195_p3), %s811_s12, 5 }
   0x7   : > { %198 = sbr.rel (%p195_p3) target bundleno = 317 (0x13d), region = 32  ;;  %p243_p4 = scmp.lt.s32.totalorder (!%p195_p3), %s676_s16, 17 }
   0x8   : > { %p252_p5 = scmp.lt.s32.totalorder (!%p195_p3), %s678_s17, 287  ;;  %p681_p6 = scmp.ne.s32.totalorder (!%p195_p3), %s811_s12, 0 }
   0xe   : > { %s960_s16 = smov (!%p243_p4, %s676_s16), 17  ;;  %s962_s17 = smov (!%p252_p5, %s678_s17), 287 }
   0xf   : > { %s677_s18 = sshll.u32 %s960_s16, 2  ;;  %s721_s22 = sshll.u32 %s962_s17, 3  ;;  %v821_v0 = vmov (!%p681_p6), 0.0  }
  0x10   : > { %s867_s21 = scalar_lea.vmem %s951_s0, %s677_s18  ;;  %s872_s25 = scalar_lea.vmem %s952_s1, %s721_s22  ;;  %281 = vst [vmem:[%s954_s3] sm:$0xff] (!%p681_p6), %v821_v0  ;;  %282 = vst [vmem:[%s954_s3 + $0x8] sm:$0xff] (!%p681_p6), %v821_v0 }
  0x11   : > { %280 = sbr.rel (%p681_p6) target bundleno = 24 (0x18), region = 36 }
  0x18 PF: > { %v747_v1 = vld [vmem:[%s872_s25 + $0x4] ss:$8 sps:$4 sm:$0xff]   ;;  %v749_v2 = vld [vmem:[%s872_s25] ss:$8 sps:$4 sm:$0xff]   ;;  %v750_v3 = vld [vmem:[%s872_s25 + $0x14] ss:$8 sps:$4 sm:$0xff]  }
  0x19   : > { %485 = vmatprep.subr.bf16.mxu0 %v747_v1  ;;  %v752_v4 = vld [vmem:[%s872_s25 + $0x10] ss:$8 sps:$4 sm:$0xff]   ;;  %v753_v5 = vld [vmem:[%s872_s25 + $0x24] ss:$8 sps:$4 sm:$0xff]   ;;  %v755_v6 = vld [vmem:[%s872_s25 + $0x20] ss:$8 sps:$4 sm:$0xff]  }
  0x1a   : > { %486 = vmatpush1.bf16.msra.mxu0 %v749_v2  ;;  %v756_v7 = vld [vmem:[%s872_s25 + $0x34] ss:$8 sps:$4 sm:$0xff]   ;;  %v758_v8 = vld [vmem:[%s872_s25 + $0x30] ss:$8 sps:$4 sm:$0xff]   ;;  %v759_v9 = vld [vmem:[%s872_s25 + $0x44] ss:$8 sps:$4 sm:$0xff]  }
  0x1b   : > { %487 = vmatprep.subr.bf16.mxu0 %v750_v3  ;;  %v761_v10 = vld [vmem:[%s872_s25 + $0x40] ss:$8 sps:$4 sm:$0xff]   ;;  %v762_v11 = vld [vmem:[%s872_s25 + $0x54] ss:$8 sps:$4 sm:$0xff]   ;;  %v764_v12 = vld [vmem:[%s872_s25 + $0x50] ss:$8 sps:$4 sm:$0xff]  }
  0x1c   : > { %v765_v13 = vld [vmem:[%s872_s25 + $0x64] ss:$8 sps:$4 sm:$0xff]   ;;  %v767_v16 = vld [vmem:[%s872_s25 + $0x60] ss:$8 sps:$4 sm:$0xff]   ;;  %v768_v17 = vld [vmem:[%s872_s25 + $0x74] ss:$8 sps:$4 sm:$0xff]  }
  0x1d   : > { %v285_v14 = vld [vmem:[%s867_s21] sm:$0xff]  ;;  %v770_v18 = vld [vmem:[%s872_s25 + $0x70] ss:$8 sps:$4 sm:$0xff]   ;;  %v774_v21 = vld [vmem:[%s872_s25 + $0x94] ss:$8 sps:$4 sm:$0xff]   ;;  %p716_p7 = scmp.ne.s32.totalorder %s811_s12, 8 }
  0x1e   : > { %488 = vmatpush1.bf16.msra.mxu0 %v752_v4  ;;  %v683_v15 = vcombine.high %v285_v14, %v285_v14  ;;  %v771_v19 = vld [vmem:[%s872_s25 + $0x84] ss:$8 sps:$4 sm:$0xff]   ;;  %v773_v20 = vld [vmem:[%s872_s25 + $0x80] ss:$8 sps:$4 sm:$0xff]   ;;  %v776_v22 = vld [vmem:[%s872_s25 + $0x90] ss:$8 sps:$4 sm:$0xff]   ;;  %v682_v35 = vcombine.low %v285_v14, %v285_v14  ;;  %v538_v44 = vlaneseq (!%p716_p7) }
  0x1f   : > { %489 = vmatprep.subr.bf16.mxu0 %v753_v5  ;;  %v777_v23 = vld [vmem:[%s872_s25 + $0xa4] ss:$8 sps:$4 sm:$0xff]   ;;  %v779_v24 = vld [vmem:[%s872_s25 + $0xa0] ss:$8 sps:$4 sm:$0xff]   ;;  %v780_v25 = vld [vmem:[%s872_s25 + $0xb4] ss:$8 sps:$4 sm:$0xff]  }
  0x20   : > { %517 = vmatprep.mubr.bf16.mxu0 %v683_v15  ;;  %v782_v26 = vld [vmem:[%s872_s25 + $0xb0] ss:$8 sps:$4 sm:$0xff]   ;;  %v783_v27 = vld [vmem:[%s872_s25 + $0xc4] ss:$8 sps:$4 sm:$0xff]   ;;  %v785_v28 = vld [vmem:[%s872_s25 + $0xc0] ss:$8 sps:$4 sm:$0xff]  }
  0x21   : > { %v786_v29 = vld [vmem:[%s872_s25 + $0xd4] ss:$8 sps:$4 sm:$0xff]   ;;  %v788_v30 = vld [vmem:[%s872_s25 + $0xd0] ss:$8 sps:$4 sm:$0xff]   ;;  %v789_v31 = vld [vmem:[%s872_s25 + $0xe4] ss:$8 sps:$4 sm:$0xff]  }
  0x22   : > { %490 = vmatpush1.bf16.msra.mxu0 %v755_v6  ;;  %v791_v32 = vld [vmem:[%s872_s25 + $0xe0] ss:$8 sps:$4 sm:$0xff]   ;;  %v792_v33 = vld [vmem:[%s872_s25 + $0xf4] ss:$8 sps:$4 sm:$0xff]   ;;  %v794_v34 = vld [vmem:[%s872_s25 + $0xf0] ss:$8 sps:$4 sm:$0xff]  }
  0x23   : > { %491 = vmatprep.subr.bf16.mxu0 %v756_v7  ;;  %v283_v36 = vld [vmem:[%s954_s3] sm:$0xff]  ;;  %v284_v37 = vld [vmem:[%s954_s3 + $0x8] sm:$0xff]  ;;  %v539_v45 = vshrl.u32 (!%p716_p7), %v538_v44, 7 }
  0x24   : > { %v536_v46 = vld [vmem:[%s953_s2] sm:$0x3] (!%p716_p7) }
  0x25   : > { %v540_v47 = vsub.s32 (!%p716_p7), 0, %v539_v45  ;;  %v544_v48 = vsub.s32 (!%p716_p7), 1, %v539_v45 }
  0x26   : > { %492 = vmatpush1.bf16.msra.mxu0 %v758_v8 }
  0x27   : > { %493 = vmatprep.subr.bf16.mxu0 %v759_v9  ;;  %v541_v51 = vrot.slane (!%p716_p7), %v536_v46, %v540_v47  ;;  %v545_v52 = vrot.slane (!%p716_p7), %v536_v46, %v544_v48 }
  0x2a   : > { %494 = vmatpush1.bf16.msra.mxu0 %v761_v10 }
  0x2b   : > { %495 = vmatprep.subr.bf16.mxu0 %v762_v11 }
  0x2e   : > { %496 = vmatpush1.bf16.msra.mxu0 %v764_v12 }
  0x2f   : > { %497 = vmatprep.subr.bf16.mxu0 %v765_v13 }
  0x32   : > { %498 = vmatpush1.bf16.msra.mxu0 %v767_v16 }
  0x33   : > { %499 = vmatprep.subr.bf16.mxu0 %v768_v17 }
  0x36   : > { %500 = vmatpush1.bf16.msra.mxu0 %v770_v18 }
  0x37   : > { %501 = vmatprep.subr.bf16.mxu0 %v771_v19 }
  0x3a   : > { %502 = vmatpush1.bf16.msra.mxu0 %v773_v20 }
  0x3b   : > { %503 = vmatprep.subr.bf16.mxu0 %v774_v21 }
  0x3e   : > { %504 = vmatpush1.bf16.msra.mxu0 %v776_v22 }
  0x3f   : > { %505 = vmatprep.subr.bf16.mxu0 %v777_v23 }
  0x42   : > { %506 = vmatpush1.bf16.msra.mxu0 %v779_v24 }
  0x43   : > { %507 = vmatprep.subr.bf16.mxu0 %v780_v25 }
  0x46   : > { %508 = vmatpush1.bf16.msra.mxu0 %v782_v26 }
  0x47   : > { %509 = vmatprep.subr.bf16.mxu0 %v783_v27 }
  0x4a   : > { %510 = vmatpush1.bf16.msra.mxu0 %v785_v28 }
  0x4b   : > { %511 = vmatprep.subr.bf16.mxu0 %v786_v29 }
  0x4e   : > { %512 = vmatpush1.bf16.msra.mxu0 %v788_v30 }
  0x4f   : > { %513 = vmatprep.subr.bf16.mxu0 %v789_v31 }
  0x52   : > { %514 = vmatpush1.bf16.msra.mxu0 %v791_v32 }
  0x53   : > { %515 = vmatprep.subr.bf16.mxu0 %v792_v33 }
  0x56   : > { %516 = vmatpush1.bf16.msra.mxu0 %v794_v34 }
  0x59   : > { %518 = vmatmul.mubr.bf16.vlgmr.msra.gmra.mrb[0].mxu0 %v682_v35 }
 0x12a   : > { %533 = sbr.rel (%p716_p7) target bundleno = 317 (0x13d), region = 40 }
 0x12c   : > { %v519_v38 = vpop.f32.mrb[0].mxu0 }
 0x12d   : > { %v526_v39 = vadd.f32 %v519_v38, %v283_v36  ;;  %v521_v40 = vpop.f32.mrb[1].mxu0 }
 0x12e   : > { %v527_v41 = vadd.f32 %v521_v40, %v284_v37  ;;  %v523_v42 = vpop.f32.mrb[2].mxu0 }
 0x12f   : > { %528 = vst [vmem:[%s954_s3] sm:$0xff] %v526_v39  ;;  %v524_v43 = vpop.f32.mrb[3].mxu0 }
 0x130   : > { %529 = vst [vmem:[%s954_s3 + $0x8] sm:$0xff] %v527_v41 }
 0x136   : > { %v534_v49 = vld [vmem:[%s954_s3] sm:$0xff] }
 0x137   : > { %v535_v50 = vld [vmem:[%s954_s3 + $0x8] sm:$0xff]  ;;  %v548_v53 = vadd.f32 %v541_v51, %v534_v49 }
 0x138   : > { %v549_v54 = vadd.f32 %v545_v52, %v535_v50 }
 0x139   : > { %v550_v55 = vmax.f32 %v548_v53, 0.0 }
 0x13a   : > { %v551_v56 = vmax.f32 %v549_v54, 0.0 }
 0x13b   : > { %552 = vst [vmem:[%s954_s3] sm:$0xff] %v550_v55 }
 0x13c   : > { %553 = vst [vmem:[%s954_s3 + $0x8] sm:$0xff] %v551_v56 }
 0x13d PF: > { %s13_s14 = sadd.s32 1, %s819_s14   ;;  %s955_s12 = smov %s815_s13 }
 0x13e   : > { %p10_p8 = scmp.ge.s32.totalorder %s13_s14, 11   ;;  %s956_s13 = smov %s958_s15 }
 0x140   :  { %12 = sbr.rel (!%p10_p8) target bundleno = 2 (0x2), region = 76 }

// kernel: resnet18_forward.41
= control target key start
LH: loop header
LB: loop body
LE: loop exit
PB: predicated region body
PF: predicated region fallthrough
CT: control target
= control target key end

     0   :  { %v274_v35 = vlaneseq  ;;  %s505_s1 = inlined_call_operand.vmem [shape: bf16[256,256], index: 1, kind: input, shape index: {}]   ;;  %s506_s0 = inlined_call_operand.vmem [shape: bf16[8,256], index: 0, kind: input, shape index: {}]   ;;  %s507_s2 = inlined_call_operand.vmem [shape: f32[1,256], index: 2, kind: input, shape index: {}]   ;;  %s508_s3 = inlined_call_operand.vmem [shape: f32[8,256], index: 3, kind: output, shape index: {}]  }
   0x1   :  { %v327_v0 = vld [vmem:[%s505_s1 + $0x4] ss:$8 sps:$4 sm:$0xff]   ;;  %v329_v1 = vld [vmem:[%s505_s1] ss:$8 sps:$4 sm:$0xff]   ;;  %v330_v2 = vld [vmem:[%s505_s1 + $0x14] ss:$8 sps:$4 sm:$0xff]  }
   0x2   :  { %222 = vmatprep.subr.bf16.mxu0 %v327_v0  ;;  %v332_v3 = vld [vmem:[%s505_s1 + $0x10] ss:$8 sps:$4 sm:$0xff]   ;;  %v333_v4 = vld [vmem:[%s505_s1 + $0x24] ss:$8 sps:$4 sm:$0xff]   ;;  %v335_v5 = vld [vmem:[%s505_s1 + $0x20] ss:$8 sps:$4 sm:$0xff]  }
   0x3   :  { %223 = vmatpush1.bf16.msra.mxu0 %v329_v1  ;;  %v336_v6 = vld [vmem:[%s505_s1 + $0x34] ss:$8 sps:$4 sm:$0xff]   ;;  %v338_v7 = vld [vmem:[%s505_s1 + $0x30] ss:$8 sps:$4 sm:$0xff]   ;;  %v339_v8 = vld [vmem:[%s505_s1 + $0x44] ss:$8 sps:$4 sm:$0xff]  }
   0x4   :  { %224 = vmatprep.subr.bf16.mxu0 %v330_v2  ;;  %v341_v9 = vld [vmem:[%s505_s1 + $0x40] ss:$8 sps:$4 sm:$0xff]   ;;  %v342_v10 = vld [vmem:[%s505_s1 + $0x54] ss:$8 sps:$4 sm:$0xff]   ;;  %v344_v11 = vld [vmem:[%s505_s1 + $0x50] ss:$8 sps:$4 sm:$0xff]  }
   0x5   :  { %v345_v12 = vld [vmem:[%s505_s1 + $0x64] ss:$8 sps:$4 sm:$0xff]   ;;  %v347_v15 = vld [vmem:[%s505_s1 + $0x60] ss:$8 sps:$4 sm:$0xff]   ;;  %v348_v16 = vld [vmem:[%s505_s1 + $0x74] ss:$8 sps:$4 sm:$0xff]  }
   0x6   :  { %v22_v13 = vld [vmem:[%s506_s0] sm:$0xff]  ;;  %v350_v17 = vld [vmem:[%s505_s1 + $0x70] ss:$8 sps:$4 sm:$0xff]   ;;  %v354_v20 = vld [vmem:[%s505_s1 + $0x94] ss:$8 sps:$4 sm:$0xff]   ;;  %v275_v36 = vshrl.u32 %v274_v35, 7 }
   0x7   :  { %225 = vmatpush1.bf16.msra.mxu0 %v332_v3  ;;  %v293_v14 = vcombine.high %v22_v13, %v22_v13  ;;  %v351_v18 = vld [vmem:[%s505_s1 + $0x84] ss:$8 sps:$4 sm:$0xff]   ;;  %v353_v19 = vld [vmem:[%s505_s1 + $0x80] ss:$8 sps:$4 sm:$0xff]   ;;  %v356_v21 = vld [vmem:[%s505_s1 + $0x90] ss:$8 sps:$4 sm:$0xff]   ;;  %v292_v34 = vcombine.low %v22_v13, %v22_v13 }
   0x8   :  { %226 = vmatprep.subr.bf16.mxu0 %v333_v4  ;;  %v357_v22 = vld [vmem:[%s505_s1 + $0xa4] ss:$8 sps:$4 sm:$0xff]   ;;  %v359_v23 = vld [vmem:[%s505_s1 + $0xa0] ss:$8 sps:$4 sm:$0xff]   ;;  %v360_v24 = vld [vmem:[%s505_s1 + $0xb4] ss:$8 sps:$4 sm:$0xff]  }
   0x9   :  { %254 = vmatprep.mubr.bf16.mxu0 %v293_v14  ;;  %v362_v25 = vld [vmem:[%s505_s1 + $0xb0] ss:$8 sps:$4 sm:$0xff]   ;;  %v363_v26 = vld [vmem:[%s505_s1 + $0xc4] ss:$8 sps:$4 sm:$0xff]   ;;  %v365_v27 = vld [vmem:[%s505_s1 + $0xc0] ss:$8 sps:$4 sm:$0xff]  }
   0xa   :  { %v366_v28 = vld [vmem:[%s505_s1 + $0xd4] ss:$8 sps:$4 sm:$0xff]   ;;  %v368_v29 = vld [vmem:[%s505_s1 + $0xd0] ss:$8 sps:$4 sm:$0xff]   ;;  %v369_v30 = vld [vmem:[%s505_s1 + $0xe4] ss:$8 sps:$4 sm:$0xff]  }
   0xb   :  { %227 = vmatpush1.bf16.msra.mxu0 %v335_v5  ;;  %v371_v31 = vld [vmem:[%s505_s1 + $0xe0] ss:$8 sps:$4 sm:$0xff]   ;;  %v372_v32 = vld [vmem:[%s505_s1 + $0xf4] ss:$8 sps:$4 sm:$0xff]   ;;  %v374_v33 = vld [vmem:[%s505_s1 + $0xf0] ss:$8 sps:$4 sm:$0xff]  }
   0xc   :  { %228 = vmatprep.subr.bf16.mxu0 %v336_v6  ;;  %v276_v37 = vsub.s32 0, %v275_v36  ;;  %v272_v38 = vld [vmem:[%s507_s2] sm:$0x3]  ;;  %v280_v39 = vsub.s32 1, %v275_v36 }
   0xe   :  { %v277_v40 = vrot.slane %v272_v38, %v276_v37  ;;  %v281_v42 = vrot.slane %v272_v38, %v280_v39 }
   0xf   :  { %229 = vmatpush1.bf16.msra.mxu0 %v338_v7 }
  0x10   :  { %230 = vmatprep.subr.bf16.mxu0 %v339_v8 }
  0x13   :  { %231 = vmatpush1.bf16.msra.mxu0 %v341_v9 }
  0x14   :  { %232 = vmatprep.subr.bf16.mxu0 %v342_v10 }
  0x17   :  { %233 = vmatpush1.bf16.msra.mxu0 %v344_v11 }
  0x18   :  { %234 = vmatprep.subr.bf16.mxu0 %v345_v12 }
  0x1b   :  { %235 = vmatpush1.bf16.msra.mxu0 %v347_v15 }
  0x1c   :  { %236 = vmatprep.subr.bf16.mxu0 %v348_v16 }
  0x1f   :  { %237 = vmatpush1.bf16.msra.mxu0 %v350_v17 }
  0x20   :  { %238 = vmatprep.subr.bf16.mxu0 %v351_v18 }
  0x23   :  { %239 = vmatpush1.bf16.msra.mxu0 %v353_v19 }
  0x24   :  { %240 = vmatprep.subr.bf16.mxu0 %v354_v20 }
  0x27   :  { %241 = vmatpush1.bf16.msra.mxu0 %v356_v21 }
  0x28   :  { %242 = vmatprep.subr.bf16.mxu0 %v357_v22 }
  0x2b   :  { %243 = vmatpush1.bf16.msra.mxu0 %v359_v23 }
  0x2c   :  { %244 = vmatprep.subr.bf16.mxu0 %v360_v24 }
  0x2f   :  { %245 = vmatpush1.bf16.msra.mxu0 %v362_v25 }
  0x30   :  { %246 = vmatprep.subr.bf16.mxu0 %v363_v26 }
  0x33   :  { %247 = vmatpush1.bf16.msra.mxu0 %v365_v27 }
  0x34   :  { %248 = vmatprep.subr.bf16.mxu0 %v366_v28 }
  0x37   :  { %249 = vmatpush1.bf16.msra.mxu0 %v368_v29 }
  0x38   :  { %250 = vmatprep.subr.bf16.mxu0 %v369_v30 }
  0x3b   :  { %251 = vmatpush1.bf16.msra.mxu0 %v371_v31 }
  0x3c   :  { %252 = vmatprep.subr.bf16.mxu0 %v372_v32 }
  0x3f   :  { %253 = vmatpush1.bf16.msra.mxu0 %v374_v33 }
  0x42   :  { %255 = vmatmul.mubr.bf16.vlgmr.msra.gmra.mrb[0].mxu0 %v292_v34 }
 0x115   :  { %v256_v41 = vpop.f32.mrb[0].mxu0 }
 0x116   :  { %v258_v43 = vpop.f32.mrb[1].mxu0  ;;  %v284_v45 = vadd.f32 %v277_v40, %v256_v41 }
 0x117   :  { %v260_v44 = vpop.f32.mrb[2].mxu0  ;;  %v285_v47 = vadd.f32 %v281_v42, %v258_v43 }
 0x118   :  { %v261_v46 = vpop.f32.mrb[3].mxu0  ;;  %286 = vst [vmem:[%s508_s3] sm:$0xff] %v284_v45 }
 0x119   :  { %287 = vst [vmem:[%s508_s3 + $0x8] sm:$0xff] %v285_v47 }

// kernel: resnet18_forward.43
= control target key start
LH: loop header
LB: loop body
LE: loop exit
PB: predicated region body
PF: predicated region fallthrough
CT: control target
= control target key end

     0   :  { %s1061_s12 = smov 0   ;;  %s1063_s13 = smov 0   ;;  %s1284_s0 = inlined_call_operand.vmem [shape: bf16[8,2304], index: 0, kind: input, shape index: {}]   ;;  %s1285_s1 = inlined_call_operand.vmem [shape: bf16[2304,512], index: 1, kind: input, shape index: {}]   ;;  %s1286_s2 = inlined_call_operand.vmem [shape: f32[1,512], index: 2, kind: input, shape index: {}]   ;;  %s1287_s3 = inlined_call_operand.vmem [shape: f32[8,512], index: 3, kind: output, shape index: {}]  }
   0x1   :  { %s1065_s14 = smov 0   ;;  %s1067_s15 = smov 0  }
   0x2   :  { %s1069_s16 = smov 0   ;;  %s1071_s17 = smov 0  }
   0x3   :  { %s1073_s18 = smov 0  }
   0x4 LB: > { %s25_s19 = sadd.s32 1, %s1030_s16  ;;  %s28_s20 = sadd.s32 1, %s1034_s17  ;;  %s1038_s18 = sphi %s1073_s18, %s13_s18   ;;  %s1034_s17 = sphi %s1071_s17, %s1293_s17   ;;  %s1030_s16 = sphi %s1069_s16, %s1292_s16   ;;  %s1026_s15 = sphi %s1067_s15, %s1291_s15   ;;  %s1022_s14 = sphi %s1065_s14, %s1290_s14   ;;  %s1018_s13 = sphi %s1063_s13, %s1289_s13   ;;  %s1014_s12 = sphi %s1061_s12, %s1288_s12  }
   0x5   : > { %p26_p0 = scmp.ge.s32.totalorder %s25_s19, 9  ;;  %p76_p1 = scmp.ne.s32.totalorder %s1018_s13, %s1014_s12 }
   0x6   : > { %p77_p2 = scmp.eq.s32.totalorder %s1038_s18, 0  ;;  %s69_s24 = sadd.s32 1, %s1018_s13 }
   0x7   : > { %s1295_s19 = smov (%p26_p0, %s25_s19), 0  ;;  %s1297_s20 = smov (!%p26_p0, %s28_s20), %s1034_s17 }
   0x8   : > { %p78_p3 = por %p77_p2, %p76_p1  ;;  %p30_p4 = scmp.ge.s32.totalorder %s1297_s20, 2 }
   0x9   : > { %s64_s21 = ssub.s32 %s1030_s16, %s1295_s19  ;;  %p825_p6 = scmp.ge.s32.totalorder %s1038_s18, 18 }
   0xa   : > { %s1299_s20 = smov (%p30_p4, %s1297_s20), 0 }
   0xb   : > { %s65_s22 = ssub.s32 %s1034_s17, %s1299_s20  ;;  %156 = sbr.rel (%p825_p6) target bundleno = 41 (0x29), region = 16 }
   0xc   : > { %s66_s23 = sor.u32 %s65_s22, %s64_s21 }
   0xd   : > { %p67_p5 = scmp.eq.s32.totalorder %s66_s23, 0 }
   0xf   : > { %s1112_s25 = scalar_select %p67_p5, %s1018_s13, %s69_s24  }
  0x12   : > { %172 = sbr.rel (!%p78_p3) target bundleno = 41 (0x29), region = 24  ;;  %s174_s26 = sand.u32 (%p78_p3), 1, %s1018_s13  }
  0x13   : > { %s828_s27 = sshll.u32 (%p78_p3), %s1034_s17, 1  ;;  %s826_s28 = sshll.u32 (%p78_p3), %s174_s26, 8 }
  0x14   : > { %s876_s29 = sshll.u32 (%p78_p3), %s1030_s16, 7  ;;  %s1126_s8 = scalar_lea.vmem (%p78_p3), [#allocation2], %s826_s28 }
  0x15   : > { %s180_s30 = sadd.s32 (%p78_p3), %s876_s29, %s828_s27 }
  0x16   : > { %s830_s4 = sshll.u32 (%p78_p3), %s180_s30, 2 }
  0x17   : > { %s1121_s7 = scalar_lea.vmem (%p78_p3), %s1285_s1, %s830_s4 }
  0x18   : > { %v272_v0 = vld [vmem:[%s1121_s7] sm:$0xff] (%p78_p3)  ;;  %v274_v1 = vld [vmem:[%s1121_s7 + $0x10] sm:$0xff] (%p78_p3) }
  0x19   : > { %v276_v2 = vld [vmem:[%s1121_s7 + $0x20] sm:$0xff]  ;;  %273 = vst [vmem:[%s1126_s8] sm:$0xff] %v272_v0  ;;  %275 = vst [vmem:[%s1126_s8 + $0x8] sm:$0xff] %v274_v1  ;;  %v278_v3 = vld [vmem:[%s1121_s7 + $0x30] sm:$0xff] }
  0x1a   : > { %277 = vst [vmem:[%s1126_s8 + $0x10] sm:$0xff] %v276_v2  ;;  %v280_v4 = vld [vmem:[%s1121_s7 + $0x40] sm:$0xff]  ;;  %v282_v5 = vld [vmem:[%s1121_s7 + $0x50] sm:$0xff]  ;;  %279 = vst [vmem:[%s1126_s8 + $0x18] sm:$0xff] %v278_v3 }
  0x1b   : > { %281 = vst [vmem:[%s1126_s8 + $0x20] sm:$0xff] %v280_v4  ;;  %283 = vst [vmem:[%s1126_s8 + $0x28] sm:$0xff] %v282_v5  ;;  %v284_v6 = vld [vmem:[%s1121_s7 + $0x60] sm:$0xff]  ;;  %v286_v7 = vld [vmem:[%s1121_s7 + $0x70] sm:$0xff] }
  0x1c   : > { %v288_v8 = vld [vmem:[%s1121_s7 + $0x80] sm:$0xff]  ;;  %285 = vst [vmem:[%s1126_s8 + $0x30] sm:$0xff] %v284_v6  ;;  %287 = vst [vmem:[%s1126_s8 + $0x38] sm:$0xff] %v286_v7  ;;  %v290_v9 = vld [vmem:[%s1121_s7 + $0x90] sm:$0xff] }
  0x1d   : > { %289 = vst [vmem:[%s1126_s8 + $0x40] sm:$0xff] %v288_v8  ;;  %v292_v10 = vld [vmem:[%s1121_s7 + $0xa0] sm:$0xff]  ;;  %v294_v11 = vld [vmem:[%s1121_s7 + $0xb0] sm:$0xff]  ;;  %291 = vst [vmem:[%s1126_s8 + $0x48] sm:$0xff] %v290_v9 }
  0x1e   : > { %293 = vst [vmem:[%s1126_s8 + $0x50] sm:$0xff] %v292_v10  ;;  %295 = vst [vmem:[%s1126_s8 + $0x58] sm:$0xff] %v294_v11  ;;  %v296_v12 = vld [vmem:[%s1121_s7 + $0xc0] sm:$0xff]  ;;  %v298_v13 = vld [vmem:[%s1121_s7 + $0xd0] sm:$0xff] }
  0x1f   : > { %v300_v14 = vld [vmem:[%s1121_s7 + $0xe0] sm:$0xff]  ;;  %297 = vst [vmem:[%s1126_s8 + $0x60] sm:$0xff] %v296_v12  ;;  %299 = vst [vmem:[%s1126_s8 + $0x68] sm:$0xff] %v298_v13  ;;  %v302_v15 = vld [vmem:[%s1121_s7 + $0xf0] sm:$0xff] }
  0x20   : > { %301 = vst [vmem:[%s1126_s8 + $0x70] sm:$0xff] %v300_v14  ;;  %v304_v16 = vld [vmem:[%s1121_s7 + $0x100] sm:$0xff]  ;;  %v306_v17 = vld [vmem:[%s1121_s7 + $0x110] sm:$0xff]  ;;  %303 = vst [vmem:[%s1126_s8 + $0x78] sm:$0xff] %v302_v15 }
  0x21   : > { %305 = vst [vmem:[%s1126_s8 + $0x80] sm:$0xff] %v304_v16  ;;  %307 = vst [vmem:[%s1126_s8 + $0x88] sm:$0xff] %v306_v17  ;;  %v308_v18 = vld [vmem:[%s1121_s7 + $0x120] sm:$0xff]  ;;  %v310_v19 = vld [vmem:[%s1121_s7 + $0x130] sm:$0xff] }
  0x22   : > { %v312_v20 = vld [vmem:[%s1121_s7 + $0x140] sm:$0xff]  ;;  %309 = vst [vmem:[%s1126_s8 + $0x90] sm:$0xff] %v308_v18  ;;  %311 = vst [vmem:[%s1126_s8 + $0x98] sm:$0xff] %v310_v19  ;;  %v314_v21 = vld [vmem:[%s1121_s7 + $0x150] sm:$0xff] }
  0x23   : > { %313 = vst [vmem:[%s1126_s8 + $0xa0] sm:$0xff] %v312_v20  ;;  %v316_v22 = vld [vmem:[%s1121_s7 + $0x160] sm:$0xff]  ;;  %v318_v23 = vld [vmem:[%s1121_s7 + $0x170] sm:$0xff]  ;;  %315 = vst [vmem:[%s1126_s8 + $0xa8] sm:$0xff] %v314_v21 }
  0x24   : > { %317 = vst [vmem:[%s1126_s8 + $0xb0] sm:$0xff] %v316_v22  ;;  %319 = vst [vmem:[%s1126_s8 + $0xb8] sm:$0xff] %v318_v23  ;;  %v320_v24 = vld [vmem:[%s1121_s7 + $0x180] sm:$0xff]  ;;  %v322_v25 = vld [vmem:[%s1121_s7 + $0x190] sm:$0xff] }
  0x25   : > { %v324_v26 = vld [vmem:[%s1121_s7 + $0x1a0] sm:$0xff]  ;;  %321 = vst [vmem:[%s1126_s8 + $0xc0] sm:$0xff] %v320_v24  ;;  %323 = vst [vmem:[%s1126_s8 + $0xc8] sm:$0xff] %v322_v25  ;;  %v326_v27 = vld [vmem:[%s1121_s7 + $0x1b0] sm:$0xff] }
  0x26   : > { %325 = vst [vmem:[%s1126_s8 + $0xd0] sm:$0xff] %v324_v26  ;;  %v328_v28 = vld [vmem:[%s1121_s7 + $0x1c0] sm:$0xff]  ;;  %v330_v29 = vld [vmem:[%s1121_s7 + $0x1d0] sm:$0xff]  ;;  %327 = vst [vmem:[%s1126_s8 + $0xd8] sm:$0xff] %v326_v27 }
  0x27   : > { %329 = vst [vmem:[%s1126_s8 + $0xe0] sm:$0xff] %v328_v28  ;;  %331 = vst [vmem:[%s1126_s8 + $0xe8] sm:$0xff] %v330_v29  ;;  %v332_v30 = vld [vmem:[%s1121_s7 + $0x1e0] sm:$0xff]  ;;  %v334_v31 = vld [vmem:[%s1121_s7 + $0x1f0] sm:$0xff] }
  0x28   : > { %333 = vst [vmem:[%s1126_s8 + $0xf0] sm:$0xff] %v332_v30  ;;  %335 = vst [vmem:[%s1126_s8 + $0xf8] sm:$0xff] %v334_v31 }
  0x29 PF: > { %p831_p7 = scmp.ge.s32.totalorder %s1038_s18, 1  ;;  %p348_p8 = scmp.lt.s32.totalorder %s1038_s18, 19 }
  0x2b   : > { %p349_p9 = pnand %p831_p7, %p348_p8 }
  0x2c   : > { %s355_s9 = sand.u32 (!%p349_p9), 1, %s1014_s12   ;;  %s833_s10 = sshll.u32 (!%p349_p9), %s1022_s14, 1 }
  0x2d   : > { %352 = sbr.rel (%p349_p9) target bundleno = 355 (0x163), region = 66  ;;  %s832_s11 = sshll.u32 (!%p349_p9), %s355_s9, 8 }
  0x2e   : > { %p398_p10 = scmp.lt.s32.totalorder (!%p349_p9), %s833_s10, 17  ;;  %s835_s21 = sshll.u32 (!%p349_p9), %s1026_s15, 1 }
  0x2f   : > { %p408_p11 = scmp.lt.s32.totalorder (!%p349_p9), %s835_s21, 3  ;;  %s1211_s5 = scalar_lea.vmem (!%p349_p9), [#allocation2], %s832_s11 }
  0x30   : > { %p838_p12 = scmp.ne.s32.totalorder (!%p349_p9), %s1022_s14, 0 }
  0x34   : > { %s1301_s10 = smov (!%p398_p10, %s833_s10), 17  ;;  %s1303_s21 = smov (!%p408_p11, %s835_s21), 3 }
  0x35   : > { %s834_s22 = sshll.u32 %s1301_s10, 2  ;;  %s410_s12 = scalar_lea.vmem %s1286_s2, %s1303_s21  ;;  %v1040_v32 = vmov (!%p838_p12), 0.0  }
  0x36   : > { %s1197_s26 = scalar_lea.vmem %s1284_s0, %s834_s22  ;;  %s837_s29 = sshll.u32 %s1303_s21, 3 }
  0x37   : > { %s1209_s15 = scalar_lea.vmem %s1287_s3, %s837_s29  ;;  %425 = sbr.rel (%p838_p12) target bundleno = 62 (0x3e), region = 74 }
  0x38   : > { %426 = vst [vmem:[%s1209_s15] sm:$0xff] (!%p838_p12), %v1040_v32  ;;  %427 = vst [vmem:[%s1209_s15 + $0x8] sm:$0xff] (!%p838_p12), %v1040_v32 }
  0x3e PF: > { %v934_v33 = vld [vmem:[%s1211_s5 + $0x4] ss:$8 sps:$4 sm:$0xff]   ;;  %v936_v34 = vld [vmem:[%s1211_s5] ss:$8 sps:$4 sm:$0xff]   ;;  %v937_v35 = vld [vmem:[%s1211_s5 + $0x14] ss:$8 sps:$4 sm:$0xff]  }
  0x3f   : > { %630 = vmatprep.subr.bf16.mxu0 %v934_v33  ;;  %v939_v36 = vld [vmem:[%s1211_s5 + $0x10] ss:$8 sps:$4 sm:$0xff]   ;;  %v940_v37 = vld [vmem:[%s1211_s5 + $0x24] ss:$8 sps:$4 sm:$0xff]   ;;  %v942_v38 = vld [vmem:[%s1211_s5 + $0x20] ss:$8 sps:$4 sm:$0xff]  }
  0x40   : > { %631 = vmatpush1.bf16.msra.mxu0 %v936_v34  ;;  %v943_v39 = vld [vmem:[%s1211_s5 + $0x34] ss:$8 sps:$4 sm:$0xff]   ;;  %v945_v40 = vld [vmem:[%s1211_s5 + $0x30] ss:$8 sps:$4 sm:$0xff]   ;;  %v946_v41 = vld [vmem:[%s1211_s5 + $0x44] ss:$8 sps:$4 sm:$0xff]  }
  0x41   : > { %632 = vmatprep.subr.bf16.mxu0 %v937_v35  ;;  %v948_v42 = vld [vmem:[%s1211_s5 + $0x40] ss:$8 sps:$4 sm:$0xff]   ;;  %v949_v43 = vld [vmem:[%s1211_s5 + $0x54] ss:$8 sps:$4 sm:$0xff]   ;;  %v951_v44 = vld [vmem:[%s1211_s5 + $0x50] ss:$8 sps:$4 sm:$0xff]  }
  0x42   : > { %v952_v45 = vld [vmem:[%s1211_s5 + $0x64] ss:$8 sps:$4 sm:$0xff]   ;;  %v954_v48 = vld [vmem:[%s1211_s5 + $0x60] ss:$8 sps:$4 sm:$0xff]   ;;  %v955_v49 = vld [vmem:[%s1211_s5 + $0x74] ss:$8 sps:$4 sm:$0xff]  }
  0x43   : > { %v430_v46 = vld [vmem:[%s1197_s26] sm:$0xff]  ;;  %v957_v50 = vld [vmem:[%s1211_s5 + $0x70] ss:$8 sps:$4 sm:$0xff]   ;;  %v961_v53 = vld [vmem:[%s1211_s5 + $0x94] ss:$8 sps:$4 sm:$0xff]   ;;  %p873_p13 = scmp.ne.s32.totalorder %s1022_s14, 8 }
  0x44   : > { %633 = vmatpush1.bf16.msra.mxu0 %v939_v36  ;;  %v840_v47 = vcombine.high %v430_v46, %v430_v46  ;;  %v958_v51 = vld [vmem:[%s1211_s5 + $0x84] ss:$8 sps:$4 sm:$0xff]   ;;  %v960_v52 = vld [vmem:[%s1211_s5 + $0x80] ss:$8 sps:$4 sm:$0xff]   ;;  %v963_v54 = vld [vmem:[%s1211_s5 + $0x90] ss:$8 sps:$4 sm:$0xff]   ;;  %v839_v3 = vcombine.low %v430_v46, %v430_v46  ;;  %v683_v12 = vlaneseq (!%p873_p13) }
  0x45   : > { %634 = vmatprep.subr.bf16.mxu0 %v940_v37  ;;  %v964_v55 = vld [vmem:[%s1211_s5 + $0xa4] ss:$8 sps:$4 sm:$0xff]   ;;  %v966_v56 = vld [vmem:[%s1211_s5 + $0xa0] ss:$8 sps:$4 sm:$0xff]   ;;  %v967_v57 = vld [vmem:[%s1211_s5 + $0xb4] ss:$8 sps:$4 sm:$0xff]  }
  0x46   : > { %662 = vmatprep.mubr.bf16.mxu0 %v840_v47  ;;  %v969_v58 = vld [vmem:[%s1211_s5 + $0xb0] ss:$8 sps:$4 sm:$0xff]   ;;  %v970_v59 = vld [vmem:[%s1211_s5 + $0xc4] ss:$8 sps:$4 sm:$0xff]   ;;  %v972_v60 = vld [vmem:[%s1211_s5 + $0xc0] ss:$8 sps:$4 sm:$0xff]  }
  0x47   : > { %v973_v61 = vld [vmem:[%s1211_s5 + $0xd4] ss:$8 sps:$4 sm:$0xff]   ;;  %v975_v62 = vld [vmem:[%s1211_s5 + $0xd0] ss:$8 sps:$4 sm:$0xff]   ;;  %v976_v63 = vld [vmem:[%s1211_s5 + $0xe4] ss:$8 sps:$4 sm:$0xff]  }
  0x48   : > { %635 = vmatpush1.bf16.msra.mxu0 %v942_v38  ;;  %v978_v0 = vld [vmem:[%s1211_s5 + $0xe0] ss:$8 sps:$4 sm:$0xff]   ;;  %v979_v1 = vld [vmem:[%s1211_s5 + $0xf4] ss:$8 sps:$4 sm:$0xff]   ;;  %v981_v2 = vld [vmem:[%s1211_s5 + $0xf0] ss:$8 sps:$4 sm:$0xff]  }
  0x49   : > { %636 = vmatprep.subr.bf16.mxu0 %v943_v39  ;;  %v428_v4 = vld [vmem:[%s1209_s15] sm:$0xff]  ;;  %v429_v5 = vld [vmem:[%s1209_s15 + $0x8] sm:$0xff]  ;;  %v684_v13 = vshrl.u32 (!%p873_p13), %v683_v12, 7 }
  0x4a   : > { %v681_v14 = vld [vmem:[%s410_s12] sm:$0x3] (!%p873_p13) }
  0x4b   : > { %v685_v15 = vsub.s32 (!%p873_p13), 0, %v684_v13  ;;  %v689_v16 = vsub.s32 (!%p873_p13), 1, %v684_v13 }
  0x4c   : > { %637 = vmatpush1.bf16.msra.mxu0 %v945_v40 }
  0x4d   : > { %638 = vmatprep.subr.bf16.mxu0 %v946_v41  ;;  %v686_v19 = vrot.slane (!%p873_p13), %v681_v14, %v685_v15  ;;  %v690_v20 = vrot.slane (!%p873_p13), %v681_v14, %v689_v16 }
  0x50   : > { %639 = vmatpush1.bf16.msra.mxu0 %v948_v42 }
  0x51   : > { %640 = vmatprep.subr.bf16.mxu0 %v949_v43 }
  0x54   : > { %641 = vmatpush1.bf16.msra.mxu0 %v951_v44 }
  0x55   : > { %642 = vmatprep.subr.bf16.mxu0 %v952_v45 }
  0x58   : > { %643 = vmatpush1.bf16.msra.mxu0 %v954_v48 }
  0x59   : > { %644 = vmatprep.subr.bf16.mxu0 %v955_v49 }
  0x5c   : > { %645 = vmatpush1.bf16.msra.mxu0 %v957_v50 }
  0x5d   : > { %646 = vmatprep.subr.bf16.mxu0 %v958_v51 }
  0x60   : > { %647 = vmatpush1.bf16.msra.mxu0 %v960_v52 }
  0x61   : > { %648 = vmatprep.subr.bf16.mxu0 %v961_v53 }
  0x64   : > { %649 = vmatpush1.bf16.msra.mxu0 %v963_v54 }
  0x65   : > { %650 = vmatprep.subr.bf16.mxu0 %v964_v55 }
  0x68   : > { %651 = vmatpush1.bf16.msra.mxu0 %v966_v56 }
  0x69   : > { %652 = vmatprep.subr.bf16.mxu0 %v967_v57 }
  0x6c   : > { %653 = vmatpush1.bf16.msra.mxu0 %v969_v58 }
  0x6d   : > { %654 = vmatprep.subr.bf16.mxu0 %v970_v59 }
  0x70   : > { %655 = vmatpush1.bf16.msra.mxu0 %v972_v60 }
  0x71   : > { %656 = vmatprep.subr.bf16.mxu0 %v973_v61 }
  0x74   : > { %657 = vmatpush1.bf16.msra.mxu0 %v975_v62 }
  0x75   : > { %658 = vmatprep.subr.bf16.mxu0 %v976_v63 }
  0x78   : > { %659 = vmatpush1.bf16.msra.mxu0 %v978_v0 }
  0x79   : > { %660 = vmatprep.subr.bf16.mxu0 %v979_v1 }
  0x7c   : > { %661 = vmatpush1.bf16.msra.mxu0 %v981_v2 }
  0x7f   : > { %663 = vmatmul.mubr.bf16.vlgmr.msra.gmra.mrb[0].mxu0 %v839_v3 }
 0x150   : > { %678 = sbr.rel (%p873_p13) target bundleno = 355 (0x163), region = 78 }
 0x152   : > { %v664_v6 = vpop.f32.mrb[0].mxu0 }
 0x153   : > { %v671_v7 = vadd.f32 %v664_v6, %v428_v4  ;;  %v666_v8 = vpop.f32.mrb[1].mxu0 }
 0x154   : > { %v672_v9 = vadd.f32 %v666_v8, %v429_v5  ;;  %v668_v10 = vpop.f32.mrb[2].mxu0 }
 0x155   : > { %673 = vst [vmem:[%s1209_s15] sm:$0xff] %v671_v7  ;;  %v669_v11 = vpop.f32.mrb[3].mxu0 }
 0x156   : > { %674 = vst [vmem:[%s1209_s15 + $0x8] sm:$0xff] %v672_v9 }
 0x15c   : > { %v679_v17 = vld [vmem:[%s1209_s15] sm:$0xff] }
 0x15d   : > { %v680_v18 = vld [vmem:[%s1209_s15 + $0x8] sm:$0xff]  ;;  %v693_v21 = vadd.f32 %v686_v19, %v679_v17 }
 0x15e   : > { %v694_v22 = vadd.f32 %v690_v20, %v680_v18 }
 0x15f   : > { %v695_v23 = vmax.f32 %v693_v21, 0.0 }
 0x160   : > { %v696_v24 = vmax.f32 %v694_v22, 0.0 }
 0x161   : > { %697 = vst [vmem:[%s1209_s15] sm:$0xff] %v695_v23 }
 0x162   : > { %698 = vst [vmem:[%s1209_s15 + $0x8] sm:$0xff] %v696_v24 }
 0x163 PF: > { %s13_s18 = sadd.s32 1, %s1038_s18   ;;  %s1288_s12 = smov %s1018_s13 }
 0x164   : > { %p10_p0 = scmp.ge.s32.totalorder %s13_s18, 20   ;;  %s1289_s13 = smov %s1112_s25 }
 0x165   : > { %s1290_s14 = smov %s1030_s16  ;;  %s1291_s15 = smov %s1034_s17 }
 0x166   : > { %s1292_s16 = smov %s1295_s19  ;;  %s1293_s17 = smov %s1299_s20 }
 0x167   :  { %12 = sbr.rel (!%p10_p0) target bundleno = 4 (0x4), region = 119 }

// kernel: resnet18_forward.44
= control target key start
LH: loop header
LB: loop body
LE: loop exit
PB: predicated region body
PF: predicated region fallthrough
CT: control target
= control target key end

     0   :  { %s1021_s12 = smov 0   ;;  %s1023_s13 = smov 0   ;;  %s1214_s0 = inlined_call_operand.vmem [shape: bf16[8,256], index: 0, kind: input, shape index: {}]   ;;  %s1215_s1 = inlined_call_operand.vmem [shape: bf16[256,512], index: 1, kind: input, shape index: {}]   ;;  %s1216_s2 = inlined_call_operand.vmem [shape: f32[1,512], index: 2, kind: input, shape index: {}]   ;;  %s1217_s3 = inlined_call_operand.vmem [shape: f32[8,512], index: 3, kind: output, shape index: {}]  }
   0x1   :  { %s1025_s14 = smov 0   ;;  %s1027_s15 = smov 0  }
   0x2   :  { %s1029_s16 = smov 0  }
   0x3 LB: > { %s28_s17 = sadd.s32 1, %s994_s15  ;;  %p76_p1 = scmp.ne.s32.totalorder %s986_s13, %s982_s12  ;;  %s998_s16 = sphi %s1029_s16, %s13_s16   ;;  %s994_s15 = sphi %s1027_s15, %s1221_s15   ;;  %s990_s14 = sphi %s1025_s14, %s1220_s14   ;;  %s986_s13 = sphi %s1023_s13, %s1219_s13   ;;  %s982_s12 = sphi %s1021_s12, %s1218_s12  }
   0x4   : > { %p30_p0 = scmp.ge.s32.totalorder %s28_s17, 2  ;;  %p77_p2 = scmp.eq.s32.totalorder %s998_s16, 0 }
   0x5   : > { %s69_s19 = sadd.s32 1, %s986_s13  ;;  %p823_p5 = scmp.ge.s32.totalorder %s998_s16, 2 }
   0x6   : > { %s1223_s17 = smov (%p30_p0, %s28_s17), 0  ;;  %p78_p3 = por %p77_p2, %p76_p1 }
   0x7   : > { %s65_s18 = ssub.s32 %s994_s15, %s1223_s17  ;;  %169 = sbr.rel (%p823_p5) target bundleno = 34 (0x22), region = 20 }
   0x8   : > { %p67_p4 = scmp.eq.s32.totalorder %s65_s18, 0 }
   0xa   : > { %s1056_s20 = scalar_select %p67_p4, %s986_s13, %s69_s19  }
   0xe   : > { %172 = sbr.rel (!%p78_p3) target bundleno = 34 (0x22), region = 24  ;;  %s174_s21 = sand.u32 (%p78_p3), 1, %s986_s13  }
   0xf   : > { %s868_s22 = sshll.u32 (%p78_p3), %s994_s15, 3  ;;  %s824_s23 = sshll.u32 (%p78_p3), %s174_s21, 8 }
  0x10   : > { %s1064_s26 = scalar_lea.vmem (%p78_p3), %s1215_s1, %s868_s22  ;;  %s1069_s27 = scalar_lea.vmem (%p78_p3), [#allocation2], %s824_s23 }
  0x11   : > { %v272_v0 = vld [vmem:[%s1064_s26] sm:$0xff] (%p78_p3)  ;;  %v274_v1 = vld [vmem:[%s1064_s26 + $0x10] sm:$0xff] (%p78_p3) }
  0x12   : > { %v276_v2 = vld [vmem:[%s1064_s26 + $0x20] sm:$0xff] (%p78_p3)  ;;  %273 = vst [vmem:[%s1069_s27] sm:$0xff] (%p78_p3), %v272_v0  ;;  %275 = vst [vmem:[%s1069_s27 + $0x8] sm:$0xff] (%p78_p3), %v274_v1  ;;  %v278_v3 = vld [vmem:[%s1064_s26 + $0x30] sm:$0xff] (%p78_p3) }
  0x13   : > { %277 = vst [vmem:[%s1069_s27 + $0x10] sm:$0xff] (%p78_p3), %v276_v2  ;;  %v280_v4 = vld [vmem:[%s1064_s26 + $0x40] sm:$0xff] (%p78_p3)  ;;  %v282_v5 = vld [vmem:[%s1064_s26 + $0x50] sm:$0xff] (%p78_p3)  ;;  %279 = vst [vmem:[%s1069_s27 + $0x18] sm:$0xff] (%p78_p3), %v278_v3 }
  0x14   : > { %281 = vst [vmem:[%s1069_s27 + $0x20] sm:$0xff] (%p78_p3), %v280_v4  ;;  %283 = vst [vmem:[%s1069_s27 + $0x28] sm:$0xff] (%p78_p3), %v282_v5  ;;  %v284_v6 = vld [vmem:[%s1064_s26 + $0x60] sm:$0xff] (%p78_p3)  ;;  %v286_v7 = vld [vmem:[%s1064_s26 + $0x70] sm:$0xff] (%p78_p3) }
  0x15   : > { %v288_v8 = vld [vmem:[%s1064_s26 + $0x80] sm:$0xff]  ;;  %285 = vst [vmem:[%s1069_s27 + $0x30] sm:$0xff] %v284_v6  ;;  %287 = vst [vmem:[%s1069_s27 + $0x38] sm:$0xff] %v286_v7  ;;  %v290_v9 = vld [vmem:[%s1064_s26 + $0x90] sm:$0xff] }
  0x16   : > { %289 = vst [vmem:[%s1069_s27 + $0x40] sm:$0xff] %v288_v8  ;;  %v292_v10 = vld [vmem:[%s1064_s26 + $0xa0] sm:$0xff]  ;;  %v294_v11 = vld [vmem:[%s1064_s26 + $0xb0] sm:$0xff]  ;;  %291 = vst [vmem:[%s1069_s27 + $0x48] sm:$0xff] %v290_v9 }
  0x17   : > { %293 = vst [vmem:[%s1069_s27 + $0x50] sm:$0xff] %v292_v10  ;;  %295 = vst [vmem:[%s1069_s27 + $0x58] sm:$0xff] %v294_v11  ;;  %v296_v12 = vld [vmem:[%s1064_s26 + $0xc0] sm:$0xff]  ;;  %v298_v13 = vld [vmem:[%s1064_s26 + $0xd0] sm:$0xff] }
  0x18   : > { %v300_v14 = vld [vmem:[%s1064_s26 + $0xe0] sm:$0xff]  ;;  %297 = vst [vmem:[%s1069_s27 + $0x60] sm:$0xff] %v296_v12  ;;  %299 = vst [vmem:[%s1069_s27 + $0x68] sm:$0xff] %v298_v13  ;;  %v302_v15 = vld [vmem:[%s1064_s26 + $0xf0] sm:$0xff] }
  0x19   : > { %301 = vst [vmem:[%s1069_s27 + $0x70] sm:$0xff] %v300_v14  ;;  %v304_v16 = vld [vmem:[%s1064_s26 + $0x100] sm:$0xff]  ;;  %v306_v17 = vld [vmem:[%s1064_s26 + $0x110] sm:$0xff]  ;;  %303 = vst [vmem:[%s1069_s27 + $0x78] sm:$0xff] %v302_v15 }
  0x1a   : > { %305 = vst [vmem:[%s1069_s27 + $0x80] sm:$0xff] %v304_v16  ;;  %307 = vst [vmem:[%s1069_s27 + $0x88] sm:$0xff] %v306_v17  ;;  %v308_v18 = vld [vmem:[%s1064_s26 + $0x120] sm:$0xff]  ;;  %v310_v19 = vld [vmem:[%s1064_s26 + $0x130] sm:$0xff] }
  0x1b   : > { %v312_v20 = vld [vmem:[%s1064_s26 + $0x140] sm:$0xff]  ;;  %309 = vst [vmem:[%s1069_s27 + $0x90] sm:$0xff] %v308_v18  ;;  %311 = vst [vmem:[%s1069_s27 + $0x98] sm:$0xff] %v310_v19  ;;  %v314_v21 = vld [vmem:[%s1064_s26 + $0x150] sm:$0xff] }
  0x1c   : > { %313 = vst [vmem:[%s1069_s27 + $0xa0] sm:$0xff] %v312_v20  ;;  %v316_v22 = vld [vmem:[%s1064_s26 + $0x160] sm:$0xff]  ;;  %v318_v23 = vld [vmem:[%s1064_s26 + $0x170] sm:$0xff]  ;;  %315 = vst [vmem:[%s1069_s27 + $0xa8] sm:$0xff] %v314_v21 }
  0x1d   : > { %317 = vst [vmem:[%s1069_s27 + $0xb0] sm:$0xff] %v316_v22  ;;  %319 = vst [vmem:[%s1069_s27 + $0xb8] sm:$0xff] %v318_v23  ;;  %v320_v24 = vld [vmem:[%s1064_s26 + $0x180] sm:$0xff]  ;;  %v322_v25 = vld [vmem:[%s1064_s26 + $0x190] sm:$0xff] }
  0x1e   : > { %v324_v26 = vld [vmem:[%s1064_s26 + $0x1a0] sm:$0xff]  ;;  %321 = vst [vmem:[%s1069_s27 + $0xc0] sm:$0xff] %v320_v24  ;;  %323 = vst [vmem:[%s1069_s27 + $0xc8] sm:$0xff] %v322_v25  ;;  %v326_v27 = vld [vmem:[%s1064_s26 + $0x1b0] sm:$0xff] }
  0x1f   : > { %325 = vst [vmem:[%s1069_s27 + $0xd0] sm:$0xff] %v324_v26  ;;  %v328_v28 = vld [vmem:[%s1064_s26 + $0x1c0] sm:$0xff]  ;;  %v330_v29 = vld [vmem:[%s1064_s26 + $0x1d0] sm:$0xff]  ;;  %327 = vst [vmem:[%s1069_s27 + $0xd8] sm:$0xff] %v326_v27 }
  0x20   : > { %329 = vst [vmem:[%s1069_s27 + $0xe0] sm:$0xff] %v328_v28  ;;  %331 = vst [vmem:[%s1069_s27 + $0xe8] sm:$0xff] %v330_v29  ;;  %v332_v30 = vld [vmem:[%s1064_s26 + $0x1e0] sm:$0xff]  ;;  %v334_v31 = vld [vmem:[%s1064_s26 + $0x1f0] sm:$0xff] }
  0x21   : > { %333 = vst [vmem:[%s1069_s27 + $0xf0] sm:$0xff] %v332_v30  ;;  %335 = vst [vmem:[%s1069_s27 + $0xf8] sm:$0xff] %v334_v31 }
  0x22 PF: > { %p827_p6 = scmp.ge.s32.totalorder %s998_s16, 1  ;;  %p348_p7 = scmp.lt.s32.totalorder %s998_s16, 3 }
  0x24   : > { %p349_p8 = pnand %p827_p6, %p348_p7 }
  0x25   : > { %s355_s28 = sand.u32 (!%p349_p8), 1, %s982_s12   ;;  %v1138_v32 = vld [vmem:[%s1214_s0] sm:$0xff] (!%p349_p8)  ;;  %s829_s4 = sshll.u32 (!%p349_p8), %s990_s14, 1  ;;  %v1000_v39 = vmov (!%p349_p8), 0.0   ;;  %v682_v4 = vlaneseq (!%p349_p8) }
  0x26   : > { %352 = sbr.rel (%p349_p8) target bundleno = 330 (0x14a), region = 66  ;;  %s828_s5 = sshll.u32 (!%p349_p8), %s355_s28, 8  ;;  %v833_v33 = vcombine.high (!%p349_p8), %v1138_v32, %v1138_v32  ;;  %v832_v3 = vcombine.low (!%p349_p8), %v1138_v32, %v1138_v32 }
  0x27   : > { %p408_p9 = scmp.lt.s32.totalorder (!%p349_p8), %s829_s4, 3  ;;  %s1143_s6 = scalar_lea.vmem (!%p349_p8), [#allocation2], %s828_s5  ;;  %v683_v9 = vshrl.u32 (!%p349_p8), %v682_v4, 7 }
  0x28   : > { %v910_v34 = vld [vmem:[%s1143_s6 + $0x4] ss:$8 sps:$4 sm:$0xff] (!%p349_p8)   ;;  %662 = vmatprep.mubr.bf16.mxu0 (!%p349_p8), %v833_v33  ;;  %v912_v35 = vld [vmem:[%s1143_s6] ss:$8 sps:$4 sm:$0xff] (!%p349_p8)   ;;  %v913_v36 = vld [vmem:[%s1143_s6 + $0x14] ss:$8 sps:$4 sm:$0xff] (!%p349_p8)  }
  0x29   : > { %630 = vmatprep.subr.bf16.mxu0 (!%p349_p8), %v910_v34  ;;  %v915_v37 = vld [vmem:[%s1143_s6 + $0x10] ss:$8 sps:$4 sm:$0xff] (!%p349_p8)   ;;  %v916_v38 = vld [vmem:[%s1143_s6 + $0x24] ss:$8 sps:$4 sm:$0xff] (!%p349_p8)   ;;  %v918_v40 = vld [vmem:[%s1143_s6 + $0x20] ss:$8 sps:$4 sm:$0xff] (!%p349_p8)  }
  0x2a   : > { %631 = vmatpush1.bf16.msra.mxu0 (!%p349_p8), %v912_v35  ;;  %v919_v41 = vld [vmem:[%s1143_s6 + $0x34] ss:$8 sps:$4 sm:$0xff] (!%p349_p8)   ;;  %v921_v42 = vld [vmem:[%s1143_s6 + $0x30] ss:$8 sps:$4 sm:$0xff] (!%p349_p8)   ;;  %v922_v43 = vld [vmem:[%s1143_s6 + $0x44] ss:$8 sps:$4 sm:$0xff] (!%p349_p8)  }
  0x2b   : > { %632 = vmatprep.subr.bf16.mxu0 (!%p349_p8), %v913_v36  ;;  %v924_v44 = vld [vmem:[%s1143_s6 + $0x40] ss:$8 sps:$4 sm:$0xff] (!%p349_p8)   ;;  %v925_v45 = vld [vmem:[%s1143_s6 + $0x54] ss:$8 sps:$4 sm:$0xff] (!%p349_p8)   ;;  %v927_v46 = vld [vmem:[%s1143_s6 + $0x50] ss:$8 sps:$4 sm:$0xff] (!%p349_p8)  }
  0x2c   : > { %v928_v47 = vld [vmem:[%s1143_s6 + $0x64] ss:$8 sps:$4 sm:$0xff] (!%p349_p8)   ;;  %v930_v48 = vld [vmem:[%s1143_s6 + $0x60] ss:$8 sps:$4 sm:$0xff] (!%p349_p8)   ;;  %v931_v49 = vld [vmem:[%s1143_s6 + $0x74] ss:$8 sps:$4 sm:$0xff] (!%p349_p8)  }
  0x2d   : > { %s1225_s4 = smov (!%p408_p9, %s829_s4), 3  ;;  %v933_v50 = vld [vmem:[%s1143_s6 + $0x70] ss:$8 sps:$4 sm:$0xff]   ;;  %v934_v51 = vld [vmem:[%s1143_s6 + $0x84] ss:$8 sps:$4 sm:$0xff]   ;;  %v684_v12 = vsub.s32 0, %v683_v9 }
  0x2e   : > { %s831_s7 = sshll.u32 %s1225_s4, 3  ;;  %633 = vmatpush1.bf16.msra.mxu0 %v915_v37  ;;  %v936_v52 = vld [vmem:[%s1143_s6 + $0x80] ss:$8 sps:$4 sm:$0xff]   ;;  %v937_v53 = vld [vmem:[%s1143_s6 + $0x94] ss:$8 sps:$4 sm:$0xff]   ;;  %s410_s14 = scalar_lea.vmem %s1216_s2, %s1225_s4  ;;  %v688_v13 = vsub.s32 1, %v683_v9 }
  0x2f   : > { %s1155_s10 = scalar_lea.vmem %s1217_s3, %s831_s7  ;;  %634 = vmatprep.subr.bf16.mxu0 %v916_v38  ;;  %v939_v54 = vld [vmem:[%s1143_s6 + $0x90] ss:$8 sps:$4 sm:$0xff]   ;;  %v940_v55 = vld [vmem:[%s1143_s6 + $0xa4] ss:$8 sps:$4 sm:$0xff]   ;;  %v942_v56 = vld [vmem:[%s1143_s6 + $0xa0] ss:$8 sps:$4 sm:$0xff]  }
  0x30   : > { %426 = vst [vmem:[%s1155_s10] sm:$0xff] %v1000_v39  ;;  %427 = vst [vmem:[%s1155_s10 + $0x8] sm:$0xff] %v1000_v39  ;;  %v943_v57 = vld [vmem:[%s1143_s6 + $0xb4] ss:$8 sps:$4 sm:$0xff]   ;;  %v945_v58 = vld [vmem:[%s1143_s6 + $0xb0] ss:$8 sps:$4 sm:$0xff]  }
  0x31   : > { %v946_v59 = vld [vmem:[%s1143_s6 + $0xc4] ss:$8 sps:$4 sm:$0xff]   ;;  %v948_v60 = vld [vmem:[%s1143_s6 + $0xc0] ss:$8 sps:$4 sm:$0xff]   ;;  %v949_v61 = vld [vmem:[%s1143_s6 + $0xd4] ss:$8 sps:$4 sm:$0xff]  }
  0x32   : > { %635 = vmatpush1.bf16.msra.mxu0 %v918_v40  ;;  %v951_v62 = vld [vmem:[%s1143_s6 + $0xd0] ss:$8 sps:$4 sm:$0xff]   ;;  %v952_v63 = vld [vmem:[%s1143_s6 + $0xe4] ss:$8 sps:$4 sm:$0xff]   ;;  %v954_v0 = vld [vmem:[%s1143_s6 + $0xe0] ss:$8 sps:$4 sm:$0xff]  }
  0x33   : > { %636 = vmatprep.subr.bf16.mxu0 %v919_v41  ;;  %v955_v1 = vld [vmem:[%s1143_s6 + $0xf4] ss:$8 sps:$4 sm:$0xff]   ;;  %v957_v2 = vld [vmem:[%s1143_s6 + $0xf0] ss:$8 sps:$4 sm:$0xff]   ;;  %v680_v14 = vld [vmem:[%s410_s14] sm:$0x3] }
  0x34   : > { %v685_v15 = vrot.slane %v680_v14, %v684_v12  ;;  %v689_v16 = vrot.slane %v680_v14, %v688_v13 }
  0x36   : > { %637 = vmatpush1.bf16.msra.mxu0 %v921_v42 }
  0x37   : > { %638 = vmatprep.subr.bf16.mxu0 %v922_v43  ;;  %v428_v5 = vld [vmem:[%s1155_s10] sm:$0xff] }
  0x3a   : > { %639 = vmatpush1.bf16.msra.mxu0 %v924_v44 }
  0x3b   : > { %640 = vmatprep.subr.bf16.mxu0 %v925_v45 }
  0x3e   : > { %641 = vmatpush1.bf16.msra.mxu0 %v927_v46 }
  0x3f   : > { %642 = vmatprep.subr.bf16.mxu0 %v928_v47 }
  0x42   : > { %643 = vmatpush1.bf16.msra.mxu0 %v930_v48 }
  0x43   : > { %644 = vmatprep.subr.bf16.mxu0 %v931_v49 }
  0x46   : > { %645 = vmatpush1.bf16.msra.mxu0 %v933_v50 }
  0x47   : > { %646 = vmatprep.subr.bf16.mxu0 %v934_v51 }
  0x4a   : > { %647 = vmatpush1.bf16.msra.mxu0 %v936_v52 }
  0x4b   : > { %648 = vmatprep.subr.bf16.mxu0 %v937_v53 }
  0x4e   : > { %649 = vmatpush1.bf16.msra.mxu0 %v939_v54 }
  0x4f   : > { %650 = vmatprep.subr.bf16.mxu0 %v940_v55 }
  0x52   : > { %651 = vmatpush1.bf16.msra.mxu0 %v942_v56 }
  0x53   : > { %652 = vmatprep.subr.bf16.mxu0 %v943_v57 }
  0x56   : > { %653 = vmatpush1.bf16.msra.mxu0 %v945_v58 }
  0x57   : > { %654 = vmatprep.subr.bf16.mxu0 %v946_v59 }
  0x5a   : > { %655 = vmatpush1.bf16.msra.mxu0 %v948_v60 }
  0x5b   : > { %656 = vmatprep.subr.bf16.mxu0 %v949_v61 }
  0x5e   : > { %657 = vmatpush1.bf16.msra.mxu0 %v951_v62 }
  0x5f   : > { %658 = vmatprep.subr.bf16.mxu0 %v952_v63 }
  0x62   : > { %659 = vmatpush1.bf16.msra.mxu0 %v954_v0 }
  0x63   : > { %660 = vmatprep.subr.bf16.mxu0 %v955_v1 }
  0x66   : > { %661 = vmatpush1.bf16.msra.mxu0 %v957_v2 }
  0x69   : > { %663 = vmatmul.mubr.bf16.vlgmr.msra.gmra.mrb[0].mxu0 %v832_v3 }
 0x13c   : > { %v664_v6 = vpop.f32.mrb[0].mxu0 }
 0x13d   : > { %v671_v7 = vadd.f32 %v664_v6, %v428_v5  ;;  %v666_v8 = vpop.f32.mrb[1].mxu0 }
 0x13e   : > { %v668_v10 = vpop.f32.mrb[2].mxu0  ;;  %674 = vst [vmem:[%s1155_s10 + $0x8] sm:$0xff] %v666_v8  ;;  %v693_v19 = vadd.f32 %v689_v16, %v666_v8 }
 0x13f   : > { %673 = vst [vmem:[%s1155_s10] sm:$0xff] %v671_v7  ;;  %v669_v11 = vpop.f32.mrb[3].mxu0 }
 0x140   : > { %695 = vst [vmem:[%s1155_s10 + $0x8] sm:$0xff] %v693_v19 }
 0x146   : > { %v678_v17 = vld [vmem:[%s1155_s10] sm:$0xff] }
 0x147   : > { %v692_v18 = vadd.f32 %v685_v15, %v678_v17 }
 0x149   : > { %694 = vst [vmem:[%s1155_s10] sm:$0xff] %v692_v18 }
 0x14a PF: > { %s13_s16 = sadd.s32 1, %s998_s16   ;;  %s1218_s12 = smov %s986_s13 }
 0x14b   : > { %p10_p10 = scmp.ge.s32.totalorder %s13_s16, 4   ;;  %s1219_s13 = smov %s1056_s20 }
 0x14c   : > { %s1220_s14 = smov %s994_s15  ;;  %s1221_s15 = smov %s1223_s17 }
 0x14d   :  { %12 = sbr.rel (!%p10_p10) target bundleno = 3 (0x3), region = 119 }

// kernel: resnet18_forward.45
= control target key start
LH: loop header
LB: loop body
LE: loop exit
PB: predicated region body
PF: predicated region fallthrough
CT: control target
= control target key end

     0   :  { %s1153_s15 = smov 0   ;;  %s1155_s16 = smov 0   ;;  %s1383_s0 = inlined_call_operand.vmem [shape: bf16[8,4608], index: 0, kind: input, shape index: {}]   ;;  %s1384_s1 = inlined_call_operand.vmem [shape: bf16[4608,512], index: 1, kind: input, shape index: {}]   ;;  %s1385_s2 = inlined_call_operand.vmem [shape: f32[1,512], index: 2, kind: input, shape index: {}]   ;;  %s1386_s3 = inlined_call_operand.vmem [shape: f32[8,512], index: 3, kind: input, shape index: {}]   ;;  %s1387_s4 = inlined_call_operand.vmem [shape: f32[8,512], index: 4, kind: output, shape index: {}]  }
   0x1   :  { %s1157_s17 = smov 0   ;;  %s1159_s18 = smov 0  }
   0x2   :  { %s1161_s19 = smov 0   ;;  %s1163_s20 = smov 0  }
   0x3   :  { %s1165_s21 = smov 0  }
   0x4 LB: > { %s26_s22 = sadd.s32 1, %s1117_s19  ;;  %s29_s23 = sadd.s32 1, %s1121_s20  ;;  %s1125_s21 = sphi %s1165_s21, %s14_s21   ;;  %s1121_s20 = sphi %s1163_s20, %s1393_s20   ;;  %s1117_s19 = sphi %s1161_s19, %s1392_s19   ;;  %s1113_s18 = sphi %s1159_s18, %s1391_s18   ;;  %s1109_s17 = sphi %s1157_s17, %s1390_s17   ;;  %s1105_s16 = sphi %s1155_s16, %s1389_s16   ;;  %s1101_s15 = sphi %s1153_s15, %s1388_s15  }
   0x5   : > { %p27_p0 = scmp.ge.s32.totalorder %s26_s22, 18  ;;  %p77_p1 = scmp.ne.s32.totalorder %s1105_s16, %s1101_s15 }
   0x6   : > { %p78_p2 = scmp.eq.s32.totalorder %s1125_s21, 0  ;;  %s70_s27 = sadd.s32 1, %s1105_s16 }
   0x7   : > { %s1395_s22 = smov (%p27_p0, %s26_s22), 0  ;;  %s1397_s23 = smov (!%p27_p0, %s29_s23), %s1121_s20 }
   0x8   : > { %p79_p3 = por %p78_p2, %p77_p1  ;;  %p31_p4 = scmp.ge.s32.totalorder %s1397_s23, 2 }
   0x9   : > { %s65_s24 = ssub.s32 %s1117_s19, %s1395_s22  ;;  %p910_p6 = scmp.ge.s32.totalorder %s1125_s21, 36 }
   0xa   : > { %s1399_s23 = smov (%p31_p4, %s1397_s23), 0 }
   0xb   : > { %s66_s25 = ssub.s32 %s1121_s20, %s1399_s23  ;;  %185 = sbr.rel (%p910_p6) target bundleno = 41 (0x29), region = 16 }
   0xc   : > { %s67_s26 = sor.u32 %s66_s25, %s65_s24 }
   0xd   : > { %p68_p5 = scmp.eq.s32.totalorder %s67_s26, 0 }
   0xf   : > { %s1204_s28 = scalar_select %p68_p5, %s1105_s16, %s70_s27  }
  0x12   : > { %201 = sbr.rel (!%p79_p3) target bundleno = 41 (0x29), region = 24  ;;  %s203_s29 = sand.u32 (%p79_p3), 1, %s1105_s16  }
  0x13   : > { %s913_s30 = sshll.u32 (%p79_p3), %s1121_s20, 1  ;;  %s911_s5 = sshll.u32 (%p79_p3), %s203_s29, 8 }
  0x14   : > { %s963_s6 = sshll.u32 (%p79_p3), %s1117_s19, 7  ;;  %s1218_s12 = scalar_lea.vmem (%p79_p3), [#allocation2], %s911_s5 }
  0x15   : > { %s209_s7 = sadd.s32 (%p79_p3), %s963_s6, %s913_s30 }
  0x16   : > { %s915_s8 = sshll.u32 (%p79_p3), %s209_s7, 2 }
  0x17   : > { %s1213_s11 = scalar_lea.vmem (%p79_p3), %s1384_s1, %s915_s8 }
  0x18   : > { %v301_v0 = vld [vmem:[%s1213_s11] sm:$0xff] (%p79_p3)  ;;  %v303_v1 = vld [vmem:[%s1213_s11 + $0x10] sm:$0xff] (%p79_p3) }
  0x19   : > { %v305_v2 = vld [vmem:[%s1213_s11 + $0x20] sm:$0xff]  ;;  %302 = vst [vmem:[%s1218_s12] sm:$0xff] %v301_v0  ;;  %304 = vst [vmem:[%s1218_s12 + $0x8] sm:$0xff] %v303_v1  ;;  %v307_v3 = vld [vmem:[%s1213_s11 + $0x30] sm:$0xff] }
  0x1a   : > { %306 = vst [vmem:[%s1218_s12 + $0x10] sm:$0xff] %v305_v2  ;;  %v309_v4 = vld [vmem:[%s1213_s11 + $0x40] sm:$0xff]  ;;  %v311_v5 = vld [vmem:[%s1213_s11 + $0x50] sm:$0xff]  ;;  %308 = vst [vmem:[%s1218_s12 + $0x18] sm:$0xff] %v307_v3 }
  0x1b   : > { %310 = vst [vmem:[%s1218_s12 + $0x20] sm:$0xff] %v309_v4  ;;  %312 = vst [vmem:[%s1218_s12 + $0x28] sm:$0xff] %v311_v5  ;;  %v313_v6 = vld [vmem:[%s1213_s11 + $0x60] sm:$0xff]  ;;  %v315_v7 = vld [vmem:[%s1213_s11 + $0x70] sm:$0xff] }
  0x1c   : > { %v317_v8 = vld [vmem:[%s1213_s11 + $0x80] sm:$0xff]  ;;  %314 = vst [vmem:[%s1218_s12 + $0x30] sm:$0xff] %v313_v6  ;;  %316 = vst [vmem:[%s1218_s12 + $0x38] sm:$0xff] %v315_v7  ;;  %v319_v9 = vld [vmem:[%s1213_s11 + $0x90] sm:$0xff] }
  0x1d   : > { %318 = vst [vmem:[%s1218_s12 + $0x40] sm:$0xff] %v317_v8  ;;  %v321_v10 = vld [vmem:[%s1213_s11 + $0xa0] sm:$0xff]  ;;  %v323_v11 = vld [vmem:[%s1213_s11 + $0xb0] sm:$0xff]  ;;  %320 = vst [vmem:[%s1218_s12 + $0x48] sm:$0xff] %v319_v9 }
  0x1e   : > { %322 = vst [vmem:[%s1218_s12 + $0x50] sm:$0xff] %v321_v10  ;;  %324 = vst [vmem:[%s1218_s12 + $0x58] sm:$0xff] %v323_v11  ;;  %v325_v12 = vld [vmem:[%s1213_s11 + $0xc0] sm:$0xff]  ;;  %v327_v13 = vld [vmem:[%s1213_s11 + $0xd0] sm:$0xff] }
  0x1f   : > { %v329_v14 = vld [vmem:[%s1213_s11 + $0xe0] sm:$0xff]  ;;  %326 = vst [vmem:[%s1218_s12 + $0x60] sm:$0xff] %v325_v12  ;;  %328 = vst [vmem:[%s1218_s12 + $0x68] sm:$0xff] %v327_v13  ;;  %v331_v15 = vld [vmem:[%s1213_s11 + $0xf0] sm:$0xff] }
  0x20   : > { %330 = vst [vmem:[%s1218_s12 + $0x70] sm:$0xff] %v329_v14  ;;  %v333_v16 = vld [vmem:[%s1213_s11 + $0x100] sm:$0xff]  ;;  %v335_v17 = vld [vmem:[%s1213_s11 + $0x110] sm:$0xff]  ;;  %332 = vst [vmem:[%s1218_s12 + $0x78] sm:$0xff] %v331_v15 }
  0x21   : > { %334 = vst [vmem:[%s1218_s12 + $0x80] sm:$0xff] %v333_v16  ;;  %336 = vst [vmem:[%s1218_s12 + $0x88] sm:$0xff] %v335_v17  ;;  %v337_v18 = vld [vmem:[%s1213_s11 + $0x120] sm:$0xff]  ;;  %v339_v19 = vld [vmem:[%s1213_s11 + $0x130] sm:$0xff] }
  0x22   : > { %v341_v20 = vld [vmem:[%s1213_s11 + $0x140] sm:$0xff]  ;;  %338 = vst [vmem:[%s1218_s12 + $0x90] sm:$0xff] %v337_v18  ;;  %340 = vst [vmem:[%s1218_s12 + $0x98] sm:$0xff] %v339_v19  ;;  %v343_v21 = vld [vmem:[%s1213_s11 + $0x150] sm:$0xff] }
  0x23   : > { %342 = vst [vmem:[%s1218_s12 + $0xa0] sm:$0xff] %v341_v20  ;;  %v345_v22 = vld [vmem:[%s1213_s11 + $0x160] sm:$0xff]  ;;  %v347_v23 = vld [vmem:[%s1213_s11 + $0x170] sm:$0xff]  ;;  %344 = vst [vmem:[%s1218_s12 + $0xa8] sm:$0xff] %v343_v21 }
  0x24   : > { %346 = vst [vmem:[%s1218_s12 + $0xb0] sm:$0xff] %v345_v22  ;;  %348 = vst [vmem:[%s1218_s12 + $0xb8] sm:$0xff] %v347_v23  ;;  %v349_v24 = vld [vmem:[%s1213_s11 + $0x180] sm:$0xff]  ;;  %v351_v25 = vld [vmem:[%s1213_s11 + $0x190] sm:$0xff] }
  0x25   : > { %v353_v26 = vld [vmem:[%s1213_s11 + $0x1a0] sm:$0xff]  ;;  %350 = vst [vmem:[%s1218_s12 + $0xc0] sm:$0xff] %v349_v24  ;;  %352 = vst [vmem:[%s1218_s12 + $0xc8] sm:$0xff] %v351_v25  ;;  %v355_v27 = vld [vmem:[%s1213_s11 + $0x1b0] sm:$0xff] }
  0x26   : > { %354 = vst [vmem:[%s1218_s12 + $0xd0] sm:$0xff] %v353_v26  ;;  %v357_v28 = vld [vmem:[%s1213_s11 + $0x1c0] sm:$0xff]  ;;  %v359_v29 = vld [vmem:[%s1213_s11 + $0x1d0] sm:$0xff]  ;;  %356 = vst [vmem:[%s1218_s12 + $0xd8] sm:$0xff] %v355_v27 }
  0x27   : > { %358 = vst [vmem:[%s1218_s12 + $0xe0] sm:$0xff] %v357_v28  ;;  %360 = vst [vmem:[%s1218_s12 + $0xe8] sm:$0xff] %v359_v29  ;;  %v361_v30 = vld [vmem:[%s1213_s11 + $0x1e0] sm:$0xff]  ;;  %v363_v31 = vld [vmem:[%s1213_s11 + $0x1f0] sm:$0xff] }
  0x28   : > { %362 = vst [vmem:[%s1218_s12 + $0xf0] sm:$0xff] %v361_v30  ;;  %364 = vst [vmem:[%s1218_s12 + $0xf8] sm:$0xff] %v363_v31 }
  0x29 PF: > { %p916_p7 = scmp.ge.s32.totalorder %s1125_s21, 1  ;;  %p390_p8 = scmp.lt.s32.totalorder %s1125_s21, 37 }
  0x2b   : > { %p391_p9 = pnand %p916_p7, %p390_p8 }
  0x2c   : > { %s397_s13 = sand.u32 (!%p391_p9), 1, %s1101_s15   ;;  %s918_s14 = sshll.u32 (!%p391_p9), %s1109_s17, 1 }
  0x2d   : > { %394 = sbr.rel (%p391_p9) target bundleno = 358 (0x166), region = 70  ;;  %s917_s24 = sshll.u32 (!%p391_p9), %s397_s13, 8 }
  0x2e   : > { %p451_p10 = scmp.lt.s32.totalorder (!%p391_p9), %s918_s14, 35  ;;  %s920_s25 = sshll.u32 (!%p391_p9), %s1113_s18, 1 }
  0x2f   : > { %p461_p11 = scmp.lt.s32.totalorder (!%p391_p9), %s920_s25, 3  ;;  %s1308_s13 = scalar_lea.vmem (!%p391_p9), [#allocation2], %s917_s24 }
  0x30   : > { %p925_p12 = scmp.ne.s32.totalorder (!%p391_p9), %s1109_s17, 0 }
  0x34   : > { %s1401_s14 = smov (!%p451_p10, %s918_s14), 35  ;;  %s1403_s25 = smov (!%p461_p11, %s920_s25), 3 }
  0x35   : > { %s919_s26 = sshll.u32 %s1401_s14, 2  ;;  %s463_s15 = scalar_lea.vmem %s1385_s2, %s1403_s25  ;;  %v1127_v32 = vmov (!%p925_p12), 0.0  }
  0x36   : > { %s1289_s30 = scalar_lea.vmem %s1383_s0, %s919_s26  ;;  %s922_s7 = sshll.u32 %s1403_s25, 3 }
  0x37   : > { %s1301_s18 = scalar_lea.vmem %s1386_s3, %s922_s7  ;;  %s1306_s12 = scalar_lea.vmem %s1387_s4, %s922_s7 }
  0x38   : > { %488 = sbr.rel (%p925_p12) target bundleno = 63 (0x3f), region = 78  ;;  %489 = vst [vmem:[%s1306_s12] sm:$0xff] (!%p925_p12), %v1127_v32  ;;  %490 = vst [vmem:[%s1306_s12 + $0x8] sm:$0xff] (!%p925_p12), %v1127_v32 }
  0x3f PF: > { %v1021_v33 = vld [vmem:[%s1308_s13 + $0x4] ss:$8 sps:$4 sm:$0xff]   ;;  %v1023_v34 = vld [vmem:[%s1308_s13] ss:$8 sps:$4 sm:$0xff]   ;;  %v1024_v35 = vld [vmem:[%s1308_s13 + $0x14] ss:$8 sps:$4 sm:$0xff]  }
  0x40   : > { %693 = vmatprep.subr.bf16.mxu0 %v1021_v33  ;;  %v1026_v36 = vld [vmem:[%s1308_s13 + $0x10] ss:$8 sps:$4 sm:$0xff]   ;;  %v1027_v37 = vld [vmem:[%s1308_s13 + $0x24] ss:$8 sps:$4 sm:$0xff]   ;;  %v1029_v38 = vld [vmem:[%s1308_s13 + $0x20] ss:$8 sps:$4 sm:$0xff]  }
  0x41   : > { %694 = vmatpush1.bf16.msra.mxu0 %v1023_v34  ;;  %v1030_v39 = vld [vmem:[%s1308_s13 + $0x34] ss:$8 sps:$4 sm:$0xff]   ;;  %v1032_v40 = vld [vmem:[%s1308_s13 + $0x30] ss:$8 sps:$4 sm:$0xff]   ;;  %v1033_v41 = vld [vmem:[%s1308_s13 + $0x44] ss:$8 sps:$4 sm:$0xff]  }
  0x42   : > { %695 = vmatprep.subr.bf16.mxu0 %v1024_v35  ;;  %v1035_v42 = vld [vmem:[%s1308_s13 + $0x40] ss:$8 sps:$4 sm:$0xff]   ;;  %v1036_v43 = vld [vmem:[%s1308_s13 + $0x54] ss:$8 sps:$4 sm:$0xff]   ;;  %v1038_v44 = vld [vmem:[%s1308_s13 + $0x50] ss:$8 sps:$4 sm:$0xff]  }
  0x43   : > { %v1039_v45 = vld [vmem:[%s1308_s13 + $0x64] ss:$8 sps:$4 sm:$0xff]   ;;  %v1041_v48 = vld [vmem:[%s1308_s13 + $0x60] ss:$8 sps:$4 sm:$0xff]   ;;  %v1042_v49 = vld [vmem:[%s1308_s13 + $0x74] ss:$8 sps:$4 sm:$0xff]  }
  0x44   : > { %v493_v46 = vld [vmem:[%s1289_s30] sm:$0xff]  ;;  %v1044_v50 = vld [vmem:[%s1308_s13 + $0x70] ss:$8 sps:$4 sm:$0xff]   ;;  %v1048_v53 = vld [vmem:[%s1308_s13 + $0x94] ss:$8 sps:$4 sm:$0xff]   ;;  %p960_p13 = scmp.ne.s32.totalorder %s1109_s17, 17 }
  0x45   : > { %696 = vmatpush1.bf16.msra.mxu0 %v1026_v36  ;;  %v927_v47 = vcombine.high %v493_v46, %v493_v46  ;;  %v1045_v51 = vld [vmem:[%s1308_s13 + $0x84] ss:$8 sps:$4 sm:$0xff]   ;;  %v1047_v52 = vld [vmem:[%s1308_s13 + $0x80] ss:$8 sps:$4 sm:$0xff]   ;;  %v1050_v54 = vld [vmem:[%s1308_s13 + $0x90] ss:$8 sps:$4 sm:$0xff]   ;;  %v926_v3 = vcombine.low %v493_v46, %v493_v46  ;;  %v746_v12 = vlaneseq (!%p960_p13) }
  0x46   : > { %697 = vmatprep.subr.bf16.mxu0 %v1027_v37  ;;  %v1051_v55 = vld [vmem:[%s1308_s13 + $0xa4] ss:$8 sps:$4 sm:$0xff]   ;;  %v1053_v56 = vld [vmem:[%s1308_s13 + $0xa0] ss:$8 sps:$4 sm:$0xff]   ;;  %v1054_v57 = vld [vmem:[%s1308_s13 + $0xb4] ss:$8 sps:$4 sm:$0xff]  }
  0x47   : > { %725 = vmatprep.mubr.bf16.mxu0 %v927_v47  ;;  %v1056_v58 = vld [vmem:[%s1308_s13 + $0xb0] ss:$8 sps:$4 sm:$0xff]   ;;  %v1057_v59 = vld [vmem:[%s1308_s13 + $0xc4] ss:$8 sps:$4 sm:$0xff]   ;;  %v1059_v60 = vld [vmem:[%s1308_s13 + $0xc0] ss:$8 sps:$4 sm:$0xff]  }
  0x48   : > { %v1060_v61 = vld [vmem:[%s1308_s13 + $0xd4] ss:$8 sps:$4 sm:$0xff]   ;;  %v1062_v62 = vld [vmem:[%s1308_s13 + $0xd0] ss:$8 sps:$4 sm:$0xff]   ;;  %v1063_v63 = vld [vmem:[%s1308_s13 + $0xe4] ss:$8 sps:$4 sm:$0xff]  }
  0x49   : > { %698 = vmatpush1.bf16.msra.mxu0 %v1029_v38  ;;  %v1065_v0 = vld [vmem:[%s1308_s13 + $0xe0] ss:$8 sps:$4 sm:$0xff]   ;;  %v1066_v1 = vld [vmem:[%s1308_s13 + $0xf4] ss:$8 sps:$4 sm:$0xff]   ;;  %v1068_v2 = vld [vmem:[%s1308_s13 + $0xf0] ss:$8 sps:$4 sm:$0xff]  }
  0x4a   : > { %699 = vmatprep.subr.bf16.mxu0 %v1030_v39  ;;  %v491_v4 = vld [vmem:[%s1306_s12] sm:$0xff]  ;;  %v492_v5 = vld [vmem:[%s1306_s12 + $0x8] sm:$0xff]  ;;  %v747_v13 = vshrl.u32 (!%p960_p13), %v746_v12, 7 }
  0x4b   : > { %v744_v14 = vld [vmem:[%s463_s15] sm:$0x3] (!%p960_p13)  ;;  %v759_v22 = vld [vmem:[%s1301_s18 + $0x8] sm:$0xff] (!%p960_p13) }
  0x4c   : > { %v748_v15 = vsub.s32 (!%p960_p13), 0, %v747_v13  ;;  %v752_v16 = vsub.s32 (!%p960_p13), 1, %v747_v13  ;;  %v758_v21 = vld [vmem:[%s1301_s18] sm:$0xff] (!%p960_p13) }
  0x4d   : > { %700 = vmatpush1.bf16.msra.mxu0 %v1032_v40 }
  0x4e   : > { %701 = vmatprep.subr.bf16.mxu0 %v1033_v41  ;;  %v749_v19 = vrot.slane (!%p960_p13), %v744_v14, %v748_v15  ;;  %v753_v20 = vrot.slane (!%p960_p13), %v744_v14, %v752_v16 }
  0x51   : > { %702 = vmatpush1.bf16.msra.mxu0 %v1035_v42 }
  0x52   : > { %703 = vmatprep.subr.bf16.mxu0 %v1036_v43 }
  0x55   : > { %704 = vmatpush1.bf16.msra.mxu0 %v1038_v44 }
  0x56   : > { %705 = vmatprep.subr.bf16.mxu0 %v1039_v45 }
  0x59   : > { %706 = vmatpush1.bf16.msra.mxu0 %v1041_v48 }
  0x5a   : > { %707 = vmatprep.subr.bf16.mxu0 %v1042_v49 }
  0x5d   : > { %708 = vmatpush1.bf16.msra.mxu0 %v1044_v50 }
  0x5e   : > { %709 = vmatprep.subr.bf16.mxu0 %v1045_v51 }
  0x61   : > { %710 = vmatpush1.bf16.msra.mxu0 %v1047_v52 }
  0x62   : > { %711 = vmatprep.subr.bf16.mxu0 %v1048_v53 }
  0x65   : > { %712 = vmatpush1.bf16.msra.mxu0 %v1050_v54 }
  0x66   : > { %713 = vmatprep.subr.bf16.mxu0 %v1051_v55 }
  0x69   : > { %714 = vmatpush1.bf16.msra.mxu0 %v1053_v56 }
  0x6a   : > { %715 = vmatprep.subr.bf16.mxu0 %v1054_v57 }
  0x6d   : > { %716 = vmatpush1.bf16.msra.mxu0 %v1056_v58 }
  0x6e   : > { %717 = vmatprep.subr.bf16.mxu0 %v1057_v59 }
  0x71   : > { %718 = vmatpush1.bf16.msra.mxu0 %v1059_v60 }
  0x72   : > { %719 = vmatprep.subr.bf16.mxu0 %v1060_v61 }
  0x75   : > { %720 = vmatpush1.bf16.msra.mxu0 %v1062_v62 }
  0x76   : > { %721 = vmatprep.subr.bf16.mxu0 %v1063_v63 }
  0x79   : > { %722 = vmatpush1.bf16.msra.mxu0 %v1065_v0 }
  0x7a   : > { %723 = vmatprep.subr.bf16.mxu0 %v1066_v1 }
  0x7d   : > { %724 = vmatpush1.bf16.msra.mxu0 %v1068_v2 }
  0x80   : > { %726 = vmatmul.mubr.bf16.vlgmr.msra.gmra.mrb[0].mxu0 %v926_v3 }
 0x151   : > { %741 = sbr.rel (%p960_p13) target bundleno = 358 (0x166), region = 82 }
 0x153   : > { %v727_v6 = vpop.f32.mrb[0].mxu0 }
 0x154   : > { %v734_v7 = vadd.f32 %v727_v6, %v491_v4  ;;  %v729_v8 = vpop.f32.mrb[1].mxu0 }
 0x155   : > { %v735_v9 = vadd.f32 %v729_v8, %v492_v5  ;;  %v731_v10 = vpop.f32.mrb[2].mxu0 }
 0x156   : > { %736 = vst [vmem:[%s1306_s12] sm:$0xff] %v734_v7  ;;  %v732_v11 = vpop.f32.mrb[3].mxu0 }
 0x157   : > { %737 = vst [vmem:[%s1306_s12 + $0x8] sm:$0xff] %v735_v9 }
 0x15d   : > { %v742_v17 = vld [vmem:[%s1306_s12] sm:$0xff] }
 0x15e   : > { %v743_v18 = vld [vmem:[%s1306_s12 + $0x8] sm:$0xff]  ;;  %v756_v23 = vadd.f32 %v749_v19, %v742_v17 }
 0x15f   : > { %v757_v24 = vadd.f32 %v753_v20, %v743_v18 }
 0x160   : > { %v760_v25 = vadd.f32 %v758_v21, %v756_v23 }
 0x161   : > { %v761_v26 = vadd.f32 %v759_v22, %v757_v24 }
 0x162   : > { %v762_v27 = vmax.f32 %v760_v25, 0.0 }
 0x163   : > { %v763_v28 = vmax.f32 %v761_v26, 0.0 }
 0x164   : > { %764 = vst [vmem:[%s1306_s12] sm:$0xff] %v762_v27 }
 0x165   : > { %765 = vst [vmem:[%s1306_s12 + $0x8] sm:$0xff] %v763_v28 }
 0x166 PF: > { %s14_s21 = sadd.s32 1, %s1125_s21   ;;  %s1388_s15 = smov %s1105_s16 }
 0x167   : > { %p11_p0 = scmp.ge.s32.totalorder %s14_s21, 38   ;;  %s1389_s16 = smov %s1204_s28 }
 0x168   : > { %s1390_s17 = smov %s1117_s19  ;;  %s1391_s18 = smov %s1121_s20 }
 0x169   : > { %s1392_s19 = smov %s1395_s22  ;;  %s1393_s20 = smov %s1399_s23 }
 0x16a   :  { %13 = sbr.rel (!%p11_p0) target bundleno = 4 (0x4), region = 126 }

// kernel: resnet18_forward.46
= control target key start
LH: loop header
LB: loop body
LE: loop exit
PB: predicated region body
PF: predicated region fallthrough
CT: control target
= control target key end

     0   :  { %s1061_s12 = smov 0   ;;  %s1063_s13 = smov 0   ;;  %s1284_s0 = inlined_call_operand.vmem [shape: bf16[8,4608], index: 0, kind: input, shape index: {}]   ;;  %s1285_s1 = inlined_call_operand.vmem [shape: bf16[4608,512], index: 1, kind: input, shape index: {}]   ;;  %s1286_s2 = inlined_call_operand.vmem [shape: f32[1,512], index: 2, kind: input, shape index: {}]   ;;  %s1287_s3 = inlined_call_operand.vmem [shape: f32[8,512], index: 3, kind: output, shape index: {}]  }
   0x1   :  { %s1065_s14 = smov 0   ;;  %s1067_s15 = smov 0  }
   0x2   :  { %s1069_s16 = smov 0   ;;  %s1071_s17 = smov 0  }
   0x3   :  { %s1073_s18 = smov 0  }
   0x4 LB: > { %s25_s19 = sadd.s32 1, %s1030_s16  ;;  %s28_s20 = sadd.s32 1, %s1034_s17  ;;  %s1038_s18 = sphi %s1073_s18, %s13_s18   ;;  %s1034_s17 = sphi %s1071_s17, %s1293_s17   ;;  %s1030_s16 = sphi %s1069_s16, %s1292_s16   ;;  %s1026_s15 = sphi %s1067_s15, %s1291_s15   ;;  %s1022_s14 = sphi %s1065_s14, %s1290_s14   ;;  %s1018_s13 = sphi %s1063_s13, %s1289_s13   ;;  %s1014_s12 = sphi %s1061_s12, %s1288_s12  }
   0x5   : > { %p26_p0 = scmp.ge.s32.totalorder %s25_s19, 18  ;;  %p76_p1 = scmp.ne.s32.totalorder %s1018_s13, %s1014_s12 }
   0x6   : > { %p77_p2 = scmp.eq.s32.totalorder %s1038_s18, 0  ;;  %s69_s24 = sadd.s32 1, %s1018_s13 }
   0x7   : > { %s1295_s19 = smov (%p26_p0, %s25_s19), 0  ;;  %s1297_s20 = smov (!%p26_p0, %s28_s20), %s1034_s17 }
   0x8   : > { %p78_p3 = por %p77_p2, %p76_p1  ;;  %p30_p4 = scmp.ge.s32.totalorder %s1297_s20, 2 }
   0x9   : > { %s64_s21 = ssub.s32 %s1030_s16, %s1295_s19  ;;  %p825_p6 = scmp.ge.s32.totalorder %s1038_s18, 36 }
   0xa   : > { %s1299_s20 = smov (%p30_p4, %s1297_s20), 0 }
   0xb   : > { %s65_s22 = ssub.s32 %s1034_s17, %s1299_s20  ;;  %156 = sbr.rel (%p825_p6) target bundleno = 41 (0x29), region = 16 }
   0xc   : > { %s66_s23 = sor.u32 %s65_s22, %s64_s21 }
   0xd   : > { %p67_p5 = scmp.eq.s32.totalorder %s66_s23, 0 }
   0xf   : > { %s1112_s25 = scalar_select %p67_p5, %s1018_s13, %s69_s24  }
  0x12   : > { %172 = sbr.rel (!%p78_p3) target bundleno = 41 (0x29), region = 24  ;;  %s174_s26 = sand.u32 (%p78_p3), 1, %s1018_s13  }
  0x13   : > { %s828_s27 = sshll.u32 (%p78_p3), %s1034_s17, 1  ;;  %s826_s28 = sshll.u32 (%p78_p3), %s174_s26, 8 }
  0x14   : > { %s876_s29 = sshll.u32 (%p78_p3), %s1030_s16, 7  ;;  %s1126_s8 = scalar_lea.vmem (%p78_p3), [#allocation2], %s826_s28 }
  0x15   : > { %s180_s30 = sadd.s32 (%p78_p3), %s876_s29, %s828_s27 }
  0x16   : > { %s830_s4 = sshll.u32 (%p78_p3), %s180_s30, 2 }
  0x17   : > { %s1121_s7 = scalar_lea.vmem (%p78_p3), %s1285_s1, %s830_s4 }
  0x18   : > { %v272_v0 = vld [vmem:[%s1121_s7] sm:$0xff] (%p78_p3)  ;;  %v274_v1 = vld [vmem:[%s1121_s7 + $0x10] sm:$0xff] (%p78_p3) }
  0x19   : > { %v276_v2 = vld [vmem:[%s1121_s7 + $0x20] sm:$0xff]  ;;  %273 = vst [vmem:[%s1126_s8] sm:$0xff] %v272_v0  ;;  %275 = vst [vmem:[%s1126_s8 + $0x8] sm:$0xff] %v274_v1  ;;  %v278_v3 = vld [vmem:[%s1121_s7 + $0x30] sm:$0xff] }
  0x1a   : > { %277 = vst [vmem:[%s1126_s8 + $0x10] sm:$0xff] %v276_v2  ;;  %v280_v4 = vld [vmem:[%s1121_s7 + $0x40] sm:$0xff]  ;;  %v282_v5 = vld [vmem:[%s1121_s7 + $0x50] sm:$0xff]  ;;  %279 = vst [vmem:[%s1126_s8 + $0x18] sm:$0xff] %v278_v3 }
  0x1b   : > { %281 = vst [vmem:[%s1126_s8 + $0x20] sm:$0xff] %v280_v4  ;;  %283 = vst [vmem:[%s1126_s8 + $0x28] sm:$0xff] %v282_v5  ;;  %v284_v6 = vld [vmem:[%s1121_s7 + $0x60] sm:$0xff]  ;;  %v286_v7 = vld [vmem:[%s1121_s7 + $0x70] sm:$0xff] }
  0x1c   : > { %v288_v8 = vld [vmem:[%s1121_s7 + $0x80] sm:$0xff]  ;;  %285 = vst [vmem:[%s1126_s8 + $0x30] sm:$0xff] %v284_v6  ;;  %287 = vst [vmem:[%s1126_s8 + $0x38] sm:$0xff] %v286_v7  ;;  %v290_v9 = vld [vmem:[%s1121_s7 + $0x90] sm:$0xff] }
  0x1d   : > { %289 = vst [vmem:[%s1126_s8 + $0x40] sm:$0xff] %v288_v8  ;;  %v292_v10 = vld [vmem:[%s1121_s7 + $0xa0] sm:$0xff]  ;;  %v294_v11 = vld [vmem:[%s1121_s7 + $0xb0] sm:$0xff]  ;;  %291 = vst [vmem:[%s1126_s8 + $0x48] sm:$0xff] %v290_v9 }
  0x1e   : > { %293 = vst [vmem:[%s1126_s8 + $0x50] sm:$0xff] %v292_v10  ;;  %295 = vst [vmem:[%s1126_s8 + $0x58] sm:$0xff] %v294_v11  ;;  %v296_v12 = vld [vmem:[%s1121_s7 + $0xc0] sm:$0xff]  ;;  %v298_v13 = vld [vmem:[%s1121_s7 + $0xd0] sm:$0xff] }
  0x1f   : > { %v300_v14 = vld [vmem:[%s1121_s7 + $0xe0] sm:$0xff]  ;;  %297 = vst [vmem:[%s1126_s8 + $0x60] sm:$0xff] %v296_v12  ;;  %299 = vst [vmem:[%s1126_s8 + $0x68] sm:$0xff] %v298_v13  ;;  %v302_v15 = vld [vmem:[%s1121_s7 + $0xf0] sm:$0xff] }
  0x20   : > { %301 = vst [vmem:[%s1126_s8 + $0x70] sm:$0xff] %v300_v14  ;;  %v304_v16 = vld [vmem:[%s1121_s7 + $0x100] sm:$0xff]  ;;  %v306_v17 = vld [vmem:[%s1121_s7 + $0x110] sm:$0xff]  ;;  %303 = vst [vmem:[%s1126_s8 + $0x78] sm:$0xff] %v302_v15 }
  0x21   : > { %305 = vst [vmem:[%s1126_s8 + $0x80] sm:$0xff] %v304_v16  ;;  %307 = vst [vmem:[%s1126_s8 + $0x88] sm:$0xff] %v306_v17  ;;  %v308_v18 = vld [vmem:[%s1121_s7 + $0x120] sm:$0xff]  ;;  %v310_v19 = vld [vmem:[%s1121_s7 + $0x130] sm:$0xff] }
  0x22   : > { %v312_v20 = vld [vmem:[%s1121_s7 + $0x140] sm:$0xff]  ;;  %309 = vst [vmem:[%s1126_s8 + $0x90] sm:$0xff] %v308_v18  ;;  %311 = vst [vmem:[%s1126_s8 + $0x98] sm:$0xff] %v310_v19  ;;  %v314_v21 = vld [vmem:[%s1121_s7 + $0x150] sm:$0xff] }
  0x23   : > { %313 = vst [vmem:[%s1126_s8 + $0xa0] sm:$0xff] %v312_v20  ;;  %v316_v22 = vld [vmem:[%s1121_s7 + $0x160] sm:$0xff]  ;;  %v318_v23 = vld [vmem:[%s1121_s7 + $0x170] sm:$0xff]  ;;  %315 = vst [vmem:[%s1126_s8 + $0xa8] sm:$0xff] %v314_v21 }
  0x24   : > { %317 = vst [vmem:[%s1126_s8 + $0xb0] sm:$0xff] %v316_v22  ;;  %319 = vst [vmem:[%s1126_s8 + $0xb8] sm:$0xff] %v318_v23  ;;  %v320_v24 = vld [vmem:[%s1121_s7 + $0x180] sm:$0xff]  ;;  %v322_v25 = vld [vmem:[%s1121_s7 + $0x190] sm:$0xff] }
  0x25   : > { %v324_v26 = vld [vmem:[%s1121_s7 + $0x1a0] sm:$0xff]  ;;  %321 = vst [vmem:[%s1126_s8 + $0xc0] sm:$0xff] %v320_v24  ;;  %323 = vst [vmem:[%s1126_s8 + $0xc8] sm:$0xff] %v322_v25  ;;  %v326_v27 = vld [vmem:[%s1121_s7 + $0x1b0] sm:$0xff] }
  0x26   : > { %325 = vst [vmem:[%s1126_s8 + $0xd0] sm:$0xff] %v324_v26  ;;  %v328_v28 = vld [vmem:[%s1121_s7 + $0x1c0] sm:$0xff]  ;;  %v330_v29 = vld [vmem:[%s1121_s7 + $0x1d0] sm:$0xff]  ;;  %327 = vst [vmem:[%s1126_s8 + $0xd8] sm:$0xff] %v326_v27 }
  0x27   : > { %329 = vst [vmem:[%s1126_s8 + $0xe0] sm:$0xff] %v328_v28  ;;  %331 = vst [vmem:[%s1126_s8 + $0xe8] sm:$0xff] %v330_v29  ;;  %v332_v30 = vld [vmem:[%s1121_s7 + $0x1e0] sm:$0xff]  ;;  %v334_v31 = vld [vmem:[%s1121_s7 + $0x1f0] sm:$0xff] }
  0x28   : > { %333 = vst [vmem:[%s1126_s8 + $0xf0] sm:$0xff] %v332_v30  ;;  %335 = vst [vmem:[%s1126_s8 + $0xf8] sm:$0xff] %v334_v31 }
  0x29 PF: > { %p831_p7 = scmp.ge.s32.totalorder %s1038_s18, 1  ;;  %p348_p8 = scmp.lt.s32.totalorder %s1038_s18, 37 }
  0x2b   : > { %p349_p9 = pnand %p831_p7, %p348_p8 }
  0x2c   : > { %s355_s9 = sand.u32 (!%p349_p9), 1, %s1014_s12   ;;  %s833_s10 = sshll.u32 (!%p349_p9), %s1022_s14, 1 }
  0x2d   : > { %352 = sbr.rel (%p349_p9) target bundleno = 355 (0x163), region = 66  ;;  %s832_s11 = sshll.u32 (!%p349_p9), %s355_s9, 8 }
  0x2e   : > { %p398_p10 = scmp.lt.s32.totalorder (!%p349_p9), %s833_s10, 35  ;;  %s835_s21 = sshll.u32 (!%p349_p9), %s1026_s15, 1 }
  0x2f   : > { %p408_p11 = scmp.lt.s32.totalorder (!%p349_p9), %s835_s21, 3  ;;  %s1211_s5 = scalar_lea.vmem (!%p349_p9), [#allocation2], %s832_s11 }
  0x30   : > { %p838_p12 = scmp.ne.s32.totalorder (!%p349_p9), %s1022_s14, 0 }
  0x34   : > { %s1301_s10 = smov (!%p398_p10, %s833_s10), 35  ;;  %s1303_s21 = smov (!%p408_p11, %s835_s21), 3 }
  0x35   : > { %s834_s22 = sshll.u32 %s1301_s10, 2  ;;  %s410_s12 = scalar_lea.vmem %s1286_s2, %s1303_s21  ;;  %v1040_v32 = vmov (!%p838_p12), 0.0  }
  0x36   : > { %s1197_s26 = scalar_lea.vmem %s1284_s0, %s834_s22  ;;  %s837_s29 = sshll.u32 %s1303_s21, 3 }
  0x37   : > { %s1209_s15 = scalar_lea.vmem %s1287_s3, %s837_s29  ;;  %425 = sbr.rel (%p838_p12) target bundleno = 62 (0x3e), region = 74 }
  0x38   : > { %426 = vst [vmem:[%s1209_s15] sm:$0xff] (!%p838_p12), %v1040_v32  ;;  %427 = vst [vmem:[%s1209_s15 + $0x8] sm:$0xff] (!%p838_p12), %v1040_v32 }
  0x3e PF: > { %v934_v33 = vld [vmem:[%s1211_s5 + $0x4] ss:$8 sps:$4 sm:$0xff]   ;;  %v936_v34 = vld [vmem:[%s1211_s5] ss:$8 sps:$4 sm:$0xff]   ;;  %v937_v35 = vld [vmem:[%s1211_s5 + $0x14] ss:$8 sps:$4 sm:$0xff]  }
  0x3f   : > { %630 = vmatprep.subr.bf16.mxu0 %v934_v33  ;;  %v939_v36 = vld [vmem:[%s1211_s5 + $0x10] ss:$8 sps:$4 sm:$0xff]   ;;  %v940_v37 = vld [vmem:[%s1211_s5 + $0x24] ss:$8 sps:$4 sm:$0xff]   ;;  %v942_v38 = vld [vmem:[%s1211_s5 + $0x20] ss:$8 sps:$4 sm:$0xff]  }
  0x40   : > { %631 = vmatpush1.bf16.msra.mxu0 %v936_v34  ;;  %v943_v39 = vld [vmem:[%s1211_s5 + $0x34] ss:$8 sps:$4 sm:$0xff]   ;;  %v945_v40 = vld [vmem:[%s1211_s5 + $0x30] ss:$8 sps:$4 sm:$0xff]   ;;  %v946_v41 = vld [vmem:[%s1211_s5 + $0x44] ss:$8 sps:$4 sm:$0xff]  }
  0x41   : > { %632 = vmatprep.subr.bf16.mxu0 %v937_v35  ;;  %v948_v42 = vld [vmem:[%s1211_s5 + $0x40] ss:$8 sps:$4 sm:$0xff]   ;;  %v949_v43 = vld [vmem:[%s1211_s5 + $0x54] ss:$8 sps:$4 sm:$0xff]   ;;  %v951_v44 = vld [vmem:[%s1211_s5 + $0x50] ss:$8 sps:$4 sm:$0xff]  }
  0x42   : > { %v952_v45 = vld [vmem:[%s1211_s5 + $0x64] ss:$8 sps:$4 sm:$0xff]   ;;  %v954_v48 = vld [vmem:[%s1211_s5 + $0x60] ss:$8 sps:$4 sm:$0xff]   ;;  %v955_v49 = vld [vmem:[%s1211_s5 + $0x74] ss:$8 sps:$4 sm:$0xff]  }
  0x43   : > { %v430_v46 = vld [vmem:[%s1197_s26] sm:$0xff]  ;;  %v957_v50 = vld [vmem:[%s1211_s5 + $0x70] ss:$8 sps:$4 sm:$0xff]   ;;  %v961_v53 = vld [vmem:[%s1211_s5 + $0x94] ss:$8 sps:$4 sm:$0xff]   ;;  %p873_p13 = scmp.ne.s32.totalorder %s1022_s14, 17 }
  0x44   : > { %633 = vmatpush1.bf16.msra.mxu0 %v939_v36  ;;  %v840_v47 = vcombine.high %v430_v46, %v430_v46  ;;  %v958_v51 = vld [vmem:[%s1211_s5 + $0x84] ss:$8 sps:$4 sm:$0xff]   ;;  %v960_v52 = vld [vmem:[%s1211_s5 + $0x80] ss:$8 sps:$4 sm:$0xff]   ;;  %v963_v54 = vld [vmem:[%s1211_s5 + $0x90] ss:$8 sps:$4 sm:$0xff]   ;;  %v839_v3 = vcombine.low %v430_v46, %v430_v46  ;;  %v683_v12 = vlaneseq (!%p873_p13) }
  0x45   : > { %634 = vmatprep.subr.bf16.mxu0 %v940_v37  ;;  %v964_v55 = vld [vmem:[%s1211_s5 + $0xa4] ss:$8 sps:$4 sm:$0xff]   ;;  %v966_v56 = vld [vmem:[%s1211_s5 + $0xa0] ss:$8 sps:$4 sm:$0xff]   ;;  %v967_v57 = vld [vmem:[%s1211_s5 + $0xb4] ss:$8 sps:$4 sm:$0xff]  }
  0x46   : > { %662 = vmatprep.mubr.bf16.mxu0 %v840_v47  ;;  %v969_v58 = vld [vmem:[%s1211_s5 + $0xb0] ss:$8 sps:$4 sm:$0xff]   ;;  %v970_v59 = vld [vmem:[%s1211_s5 + $0xc4] ss:$8 sps:$4 sm:$0xff]   ;;  %v972_v60 = vld [vmem:[%s1211_s5 + $0xc0] ss:$8 sps:$4 sm:$0xff]  }
  0x47   : > { %v973_v61 = vld [vmem:[%s1211_s5 + $0xd4] ss:$8 sps:$4 sm:$0xff]   ;;  %v975_v62 = vld [vmem:[%s1211_s5 + $0xd0] ss:$8 sps:$4 sm:$0xff]   ;;  %v976_v63 = vld [vmem:[%s1211_s5 + $0xe4] ss:$8 sps:$4 sm:$0xff]  }
  0x48   : > { %635 = vmatpush1.bf16.msra.mxu0 %v942_v38  ;;  %v978_v0 = vld [vmem:[%s1211_s5 + $0xe0] ss:$8 sps:$4 sm:$0xff]   ;;  %v979_v1 = vld [vmem:[%s1211_s5 + $0xf4] ss:$8 sps:$4 sm:$0xff]   ;;  %v981_v2 = vld [vmem:[%s1211_s5 + $0xf0] ss:$8 sps:$4 sm:$0xff]  }
  0x49   : > { %636 = vmatprep.subr.bf16.mxu0 %v943_v39  ;;  %v428_v4 = vld [vmem:[%s1209_s15] sm:$0xff]  ;;  %v429_v5 = vld [vmem:[%s1209_s15 + $0x8] sm:$0xff]  ;;  %v684_v13 = vshrl.u32 (!%p873_p13), %v683_v12, 7 }
  0x4a   : > { %v681_v14 = vld [vmem:[%s410_s12] sm:$0x3] (!%p873_p13) }
  0x4b   : > { %v685_v15 = vsub.s32 (!%p873_p13), 0, %v684_v13  ;;  %v689_v16 = vsub.s32 (!%p873_p13), 1, %v684_v13 }
  0x4c   : > { %637 = vmatpush1.bf16.msra.mxu0 %v945_v40 }
  0x4d   : > { %638 = vmatprep.subr.bf16.mxu0 %v946_v41  ;;  %v686_v19 = vrot.slane (!%p873_p13), %v681_v14, %v685_v15  ;;  %v690_v20 = vrot.slane (!%p873_p13), %v681_v14, %v689_v16 }
  0x50   : > { %639 = vmatpush1.bf16.msra.mxu0 %v948_v42 }
  0x51   : > { %640 = vmatprep.subr.bf16.mxu0 %v949_v43 }
  0x54   : > { %641 = vmatpush1.bf16.msra.mxu0 %v951_v44 }
  0x55   : > { %642 = vmatprep.subr.bf16.mxu0 %v952_v45 }
  0x58   : > { %643 = vmatpush1.bf16.msra.mxu0 %v954_v48 }
  0x59   : > { %644 = vmatprep.subr.bf16.mxu0 %v955_v49 }
  0x5c   : > { %645 = vmatpush1.bf16.msra.mxu0 %v957_v50 }
  0x5d   : > { %646 = vmatprep.subr.bf16.mxu0 %v958_v51 }
  0x60   : > { %647 = vmatpush1.bf16.msra.mxu0 %v960_v52 }
  0x61   : > { %648 = vmatprep.subr.bf16.mxu0 %v961_v53 }
  0x64   : > { %649 = vmatpush1.bf16.msra.mxu0 %v963_v54 }
  0x65   : > { %650 = vmatprep.subr.bf16.mxu0 %v964_v55 }
  0x68   : > { %651 = vmatpush1.bf16.msra.mxu0 %v966_v56 }
  0x69   : > { %652 = vmatprep.subr.bf16.mxu0 %v967_v57 }
  0x6c   : > { %653 = vmatpush1.bf16.msra.mxu0 %v969_v58 }
  0x6d   : > { %654 = vmatprep.subr.bf16.mxu0 %v970_v59 }
  0x70   : > { %655 = vmatpush1.bf16.msra.mxu0 %v972_v60 }
  0x71   : > { %656 = vmatprep.subr.bf16.mxu0 %v973_v61 }
  0x74   : > { %657 = vmatpush1.bf16.msra.mxu0 %v975_v62 }
  0x75   : > { %658 = vmatprep.subr.bf16.mxu0 %v976_v63 }
  0x78   : > { %659 = vmatpush1.bf16.msra.mxu0 %v978_v0 }
  0x79   : > { %660 = vmatprep.subr.bf16.mxu0 %v979_v1 }
  0x7c   : > { %661 = vmatpush1.bf16.msra.mxu0 %v981_v2 }
  0x7f   : > { %663 = vmatmul.mubr.bf16.vlgmr.msra.gmra.mrb[0].mxu0 %v839_v3 }
 0x150   : > { %678 = sbr.rel (%p873_p13) target bundleno = 355 (0x163), region = 78 }
 0x152   : > { %v664_v6 = vpop.f32.mrb[0].mxu0 }
 0x153   : > { %v671_v7 = vadd.f32 %v664_v6, %v428_v4  ;;  %v666_v8 = vpop.f32.mrb[1].mxu0 }
 0x154   : > { %v672_v9 = vadd.f32 %v666_v8, %v429_v5  ;;  %v668_v10 = vpop.f32.mrb[2].mxu0 }
 0x155   : > { %673 = vst [vmem:[%s1209_s15] sm:$0xff] %v671_v7  ;;  %v669_v11 = vpop.f32.mrb[3].mxu0 }
 0x156   : > { %674 = vst [vmem:[%s1209_s15 + $0x8] sm:$0xff] %v672_v9 }
 0x15c   : > { %v679_v17 = vld [vmem:[%s1209_s15] sm:$0xff] }
 0x15d   : > { %v680_v18 = vld [vmem:[%s1209_s15 + $0x8] sm:$0xff]  ;;  %v693_v21 = vadd.f32 %v686_v19, %v679_v17 }
 0x15e   : > { %v694_v22 = vadd.f32 %v690_v20, %v680_v18 }
 0x15f   : > { %v695_v23 = vmax.f32 %v693_v21, 0.0 }
 0x160   : > { %v696_v24 = vmax.f32 %v694_v22, 0.0 }
 0x161   : > { %697 = vst [vmem:[%s1209_s15] sm:$0xff] %v695_v23 }
 0x162   : > { %698 = vst [vmem:[%s1209_s15 + $0x8] sm:$0xff] %v696_v24 }
 0x163 PF: > { %s13_s18 = sadd.s32 1, %s1038_s18   ;;  %s1288_s12 = smov %s1018_s13 }
 0x164   : > { %p10_p0 = scmp.ge.s32.totalorder %s13_s18, 38   ;;  %s1289_s13 = smov %s1112_s25 }
 0x165   : > { %s1290_s14 = smov %s1030_s16  ;;  %s1291_s15 = smov %s1034_s17 }
 0x166   : > { %s1292_s16 = smov %s1295_s19  ;;  %s1293_s17 = smov %s1299_s20 }
 0x167   :  { %12 = sbr.rel (!%p10_p0) target bundleno = 4 (0x4), region = 119 }

// kernel: resnet18_forward.47
= control target key start
LH: loop header
LB: loop body
LE: loop exit
PB: predicated region body
PF: predicated region fallthrough
CT: control target
= control target key end

     0   :  { %s1059_s12 = smov 0   ;;  %s1061_s13 = smov 0   ;;  %s1282_s0 = inlined_call_operand.vmem [shape: bf16[8,512], index: 0, kind: input, shape index: {}]   ;;  %s1283_s1 = inlined_call_operand.vmem [shape: bf16[512,512], index: 1, kind: input, shape index: {}]   ;;  %s1284_s2 = inlined_call_operand.vmem [shape: f32[1,512], index: 2, kind: input, shape index: {}]   ;;  %s1285_s3 = inlined_call_operand.vmem [shape: f32[8,512], index: 3, kind: output, shape index: {}]  }
   0x1   :  { %s1063_s14 = smov 0   ;;  %s1065_s15 = smov 0  }
   0x2   :  { %s1067_s16 = smov 0   ;;  %s1069_s17 = smov 0  }
   0x3   :  { %s1071_s18 = smov 0  }
   0x4 LB: > { %s25_s19 = sadd.s32 1, %s1028_s16  ;;  %s28_s20 = sadd.s32 1, %s1032_s17  ;;  %s1036_s18 = sphi %s1071_s18, %s13_s18   ;;  %s1032_s17 = sphi %s1069_s17, %s1291_s17   ;;  %s1028_s16 = sphi %s1067_s16, %s1290_s16   ;;  %s1024_s15 = sphi %s1065_s15, %s1289_s15   ;;  %s1020_s14 = sphi %s1063_s14, %s1288_s14   ;;  %s1016_s13 = sphi %s1061_s13, %s1287_s13   ;;  %s1012_s12 = sphi %s1059_s12, %s1286_s12  }
   0x5   : > { %p26_p0 = scmp.ge.s32.totalorder %s25_s19, 2  ;;  %p76_p1 = scmp.ne.s32.totalorder %s1016_s13, %s1012_s12 }
   0x6   : > { %p77_p2 = scmp.eq.s32.totalorder %s1036_s18, 0  ;;  %s69_s24 = sadd.s32 1, %s1016_s13 }
   0x7   : > { %s1293_s19 = smov (%p26_p0, %s25_s19), 0  ;;  %s1295_s20 = smov (!%p26_p0, %s28_s20), %s1032_s17 }
   0x8   : > { %p78_p3 = por %p77_p2, %p76_p1  ;;  %p30_p4 = scmp.ge.s32.totalorder %s1295_s20, 2 }
   0x9   : > { %s64_s21 = ssub.s32 %s1028_s16, %s1293_s19  ;;  %p823_p6 = scmp.ge.s32.totalorder %s1036_s18, 4 }
   0xa   : > { %s1297_s20 = smov (%p30_p4, %s1295_s20), 0 }
   0xb   : > { %s65_s22 = ssub.s32 %s1032_s17, %s1297_s20  ;;  %156 = sbr.rel (%p823_p6) target bundleno = 41 (0x29), region = 16 }
   0xc   : > { %s66_s23 = sor.u32 %s65_s22, %s64_s21 }
   0xd   : > { %p67_p5 = scmp.eq.s32.totalorder %s66_s23, 0 }
   0xf   : > { %s1110_s25 = scalar_select %p67_p5, %s1016_s13, %s69_s24  }
  0x12   : > { %172 = sbr.rel (!%p78_p3) target bundleno = 41 (0x29), region = 24  ;;  %s174_s26 = sand.u32 (%p78_p3), 1, %s1016_s13  }
  0x13   : > { %s826_s27 = sshll.u32 (%p78_p3), %s1032_s17, 1  ;;  %s824_s28 = sshll.u32 (%p78_p3), %s174_s26, 8 }
  0x14   : > { %s874_s29 = sshll.u32 (%p78_p3), %s1028_s16, 7  ;;  %s1124_s8 = scalar_lea.vmem (%p78_p3), [#allocation2], %s824_s28 }
  0x15   : > { %s180_s30 = sadd.s32 (%p78_p3), %s874_s29, %s826_s27 }
  0x16   : > { %s828_s4 = sshll.u32 (%p78_p3), %s180_s30, 2 }
  0x17   : > { %s1119_s7 = scalar_lea.vmem (%p78_p3), %s1283_s1, %s828_s4 }
  0x18   : > { %v272_v0 = vld [vmem:[%s1119_s7] sm:$0xff] (%p78_p3)  ;;  %v274_v1 = vld [vmem:[%s1119_s7 + $0x10] sm:$0xff] (%p78_p3) }
  0x19   : > { %v276_v2 = vld [vmem:[%s1119_s7 + $0x20] sm:$0xff]  ;;  %273 = vst [vmem:[%s1124_s8] sm:$0xff] %v272_v0  ;;  %275 = vst [vmem:[%s1124_s8 + $0x8] sm:$0xff] %v274_v1  ;;  %v278_v3 = vld [vmem:[%s1119_s7 + $0x30] sm:$0xff] }
  0x1a   : > { %277 = vst [vmem:[%s1124_s8 + $0x10] sm:$0xff] %v276_v2  ;;  %v280_v4 = vld [vmem:[%s1119_s7 + $0x40] sm:$0xff]  ;;  %v282_v5 = vld [vmem:[%s1119_s7 + $0x50] sm:$0xff]  ;;  %279 = vst [vmem:[%s1124_s8 + $0x18] sm:$0xff] %v278_v3 }
  0x1b   : > { %281 = vst [vmem:[%s1124_s8 + $0x20] sm:$0xff] %v280_v4  ;;  %283 = vst [vmem:[%s1124_s8 + $0x28] sm:$0xff] %v282_v5  ;;  %v284_v6 = vld [vmem:[%s1119_s7 + $0x60] sm:$0xff]  ;;  %v286_v7 = vld [vmem:[%s1119_s7 + $0x70] sm:$0xff] }
  0x1c   : > { %v288_v8 = vld [vmem:[%s1119_s7 + $0x80] sm:$0xff]  ;;  %285 = vst [vmem:[%s1124_s8 + $0x30] sm:$0xff] %v284_v6  ;;  %287 = vst [vmem:[%s1124_s8 + $0x38] sm:$0xff] %v286_v7  ;;  %v290_v9 = vld [vmem:[%s1119_s7 + $0x90] sm:$0xff] }
  0x1d   : > { %289 = vst [vmem:[%s1124_s8 + $0x40] sm:$0xff] %v288_v8  ;;  %v292_v10 = vld [vmem:[%s1119_s7 + $0xa0] sm:$0xff]  ;;  %v294_v11 = vld [vmem:[%s1119_s7 + $0xb0] sm:$0xff]  ;;  %291 = vst [vmem:[%s1124_s8 + $0x48] sm:$0xff] %v290_v9 }
  0x1e   : > { %293 = vst [vmem:[%s1124_s8 + $0x50] sm:$0xff] %v292_v10  ;;  %295 = vst [vmem:[%s1124_s8 + $0x58] sm:$0xff] %v294_v11  ;;  %v296_v12 = vld [vmem:[%s1119_s7 + $0xc0] sm:$0xff]  ;;  %v298_v13 = vld [vmem:[%s1119_s7 + $0xd0] sm:$0xff] }
  0x1f   : > { %v300_v14 = vld [vmem:[%s1119_s7 + $0xe0] sm:$0xff]  ;;  %297 = vst [vmem:[%s1124_s8 + $0x60] sm:$0xff] %v296_v12  ;;  %299 = vst [vmem:[%s1124_s8 + $0x68] sm:$0xff] %v298_v13  ;;  %v302_v15 = vld [vmem:[%s1119_s7 + $0xf0] sm:$0xff] }
  0x20   : > { %301 = vst [vmem:[%s1124_s8 + $0x70] sm:$0xff] %v300_v14  ;;  %v304_v16 = vld [vmem:[%s1119_s7 + $0x100] sm:$0xff]  ;;  %v306_v17 = vld [vmem:[%s1119_s7 + $0x110] sm:$0xff]  ;;  %303 = vst [vmem:[%s1124_s8 + $0x78] sm:$0xff] %v302_v15 }
  0x21   : > { %305 = vst [vmem:[%s1124_s8 + $0x80] sm:$0xff] %v304_v16  ;;  %307 = vst [vmem:[%s1124_s8 + $0x88] sm:$0xff] %v306_v17  ;;  %v308_v18 = vld [vmem:[%s1119_s7 + $0x120] sm:$0xff]  ;;  %v310_v19 = vld [vmem:[%s1119_s7 + $0x130] sm:$0xff] }
  0x22   : > { %v312_v20 = vld [vmem:[%s1119_s7 + $0x140] sm:$0xff]  ;;  %309 = vst [vmem:[%s1124_s8 + $0x90] sm:$0xff] %v308_v18  ;;  %311 = vst [vmem:[%s1124_s8 + $0x98] sm:$0xff] %v310_v19  ;;  %v314_v21 = vld [vmem:[%s1119_s7 + $0x150] sm:$0xff] }
  0x23   : > { %313 = vst [vmem:[%s1124_s8 + $0xa0] sm:$0xff] %v312_v20  ;;  %v316_v22 = vld [vmem:[%s1119_s7 + $0x160] sm:$0xff]  ;;  %v318_v23 = vld [vmem:[%s1119_s7 + $0x170] sm:$0xff]  ;;  %315 = vst [vmem:[%s1124_s8 + $0xa8] sm:$0xff] %v314_v21 }
  0x24   : > { %317 = vst [vmem:[%s1124_s8 + $0xb0] sm:$0xff] %v316_v22  ;;  %319 = vst [vmem:[%s1124_s8 + $0xb8] sm:$0xff] %v318_v23  ;;  %v320_v24 = vld [vmem:[%s1119_s7 + $0x180] sm:$0xff]  ;;  %v322_v25 = vld [vmem:[%s1119_s7 + $0x190] sm:$0xff] }
  0x25   : > { %v324_v26 = vld [vmem:[%s1119_s7 + $0x1a0] sm:$0xff]  ;;  %321 = vst [vmem:[%s1124_s8 + $0xc0] sm:$0xff] %v320_v24  ;;  %323 = vst [vmem:[%s1124_s8 + $0xc8] sm:$0xff] %v322_v25  ;;  %v326_v27 = vld [vmem:[%s1119_s7 + $0x1b0] sm:$0xff] }
  0x26   : > { %325 = vst [vmem:[%s1124_s8 + $0xd0] sm:$0xff] %v324_v26  ;;  %v328_v28 = vld [vmem:[%s1119_s7 + $0x1c0] sm:$0xff]  ;;  %v330_v29 = vld [vmem:[%s1119_s7 + $0x1d0] sm:$0xff]  ;;  %327 = vst [vmem:[%s1124_s8 + $0xd8] sm:$0xff] %v326_v27 }
  0x27   : > { %329 = vst [vmem:[%s1124_s8 + $0xe0] sm:$0xff] %v328_v28  ;;  %331 = vst [vmem:[%s1124_s8 + $0xe8] sm:$0xff] %v330_v29  ;;  %v332_v30 = vld [vmem:[%s1119_s7 + $0x1e0] sm:$0xff]  ;;  %v334_v31 = vld [vmem:[%s1119_s7 + $0x1f0] sm:$0xff] }
  0x28   : > { %333 = vst [vmem:[%s1124_s8 + $0xf0] sm:$0xff] %v332_v30  ;;  %335 = vst [vmem:[%s1124_s8 + $0xf8] sm:$0xff] %v334_v31 }
  0x29 PF: > { %p829_p7 = scmp.ge.s32.totalorder %s1036_s18, 1  ;;  %p348_p8 = scmp.lt.s32.totalorder %s1036_s18, 5 }
  0x2b   : > { %p349_p9 = pnand %p829_p7, %p348_p8 }
  0x2c   : > { %s355_s9 = sand.u32 (!%p349_p9), 1, %s1012_s12   ;;  %s831_s10 = sshll.u32 (!%p349_p9), %s1020_s14, 1 }
  0x2d   : > { %352 = sbr.rel (%p349_p9) target bundleno = 353 (0x161), region = 66  ;;  %s830_s11 = sshll.u32 (!%p349_p9), %s355_s9, 8 }
  0x2e   : > { %p398_p10 = scmp.lt.s32.totalorder (!%p349_p9), %s831_s10, 3  ;;  %s833_s21 = sshll.u32 (!%p349_p9), %s1024_s15, 1 }
  0x2f   : > { %p408_p11 = scmp.lt.s32.totalorder (!%p349_p9), %s833_s21, 3  ;;  %s1209_s5 = scalar_lea.vmem (!%p349_p9), [#allocation2], %s830_s11 }
  0x30   : > { %p836_p12 = scmp.ne.s32.totalorder (!%p349_p9), %s1020_s14, 0 }
  0x34   : > { %s1299_s10 = smov (!%p398_p10, %s831_s10), 3  ;;  %s1301_s21 = smov (!%p408_p11, %s833_s21), 3 }
  0x35   : > { %s832_s22 = sshll.u32 %s1299_s10, 2  ;;  %s410_s12 = scalar_lea.vmem %s1284_s2, %s1301_s21  ;;  %v1038_v32 = vmov (!%p836_p12), 0.0  }
  0x36   : > { %s1195_s26 = scalar_lea.vmem %s1282_s0, %s832_s22  ;;  %s835_s29 = sshll.u32 %s1301_s21, 3 }
  0x37   : > { %s1207_s15 = scalar_lea.vmem %s1285_s3, %s835_s29  ;;  %425 = sbr.rel (%p836_p12) target bundleno = 62 (0x3e), region = 74 }
  0x38   : > { %426 = vst [vmem:[%s1207_s15] sm:$0xff] (!%p836_p12), %v1038_v32  ;;  %427 = vst [vmem:[%s1207_s15 + $0x8] sm:$0xff] (!%p836_p12), %v1038_v32 }
  0x3e PF: > { %v932_v33 = vld [vmem:[%s1209_s5 + $0x4] ss:$8 sps:$4 sm:$0xff]   ;;  %v934_v34 = vld [vmem:[%s1209_s5] ss:$8 sps:$4 sm:$0xff]   ;;  %v935_v35 = vld [vmem:[%s1209_s5 + $0x14] ss:$8 sps:$4 sm:$0xff]  }
  0x3f   : > { %630 = vmatprep.subr.bf16.mxu0 %v932_v33  ;;  %v937_v36 = vld [vmem:[%s1209_s5 + $0x10] ss:$8 sps:$4 sm:$0xff]   ;;  %v938_v37 = vld [vmem:[%s1209_s5 + $0x24] ss:$8 sps:$4 sm:$0xff]   ;;  %v940_v38 = vld [vmem:[%s1209_s5 + $0x20] ss:$8 sps:$4 sm:$0xff]  }
  0x40   : > { %631 = vmatpush1.bf16.msra.mxu0 %v934_v34  ;;  %v941_v39 = vld [vmem:[%s1209_s5 + $0x34] ss:$8 sps:$4 sm:$0xff]   ;;  %v943_v40 = vld [vmem:[%s1209_s5 + $0x30] ss:$8 sps:$4 sm:$0xff]   ;;  %v944_v41 = vld [vmem:[%s1209_s5 + $0x44] ss:$8 sps:$4 sm:$0xff]  }
  0x41   : > { %632 = vmatprep.subr.bf16.mxu0 %v935_v35  ;;  %v946_v42 = vld [vmem:[%s1209_s5 + $0x40] ss:$8 sps:$4 sm:$0xff]   ;;  %v947_v43 = vld [vmem:[%s1209_s5 + $0x54] ss:$8 sps:$4 sm:$0xff]   ;;  %v949_v44 = vld [vmem:[%s1209_s5 + $0x50] ss:$8 sps:$4 sm:$0xff]  }
  0x42   : > { %v950_v45 = vld [vmem:[%s1209_s5 + $0x64] ss:$8 sps:$4 sm:$0xff]   ;;  %v952_v48 = vld [vmem:[%s1209_s5 + $0x60] ss:$8 sps:$4 sm:$0xff]   ;;  %v953_v49 = vld [vmem:[%s1209_s5 + $0x74] ss:$8 sps:$4 sm:$0xff]  }
  0x43   : > { %v430_v46 = vld [vmem:[%s1195_s26] sm:$0xff]  ;;  %v955_v50 = vld [vmem:[%s1209_s5 + $0x70] ss:$8 sps:$4 sm:$0xff]   ;;  %v959_v53 = vld [vmem:[%s1209_s5 + $0x94] ss:$8 sps:$4 sm:$0xff]   ;;  %p871_p13 = scmp.ne.s32.totalorder %s1020_s14, 1 }
  0x44   : > { %633 = vmatpush1.bf16.msra.mxu0 %v937_v36  ;;  %v838_v47 = vcombine.high %v430_v46, %v430_v46  ;;  %v956_v51 = vld [vmem:[%s1209_s5 + $0x84] ss:$8 sps:$4 sm:$0xff]   ;;  %v958_v52 = vld [vmem:[%s1209_s5 + $0x80] ss:$8 sps:$4 sm:$0xff]   ;;  %v961_v54 = vld [vmem:[%s1209_s5 + $0x90] ss:$8 sps:$4 sm:$0xff]   ;;  %v837_v3 = vcombine.low %v430_v46, %v430_v46  ;;  %v683_v12 = vlaneseq (!%p871_p13) }
  0x45   : > { %634 = vmatprep.subr.bf16.mxu0 %v938_v37  ;;  %v962_v55 = vld [vmem:[%s1209_s5 + $0xa4] ss:$8 sps:$4 sm:$0xff]   ;;  %v964_v56 = vld [vmem:[%s1209_s5 + $0xa0] ss:$8 sps:$4 sm:$0xff]   ;;  %v965_v57 = vld [vmem:[%s1209_s5 + $0xb4] ss:$8 sps:$4 sm:$0xff]  }
  0x46   : > { %662 = vmatprep.mubr.bf16.mxu0 %v838_v47  ;;  %v967_v58 = vld [vmem:[%s1209_s5 + $0xb0] ss:$8 sps:$4 sm:$0xff]   ;;  %v968_v59 = vld [vmem:[%s1209_s5 + $0xc4] ss:$8 sps:$4 sm:$0xff]   ;;  %v970_v60 = vld [vmem:[%s1209_s5 + $0xc0] ss:$8 sps:$4 sm:$0xff]  }
  0x47   : > { %v971_v61 = vld [vmem:[%s1209_s5 + $0xd4] ss:$8 sps:$4 sm:$0xff]   ;;  %v973_v62 = vld [vmem:[%s1209_s5 + $0xd0] ss:$8 sps:$4 sm:$0xff]   ;;  %v974_v63 = vld [vmem:[%s1209_s5 + $0xe4] ss:$8 sps:$4 sm:$0xff]  }
  0x48   : > { %635 = vmatpush1.bf16.msra.mxu0 %v940_v38  ;;  %v976_v0 = vld [vmem:[%s1209_s5 + $0xe0] ss:$8 sps:$4 sm:$0xff]   ;;  %v977_v1 = vld [vmem:[%s1209_s5 + $0xf4] ss:$8 sps:$4 sm:$0xff]   ;;  %v979_v2 = vld [vmem:[%s1209_s5 + $0xf0] ss:$8 sps:$4 sm:$0xff]  }
  0x49   : > { %636 = vmatprep.subr.bf16.mxu0 %v941_v39  ;;  %v428_v4 = vld [vmem:[%s1207_s15] sm:$0xff]  ;;  %v429_v5 = vld [vmem:[%s1207_s15 + $0x8] sm:$0xff]  ;;  %v684_v13 = vshrl.u32 (!%p871_p13), %v683_v12, 7 }
  0x4a   : > { %v681_v14 = vld [vmem:[%s410_s12] sm:$0x3] (!%p871_p13) }
  0x4b   : > { %v685_v15 = vsub.s32 (!%p871_p13), 0, %v684_v13  ;;  %v689_v16 = vsub.s32 (!%p871_p13), 1, %v684_v13 }
  0x4c   : > { %637 = vmatpush1.bf16.msra.mxu0 %v943_v40 }
  0x4d   : > { %638 = vmatprep.subr.bf16.mxu0 %v944_v41  ;;  %v686_v19 = vrot.slane (!%p871_p13), %v681_v14, %v685_v15  ;;  %v690_v20 = vrot.slane (!%p871_p13), %v681_v14, %v689_v16 }
  0x50   : > { %639 = vmatpush1.bf16.msra.mxu0 %v946_v42 }
  0x51   : > { %640 = vmatprep.subr.bf16.mxu0 %v947_v43 }
  0x54   : > { %641 = vmatpush1.bf16.msra.mxu0 %v949_v44 }
  0x55   : > { %642 = vmatprep.subr.bf16.mxu0 %v950_v45 }
  0x58   : > { %643 = vmatpush1.bf16.msra.mxu0 %v952_v48 }
  0x59   : > { %644 = vmatprep.subr.bf16.mxu0 %v953_v49 }
  0x5c   : > { %645 = vmatpush1.bf16.msra.mxu0 %v955_v50 }
  0x5d   : > { %646 = vmatprep.subr.bf16.mxu0 %v956_v51 }
  0x60   : > { %647 = vmatpush1.bf16.msra.mxu0 %v958_v52 }
  0x61   : > { %648 = vmatprep.subr.bf16.mxu0 %v959_v53 }
  0x64   : > { %649 = vmatpush1.bf16.msra.mxu0 %v961_v54 }
  0x65   : > { %650 = vmatprep.subr.bf16.mxu0 %v962_v55 }
  0x68   : > { %651 = vmatpush1.bf16.msra.mxu0 %v964_v56 }
  0x69   : > { %652 = vmatprep.subr.bf16.mxu0 %v965_v57 }
  0x6c   : > { %653 = vmatpush1.bf16.msra.mxu0 %v967_v58 }
  0x6d   : > { %654 = vmatprep.subr.bf16.mxu0 %v968_v59 }
  0x70   : > { %655 = vmatpush1.bf16.msra.mxu0 %v970_v60 }
  0x71   : > { %656 = vmatprep.subr.bf16.mxu0 %v971_v61 }
  0x74   : > { %657 = vmatpush1.bf16.msra.mxu0 %v973_v62 }
  0x75   : > { %658 = vmatprep.subr.bf16.mxu0 %v974_v63 }
  0x78   : > { %659 = vmatpush1.bf16.msra.mxu0 %v976_v0 }
  0x79   : > { %660 = vmatprep.subr.bf16.mxu0 %v977_v1 }
  0x7c   : > { %661 = vmatpush1.bf16.msra.mxu0 %v979_v2 }
  0x7f   : > { %663 = vmatmul.mubr.bf16.vlgmr.msra.gmra.mrb[0].mxu0 %v837_v3 }
 0x150   : > { %678 = sbr.rel (%p871_p13) target bundleno = 353 (0x161), region = 78 }
 0x152   : > { %v664_v6 = vpop.f32.mrb[0].mxu0 }
 0x153   : > { %v671_v7 = vadd.f32 %v664_v6, %v428_v4  ;;  %v666_v8 = vpop.f32.mrb[1].mxu0 }
 0x154   : > { %v672_v9 = vadd.f32 %v666_v8, %v429_v5  ;;  %v668_v10 = vpop.f32.mrb[2].mxu0 }
 0x155   : > { %673 = vst [vmem:[%s1207_s15] sm:$0xff] %v671_v7  ;;  %v669_v11 = vpop.f32.mrb[3].mxu0 }
 0x156   : > { %674 = vst [vmem:[%s1207_s15 + $0x8] sm:$0xff] %v672_v9 }
 0x15c   : > { %v679_v17 = vld [vmem:[%s1207_s15] sm:$0xff] }
 0x15d   : > { %v680_v18 = vld [vmem:[%s1207_s15 + $0x8] sm:$0xff]  ;;  %v693_v21 = vadd.f32 %v686_v19, %v679_v17 }
 0x15e   : > { %v694_v22 = vadd.f32 %v690_v20, %v680_v18 }
 0x15f   : > { %695 = vst [vmem:[%s1207_s15] sm:$0xff] %v693_v21 }
 0x160   : > { %696 = vst [vmem:[%s1207_s15 + $0x8] sm:$0xff] %v694_v22 }
 0x161 PF: > { %s13_s18 = sadd.s32 1, %s1036_s18   ;;  %s1286_s12 = smov %s1016_s13 }
 0x162   : > { %p10_p0 = scmp.ge.s32.totalorder %s13_s18, 6   ;;  %s1287_s13 = smov %s1110_s25 }
 0x163   : > { %s1288_s14 = smov %s1028_s16  ;;  %s1289_s15 = smov %s1032_s17 }
 0x164   : > { %s1290_s16 = smov %s1293_s19  ;;  %s1291_s17 = smov %s1297_s20 }
 0x165   :  { %12 = sbr.rel (!%p10_p0) target bundleno = 4 (0x4), region = 119 }

// kernel: resnet18_forward.49
= control target key start
LH: loop header
LB: loop body
LE: loop exit
PB: predicated region body
PF: predicated region fallthrough
CT: control target
= control target key end

     0   :  { %s706_s12 = smov 0   ;;  %s708_s13 = smov 0   ;;  %s781_s0 = inlined_call_operand.vmem [shape: bf16[8,512], index: 0, kind: input, shape index: {}]   ;;  %s782_s1 = inlined_call_operand.vmem [shape: bf16[512,128], index: 1, kind: input, shape index: {}]   ;;  %s783_s2 = inlined_call_operand.vmem [shape: f32[1,128], index: 2, kind: input, shape index: {}]   ;;  %s784_s3 = inlined_call_operand.vmem [shape: f32[8,128], index: 3, kind: output, shape index: {}]  }
   0x1   :  { %s710_s14 = smov 0  }
   0x2 LB: > { %s25_s15 = sadd.s32 1, %s679_s13  ;;  %p567_p0 = scmp.ge.s32.totalorder %s683_s14, 1  ;;  %s683_s14 = sphi %s710_s14, %s13_s14   ;;  %s679_s13 = sphi %s708_s13, %s786_s13   ;;  %s675_s12 = sphi %s706_s12, %s785_s12  }
   0x3   : > { %p26_p1 = scmp.ge.s32.totalorder %s25_s15, 2  ;;  %p189_p2 = scmp.lt.s32.totalorder %s683_s14, 3 }
   0x5   : > { %s788_s15 = smov (%p26_p1, %s25_s15), 0  ;;  %p190_p3 = pnand %p567_p0, %p189_p2 }
   0x6   : > { %s568_s16 = sshll.u32 (!%p190_p3), %s675_s12, 1  ;;  %s570_s17 = sshll.u32 (!%p190_p3), %s675_s12, 5 }
   0x7   : > { %193 = sbr.rel (%p190_p3) target bundleno = 285 (0x11d), region = 32  ;;  %p233_p4 = scmp.lt.s32.totalorder (!%p190_p3), %s568_s16, 3 }
   0x8   : > { %p241_p5 = scmp.lt.s32.totalorder (!%p190_p3), %s570_s17, 63  ;;  %p572_p6 = scmp.ne.s32.totalorder (!%p190_p3), %s675_s12, 0 }
   0xe   : > { %s790_s16 = smov (!%p233_p4, %s568_s16), 3  ;;  %s792_s17 = smov (!%p241_p5, %s570_s17), 63 }
   0xf   : > { %s569_s18 = sshll.u32 %s790_s16, 2  ;;  %s571_s22 = sshll.u32 %s792_s17, 2  ;;  %v685_v0 = vmov (!%p572_p6), 0.0  }
  0x10   : > { %s238_s21 = scalar_lea.vmem %s781_s0, %s569_s18  ;;  %s734_s25 = scalar_lea.vmem %s782_s1, %s571_s22  ;;  %264 = vst [vmem:[%s784_s3] sm:$0xff] (!%p572_p6), %v685_v0 }
  0x11   : > { %263 = sbr.rel (%p572_p6) target bundleno = 24 (0x18), region = 36 }
  0x18 PF: > { %v643_v1 = vld [vmem:[%s734_s25 + $0x40] sm:$0xff]   ;;  %v645_v3 = vld [vmem:[%s734_s25 + $0x48] sm:$0xff]   ;;  %v647_v5 = vld [vmem:[%s734_s25 + $0x50] sm:$0xff]   ;;  %p591_p7 = scmp.ne.s32.totalorder %s675_s12, 1 }
  0x19   : > { %v644_v2 = vld [vmem:[%s734_s25] sm:$0xff]   ;;  %596 = vmatprep.subr.bf16.mxu0 %v643_v1  ;;  %v646_v4 = vld [vmem:[%s734_s25 + $0x8] sm:$0xff]   ;;  %v648_v6 = vld [vmem:[%s734_s25 + $0x10] sm:$0xff]  }
  0x1a   : > { %597 = vmatpush3.bf16.msra.mxu0 %v644_v2  ;;  %v649_v7 = vld [vmem:[%s734_s25 + $0x58] sm:$0xff]   ;;  %v651_v9 = vld [vmem:[%s734_s25 + $0x60] sm:$0xff]   ;;  %v653_v11 = vld [vmem:[%s734_s25 + $0x68] sm:$0xff]  }
  0x1b   : > { %598 = vmatprep.subr.bf16.mxu0 %v645_v3  ;;  %v650_v8 = vld [vmem:[%s734_s25 + $0x18] sm:$0xff]   ;;  %v652_v10 = vld [vmem:[%s734_s25 + $0x20] sm:$0xff]   ;;  %v654_v14 = vld [vmem:[%s734_s25 + $0x28] sm:$0xff]  }
  0x1c   : > { %v266_v12 = vld [vmem:[%s238_s21] sm:$0xff]  ;;  %v655_v15 = vld [vmem:[%s734_s25 + $0x70] sm:$0xff]   ;;  %v657_v17 = vld [vmem:[%s734_s25 + $0x78] sm:$0xff]  }
  0x1d   : > { %v574_v13 = vcombine.high %v266_v12, %v266_v12  ;;  %v656_v16 = vld [vmem:[%s734_s25 + $0x30] sm:$0xff]   ;;  %v658_v18 = vld [vmem:[%s734_s25 + $0x38] sm:$0xff]   ;;  %v573_v19 = vcombine.low %v266_v12, %v266_v12  ;;  %v265_v21 = vld [vmem:[%s784_s3] sm:$0xff] }
  0x1e   : > { %599 = vmatpush3.bf16.msra.mxu0 %v646_v4  ;;  %v592_v28 = vld [vmem:[%s783_s2] ss:$0 sm:$0xff] (!%p591_p7) }
  0x1f   : > { %600 = vmatprep.subr.bf16.mxu0 %v647_v5  ;;  %434 = vmatprep.mubr.bf16.mxu0 %v574_v13 }
  0x22   : > { %601 = vmatpush3.bf16.msra.mxu0 %v648_v6 }
  0x23   : > { %602 = vmatprep.subr.bf16.mxu0 %v649_v7 }
  0x26   : > { %603 = vmatpush3.bf16.msra.mxu0 %v650_v8 }
  0x27   : > { %604 = vmatprep.subr.bf16.mxu0 %v651_v9 }
  0x2a   : > { %605 = vmatpush3.bf16.msra.mxu0 %v652_v10 }
  0x2b   : > { %606 = vmatprep.subr.bf16.mxu0 %v653_v11 }
  0x2e   : > { %607 = vmatpush3.bf16.msra.mxu0 %v654_v14 }
  0x2f   : > { %608 = vmatprep.subr.bf16.mxu0 %v655_v15 }
  0x32   : > { %609 = vmatpush3.bf16.msra.mxu0 %v656_v16 }
  0x33   : > { %610 = vmatprep.subr.bf16.mxu0 %v657_v17 }
  0x36   : > { %611 = vmatpush3.bf16.msra.mxu0 %v658_v18 }
  0x39   : > { %435 = vmatmul.mubr.bf16.vlgmr.msra.gmra.mrb[0].mxu0 %v573_v19 }
 0x10c   : > { %v612_v20 = vpop.f32.mrb[0].mxu0  ;;  %447 = sbr.rel (%p591_p7) target bundleno = 285 (0x11d), region = 40 }
 0x10d   : > { %v613_v22 = vpop.f32.mrb[1].mxu0 }
 0x10e   : > { %v614_v23 = vadd.f32 %v613_v22, %v612_v20  ;;  %v615_v24 = vpop.f32.mrb[2].mxu0 }
 0x10f   : > { %v616_v25 = vpop.f32.mrb[3].mxu0 }
 0x110   : > { %v442_v26 = vadd.f32 %v614_v23, %v265_v21 }
 0x112   : > { %443 = vst [vmem:[%s784_s3] sm:$0xff] %v442_v26 }
 0x119   : > { %v448_v27 = vld [vmem:[%s784_s3] sm:$0xff] }
 0x11a   : > { %v456_v29 = vadd.f32 %v592_v28, %v448_v27 }
 0x11c   : > { %457 = vst [vmem:[%s784_s3] sm:$0xff] %v456_v29 }
 0x11d PF: > { %s13_s14 = sadd.s32 1, %s683_s14   ;;  %s785_s12 = smov %s679_s13 }
 0x11e   : > { %p10_p8 = scmp.ge.s32.totalorder %s13_s14, 4   ;;  %s786_s13 = smov %s788_s15 }
 0x120   :  { %12 = sbr.rel (!%p10_p8) target bundleno = 2 (0x2), region = 76 }

</bundles_post_ra>
